<compile_context>
chip_gen: v6e
topology: v6e:2x2x1
jax: 0.10.0
libtpu: 0.0.40
codegen_flags: <defaults>
</compile_context>

<pallas_src>
import functools

import jax
import jax.numpy as jnp
from jax import lax
from jax.experimental import pallas as pl
from jax.experimental.pallas import tpu as pltpu

LANE = 128
CPAD = 128                      # all activation channel dims padded to this (lane-dense)
VMEM_LIMIT = 32 * 1024 * 1024   # explicit scoped-VMEM limit (safe on v5e/v6e/v7x)


# --------------------------------------------------------------------------
# small helpers
# --------------------------------------------------------------------------
def _round_up(x, m):
    return (x + m - 1) // m * m


def _pick_tm(m, cap=256):
    """Row tile: >= 2 M tiles when possible (feeds both v7x TCs), 16-row aligned."""
    tm = _round_up(max(1, (m + 1) // 2), 16)
    return max(16, min(cap, tm, _round_up(m, 16)))


def _pad1d(v, n):
    return jnp.pad(v, (0, n - v.shape[0]))


def _pad_channels(x_nhwc, c):
    pad = c - x_nhwc.shape[-1]
    if pad == 0:
        return x_nhwc
    return jnp.pad(x_nhwc, ((0, 0), (0, 0), (0, 0), (0, pad)))


# --------------------------------------------------------------------------
# Pallas kernel 1: matmul + bias + activation epilogue (+ optional BN stats)
# --------------------------------------------------------------------------
def _mm_kernel(a_ref, b_ref, bias_ref, *out_refs, act, emit_stats, m_valid, tm):
    o_ref = out_refs[0]
    y = jnp.dot(a_ref[...].astype(jnp.bfloat16), b_ref[...],
                preferred_element_type=jnp.float32)
    y = y + bias_ref[...]

    if emit_stats:
        sum_ref, ssq_ref = out_refs[1], out_refs[2]
        if m_valid is not None:           # mask padded M rows out of the statistics
            rid = pl.program_id(0) * tm + lax.broadcasted_iota(jnp.int32, y.shape, 0)
            yv = jnp.where(rid < m_valid, y, 0.0)
        else:
            yv = y
        sum_ref[...] = jnp.sum(yv, axis=0, keepdims=True)[None]
        ssq_ref[...] = jnp.sum(yv * yv, axis=0, keepdims=True)[None]

    if act == "relu":
        y = jnp.maximum(y, 0.0)
    elif act == "sigmoid":
        y = jax.nn.sigmoid(y)
    o_ref[...] = y.astype(o_ref.dtype)


def matmul_fused(a, b, bias, *, act="none", out_dtype=jnp.bfloat16, emit_stats=False):
    """act((M,K)@(K,N) + bias(N,)). bf16 MXU operands, fp32 accumulation.

    Single K step (all convs here have K <= 2048): no accumulator scratch and
    the weight tile stays resident.  Optionally also returns per-channel sum /
    sum-of-squares of the pre-activation output (free BatchNorm batch stats).
    """
    M, K = a.shape
    K2, N = b.shape
    assert K == K2
    Kp = _round_up(K, LANE)
    assert Kp <= 4096, "single-K-step design; add a K grid axis for larger K"
    Np = _round_up(N, LANE)
    tn = 256 if (Np % 256 == 0 and Np >= 256) else 128
    tm = _pick_tm(M)
    Mp = _round_up(M, tm)

    a_p = a if (Mp == M and Kp == K) else jnp.pad(a, ((0, Mp - M), (0, Kp - K)))
    b_p = b.astype(jnp.bfloat16)
    if Kp != K or Np != N:
        b_p = jnp.pad(b_p, ((0, Kp - K), (0, Np - N)))
    bias_p = bias.reshape(1, -1).astype(jnp.float32)
    if Np != N:
        bias_p = jnp.pad(bias_p, ((0, 0), (0, Np - N)))

    in_specs = [
        pl.BlockSpec((tm, Kp), lambda i, j: (i, 0)),
        pl.BlockSpec((Kp, tn), lambda i, j: (0, j)),
        pl.BlockSpec((1, tn), lambda i, j: (0, j)),
    ]
    o_spec = pl.BlockSpec((tm, tn), lambda i, j: (i, j))
    o_shape = jax.ShapeDtypeStruct((Mp, Np), out_dtype)
    if emit_stats:
        st_spec = pl.BlockSpec((1, 1, tn), lambda i, j: (i, 0, j))
        st_shape = jax.ShapeDtypeStruct((Mp // tm, 1, Np), jnp.float32)
        out_specs = (o_spec, st_spec, st_spec)
        out_shape = (o_shape, st_shape, st_shape)
    else:
        out_specs = o_spec
        out_shape = o_shape

    kernel = functools.partial(_mm_kernel, act=act, emit_stats=emit_stats,
                               m_valid=(M if Mp != M else None), tm=tm)
    res = pl.pallas_call(
        kernel,
        out_shape=out_shape,
        grid_spec=pltpu.PrefetchScalarGridSpec(
            num_scalar_prefetch=0,
            grid=(Mp // tm, Np // tn),
            in_specs=in_specs,
            out_specs=out_specs),
        compiler_params=pltpu.CompilerParams(
            dimension_semantics=("parallel", "parallel"),
            vmem_limit_bytes=VMEM_LIMIT),
    )(a_p, b_p, bias_p)

    if emit_stats:
        out, s, s2 = res
    else:
        out = res
    if Mp != M or Np != N:
        out = out[:M, :N]
    if emit_stats:
        return out, jnp.sum(s, axis=(0, 1))[:N], jnp.sum(s2, axis=(0, 1))[:N]
    return out


# --------------------------------------------------------------------------
# Pallas kernel 2: fused BN-affine + residual + ReLU  (VPU, bf16 in/out)
# --------------------------------------------------------------------------
def _bn_res_relu_kernel(x_ref, s_ref, b_ref, r_ref, o_ref):
    y = (x_ref[...].astype(jnp.float32) * s_ref[...] + b_ref[...]
         + r_ref[...].astype(jnp.float32))
    o_ref[...] = jnp.maximum(y, 0.0).astype(o_ref.dtype)


def bn_residual_relu(x2d, residual2d, scale, shift):
    """relu(scale*x + shift + residual); per-channel scale/shift; bf16 I/O."""
    M, C = x2d.shape                     # C == CPAD (lane-dense)
    tm = _pick_tm(M, cap=1024)
    Mp = _round_up(M, tm)
    xp = x2d if Mp == M else jnp.pad(x2d, ((0, Mp - M), (0, 0)))
    rp = residual2d if Mp == M else jnp.pad(residual2d, ((0, Mp - M), (0, 0)))
    s2d = scale.reshape(1, C).astype(jnp.float32)
    b2d = shift.reshape(1, C).astype(jnp.float32)

    x_spec = pl.BlockSpec((tm, C), lambda i: (i, 0))
    v_spec = pl.BlockSpec((1, C), lambda i: (0, 0))
    out = pl.pallas_call(
        _bn_res_relu_kernel,
        out_shape=jax.ShapeDtypeStruct((Mp, C), jnp.bfloat16),
        grid_spec=pltpu.PrefetchScalarGridSpec(
            num_scalar_prefetch=0, grid=(Mp // tm,),
            in_specs=[x_spec, v_spec, v_spec, x_spec], out_specs=x_spec),
        compiler_params=pltpu.CompilerParams(
            dimension_semantics=("parallel",),
            vmem_limit_bytes=VMEM_LIMIT),
    )(xp, s2d, b2d, rp)
    return out[:M] if Mp != M else out


# --------------------------------------------------------------------------
# Pallas kernel 3: vector quantization (distances + argmin + onehot@codebook)
# --------------------------------------------------------------------------
def _vq_kernel(z_ref, e_ref, e2_ref, idx_ref, zq_ref):
    z = z_ref[...]                                    # (tm, CPAD)  fp32
    e = e_ref[...]                                    # (KP, CPAD)  fp32
    z2 = jnp.sum(z * z, axis=-1, keepdims=True)
    cross = lax.dot_general(z, e, (((1,), (1,)), ((), ())),
                            preferred_element_type=jnp.float32)     # (tm, KP)
    d = z2 - 2.0 * cross + e2_ref[...]                # squared dists (+pad penalty)
    kdim = d.shape[1]
    d_min = jnp.min(d, axis=-1, keepdims=True)
    ids = lax.broadcasted_iota(jnp.int32, d.shape, 1)
    idx = jnp.min(jnp.where(d <= d_min, ids, kdim), axis=-1, keepdims=True)
    idx_ref[...] = idx                                # first arg-min (torch semantics)
    onehot = (ids == idx).astype(jnp.float32)
    zq_ref[...] = jnp.dot(onehot, e, preferred_element_type=jnp.float32)


def vector_quantize(z_pc, codebook):
    B, He, We, _ = z_pc.shape
    num_embeddings, emb_dim = codebook.shape
    M = B * He * We

    KP = _round_up(num_embeddings, LANE)
    e_p = jnp.pad(codebook.astype(jnp.float32),
                  ((0, KP - num_embeddings), (0, CPAD - emb_dim)))
    e2 = jnp.sum(e_p * e_p, axis=-1)
    penalty = jnp.where(jnp.arange(KP) < num_embeddings, 0.0, 1e30)
    e2p = (e2 + penalty).reshape(1, KP).astype(jnp.float32)

    z_flat = z_pc.reshape(M, CPAD).astype(jnp.float32)
    tm = _pick_tm(M)
    Mp = _round_up(M, tm)
    zf = z_flat if Mp == M else jnp.pad(z_flat, ((0, Mp - M), (0, 0)))

    # TODO(synk): for codebooks >= ~2048 entries, grid over the codebook axis with
    # an online (min, argmin) carry instead of the full (tm, KP) distance block.
    idx, zq = pl.pallas_call(
        _vq_kernel,
        out_shape=(jax.ShapeDtypeStruct((Mp, 1), jnp.int32),
                   jax.ShapeDtypeStruct((Mp, CPAD), jnp.float32)),
        grid_spec=pltpu.PrefetchScalarGridSpec(
            num_scalar_prefetch=0, grid=(Mp // tm,),
            in_specs=[pl.BlockSpec((tm, CPAD), lambda i: (i, 0)),
                      pl.BlockSpec((KP, CPAD), lambda i: (0, 0)),
                      pl.BlockSpec((1, KP), lambda i: (0, 0))],
            out_specs=(pl.BlockSpec((tm, 1), lambda i: (i, 0)),
                       pl.BlockSpec((tm, CPAD), lambda i: (i, 0)))),
        compiler_params=pltpu.CompilerParams(
            dimension_semantics=("parallel",),
            vmem_limit_bytes=VMEM_LIMIT),
    )(zf, e_p, e2p)

    return idx[:M, 0], zq[:M].reshape(B, He, We, CPAD)


# --------------------------------------------------------------------------
# Convolutions (im2col glue in XLA, all FLOPs in the Pallas matmul)
# --------------------------------------------------------------------------
def _im2col(x, kh, kw, stride, pads):
    """pads = (top, bottom, left, right). x is channel-padded NHWC (any dtype)."""
    N, H, W, C = x.shape
    t, b, l, r = pads
    xp = jnp.pad(x, ((0, 0), (t, b), (l, r), (0, 0)))
    Ho = (H + t + b - kh) // stride + 1
    Wo = (W + l + r - kw) // stride + 1
    cols = []
    for i in range(kh):
        for j in range(kw):
            cols.append(xp[:, i: i + stride * (Ho - 1) + 1: stride,
                           j: j + stride * (Wo - 1) + 1: stride, :])
    col = jnp.concatenate(cols, axis=-1)
    return col.reshape(N * Ho * Wo, kh * kw * C), (N, Ho, Wo)


def _weight_to_gemm(weight):
    """torch Conv2d weight (Cout, Cin, kh, kw) -> (kh*kw*CPAD, CPAD), zero padded."""
    Cout, Cin, kh, kw = weight.shape
    assert Cin <= CPAD and Cout <= CPAD
    w = jnp.transpose(weight, (2, 3, 1, 0))                    # (kh, kw, Cin, Cout)
    w = jnp.pad(w, ((0, 0), (0, 0), (0, CPAD - Cin), (0, CPAD - Cout)))
    return w.reshape(kh * kw * CPAD, CPAD)


def _convT_fused_weight(weight):
    """torch ConvTranspose2d weight (Cin, Cout, 4, 4) -> fused (9*CPAD, 4*CPAD) GEMM weight.

    ConvTranspose2d(k=4, s=2, p=1): output phase (a, b) with a, b in {0, 1} obeys
      y[2m+a, 2n+b] = sum_{di,dj in {0,1}} xpad1[m+a+di, n+b+dj] * W[:, :, sel_a[di], sel_b[dj]]
    where xpad1 is the input zero-padded by 1 on every side, sel_0 = (3, 1),
    sel_1 = (2, 0).  All four phases read the same 3x3 window xpad1[m:m+3, n:n+3],
    so they fuse into one GEMM with N = 4*CPAD (unused 3x3 taps are zero).
    """
    Cin, Cout, _, _ = weight.shape
    sel = {0: (3, 1), 1: (2, 0)}
    w = jnp.zeros((3, 3, CPAD, 4, CPAD), jnp.float32)
    for a in (0, 1):
        for b in (0, 1):
            p = a * 2 + b
            for di in (0, 1):
                for dj in (0, 1):
                    sub = weight[:, :, sel[a][di], sel[b][dj]]      # (Cin, Cout)
                    w = w.at[a + di, b + dj, :Cin, p, :Cout].set(sub)
    return w.reshape(9 * CPAD, 4 * CPAD)


def conv2d_p(x_pc, weight, bias, stride=1, padding=0, act="none",
             out_dtype=jnp.bfloat16, emit_stats=False):
    """Conv2d on channel-padded NHWC input; bias/activation/BN-stats fused into the matmul."""
    Cout, Cin, kh, kw = weight.shape
    N, H, W, _ = x_pc.shape
    if kh == 1 and kw == 1 and stride == 1 and padding == 0:
        col, Ho, Wo = x_pc.reshape(N * H * W, CPAD), H, W
    else:
        col, (N, Ho, Wo) = _im2col(x_pc, kh, kw, stride,
                                   (padding, padding, padding, padding))
    res = matmul_fused(col, _weight_to_gemm(weight), _pad1d(bias, CPAD),
                       act=act, out_dtype=out_dtype, emit_stats=emit_stats)
    if emit_stats:
        out, s, s2 = res
        return out.reshape(N, Ho, Wo, CPAD), s, s2
    return res.reshape(N, Ho, Wo, CPAD)


def conv_transpose2d_p(x_pc, weight, bias, act="relu"):
    """ConvTranspose2d(k=4, s=2, p=1): one fused GEMM over all 4 stride phases."""
    N, H, W, _ = x_pc.shape
    col, _ = _im2col(x_pc, 3, 3, 1, (1, 1, 1, 1))
    out = matmul_fused(col, _convT_fused_weight(weight),
                       jnp.tile(_pad1d(bias, CPAD), 4), act=act)
    out = out.reshape(N, H, W, 2, 2, CPAD)
    # TODO(synk): strided output index_map in the matmul kernel instead of this
    # XLA transpose+reshape interleave.
    return jnp.transpose(out, (0, 1, 3, 2, 4, 5)).reshape(N, 2 * H, 2 * W, CPAD)


def _bn_from_stats(sum_c, ssq_c, count, gamma, beta, eps=1e-5):
    """Training-mode BatchNorm2d (batch stats, biased variance) -> per-channel scale/shift."""
    mean = sum_c / count
    var = jnp.maximum(ssq_c / count - mean * mean, 0.0)
    g = _pad1d(gamma, CPAD)           # padded channels: scale = 0, shift = 0 -> stay 0
    b = _pad1d(beta, CPAD)
    scale = g * lax.rsqrt(var + eps)
    shift = b - mean * scale
    return scale, shift


# --------------------------------------------------------------------------
# Model blocks (activations are channel-padded NHWC, C == CPAD, bf16 in HBM)
# --------------------------------------------------------------------------
def residual_block_p(x_pc, p):
    N, H, W, _ = x_pc.shape
    M = N * H * W
    # conv1 (3x3, p1); BN1 batch stats come free from the matmul epilogue.
    y1, s1, q1 = conv2d_p(x_pc, p["conv1_w"], p["conv1_b"], padding=1, emit_stats=True)
    scale1, shift1 = _bn_from_stats(s1, q1, M, p["bn1_g"], p["bn1_b"])
    # BN1 affine + ReLU folded into conv2's im2col slab construction (XLA fuses it);
    # padding happens after the affine so the spatial zero-halo stays exactly zero.
    a1 = jnp.maximum(y1.astype(jnp.float32) * scale1 + shift1, 0.0).astype(jnp.bfloat16)
    # conv2 (3x3, p1); BN2 stats also free.
    y2, s2, q2 = conv2d_p(a1, p["conv2_w"], p["conv2_b"], padding=1, emit_stats=True)
    scale2, shift2 = _bn_from_stats(s2, q2, M, p["bn2_g"], p["bn2_b"])
    # relu(bn2(y2) + x): one fused Pallas elementwise pass (bf16 I/O).
    out = bn_residual_relu(y2.reshape(M, CPAD), x_pc.reshape(M, CPAD), scale2, shift2)
    return out.reshape(N, H, W, CPAD)


def encoder_forward(x_pc, p):
    y = conv2d_p(x_pc, p["in_w"], p["in_b"])                               # 1x1
    for layer in p["layers"]:
        for rb in layer["resblocks"]:
            y = residual_block_p(y, rb)
        y = conv2d_p(y, layer["down_w"], layer["down_b"],
                     stride=2, padding=1, act="relu")                      # 4x4 s2 p1 + ReLU
    return conv2d_p(y, p["out_w"], p["out_b"], out_dtype=jnp.float32)      # 1x1 -> embedding


def decoder_forward(z_pc, p):
    y = conv2d_p(z_pc, p["in_w"], p["in_b"])                               # 1x1
    for layer in p["layers"]:
        for rb in layer["resblocks"]:
            y = residual_block_p(y, rb)
        y = conv_transpose2d_p(y, layer["up_w"], layer["up_b"], act="relu")
    return conv2d_p(y, p["out_w"], p["out_b"], act="sigmoid",
                    out_dtype=jnp.float32)                                 # 1x1 + Sigmoid


def vqvae_forward(x_nchw, params):
    codebook = params["codebook"]
    num_embeddings, emb_dim = codebook.shape
    out_channels = params["decoder"]["out_w"].shape[0]

    x = jnp.transpose(x_nchw, (0, 2, 3, 1))                 # NCHW -> NHWC
    x_pc = _pad_channels(x.astype(jnp.float32), CPAD)
    z = encoder_forward(x_pc, params["encoder"])             # (B, He, We, CPAD) fp32
    B, He, We, _ = z.shape

    idx, z_q = vector_quantize(z, codebook)
    # straight-through exactly as written in the torch module:
    #   z_q = z_q + (z - z_q).detach()   (forward value ~= z)
    z_q_st = z_q + lax.stop_gradient(z - z_q)

    recon = decoder_forward(z_q_st, params["decoder"])
    recon_nchw = jnp.transpose(recon[..., :out_channels], (0, 3, 1, 2))

    # losses on the real embedding channels only (padded channels are zero)
    z_r = z[..., :emb_dim]
    zq_r = z_q_st[..., :emb_dim]
    commitment_loss = jnp.mean(jnp.square(z_r - lax.stop_gradient(zq_r)))
    codebook_loss = jnp.mean(jnp.square(lax.stop_gradient(z_r) - zq_r))
    loss = commitment_loss + codebook_loss

    # tiny bincount / entropy bookkeeping left in XLA
    counts = jnp.sum(jax.nn.one_hot(idx, num_embeddings, dtype=jnp.float32), axis=0)
    p = counts + 1e-6
    p = p / jnp.sum(p)
    entropy_loss = -jnp.sum(p * jnp.log(p))
    loss = loss - entropy_loss          # matches the torch module (loss -= entropy)

    return recon_nchw, loss, idx.reshape(B, He, We)


# --------------------------------------------------------------------------
# Deterministic synthetic parameters (no checkpoint loading)
# --------------------------------------------------------------------------
def init_params(key, cfg):
    keys = iter(jax.random.split(key, 64))

    def conv_w(cout, cin, kh, kw):
        fan_in = cin * kh * kw
        return jax.random.normal(next(keys), (cout, cin, kh, kw), jnp.float32) / jnp.sqrt(fan_in)

    def convT_w(cin, cout, kh, kw):
        fan_in = cin * kh * kw
        return jax.random.normal(next(keys), (cin, cout, kh, kw), jnp.float32) / jnp.sqrt(fan_in)

    def bias(c):
        return 0.01 * jax.random.normal(next(keys), (c,), jnp.float32)

    def resblock(c):
        return {
            "conv1_w": conv_w(c, c, 3, 3), "conv1_b": bias(c),
            "bn1_g": jnp.ones((c,), jnp.float32), "bn1_b": jnp.zeros((c,), jnp.float32),
            "conv2_w": conv_w(c, c, 3, 3), "conv2_b": bias(c),
            "bn2_g": jnp.ones((c,), jnp.float32), "bn2_b": jnp.zeros((c,), jnp.float32),
        }

    h = cfg["hidden_size"]
    enc = {
        "in_w": conv_w(h, cfg["enc_in"], 1, 1), "in_b": bias(h),
        "layers": [
            {
                "resblocks": [resblock(h) for _ in range(cfg["enc_resblocks"])],
                "down_w": conv_w(h, h, 4, 4), "down_b": bias(h),
            }
            for _ in range(cfg["enc_layers"])
        ],
        "out_w": conv_w(cfg["emb_dim"], h, 1, 1), "out_b": bias(cfg["emb_dim"]),
    }
    dec = {
        "in_w": conv_w(h, cfg["emb_dim"], 1, 1), "in_b": bias(h),
        "layers": [
            {
                "resblocks": [resblock(h) for _ in range(cfg["dec_resblocks"])],
                "up_w": convT_w(h, h, 4, 4), "up_b": bias(h),
            }
            for _ in range(cfg["dec_layers"])
        ],
        "out_w": conv_w(cfg["dec_out"], h, 1, 1), "out_b": bias(cfg["dec_out"]),
    }
    std = jnp.sqrt(2.0 / (cfg["num_embeddings"] + cfg["emb_dim"]))   # xavier-normal
    codebook = std * jax.random.normal(
        next(keys), (cfg["num_embeddings"], cfg["emb_dim"]), jnp.float32)
    return {"encoder": enc, "decoder": dec, "codebook": codebook}


# --------------------------------------------------------------------------
if __name__ == "__main__":
    cfg = dict(
        enc_in=3, dec_out=3,
        hidden_size=32,
        enc_layers=1, enc_resblocks=1,
        dec_layers=1, dec_resblocks=1,
        emb_dim=8,                 # encoder.output_channels == decoder.input_channels
        num_embeddings=16,
    )

    key = jax.random.PRNGKey(0)
    pkey, xkey = jax.random.split(key)
    params = init_params(pkey, cfg)
    x = jax.random.uniform(xkey, (2, 3, 16, 16), jnp.float32)     # NCHW, like PyTorch

    fwd = jax.jit(vqvae_forward)
    recon_x, loss, encoding_indices = fwd(x, params)
    jax.block_until_ready((recon_x, loss, encoding_indices))

    assert recon_x.shape == (2, 3, 16, 16)
    assert encoding_indices.shape == (2, 8, 8)
    assert loss.shape == ()
    assert bool(jnp.all(jnp.isfinite(recon_x)))
    assert bool(jnp.isfinite(loss))
    print("KERNEL_OK")
</pallas_src>

<mosaic_0001>
module attributes {stable_mosaic.version = 11 : i64} {
  func.func @_mm_kernel(%arg0: i32, %arg1: i32, %arg2: memref<256x128xf32, #tpu.memory_space<vmem>>, %arg3: memref<128x128xbf16, #tpu.memory_space<vmem>>, %arg4: memref<1x128xf32, #tpu.memory_space<vmem>>, %arg5: memref<256x128xbf16, #tpu.memory_space<vmem>>) attributes {dimension_semantics = [#tpu.dimension_semantics<parallel>, #tpu.dimension_semantics<parallel>], iteration_bounds = array<i64: 2, 1>, scalar_prefetch = 0 : i64, scratch_operands = 0 : i64, tpu.core_type = #tpu.core_type<tc>, window_params = [{transform_indices = @transform_0, window_bounds = array<i64: 256, 128>}, {transform_indices = @transform_1, window_bounds = array<i64: 128, 128>}, {transform_indices = @transform_2, window_bounds = array<i64: 1, 128>}, {transform_indices = @transform_3, window_bounds = array<i64: 256, 128>}]} {
    %c0 = arith.constant 0 : index
    %c0_0 = arith.constant 0 : index
    %0 = vector.load %arg2[%c0, %c0_0] : memref<256x128xf32, #tpu.memory_space<vmem>>, vector<256x128xf32>
    %1 = arith.truncf %0 : vector<256x128xf32> to vector<256x128xbf16>
    %c0_1 = arith.constant 0 : index
    %c0_2 = arith.constant 0 : index
    %2 = vector.load %arg3[%c0_1, %c0_2] : memref<128x128xbf16, #tpu.memory_space<vmem>>, vector<128x128xbf16>
    %cst = arith.constant dense<0.000000e+00> : vector<256x128xf32>
    %3 = tpu.matmul %1, %2, %cst {dimension_numbers = #tpu.dot_dimension_numbers<[1], [0], [0], [1], [0, 0, 1, 1], [], []>} : vector<256x128xbf16>, vector<128x128xbf16>, vector<256x128xf32> -> vector<256x128xf32>
    %c0_3 = arith.constant 0 : index
    %c0_4 = arith.constant 0 : index
    %4 = vector.load %arg4[%c0_3, %c0_4] : memref<1x128xf32, #tpu.memory_space<vmem>>, vector<1x128xf32>
    %5 = vector.broadcast %4 : vector<1x128xf32> to vector<256x128xf32>
    %6 = arith.addf %3, %5 : vector<256x128xf32>
    %7 = arith.truncf %6 : vector<256x128xf32> to vector<256x128xbf16>
    %c0_5 = arith.constant 0 : index
    %c0_6 = arith.constant 0 : index
    %8 = vector.load %arg5[%c0_5, %c0_6] : memref<256x128xbf16, #tpu.memory_space<vmem>>, vector<256x128xbf16>
    tpu.vector_store %arg5[%c0_5, %c0_6], %7 {strides = array<i32>} : memref<256x128xbf16, #tpu.memory_space<vmem>>, vector<256x128xbf16>,
    return
  }
  func.func @transform_0(%arg0: i32, %arg1: i32) -> (i32, i32) {
    %c0_i32 = arith.constant 0 : i32
    %c0_i32_0 = arith.constant 0 : i32
    return %arg0, %c0_i32 : i32, i32
  }
  func.func @transform_1(%arg0: i32, %arg1: i32) -> (i32, i32) {
    %c0_i32 = arith.constant 0 : i32
    %c0_i32_0 = arith.constant 0 : i32
    return %c0_i32, %arg1 : i32, i32
  }
  func.func @transform_2(%arg0: i32, %arg1: i32) -> (i32, i32) {
    %c0_i32 = arith.constant 0 : i32
    %c0_i32_0 = arith.constant 0 : i32
    return %c0_i32, %arg1 : i32, i32
  }
  func.func @transform_3(%arg0: i32, %arg1: i32) -> (i32, i32) {
    %c0_i32 = arith.constant 0 : i32
    return %arg0, %arg1 : i32, i32
  }
}

module attributes {stable_mosaic.version = 11 : i64} {
  func.func @_mm_kernel(%arg0: i32, %arg1: i32, %arg2: memref<256x1152xbf16, #tpu.memory_space<vmem>>, %arg3: memref<1152x128xbf16, #tpu.memory_space<vmem>>, %arg4: memref<1x128xf32, #tpu.memory_space<vmem>>, %arg5: memref<256x128xbf16, #tpu.memory_space<vmem>>, %arg6: memref<1x1x128xf32, #tpu.memory_space<vmem>>, %arg7: memref<1x1x128xf32, #tpu.memory_space<vmem>>) attributes {dimension_semantics = [#tpu.dimension_semantics<parallel>, #tpu.dimension_semantics<parallel>], iteration_bounds = array<i64: 2, 1>, scalar_prefetch = 0 : i64, scratch_operands = 0 : i64, tpu.core_type = #tpu.core_type<tc>, window_params = [{transform_indices = @transform_0, window_bounds = array<i64: 256, 1152>}, {transform_indices = @transform_1, window_bounds = array<i64: 1152, 128>}, {transform_indices = @transform_2, window_bounds = array<i64: 1, 128>}, {transform_indices = @transform_3, window_bounds = array<i64: 256, 128>}, {transform_indices = @transform_4, window_bounds = array<i64: 1, 1, 128>}, {transform_indices = @transform_5, window_bounds = array<i64: 1, 1, 128>}]} {
    %c0 = arith.constant 0 : index
    %c0_0 = arith.constant 0 : index
    %0 = vector.load %arg2[%c0, %c0_0] : memref<256x1152xbf16, #tpu.memory_space<vmem>>, vector<256x1152xbf16>
    %c0_1 = arith.constant 0 : index
    %c0_2 = arith.constant 0 : index
    %1 = vector.load %arg3[%c0_1, %c0_2] : memref<1152x128xbf16, #tpu.memory_space<vmem>>, vector<1152x128xbf16>
    %cst = arith.constant dense<0.000000e+00> : vector<256x128xf32>
    %2 = tpu.matmul %0, %1, %cst {dimension_numbers = #tpu.dot_dimension_numbers<[1], [0], [0], [1], [0, 0, 1, 1], [], []>} : vector<256x1152xbf16>, vector<1152x128xbf16>, vector<256x128xf32> -> vector<256x128xf32>
    %c0_3 = arith.constant 0 : index
    %c0_4 = arith.constant 0 : index
    %3 = vector.load %arg4[%c0_3, %c0_4] : memref<1x128xf32, #tpu.memory_space<vmem>>, vector<1x128xf32>
    %4 = vector.broadcast %3 : vector<1x128xf32> to vector<256x128xf32>
    %5 = arith.addf %2, %4 : vector<256x128xf32>
    %cst_5 = arith.constant dense<0.000000e+00> : vector<128xf32>
    %6 = vector.multi_reduction <add>, %5, %cst_5 [0] : vector<256x128xf32> to vector<128xf32>
    %7 = vector.shape_cast %6 : vector<128xf32> to vector<1x128xf32>
    %8 = vector.shape_cast %7 : vector<1x128xf32> to vector<1x1x128xf32>
    %c0_6 = arith.constant 0 : index
    %c0_7 = arith.constant 0 : index
    %c0_8 = arith.constant 0 : index
    %9 = vector.load %arg6[%c0_6, %c0_7, %c0_8] : memref<1x1x128xf32, #tpu.memory_space<vmem>>, vector<1x1x128xf32>
    tpu.vector_store %arg6[%c0_6, %c0_7, %c0_8], %8 {strides = array<i32>} : memref<1x1x128xf32, #tpu.memory_space<vmem>>, vector<1x1x128xf32>,
    %10 = arith.mulf %5, %5 : vector<256x128xf32>
    %cst_9 = arith.constant dense<0.000000e+00> : vector<128xf32>
    %11 = vector.multi_reduction <add>, %10, %cst_9 [0] : vector<256x128xf32> to vector<128xf32>
    %12 = vector.shape_cast %11 : vector<128xf32> to vector<1x128xf32>
    %13 = vector.shape_cast %12 : vector<1x128xf32> to vector<1x1x128xf32>
    %c0_10 = arith.constant 0 : index
    %c0_11 = arith.constant 0 : index
    %c0_12 = arith.constant 0 : index
    %14 = vector.load %arg7[%c0_10, %c0_11, %c0_12] : memref<1x1x128xf32, #tpu.memory_space<vmem>>, vector<1x1x128xf32>
    tpu.vector_store %arg7[%c0_10, %c0_11, %c0_12], %13 {strides = array<i32>} : memref<1x1x128xf32, #tpu.memory_space<vmem>>, vector<1x1x128xf32>,
    %15 = arith.truncf %5 : vector<256x128xf32> to vector<256x128xbf16>
    %c0_13 = arith.constant 0 : index
    %c0_14 = arith.constant 0 : index
    %16 = vector.load %arg5[%c0_13, %c0_14] : memref<256x128xbf16, #tpu.memory_space<vmem>>, vector<256x128xbf16>
    tpu.vector_store %arg5[%c0_13, %c0_14], %15 {strides = array<i32>} : memref<256x128xbf16, #tpu.memory_space<vmem>>, vector<256x128xbf16>,
    return
  }
  func.func @transform_0(%arg0: i32, %arg1: i32) -> (i32, i32) {
    %c0_i32 = arith.constant 0 : i32
    %c0_i32_0 = arith.constant 0 : i32
    return %arg0, %c0_i32 : i32, i32
  }
  func.func @transform_1(%arg0: i32, %arg1: i32) -> (i32, i32) {
    %c0_i32 = arith.constant 0 : i32
    %c0_i32_0 = arith.constant 0 : i32
    return %c0_i32, %arg1 : i32, i32
  }
  func.func @transform_2(%arg0: i32, %arg1: i32) -> (i32, i32) {
    %c0_i32 = arith.constant 0 : i32
    %c0_i32_0 = arith.constant 0 : i32
    return %c0_i32, %arg1 : i32, i32
  }
  func.func @transform_3(%arg0: i32, %arg1: i32) -> (i32, i32) {
    %c0_i32 = arith.constant 0 : i32
    return %arg0, %arg1 : i32, i32
  }
  func.func @transform_4(%arg0: i32, %arg1: i32) -> (i32, i32, i32) {
    %c0_i32 = arith.constant 0 : i32
    %c0_i32_0 = arith.constant 0 : i32
    return %arg0, %c0_i32, %arg1 : i32, i32, i32
  }
  func.func @transform_5(%arg0: i32, %arg1: i32) -> (i32, i32, i32) {
    %c0_i32 = arith.constant 0 : i32
    %c0_i32_0 = arith.constant 0 : i32
    return %arg0, %c0_i32, %arg1 : i32, i32, i32
  }
}

module attributes {stable_mosaic.version = 11 : i64} {
  func.func @_bn_res_relu_kernel(%arg0: i32, %arg1: memref<256x128xbf16, #tpu.memory_space<vmem>>, %arg2: memref<1x128xf32, #tpu.memory_space<vmem>>, %arg3: memref<1x128xf32, #tpu.memory_space<vmem>>, %arg4: memref<256x128xbf16, #tpu.memory_space<vmem>>, %arg5: memref<256x128xbf16, #tpu.memory_space<vmem>>) attributes {dimension_semantics = [#tpu.dimension_semantics<parallel>], iteration_bounds = array<i64: 2>, scalar_prefetch = 0 : i64, scratch_operands = 0 : i64, tpu.core_type = #tpu.core_type<tc>, window_params = [{transform_indices = @transform_0, window_bounds = array<i64: 256, 128>}, {pipeline_mode = #tpu.pipeline_mode<synchronous>, transform_indices = @transform_1, window_bounds = array<i64: 1, 128>}, {pipeline_mode = #tpu.pipeline_mode<synchronous>, transform_indices = @transform_2, window_bounds = array<i64: 1, 128>}, {transform_indices = @transform_3, window_bounds = array<i64: 256, 128>}, {transform_indices = @transform_4, window_bounds = array<i64: 256, 128>}]} {
    %c0 = arith.constant 0 : index
    %c0_0 = arith.constant 0 : index
    %0 = vector.load %arg1[%c0, %c0_0] : memref<256x128xbf16, #tpu.memory_space<vmem>>, vector<256x128xbf16>
    %1 = arith.extf %0 : vector<256x128xbf16> to vector<256x128xf32>
    %c0_1 = arith.constant 0 : index
    %c0_2 = arith.constant 0 : index
    %2 = vector.load %arg2[%c0_1, %c0_2] : memref<1x128xf32, #tpu.memory_space<vmem>>, vector<1x128xf32>
    %3 = vector.broadcast %2 : vector<1x128xf32> to vector<256x128xf32>
    %4 = arith.mulf %1, %3 : vector<256x128xf32>
    %c0_3 = arith.constant 0 : index
    %c0_4 = arith.constant 0 : index
    %5 = vector.load %arg3[%c0_3, %c0_4] : memref<1x128xf32, #tpu.memory_space<vmem>>, vector<1x128xf32>
    %6 = vector.broadcast %5 : vector<1x128xf32> to vector<256x128xf32>
    %7 = arith.addf %4, %6 : vector<256x128xf32>
    %c0_5 = arith.constant 0 : index
    %c0_6 = arith.constant 0 : index
    %8 = vector.load %arg4[%c0_5, %c0_6] : memref<256x128xbf16, #tpu.memory_space<vmem>>, vector<256x128xbf16>
    %9 = arith.extf %8 : vector<256x128xbf16> to vector<256x128xf32>
    %10 = arith.addf %7, %9 : vector<256x128xf32>
    %cst = arith.constant 0.000000e+00 : f32
    %11 = vector.broadcast %cst : f32 to vector<256x128xf32>
    %12 = arith.maximumf %10, %11 : vector<256x128xf32>
    %13 = arith.truncf %12 : vector<256x128xf32> to vector<256x128xbf16>
    %c0_7 = arith.constant 0 : index
    %c0_8 = arith.constant 0 : index
    %14 = vector.load %arg5[%c0_7, %c0_8] : memref<256x128xbf16, #tpu.memory_space<vmem>>, vector<256x128xbf16>
    tpu.vector_store %arg5[%c0_7, %c0_8], %13 {strides = array<i32>} : memref<256x128xbf16, #tpu.memory_space<vmem>>, vector<256x128xbf16>,
    return
  }
  func.func @transform_0(%arg0: i32) -> (i32, i32) {
    %c0_i32 = arith.constant 0 : i32
    %c0_i32_0 = arith.constant 0 : i32
    return %arg0, %c0_i32 : i32, i32
  }
  func.func @transform_1(%arg0: i32) -> (i32, i32) {
    %c0_i32 = arith.constant 0 : i32
    %c0_i32_0 = arith.constant 0 : i32
    %c0_i32_1 = arith.constant 0 : i32
    return %c0_i32, %c0_i32_0 : i32, i32
  }
  func.func @transform_2(%arg0: i32) -> (i32, i32) {
    %c0_i32 = arith.constant 0 : i32
    %c0_i32_0 = arith.constant 0 : i32
    %c0_i32_1 = arith.constant 0 : i32
    return %c0_i32, %c0_i32_0 : i32, i32
  }
  func.func @transform_3(%arg0: i32) -> (i32, i32) {
    %c0_i32 = arith.constant 0 : i32
    %c0_i32_0 = arith.constant 0 : i32
    return %arg0, %c0_i32 : i32, i32
  }
  func.func @transform_4(%arg0: i32) -> (i32, i32) {
    %c0_i32 = arith.constant 0 : i32
    %c0_i32_0 = arith.constant 0 : i32
    return %arg0, %c0_i32 : i32, i32
  }
}

module attributes {stable_mosaic.version = 11 : i64} {
  func.func @_mm_kernel(%arg0: i32, %arg1: i32, %arg2: memref<64x2048xbf16, #tpu.memory_space<vmem>>, %arg3: memref<2048x128xbf16, #tpu.memory_space<vmem>>, %arg4: memref<1x128xf32, #tpu.memory_space<vmem>>, %arg5: memref<64x128xbf16, #tpu.memory_space<vmem>>) attributes {dimension_semantics = [#tpu.dimension_semantics<parallel>, #tpu.dimension_semantics<parallel>], iteration_bounds = array<i64: 2, 1>, scalar_prefetch = 0 : i64, scratch_operands = 0 : i64, tpu.core_type = #tpu.core_type<tc>, window_params = [{transform_indices = @transform_0, window_bounds = array<i64: 64, 2048>}, {transform_indices = @transform_1, window_bounds = array<i64: 2048, 128>}, {transform_indices = @transform_2, window_bounds = array<i64: 1, 128>}, {transform_indices = @transform_3, window_bounds = array<i64: 64, 128>}]} {
    %c0 = arith.constant 0 : index
    %c0_0 = arith.constant 0 : index
    %0 = vector.load %arg2[%c0, %c0_0] : memref<64x2048xbf16, #tpu.memory_space<vmem>>, vector<64x2048xbf16>
    %c0_1 = arith.constant 0 : index
    %c0_2 = arith.constant 0 : index
    %1 = vector.load %arg3[%c0_1, %c0_2] : memref<2048x128xbf16, #tpu.memory_space<vmem>>, vector<2048x128xbf16>
    %cst = arith.constant dense<0.000000e+00> : vector<64x128xf32>
    %2 = tpu.matmul %0, %1, %cst {dimension_numbers = #tpu.dot_dimension_numbers<[1], [0], [0], [1], [0, 0, 1, 1], [], []>} : vector<64x2048xbf16>, vector<2048x128xbf16>, vector<64x128xf32> -> vector<64x128xf32>
    %c0_3 = arith.constant 0 : index
    %c0_4 = arith.constant 0 : index
    %3 = vector.load %arg4[%c0_3, %c0_4] : memref<1x128xf32, #tpu.memory_space<vmem>>, vector<1x128xf32>
    %4 = vector.broadcast %3 : vector<1x128xf32> to vector<64x128xf32>
    %5 = arith.addf %2, %4 : vector<64x128xf32>
    %cst_5 = arith.constant 0.000000e+00 : f32
    %6 = vector.broadcast %cst_5 : f32 to vector<64x128xf32>
    %7 = arith.maximumf %5, %6 : vector<64x128xf32>
    %8 = arith.truncf %7 : vector<64x128xf32> to vector<64x128xbf16>
    %c0_6 = arith.constant 0 : index
    %c0_7 = arith.constant 0 : index
    %9 = vector.load %arg5[%c0_6, %c0_7] : memref<64x128xbf16, #tpu.memory_space<vmem>>, vector<64x128xbf16>
    tpu.vector_store %arg5[%c0_6, %c0_7], %8 {strides = array<i32>} : memref<64x128xbf16, #tpu.memory_space<vmem>>, vector<64x128xbf16>,
    return
  }
  func.func @transform_0(%arg0: i32, %arg1: i32) -> (i32, i32) {
    %c0_i32 = arith.constant 0 : i32
    %c0_i32_0 = arith.constant 0 : i32
    return %arg0, %c0_i32 : i32, i32
  }
  func.func @transform_1(%arg0: i32, %arg1: i32) -> (i32, i32) {
    %c0_i32 = arith.constant 0 : i32
    %c0_i32_0 = arith.constant 0 : i32
    return %c0_i32, %arg1 : i32, i32
  }
  func.func @transform_2(%arg0: i32, %arg1: i32) -> (i32, i32) {
    %c0_i32 = arith.constant 0 : i32
    %c0_i32_0 = arith.constant 0 : i32
    return %c0_i32, %arg1 : i32, i32
  }
  func.func @transform_3(%arg0: i32, %arg1: i32) -> (i32, i32) {
    %c0_i32 = arith.constant 0 : i32
    return %arg0, %arg1 : i32, i32
  }
}

module attributes {stable_mosaic.version = 11 : i64} {
  func.func @_mm_kernel(%arg0: i32, %arg1: i32, %arg2: memref<64x128xbf16, #tpu.memory_space<vmem>>, %arg3: memref<128x128xbf16, #tpu.memory_space<vmem>>, %arg4: memref<1x128xf32, #tpu.memory_space<vmem>>, %arg5: memref<64x128xf32, #tpu.memory_space<vmem>>) attributes {dimension_semantics = [#tpu.dimension_semantics<parallel>, #tpu.dimension_semantics<parallel>], iteration_bounds = array<i64: 2, 1>, scalar_prefetch = 0 : i64, scratch_operands = 0 : i64, tpu.core_type = #tpu.core_type<tc>, window_params = [{transform_indices = @transform_0, window_bounds = array<i64: 64, 128>}, {transform_indices = @transform_1, window_bounds = array<i64: 128, 128>}, {transform_indices = @transform_2, window_bounds = array<i64: 1, 128>}, {transform_indices = @transform_3, window_bounds = array<i64: 64, 128>}]} {
    %c0 = arith.constant 0 : index
    %c0_0 = arith.constant 0 : index
    %0 = vector.load %arg2[%c0, %c0_0] : memref<64x128xbf16, #tpu.memory_space<vmem>>, vector<64x128xbf16>
    %c0_1 = arith.constant 0 : index
    %c0_2 = arith.constant 0 : index
    %1 = vector.load %arg3[%c0_1, %c0_2] : memref<128x128xbf16, #tpu.memory_space<vmem>>, vector<128x128xbf16>
    %cst = arith.constant dense<0.000000e+00> : vector<64x128xf32>
    %2 = tpu.matmul %0, %1, %cst {dimension_numbers = #tpu.dot_dimension_numbers<[1], [0], [0], [1], [0, 0, 1, 1], [], []>} : vector<64x128xbf16>, vector<128x128xbf16>, vector<64x128xf32> -> vector<64x128xf32>
    %c0_3 = arith.constant 0 : index
    %c0_4 = arith.constant 0 : index
    %3 = vector.load %arg4[%c0_3, %c0_4] : memref<1x128xf32, #tpu.memory_space<vmem>>, vector<1x128xf32>
    %4 = vector.broadcast %3 : vector<1x128xf32> to vector<64x128xf32>
    %5 = arith.addf %2, %4 : vector<64x128xf32>
    %c0_5 = arith.constant 0 : index
    %c0_6 = arith.constant 0 : index
    %6 = vector.load %arg5[%c0_5, %c0_6] : memref<64x128xf32, #tpu.memory_space<vmem>>, vector<64x128xf32>
    tpu.vector_store %arg5[%c0_5, %c0_6], %5 {strides = array<i32>} : memref<64x128xf32, #tpu.memory_space<vmem>>, vector<64x128xf32>,
    return
  }
  func.func @transform_0(%arg0: i32, %arg1: i32) -> (i32, i32) {
    %c0_i32 = arith.constant 0 : i32
    %c0_i32_0 = arith.constant 0 : i32
    return %arg0, %c0_i32 : i32, i32
  }
  func.func @transform_1(%arg0: i32, %arg1: i32) -> (i32, i32) {
    %c0_i32 = arith.constant 0 : i32
    %c0_i32_0 = arith.constant 0 : i32
    return %c0_i32, %arg1 : i32, i32
  }
  func.func @transform_2(%arg0: i32, %arg1: i32) -> (i32, i32) {
    %c0_i32 = arith.constant 0 : i32
    %c0_i32_0 = arith.constant 0 : i32
    return %c0_i32, %arg1 : i32, i32
  }
  func.func @transform_3(%arg0: i32, %arg1: i32) -> (i32, i32) {
    %c0_i32 = arith.constant 0 : i32
    return %arg0, %arg1 : i32, i32
  }
}

module attributes {stable_mosaic.version = 11 : i64} {
  func.func @_vq_kernel(%arg0: i32, %arg1: memref<64x128xf32, #tpu.memory_space<vmem>>, %arg2: memref<128x128xf32, #tpu.memory_space<vmem>>, %arg3: memref<1x128xf32, #tpu.memory_space<vmem>>, %arg4: memref<64x1xi32, #tpu.memory_space<vmem>>, %arg5: memref<64x128xf32, #tpu.memory_space<vmem>>) attributes {dimension_semantics = [#tpu.dimension_semantics<parallel>], iteration_bounds = array<i64: 2>, scalar_prefetch = 0 : i64, scratch_operands = 0 : i64, tpu.core_type = #tpu.core_type<tc>, window_params = [{transform_indices = @transform_0, window_bounds = array<i64: 64, 128>}, {pipeline_mode = #tpu.pipeline_mode<synchronous>, transform_indices = @transform_1, window_bounds = array<i64: 128, 128>}, {pipeline_mode = #tpu.pipeline_mode<synchronous>, transform_indices = @transform_2, window_bounds = array<i64: 1, 128>}, {transform_indices = @transform_3, window_bounds = array<i64: 64, 1>}, {transform_indices = @transform_4, window_bounds = array<i64: 64, 128>}]} {
    %c0 = arith.constant 0 : index
    %c0_0 = arith.constant 0 : index
    %0 = vector.load %arg1[%c0, %c0_0] : memref<64x128xf32, #tpu.memory_space<vmem>>, vector<64x128xf32>
    %c0_1 = arith.constant 0 : index
    %c0_2 = arith.constant 0 : index
    %1 = vector.load %arg2[%c0_1, %c0_2] : memref<128x128xf32, #tpu.memory_space<vmem>>, vector<128x128xf32>
    %2 = arith.mulf %0, %0 : vector<64x128xf32>
    %cst = arith.constant dense<0.000000e+00> : vector<64xf32>
    %3 = vector.multi_reduction <add>, %2, %cst [1] : vector<64x128xf32> to vector<64xf32>
    %4 = vector.shape_cast %3 : vector<64xf32> to vector<64x1xf32>
    %cst_3 = arith.constant dense<0.000000e+00> : vector<64x128xf32>
    %5 = tpu.matmul %0, %1, %cst_3 {dimension_numbers = #tpu.dot_dimension_numbers<[1], [1], [0], [0], [0, 0, 1, 0], [], []>} : vector<64x128xf32>, vector<128x128xf32>, vector<64x128xf32> -> vector<64x128xf32>
    %cst_4 = arith.constant 2.000000e+00 : f32
    %6 = vector.broadcast %cst_4 : f32 to vector<64x128xf32>
    %7 = arith.mulf %6, %5 : vector<64x128xf32>
    %8 = vector.broadcast %4 : vector<64x1xf32> to vector<64x128xf32>
    %9 = arith.subf %8, %7 : vector<64x128xf32>
    %c0_5 = arith.constant 0 : index
    %c0_6 = arith.constant 0 : index
    %10 = vector.load %arg3[%c0_5, %c0_6] : memref<1x128xf32, #tpu.memory_space<vmem>>, vector<1x128xf32>
    %11 = vector.broadcast %10 : vector<1x128xf32> to vector<64x128xf32>
    %12 = arith.addf %9, %11 : vector<64x128xf32>
    %cst_7 = arith.constant dense<0x7F800000> : vector<64xf32>
    %13 = vector.multi_reduction <minimumf>, %12, %cst_7 [1] : vector<64x128xf32> to vector<64xf32>
    %14 = vector.shape_cast %13 : vector<64xf32> to vector<64x1xf32>
    %15 = tpu.iota {dimensions = array<i32: 1>} : vector<64x128xi32>
    %16 = vector.broadcast %14 : vector<64x1xf32> to vector<64x128xf32>
    %17 = arith.cmpf ole, %12, %16 : vector<64x128xf32>
    %c128_i32 = arith.constant 128 : i32
    %18 = vector.broadcast %c128_i32 : i32 to vector<64x128xi32>
    %19 = arith.select %17, %15, %18 : vector<64x128xi1>, vector<64x128xi32>
    %cst_8 = arith.constant dense<2147483647> : vector<64xi32>
    %20 = vector.multi_reduction <minsi>, %19, %cst_8 [1] : vector<64x128xi32> to vector<64xi32>
    %21 = vector.shape_cast %20 : vector<64xi32> to vector<64x1xi32>
    %c0_9 = arith.constant 0 : index
    %c0_10 = arith.constant 0 : index
    %22 = vector.load %arg4[%c0_9, %c0_10] : memref<64x1xi32, #tpu.memory_space<vmem>>, vector<64x1xi32>
    tpu.vector_store %arg4[%c0_9, %c0_10], %21 {strides = array<i32>} : memref<64x1xi32, #tpu.memory_space<vmem>>, vector<64x1xi32>,
    %23 = vector.broadcast %21 : vector<64x1xi32> to vector<64x128xi32>
    %24 = arith.cmpi eq, %15, %23 : vector<64x128xi32>
    %25 = arith.extui %24 : vector<64x128xi1> to vector<64x128xi32>
    %26 = arith.sitofp %25 : vector<64x128xi32> to vector<64x128xf32>
    %cst_11 = arith.constant dense<0.000000e+00> : vector<64x128xf32>
    %27 = tpu.matmul %26, %1, %cst_11 {dimension_numbers = #tpu.dot_dimension_numbers<[1], [0], [0], [1], [0, 0, 1, 1], [], []>} : vector<64x128xf32>, vector<128x128xf32>, vector<64x128xf32> -> vector<64x128xf32>
    %c0_12 = arith.constant 0 : index
    %c0_13 = arith.constant 0 : index
    %28 = vector.load %arg5[%c0_12, %c0_13] : memref<64x128xf32, #tpu.memory_space<vmem>>, vector<64x128xf32>
    tpu.vector_store %arg5[%c0_12, %c0_13], %27 {strides = array<i32>} : memref<64x128xf32, #tpu.memory_space<vmem>>, vector<64x128xf32>,
    return
  }
  func.func @transform_0(%arg0: i32) -> (i32, i32) {
    %c0_i32 = arith.constant 0 : i32
    %c0_i32_0 = arith.constant 0 : i32
    return %arg0, %c0_i32 : i32, i32
  }
  func.func @transform_1(%arg0: i32) -> (i32, i32) {
    %c0_i32 = arith.constant 0 : i32
    %c0_i32_0 = arith.constant 0 : i32
    %c0_i32_1 = arith.constant 0 : i32
    return %c0_i32, %c0_i32_0 : i32, i32
  }
  func.func @transform_2(%arg0: i32) -> (i32, i32) {
    %c0_i32 = arith.constant 0 : i32
    %c0_i32_0 = arith.constant 0 : i32
    %c0_i32_1 = arith.constant 0 : i32
    return %c0_i32, %c0_i32_0 : i32, i32
  }
  func.func @transform_3(%arg0: i32) -> (i32, i32) {
    %c0_i32 = arith.constant 0 : i32
    %c0_i32_0 = arith.constant 0 : i32
    return %arg0, %c0_i32 : i32, i32
  }
  func.func @transform_4(%arg0: i32) -> (i32, i32) {
    %c0_i32 = arith.constant 0 : i32
    %c0_i32_0 = arith.constant 0 : i32
    return %arg0, %c0_i32 : i32, i32
  }
}

module attributes {stable_mosaic.version = 11 : i64} {
  func.func @_mm_kernel(%arg0: i32, %arg1: i32, %arg2: memref<64x128xf32, #tpu.memory_space<vmem>>, %arg3: memref<128x128xbf16, #tpu.memory_space<vmem>>, %arg4: memref<1x128xf32, #tpu.memory_space<vmem>>, %arg5: memref<64x128xbf16, #tpu.memory_space<vmem>>) attributes {dimension_semantics = [#tpu.dimension_semantics<parallel>, #tpu.dimension_semantics<parallel>], iteration_bounds = array<i64: 2, 1>, scalar_prefetch = 0 : i64, scratch_operands = 0 : i64, tpu.core_type = #tpu.core_type<tc>, window_params = [{transform_indices = @transform_0, window_bounds = array<i64: 64, 128>}, {transform_indices = @transform_1, window_bounds = array<i64: 128, 128>}, {transform_indices = @transform_2, window_bounds = array<i64: 1, 128>}, {transform_indices = @transform_3, window_bounds = array<i64: 64, 128>}]} {
    %c0 = arith.constant 0 : index
    %c0_0 = arith.constant 0 : index
    %0 = vector.load %arg2[%c0, %c0_0] : memref<64x128xf32, #tpu.memory_space<vmem>>, vector<64x128xf32>
    %1 = arith.truncf %0 : vector<64x128xf32> to vector<64x128xbf16>
    %c0_1 = arith.constant 0 : index
    %c0_2 = arith.constant 0 : index
    %2 = vector.load %arg3[%c0_1, %c0_2] : memref<128x128xbf16, #tpu.memory_space<vmem>>, vector<128x128xbf16>
    %cst = arith.constant dense<0.000000e+00> : vector<64x128xf32>
    %3 = tpu.matmul %1, %2, %cst {dimension_numbers = #tpu.dot_dimension_numbers<[1], [0], [0], [1], [0, 0, 1, 1], [], []>} : vector<64x128xbf16>, vector<128x128xbf16>, vector<64x128xf32> -> vector<64x128xf32>
    %c0_3 = arith.constant 0 : index
    %c0_4 = arith.constant 0 : index
    %4 = vector.load %arg4[%c0_3, %c0_4] : memref<1x128xf32, #tpu.memory_space<vmem>>, vector<1x128xf32>
    %5 = vector.broadcast %4 : vector<1x128xf32> to vector<64x128xf32>
    %6 = arith.addf %3, %5 : vector<64x128xf32>
    %7 = arith.truncf %6 : vector<64x128xf32> to vector<64x128xbf16>
    %c0_5 = arith.constant 0 : index
    %c0_6 = arith.constant 0 : index
    %8 = vector.load %arg5[%c0_5, %c0_6] : memref<64x128xbf16, #tpu.memory_space<vmem>>, vector<64x128xbf16>
    tpu.vector_store %arg5[%c0_5, %c0_6], %7 {strides = array<i32>} : memref<64x128xbf16, #tpu.memory_space<vmem>>, vector<64x128xbf16>,
    return
  }
  func.func @transform_0(%arg0: i32, %arg1: i32) -> (i32, i32) {
    %c0_i32 = arith.constant 0 : i32
    %c0_i32_0 = arith.constant 0 : i32
    return %arg0, %c0_i32 : i32, i32
  }
  func.func @transform_1(%arg0: i32, %arg1: i32) -> (i32, i32) {
    %c0_i32 = arith.constant 0 : i32
    %c0_i32_0 = arith.constant 0 : i32
    return %c0_i32, %arg1 : i32, i32
  }
  func.func @transform_2(%arg0: i32, %arg1: i32) -> (i32, i32) {
    %c0_i32 = arith.constant 0 : i32
    %c0_i32_0 = arith.constant 0 : i32
    return %c0_i32, %arg1 : i32, i32
  }
  func.func @transform_3(%arg0: i32, %arg1: i32) -> (i32, i32) {
    %c0_i32 = arith.constant 0 : i32
    return %arg0, %arg1 : i32, i32
  }
}

module attributes {stable_mosaic.version = 11 : i64} {
  func.func @_mm_kernel(%arg0: i32, %arg1: i32, %arg2: memref<64x1152xbf16, #tpu.memory_space<vmem>>, %arg3: memref<1152x128xbf16, #tpu.memory_space<vmem>>, %arg4: memref<1x128xf32, #tpu.memory_space<vmem>>, %arg5: memref<64x128xbf16, #tpu.memory_space<vmem>>, %arg6: memref<1x1x128xf32, #tpu.memory_space<vmem>>, %arg7: memref<1x1x128xf32, #tpu.memory_space<vmem>>) attributes {dimension_semantics = [#tpu.dimension_semantics<parallel>, #tpu.dimension_semantics<parallel>], iteration_bounds = array<i64: 2, 1>, scalar_prefetch = 0 : i64, scratch_operands = 0 : i64, tpu.core_type = #tpu.core_type<tc>, window_params = [{transform_indices = @transform_0, window_bounds = array<i64: 64, 1152>}, {transform_indices = @transform_1, window_bounds = array<i64: 1152, 128>}, {transform_indices = @transform_2, window_bounds = array<i64: 1, 128>}, {transform_indices = @transform_3, window_bounds = array<i64: 64, 128>}, {transform_indices = @transform_4, window_bounds = array<i64: 1, 1, 128>}, {transform_indices = @transform_5, window_bounds = array<i64: 1, 1, 128>}]} {
    %c0 = arith.constant 0 : index
    %c0_0 = arith.constant 0 : index
    %0 = vector.load %arg2[%c0, %c0_0] : memref<64x1152xbf16, #tpu.memory_space<vmem>>, vector<64x1152xbf16>
    %c0_1 = arith.constant 0 : index
    %c0_2 = arith.constant 0 : index
    %1 = vector.load %arg3[%c0_1, %c0_2] : memref<1152x128xbf16, #tpu.memory_space<vmem>>, vector<1152x128xbf16>
    %cst = arith.constant dense<0.000000e+00> : vector<64x128xf32>
    %2 = tpu.matmul %0, %1, %cst {dimension_numbers = #tpu.dot_dimension_numbers<[1], [0], [0], [1], [0, 0, 1, 1], [], []>} : vector<64x1152xbf16>, vector<1152x128xbf16>, vector<64x128xf32> -> vector<64x128xf32>
    %c0_3 = arith.constant 0 : index
    %c0_4 = arith.constant 0 : index
    %3 = vector.load %arg4[%c0_3, %c0_4] : memref<1x128xf32, #tpu.memory_space<vmem>>, vector<1x128xf32>
    %4 = vector.broadcast %3 : vector<1x128xf32> to vector<64x128xf32>
    %5 = arith.addf %2, %4 : vector<64x128xf32>
    %cst_5 = arith.constant dense<0.000000e+00> : vector<128xf32>
    %6 = vector.multi_reduction <add>, %5, %cst_5 [0] : vector<64x128xf32> to vector<128xf32>
    %7 = vector.shape_cast %6 : vector<128xf32> to vector<1x128xf32>
    %8 = vector.shape_cast %7 : vector<1x128xf32> to vector<1x1x128xf32>
    %c0_6 = arith.constant 0 : index
    %c0_7 = arith.constant 0 : index
    %c0_8 = arith.constant 0 : index
    %9 = vector.load %arg6[%c0_6, %c0_7, %c0_8] : memref<1x1x128xf32, #tpu.memory_space<vmem>>, vector<1x1x128xf32>
    tpu.vector_store %arg6[%c0_6, %c0_7, %c0_8], %8 {strides = array<i32>} : memref<1x1x128xf32, #tpu.memory_space<vmem>>, vector<1x1x128xf32>,
    %10 = arith.mulf %5, %5 : vector<64x128xf32>
    %cst_9 = arith.constant dense<0.000000e+00> : vector<128xf32>
    %11 = vector.multi_reduction <add>, %10, %cst_9 [0] : vector<64x128xf32> to vector<128xf32>
    %12 = vector.shape_cast %11 : vector<128xf32> to vector<1x128xf32>
    %13 = vector.shape_cast %12 : vector<1x128xf32> to vector<1x1x128xf32>
    %c0_10 = arith.constant 0 : index
    %c0_11 = arith.constant 0 : index
    %c0_12 = arith.constant 0 : index
    %14 = vector.load %arg7[%c0_10, %c0_11, %c0_12] : memref<1x1x128xf32, #tpu.memory_space<vmem>>, vector<1x1x128xf32>
    tpu.vector_store %arg7[%c0_10, %c0_11, %c0_12], %13 {strides = array<i32>} : memref<1x1x128xf32, #tpu.memory_space<vmem>>, vector<1x1x128xf32>,
    %15 = arith.truncf %5 : vector<64x128xf32> to vector<64x128xbf16>
    %c0_13 = arith.constant 0 : index
    %c0_14 = arith.constant 0 : index
    %16 = vector.load %arg5[%c0_13, %c0_14] : memref<64x128xbf16, #tpu.memory_space<vmem>>, vector<64x128xbf16>
    tpu.vector_store %arg5[%c0_13, %c0_14], %15 {strides = array<i32>} : memref<64x128xbf16, #tpu.memory_space<vmem>>, vector<64x128xbf16>,
    return
  }
  func.func @transform_0(%arg0: i32, %arg1: i32) -> (i32, i32) {
    %c0_i32 = arith.constant 0 : i32
    %c0_i32_0 = arith.constant 0 : i32
    return %arg0, %c0_i32 : i32, i32
  }
  func.func @transform_1(%arg0: i32, %arg1: i32) -> (i32, i32) {
    %c0_i32 = arith.constant 0 : i32
    %c0_i32_0 = arith.constant 0 : i32
    return %c0_i32, %arg1 : i32, i32
  }
  func.func @transform_2(%arg0: i32, %arg1: i32) -> (i32, i32) {
    %c0_i32 = arith.constant 0 : i32
    %c0_i32_0 = arith.constant 0 : i32
    return %c0_i32, %arg1 : i32, i32
  }
  func.func @transform_3(%arg0: i32, %arg1: i32) -> (i32, i32) {
    %c0_i32 = arith.constant 0 : i32
    return %arg0, %arg1 : i32, i32
  }
  func.func @transform_4(%arg0: i32, %arg1: i32) -> (i32, i32, i32) {
    %c0_i32 = arith.constant 0 : i32
    %c0_i32_0 = arith.constant 0 : i32
    return %arg0, %c0_i32, %arg1 : i32, i32, i32
  }
  func.func @transform_5(%arg0: i32, %arg1: i32) -> (i32, i32, i32) {
    %c0_i32 = arith.constant 0 : i32
    %c0_i32_0 = arith.constant 0 : i32
    return %arg0, %c0_i32, %arg1 : i32, i32, i32
  }
}

module attributes {stable_mosaic.version = 11 : i64} {
  func.func @_bn_res_relu_kernel(%arg0: i32, %arg1: memref<64x128xbf16, #tpu.memory_space<vmem>>, %arg2: memref<1x128xf32, #tpu.memory_space<vmem>>, %arg3: memref<1x128xf32, #tpu.memory_space<vmem>>, %arg4: memref<64x128xbf16, #tpu.memory_space<vmem>>, %arg5: memref<64x128xbf16, #tpu.memory_space<vmem>>) attributes {dimension_semantics = [#tpu.dimension_semantics<parallel>], iteration_bounds = array<i64: 2>, scalar_prefetch = 0 : i64, scratch_operands = 0 : i64, tpu.core_type = #tpu.core_type<tc>, window_params = [{transform_indices = @transform_0, window_bounds = array<i64: 64, 128>}, {pipeline_mode = #tpu.pipeline_mode<synchronous>, transform_indices = @transform_1, window_bounds = array<i64: 1, 128>}, {pipeline_mode = #tpu.pipeline_mode<synchronous>, transform_indices = @transform_2, window_bounds = array<i64: 1, 128>}, {transform_indices = @transform_3, window_bounds = array<i64: 64, 128>}, {transform_indices = @transform_4, window_bounds = array<i64: 64, 128>}]} {
    %c0 = arith.constant 0 : index
    %c0_0 = arith.constant 0 : index
    %0 = vector.load %arg1[%c0, %c0_0] : memref<64x128xbf16, #tpu.memory_space<vmem>>, vector<64x128xbf16>
    %1 = arith.extf %0 : vector<64x128xbf16> to vector<64x128xf32>
    %c0_1 = arith.constant 0 : index
    %c0_2 = arith.constant 0 : index
    %2 = vector.load %arg2[%c0_1, %c0_2] : memref<1x128xf32, #tpu.memory_space<vmem>>, vector<1x128xf32>
    %3 = vector.broadcast %2 : vector<1x128xf32> to vector<64x128xf32>
    %4 = arith.mulf %1, %3 : vector<64x128xf32>
    %c0_3 = arith.constant 0 : index
    %c0_4 = arith.constant 0 : index
    %5 = vector.load %arg3[%c0_3, %c0_4] : memref<1x128xf32, #tpu.memory_space<vmem>>, vector<1x128xf32>
    %6 = vector.broadcast %5 : vector<1x128xf32> to vector<64x128xf32>
    %7 = arith.addf %4, %6 : vector<64x128xf32>
    %c0_5 = arith.constant 0 : index
    %c0_6 = arith.constant 0 : index
    %8 = vector.load %arg4[%c0_5, %c0_6] : memref<64x128xbf16, #tpu.memory_space<vmem>>, vector<64x128xbf16>
    %9 = arith.extf %8 : vector<64x128xbf16> to vector<64x128xf32>
    %10 = arith.addf %7, %9 : vector<64x128xf32>
    %cst = arith.constant 0.000000e+00 : f32
    %11 = vector.broadcast %cst : f32 to vector<64x128xf32>
    %12 = arith.maximumf %10, %11 : vector<64x128xf32>
    %13 = arith.truncf %12 : vector<64x128xf32> to vector<64x128xbf16>
    %c0_7 = arith.constant 0 : index
    %c0_8 = arith.constant 0 : index
    %14 = vector.load %arg5[%c0_7, %c0_8] : memref<64x128xbf16, #tpu.memory_space<vmem>>, vector<64x128xbf16>
    tpu.vector_store %arg5[%c0_7, %c0_8], %13 {strides = array<i32>} : memref<64x128xbf16, #tpu.memory_space<vmem>>, vector<64x128xbf16>,
    return
  }
  func.func @transform_0(%arg0: i32) -> (i32, i32) {
    %c0_i32 = arith.constant 0 : i32
    %c0_i32_0 = arith.constant 0 : i32
    return %arg0, %c0_i32 : i32, i32
  }
  func.func @transform_1(%arg0: i32) -> (i32, i32) {
    %c0_i32 = arith.constant 0 : i32
    %c0_i32_0 = arith.constant 0 : i32
    %c0_i32_1 = arith.constant 0 : i32
    return %c0_i32, %c0_i32_0 : i32, i32
  }
  func.func @transform_2(%arg0: i32) -> (i32, i32) {
    %c0_i32 = arith.constant 0 : i32
    %c0_i32_0 = arith.constant 0 : i32
    %c0_i32_1 = arith.constant 0 : i32
    return %c0_i32, %c0_i32_0 : i32, i32
  }
  func.func @transform_3(%arg0: i32) -> (i32, i32) {
    %c0_i32 = arith.constant 0 : i32
    %c0_i32_0 = arith.constant 0 : i32
    return %arg0, %c0_i32 : i32, i32
  }
  func.func @transform_4(%arg0: i32) -> (i32, i32) {
    %c0_i32 = arith.constant 0 : i32
    %c0_i32_0 = arith.constant 0 : i32
    return %arg0, %c0_i32 : i32, i32
  }
}

module attributes {stable_mosaic.version = 11 : i64} {
  func.func @_mm_kernel(%arg0: i32, %arg1: i32, %arg2: memref<64x1152xbf16, #tpu.memory_space<vmem>>, %arg3: memref<1152x256xbf16, #tpu.memory_space<vmem>>, %arg4: memref<1x256xf32, #tpu.memory_space<vmem>>, %arg5: memref<64x256xbf16, #tpu.memory_space<vmem>>) attributes {dimension_semantics = [#tpu.dimension_semantics<parallel>, #tpu.dimension_semantics<parallel>], iteration_bounds = array<i64: 2, 2>, scalar_prefetch = 0 : i64, scratch_operands = 0 : i64, tpu.core_type = #tpu.core_type<tc>, window_params = [{transform_indices = @transform_0, window_bounds = array<i64: 64, 1152>}, {transform_indices = @transform_1, window_bounds = array<i64: 1152, 256>}, {transform_indices = @transform_2, window_bounds = array<i64: 1, 256>}, {transform_indices = @transform_3, window_bounds = array<i64: 64, 256>}]} {
    %c0 = arith.constant 0 : index
    %c0_0 = arith.constant 0 : index
    %0 = vector.load %arg2[%c0, %c0_0] : memref<64x1152xbf16, #tpu.memory_space<vmem>>, vector<64x1152xbf16>
    %c0_1 = arith.constant 0 : index
    %c0_2 = arith.constant 0 : index
    %1 = vector.load %arg3[%c0_1, %c0_2] : memref<1152x256xbf16, #tpu.memory_space<vmem>>, vector<1152x256xbf16>
    %cst = arith.constant dense<0.000000e+00> : vector<64x256xf32>
    %2 = tpu.matmul %0, %1, %cst {dimension_numbers = #tpu.dot_dimension_numbers<[1], [0], [0], [1], [0, 0, 1, 1], [], []>} : vector<64x1152xbf16>, vector<1152x256xbf16>, vector<64x256xf32> -> vector<64x256xf32>
    %c0_3 = arith.constant 0 : index
    %c0_4 = arith.constant 0 : index
    %3 = vector.load %arg4[%c0_3, %c0_4] : memref<1x256xf32, #tpu.memory_space<vmem>>, vector<1x256xf32>
    %4 = vector.broadcast %3 : vector<1x256xf32> to vector<64x256xf32>
    %5 = arith.addf %2, %4 : vector<64x256xf32>
    %cst_5 = arith.constant 0.000000e+00 : f32
    %6 = vector.broadcast %cst_5 : f32 to vector<64x256xf32>
    %7 = arith.maximumf %5, %6 : vector<64x256xf32>
    %8 = arith.truncf %7 : vector<64x256xf32> to vector<64x256xbf16>
    %c0_6 = arith.constant 0 : index
    %c0_7 = arith.constant 0 : index
    %9 = vector.load %arg5[%c0_6, %c0_7] : memref<64x256xbf16, #tpu.memory_space<vmem>>, vector<64x256xbf16>
    tpu.vector_store %arg5[%c0_6, %c0_7], %8 {strides = array<i32>} : memref<64x256xbf16, #tpu.memory_space<vmem>>, vector<64x256xbf16>,
    return
  }
  func.func @transform_0(%arg0: i32, %arg1: i32) -> (i32, i32) {
    %c0_i32 = arith.constant 0 : i32
    %c0_i32_0 = arith.constant 0 : i32
    return %arg0, %c0_i32 : i32, i32
  }
  func.func @transform_1(%arg0: i32, %arg1: i32) -> (i32, i32) {
    %c0_i32 = arith.constant 0 : i32
    %c0_i32_0 = arith.constant 0 : i32
    return %c0_i32, %arg1 : i32, i32
  }
  func.func @transform_2(%arg0: i32, %arg1: i32) -> (i32, i32) {
    %c0_i32 = arith.constant 0 : i32
    %c0_i32_0 = arith.constant 0 : i32
    return %c0_i32, %arg1 : i32, i32
  }
  func.func @transform_3(%arg0: i32, %arg1: i32) -> (i32, i32) {
    %c0_i32 = arith.constant 0 : i32
    return %arg0, %arg1 : i32, i32
  }
}

module attributes {stable_mosaic.version = 11 : i64} {
  func.func @_mm_kernel(%arg0: i32, %arg1: i32, %arg2: memref<256x128xbf16, #tpu.memory_space<vmem>>, %arg3: memref<128x128xbf16, #tpu.memory_space<vmem>>, %arg4: memref<1x128xf32, #tpu.memory_space<vmem>>, %arg5: memref<256x128xf32, #tpu.memory_space<vmem>>) attributes {dimension_semantics = [#tpu.dimension_semantics<parallel>, #tpu.dimension_semantics<parallel>], iteration_bounds = array<i64: 2, 1>, scalar_prefetch = 0 : i64, scratch_operands = 0 : i64, tpu.core_type = #tpu.core_type<tc>, window_params = [{transform_indices = @transform_0, window_bounds = array<i64: 256, 128>}, {transform_indices = @transform_1, window_bounds = array<i64: 128, 128>}, {transform_indices = @transform_2, window_bounds = array<i64: 1, 128>}, {transform_indices = @transform_3, window_bounds = array<i64: 256, 128>}]} {
    %c0 = arith.constant 0 : index
    %c0_0 = arith.constant 0 : index
    %0 = vector.load %arg2[%c0, %c0_0] : memref<256x128xbf16, #tpu.memory_space<vmem>>, vector<256x128xbf16>
    %c0_1 = arith.constant 0 : index
    %c0_2 = arith.constant 0 : index
    %1 = vector.load %arg3[%c0_1, %c0_2] : memref<128x128xbf16, #tpu.memory_space<vmem>>, vector<128x128xbf16>
    %cst = arith.constant dense<0.000000e+00> : vector<256x128xf32>
    %2 = tpu.matmul %0, %1, %cst {dimension_numbers = #tpu.dot_dimension_numbers<[1], [0], [0], [1], [0, 0, 1, 1], [], []>} : vector<256x128xbf16>, vector<128x128xbf16>, vector<256x128xf32> -> vector<256x128xf32>
    %c0_3 = arith.constant 0 : index
    %c0_4 = arith.constant 0 : index
    %3 = vector.load %arg4[%c0_3, %c0_4] : memref<1x128xf32, #tpu.memory_space<vmem>>, vector<1x128xf32>
    %4 = vector.broadcast %3 : vector<1x128xf32> to vector<256x128xf32>
    %5 = arith.addf %2, %4 : vector<256x128xf32>
    %6 = arith.negf %5 : vector<256x128xf32>
    %7 = math.exp %6 : vector<256x128xf32>
    %cst_5 = arith.constant 1.000000e+00 : f32
    %8 = vector.broadcast %cst_5 : f32 to vector<256x128xf32>
    %9 = arith.addf %8, %7 : vector<256x128xf32>
    %10 = arith.divf %8, %9 : vector<256x128xf32>
    %c0_6 = arith.constant 0 : index
    %c0_7 = arith.constant 0 : index
    %11 = vector.load %arg5[%c0_6, %c0_7] : memref<256x128xf32, #tpu.memory_space<vmem>>, vector<256x128xf32>
    tpu.vector_store %arg5[%c0_6, %c0_7], %10 {strides = array<i32>} : memref<256x128xf32, #tpu.memory_space<vmem>>, vector<256x128xf32>,
    return
  }
  func.func @transform_0(%arg0: i32, %arg1: i32) -> (i32, i32) {
    %c0_i32 = arith.constant 0 : i32
    %c0_i32_0 = arith.constant 0 : i32
    return %arg0, %c0_i32 : i32, i32
  }
  func.func @transform_1(%arg0: i32, %arg1: i32) -> (i32, i32) {
    %c0_i32 = arith.constant 0 : i32
    %c0_i32_0 = arith.constant 0 : i32
    return %c0_i32, %arg1 : i32, i32
  }
  func.func @transform_2(%arg0: i32, %arg1: i32) -> (i32, i32) {
    %c0_i32 = arith.constant 0 : i32
    %c0_i32_0 = arith.constant 0 : i32
    return %c0_i32, %arg1 : i32, i32
  }
  func.func @transform_3(%arg0: i32, %arg1: i32) -> (i32, i32) {
    %c0_i32 = arith.constant 0 : i32
    return %arg0, %arg1 : i32, i32
  }
}

</mosaic_0001>

<bundles_post_ra>
// kernel: vqvae_forward.13
= control target key start
LH: loop header
LB: loop body
LE: loop exit
PB: predicated region body
PF: predicated region fallthrough
CT: control target
= control target key end

     0   :  { %s1113_s12 = smov 0   ;;  %s1115_s13 = smov 0   ;;  %s1263_s0 = inlined_call_operand.vmem [shape: f32[512,128], index: 0, kind: input, shape index: {}]   ;;  %s1264_s1 = inlined_call_operand.vmem [shape: bf16[128,128], index: 1, kind: input, shape index: {}]   ;;  %s1265_s2 = inlined_call_operand.vmem [shape: f32[1,128], index: 2, kind: input, shape index: {}]   ;;  %s1266_s3 = inlined_call_operand.vmem [shape: bf16[512,128], index: 3, kind: output, shape index: {}]  }
   0x1   :  { %s1117_s14 = smov 0  }
   0x2 LB: > { %s25_s15 = sadd.s32 1, %s1087_s13  ;;  %p774_p0 = scmp.ge.s32.totalorder %s1091_s14, 1  ;;  %s1091_s14 = sphi %s1117_s14, %s13_s14   ;;  %s1087_s13 = sphi %s1115_s13, %s1268_s13   ;;  %s1083_s12 = sphi %s1113_s12, %s1267_s12  }
   0x3   : > { %p27_p1 = scmp.ge.s32.totalorder %s25_s15, 2  ;;  %p169_p2 = scmp.lt.s32.totalorder %s1091_s14, 3 }
   0x5   : > { %s1270_s15 = smov (%p27_p1, %s25_s15), 0  ;;  %p170_p3 = pnand %p774_p0, %p169_p2 }
   0x6   : > { %s775_s18 = sshll.u32 (!%p170_p3), %s1083_s12, 5 }
   0x7   : > { %173 = sbr.rel (%p170_p3) target bundleno = 273 (0x111), region = 32  ;;  %p204_p4 = scmp.lt.s32.totalorder (!%p170_p3), %s775_s18, 63 }
   0xc   : > { %v1061_v0 = vld [vmem:[%s1264_s1 + $0x38] sm:$0xff]   ;;  %v1062_v1 = vld [vmem:[%s1264_s1 + $0x30] sm:$0xff]   ;;  %s1272_s18 = smov (!%p204_p4, %s775_s18), 63  ;;  %v1063_v2 = vld [vmem:[%s1264_s1 + $0x28] sm:$0xff]  }
   0xd   : > { %973 = vmatprep.subr.bf16.mxu0 %v1061_v0  ;;  %1021 = vmatprep.subr.bf16.mxu1 %v1061_v0  ;;  %s776_s23 = sshll.u32 %s1272_s18, 3  ;;  %v1064_v3 = vld [vmem:[%s1264_s1 + $0x20] sm:$0xff]   ;;  %v1065_v10 = vld [vmem:[%s1264_s1 + $0x18] sm:$0xff]   ;;  %v1066_v11 = vld [vmem:[%s1264_s1 + $0x10] sm:$0xff]   ;;  %s778_s12 = sshll.u32 %s1272_s18, 2 }
   0xe   : > { %974 = vmatpush3.bf16.msra.mxu0 %v1061_v0  ;;  %1029 = vmatpush3.bf16.msra.mxu1 %v1061_v0  ;;  %s1146_s26 = scalar_lea.vmem %s1263_s0, %s776_s23  ;;  %v1067_v12 = vld [vmem:[%s1264_s1 + $0x8] sm:$0xff]   ;;  %v1068_v13 = vld [vmem:[%s1264_s1] sm:$0xff]   ;;  %s1210_s19 = scalar_lea.vmem %s1266_s3, %s778_s12 }
   0xf   : > { %975 = vmatprep.subr.bf16.mxu0 %v1062_v1  ;;  %1022 = vmatprep.subr.bf16.mxu1 %v1062_v1  ;;  %v226_v4 = vld [vmem:[%s1146_s26] sm:$0xff]  ;;  %v227_v5 = vld [vmem:[%s1146_s26 + $0x8] sm:$0xff]  ;;  %v228_v14 = vld [vmem:[%s1146_s26 + $0x10] sm:$0xff] }
  0x10   : > { %v242_v6 = vld [vmem:[%s1146_s26 + $0x80] sm:$0xff]  ;;  %v258_v7 = vpack.c.bf16 %v227_v5, %v226_v4  ;;  %v243_v8 = vld [vmem:[%s1146_s26 + $0x88] sm:$0xff]  ;;  %v229_v15 = vld [vmem:[%s1146_s26 + $0x18] sm:$0xff] }
  0x11   : > { %v266_v9 = vpack.c.bf16 %v243_v8, %v242_v6  ;;  %v244_v16 = vld [vmem:[%s1146_s26 + $0x90] sm:$0xff]  ;;  %v245_v17 = vld [vmem:[%s1146_s26 + $0x98] sm:$0xff]  ;;  %v230_v18 = vld [vmem:[%s1146_s26 + $0x20] sm:$0xff]  ;;  %v259_v22 = vpack.c.bf16 %v229_v15, %v228_v14 }
  0x12   : > { %976 = vmatpush3.bf16.msra.mxu0 %v1062_v1  ;;  %1030 = vmatpush3.bf16.msra.mxu1 %v1062_v1  ;;  %v231_v19 = vld [vmem:[%s1146_s26 + $0x28] sm:$0xff]  ;;  %v246_v20 = vld [vmem:[%s1146_s26 + $0xa0] sm:$0xff]  ;;  %v267_v23 = vpack.c.bf16 %v245_v17, %v244_v16  ;;  %v232_v26 = vld [vmem:[%s1146_s26 + $0x30] sm:$0xff] }
  0x13   : > { %977 = vmatprep.subr.bf16.mxu0 %v1063_v2  ;;  %1023 = vmatprep.subr.bf16.mxu1 %v1063_v2  ;;  %v247_v21 = vld [vmem:[%s1146_s26 + $0xa8] sm:$0xff]  ;;  %v260_v24 = vpack.c.bf16 %v231_v19, %v230_v18  ;;  %v233_v27 = vld [vmem:[%s1146_s26 + $0x38] sm:$0xff]  ;;  %v248_v28 = vld [vmem:[%s1146_s26 + $0xb0] sm:$0xff] }
  0x14   : > { %989 = vmatprep.mubr.bf16.mxu0 %v258_v7  ;;  %1005 = vmatprep.mubr.bf16.mxu1 %v266_v9  ;;  %v268_v25 = vpack.c.bf16 %v247_v21, %v246_v20  ;;  %v249_v29 = vld [vmem:[%s1146_s26 + $0xb8] sm:$0xff]  ;;  %v234_v30 = vld [vmem:[%s1146_s26 + $0x40] sm:$0xff]  ;;  %v235_v31 = vld [vmem:[%s1146_s26 + $0x48] sm:$0xff]  ;;  %v261_v34 = vpack.c.bf16 %v233_v27, %v232_v26 }
  0x15   : > { %v250_v32 = vld [vmem:[%s1146_s26 + $0xc0] sm:$0xff]  ;;  %v251_v33 = vld [vmem:[%s1146_s26 + $0xc8] sm:$0xff]  ;;  %v269_v35 = vpack.c.bf16 %v249_v29, %v248_v28  ;;  %v262_v36 = vpack.c.bf16 %v235_v31, %v234_v30  ;;  %v236_v38 = vld [vmem:[%s1146_s26 + $0x50] sm:$0xff] }
  0x16   : > { %978 = vmatpush3.bf16.msra.mxu0 %v1063_v2  ;;  %1031 = vmatpush3.bf16.msra.mxu1 %v1063_v2  ;;  %v270_v37 = vpack.c.bf16 %v251_v33, %v250_v32  ;;  %v237_v39 = vld [vmem:[%s1146_s26 + $0x58] sm:$0xff]  ;;  %v252_v40 = vld [vmem:[%s1146_s26 + $0xd0] sm:$0xff]  ;;  %v238_v42 = vld [vmem:[%s1146_s26 + $0x60] sm:$0xff] }
  0x17   : > { %979 = vmatprep.subr.bf16.mxu0 %v1064_v3  ;;  %1024 = vmatprep.subr.bf16.mxu1 %v1064_v3  ;;  %v253_v41 = vld [vmem:[%s1146_s26 + $0xd8] sm:$0xff]  ;;  %v239_v43 = vld [vmem:[%s1146_s26 + $0x68] sm:$0xff]  ;;  %v254_v44 = vld [vmem:[%s1146_s26 + $0xe0] sm:$0xff]  ;;  %v263_v46 = vpack.c.bf16 %v237_v39, %v236_v38 }
  0x18   : > { %v255_v45 = vld [vmem:[%s1146_s26 + $0xe8] sm:$0xff]  ;;  %v271_v47 = vpack.c.bf16 %v253_v41, %v252_v40  ;;  %v264_v48 = vpack.c.bf16 %v239_v43, %v238_v42  ;;  %v240_v50 = vld [vmem:[%s1146_s26 + $0x70] sm:$0xff]  ;;  %v241_v51 = vld [vmem:[%s1146_s26 + $0x78] sm:$0xff] }
  0x19   : > { %v272_v49 = vpack.c.bf16 %v255_v45, %v254_v44  ;;  %v256_v52 = vld [vmem:[%s1146_s26 + $0xf0] sm:$0xff]  ;;  %v257_v53 = vld [vmem:[%s1146_s26 + $0xf8] sm:$0xff]  ;;  %v265_v54 = vpack.c.bf16 %v241_v51, %v240_v50  ;;  %v1198_v58 = vld [vmem:[%s1265_s2] ss:$0 sm:$0xff] }
  0x1a   : > { %980 = vmatpush3.bf16.msra.mxu0 %v1064_v3  ;;  %1032 = vmatpush3.bf16.msra.mxu1 %v1064_v3  ;;  %v273_v55 = vpack.c.bf16 %v257_v53, %v256_v52 }
  0x1b   : > { %981 = vmatprep.subr.bf16.mxu0 %v1065_v10  ;;  %1025 = vmatprep.subr.bf16.mxu1 %v1065_v10 }
  0x1e   : > { %982 = vmatpush3.bf16.msra.mxu0 %v1065_v10  ;;  %1033 = vmatpush3.bf16.msra.mxu1 %v1065_v10 }
  0x1f   : > { %983 = vmatprep.subr.bf16.mxu0 %v1066_v11  ;;  %1026 = vmatprep.subr.bf16.mxu1 %v1066_v11 }
  0x22   : > { %984 = vmatpush3.bf16.msra.mxu0 %v1066_v11  ;;  %1034 = vmatpush3.bf16.msra.mxu1 %v1066_v11 }
  0x23   : > { %985 = vmatprep.subr.bf16.mxu0 %v1067_v12  ;;  %1027 = vmatprep.subr.bf16.mxu1 %v1067_v12 }
  0x26   : > { %986 = vmatpush3.bf16.msra.mxu0 %v1067_v12  ;;  %1035 = vmatpush3.bf16.msra.mxu1 %v1067_v12 }
  0x27   : > { %987 = vmatprep.subr.bf16.mxu0 %v1068_v13  ;;  %1028 = vmatprep.subr.bf16.mxu1 %v1068_v13 }
  0x2a   : > { %988 = vmatpush3.bf16.msra.mxu0 %v1068_v13  ;;  %1036 = vmatpush3.bf16.msra.mxu1 %v1068_v13 }
  0x2d   : > { %990 = vmatmul.mubr.bf16.vlgmr.msra.gmra.mxu0 %v259_v22  ;;  %1006 = vmatmul.mubr.bf16.vlgmr.msra.gmra.mxu1 %v267_v23 }
  0x2e   : > { %993 = vmatprep.mubr.bf16.mxu0 %v260_v24  ;;  %1009 = vmatprep.mubr.bf16.mxu1 %v268_v25 }
  0x35   : > { %994 = vmatmul.mubr.bf16.gmra.mxu0 %v261_v34  ;;  %1010 = vmatmul.mubr.bf16.gmra.mxu1 %v269_v35 }
  0x36   : > { %997 = vmatprep.mubr.bf16.mxu0 %v262_v36  ;;  %1013 = vmatprep.mubr.bf16.mxu1 %v270_v37 }
  0x3d   : > { %998 = vmatmul.mubr.bf16.gmra.mxu0 %v263_v46  ;;  %1014 = vmatmul.mubr.bf16.gmra.mxu1 %v271_v47 }
  0x3e   : > { %1001 = vmatprep.mubr.bf16.mxu0 %v264_v48  ;;  %1017 = vmatprep.mubr.bf16.mxu1 %v272_v49 }
  0x45   : > { %1002 = vmatmul.mubr.bf16.gmra.mxu0 %v265_v54  ;;  %1018 = vmatmul.mubr.bf16.gmra.mxu1 %v273_v55 }
  0xed   : > { %v991_v56 = vpop.f32.mrf.mxu0  ;;  %v1007_v57 = vpop.f32.mrf.mxu1 }
  0xee   : > { %v388_v63 = vadd.f32 %v991_v56, %v1198_v58  ;;  %v452_v0 = vadd.f32 %v1007_v57, %v1198_v58 }
  0xef   : > { %v379_v59 = vpop.f32.mrf.mxu0  ;;  %v443_v60 = vpop.f32.mrf.mxu1 }
  0xf0   : > { %v380_v3 = vadd.f32 %v1198_v58, %v379_v59  ;;  %v444_v4 = vadd.f32 %v1198_v58, %v443_v60 }
  0xf1   : > { %v992_v61 = vpop.f32.mrf.mxu0  ;;  %v1008_v62 = vpop.f32.mrf.mxu1 }
  0xf2   : > { %v391_v1 = vadd.f32 %v992_v61, %v1198_v58  ;;  %v455_v2 = vadd.f32 %v1008_v62, %v1198_v58 }
  0xf3   : > { %v382_v5 = vpop.f32.mrf.mxu0  ;;  %v446_v6 = vpop.f32.mrf.mxu1 }
  0xf4   : > { %v862_v7 = vpack.c.bf16 %v391_v1, %v388_v63  ;;  %v902_v8 = vpack.c.bf16 %v455_v2, %v452_v0  ;;  %v383_v9 = vadd.f32 %v1198_v58, %v382_v5  ;;  %v447_v10 = vadd.f32 %v1198_v58, %v446_v6 }
  0xf5   : > { %v995_v11 = vpop.f32.mrf.mxu0  ;;  %v1011_v12 = vpop.f32.mrf.mxu1 }
  0xf6   : > { %934 = vst [vmem:[%s1210_s19 + $0x8] sm:$0xff] %v862_v7   ;;  %942 = vst [vmem:[%s1210_s19 + $0x48] sm:$0xff] %v902_v8   ;;  %v857_v13 = vpack.c.bf16 %v383_v9, %v380_v3  ;;  %v897_v14 = vpack.c.bf16 %v447_v10, %v444_v4  ;;  %v404_v19 = vadd.f32 %v995_v11, %v1198_v58 }
  0xf7   : > { %v395_v15 = vpop.f32.mrf.mxu0  ;;  %v459_v16 = vpop.f32.mrf.mxu1  ;;  %v468_v20 = vadd.f32 %v1011_v12, %v1198_v58 }
  0xf8   : > { %858 = vst [vmem:[%s1210_s19] sm:$0xff] %v857_v13   ;;  %941 = vst [vmem:[%s1210_s19 + $0x40] sm:$0xff] %v897_v14   ;;  %v396_v23 = vadd.f32 %v1198_v58, %v395_v15  ;;  %v460_v24 = vadd.f32 %v1198_v58, %v459_v16 }
  0xf9   : > { %v996_v17 = vpop.f32.mrf.mxu0  ;;  %v1012_v18 = vpop.f32.mrf.mxu1 }
  0xfa   : > { %v407_v21 = vadd.f32 %v996_v17, %v1198_v58  ;;  %v471_v22 = vadd.f32 %v1012_v18, %v1198_v58 }
  0xfb   : > { %v398_v25 = vpop.f32.mrf.mxu0  ;;  %v462_v26 = vpop.f32.mrf.mxu1 }
  0xfc   : > { %v872_v27 = vpack.c.bf16 %v407_v21, %v404_v19  ;;  %v912_v28 = vpack.c.bf16 %v471_v22, %v468_v20  ;;  %v399_v29 = vadd.f32 %v1198_v58, %v398_v25  ;;  %v463_v30 = vadd.f32 %v1198_v58, %v462_v26 }
  0xfd   : > { %v999_v31 = vpop.f32.mrf.mxu0  ;;  %v1015_v32 = vpop.f32.mrf.mxu1 }
  0xfe   : > { %936 = vst [vmem:[%s1210_s19 + $0x18] sm:$0xff] %v872_v27   ;;  %944 = vst [vmem:[%s1210_s19 + $0x58] sm:$0xff] %v912_v28   ;;  %v867_v33 = vpack.c.bf16 %v399_v29, %v396_v23  ;;  %v907_v34 = vpack.c.bf16 %v463_v30, %v460_v24  ;;  %v420_v39 = vadd.f32 %v999_v31, %v1198_v58 }
  0xff   : > { %v411_v35 = vpop.f32.mrf.mxu0  ;;  %v475_v36 = vpop.f32.mrf.mxu1  ;;  %v484_v40 = vadd.f32 %v1015_v32, %v1198_v58 }
 0x100   : > { %935 = vst [vmem:[%s1210_s19 + $0x10] sm:$0xff] %v867_v33   ;;  %943 = vst [vmem:[%s1210_s19 + $0x50] sm:$0xff] %v907_v34   ;;  %v412_v43 = vadd.f32 %v1198_v58, %v411_v35  ;;  %v476_v44 = vadd.f32 %v1198_v58, %v475_v36 }
 0x101   : > { %v1000_v37 = vpop.f32.mrf.mxu0  ;;  %v1016_v38 = vpop.f32.mrf.mxu1 }
 0x102   : > { %v423_v41 = vadd.f32 %v1000_v37, %v1198_v58  ;;  %v487_v42 = vadd.f32 %v1016_v38, %v1198_v58 }
 0x103   : > { %v414_v45 = vpop.f32.mrf.mxu0  ;;  %v478_v46 = vpop.f32.mrf.mxu1 }
 0x104   : > { %v882_v47 = vpack.c.bf16 %v423_v41, %v420_v39  ;;  %v922_v48 = vpack.c.bf16 %v487_v42, %v484_v40  ;;  %v415_v49 = vadd.f32 %v1198_v58, %v414_v45  ;;  %v479_v50 = vadd.f32 %v1198_v58, %v478_v46 }
 0x105   : > { %v1003_v51 = vpop.f32.mrf.mxu0  ;;  %v1019_v52 = vpop.f32.mrf.mxu1 }
 0x106   : > { %938 = vst [vmem:[%s1210_s19 + $0x28] sm:$0xff] %v882_v47   ;;  %946 = vst [vmem:[%s1210_s19 + $0x68] sm:$0xff] %v922_v48   ;;  %v877_v53 = vpack.c.bf16 %v415_v49, %v412_v43  ;;  %v917_v54 = vpack.c.bf16 %v479_v50, %v476_v44  ;;  %v436_v60 = vadd.f32 %v1003_v51, %v1198_v58 }
 0x107   : > { %v427_v55 = vpop.f32.mrf.mxu0  ;;  %v491_v56 = vpop.f32.mrf.mxu1  ;;  %v500_v61 = vadd.f32 %v1019_v52, %v1198_v58 }
 0x108   : > { %937 = vst [vmem:[%s1210_s19 + $0x20] sm:$0xff] %v877_v53   ;;  %945 = vst [vmem:[%s1210_s19 + $0x60] sm:$0xff] %v917_v54   ;;  %v428_v0 = vadd.f32 %v1198_v58, %v427_v55  ;;  %v492_v1 = vadd.f32 %v1198_v58, %v491_v56 }
 0x109   : > { %v1004_v57 = vpop.f32.mrf.mxu0  ;;  %v1020_v59 = vpop.f32.mrf.mxu1 }
 0x10a   : > { %v439_v62 = vadd.f32 %v1004_v57, %v1198_v58  ;;  %v503_v63 = vadd.f32 %v1020_v59, %v1198_v58 }
 0x10b   : > { %v430_v2 = vpop.f32.mrf.mxu0  ;;  %v494_v3 = vpop.f32.mrf.mxu1 }
 0x10c   : > { %v892_v4 = vpack.c.bf16 %v439_v62, %v436_v60  ;;  %v932_v5 = vpack.c.bf16 %v503_v63, %v500_v61  ;;  %v431_v6 = vadd.f32 %v1198_v58, %v430_v2  ;;  %v495_v7 = vadd.f32 %v1198_v58, %v494_v3 }
 0x10e   : > { %940 = vst [vmem:[%s1210_s19 + $0x38] sm:$0xff] %v892_v4   ;;  %948 = vst [vmem:[%s1210_s19 + $0x78] sm:$0xff] %v932_v5   ;;  %v887_v8 = vpack.c.bf16 %v431_v6, %v428_v0  ;;  %v927_v9 = vpack.c.bf16 %v495_v7, %v492_v1 }
 0x110   : > { %939 = vst [vmem:[%s1210_s19 + $0x30] sm:$0xff] %v887_v8   ;;  %947 = vst [vmem:[%s1210_s19 + $0x70] sm:$0xff] %v927_v9  }
 0x111 PF: > { %s13_s14 = sadd.s32 1, %s1091_s14   ;;  %s1267_s12 = smov %s1087_s13 }
 0x112   : > { %p10_p5 = scmp.ge.s32.totalorder %s13_s14, 4   ;;  %s1268_s13 = smov %s1270_s15 }
 0x114   :  { %12 = sbr.rel (!%p10_p5) target bundleno = 2 (0x2), region = 68 }

// kernel: vqvae_forward.14
= control target key start
LH: loop header
LB: loop body
LE: loop exit
PB: predicated region body
PF: predicated region fallthrough
CT: control target
= control target key end

     0   :  { %s4324_s18 = smov 0   ;;  %s4326_s19 = smov 0   ;;  %s5209_s0 = inlined_call_operand.vmem [shape: bf16[512,1152], index: 0, kind: input, shape index: {}]   ;;  %s5210_s1 = inlined_call_operand.vmem [shape: bf16[1152,128], index: 1, kind: input, shape index: {}]   ;;  %s5211_s2 = inlined_call_operand.vmem [shape: f32[1,128], index: 2, kind: input, shape index: {}]   ;;  %s5212_s3 = inlined_call_operand.vmem [shape: bf16[512,128], index: 3, kind: output, shape index: {0}]   ;;  %s5213_s4 = inlined_call_operand.vmem [shape: f32[2,1,128], index: 4, kind: output, shape index: {1}]   ;;  %s5214_s5 = inlined_call_operand.vmem [shape: f32[2,1,128], index: 5, kind: output, shape index: {2}]  }
   0x1   :  { %s4328_s20 = smov 0  }
   0x2 LB: > { %s28_s21 = sadd.s32 1, %s4288_s19  ;;  %p3046_p0 = scmp.ge.s32.totalorder %s4292_s20, 1  ;;  %s4292_s20 = sphi %s4328_s20, %s16_s20   ;;  %s4288_s19 = sphi %s4326_s19, %s5238_s19   ;;  %s4284_s18 = sphi %s4324_s18, %s5237_s18  }
   0x3   : > { %p30_p1 = scmp.ge.s32.totalorder %s28_s21, 2  ;;  %p229_p2 = scmp.lt.s32.totalorder %s4292_s20, 3 }
   0x5   : > { %s5240_s21 = smov (%p30_p1, %s28_s21), 0  ;;  %p230_p3 = pnand %p3046_p0, %p229_p2 }
   0x7   : > { %233 = sbr.rel (%p230_p3) target bundleno = 548 (0x224), region = 32 }
   0xc   : > { %v3990_v0 = vld [vmem:[%s5210_s1 + $0x78] sm:$0xff]   ;;  %s3047_s24 = sshll.u32 %s4284_s18, 5  ;;  %v3992_v2 = vld [vmem:[%s5210_s1 + $0x70] sm:$0xff]   ;;  %v3994_v4 = vld [vmem:[%s5210_s1 + $0x68] sm:$0xff]   ;;  %p303_p5 = scmp.lt.s32.totalorder %s4284_s18, 1 }
   0xd   : > { %v3991_v1 = vld [vmem:[%s5210_s1 + $0x38] sm:$0xff]   ;;  %3429 = vmatprep.subr.bf16.mxu0 %v3990_v0  ;;  %3949 = vmatprep.subr.bf16.mxu1 %v3990_v0  ;;  %p281_p4 = scmp.lt.s32.totalorder %s3047_s24, 63  ;;  %v3993_v3 = vld [vmem:[%s5210_s1 + $0x30] sm:$0xff]   ;;  %v3995_v5 = vld [vmem:[%s5210_s1 + $0x28] sm:$0xff]  }
   0xe   : > { %3430 = vmatpush3.bf16.msra.mxu0 %v3991_v1  ;;  %3957 = vmatpush3.bf16.msra.mxu1 %v3991_v1  ;;  %v3996_v6 = vld [vmem:[%s5210_s1 + $0x60] sm:$0xff]   ;;  %v3998_v8 = vld [vmem:[%s5210_s1 + $0x58] sm:$0xff]   ;;  %v4000_v10 = vld [vmem:[%s5210_s1 + $0x50] sm:$0xff]   ;;  %s5244_s18 = smov (!%p303_p5, %s4284_s18), 1 }
   0xf   : > { %3431 = vmatprep.subr.bf16.mxu0 %v3992_v2  ;;  %3950 = vmatprep.subr.bf16.mxu1 %v3992_v2  ;;  %s5242_s24 = smov (!%p281_p4, %s3047_s24), 63  ;;  %v3997_v7 = vld [vmem:[%s5210_s1 + $0x20] sm:$0xff]   ;;  %v3999_v9 = vld [vmem:[%s5210_s1 + $0x18] sm:$0xff]   ;;  %v4001_v13 = vld [vmem:[%s5210_s1 + $0x10] sm:$0xff]   ;;  %s308_s22 = scalar_lea.vmem %s5213_s4, %s5244_s18 }
  0x10   : > { %s3965_s12 = smul.u32 36, %s5242_s24  ;;  %v4002_v14 = vld [vmem:[%s5210_s1 + $0x48] sm:$0xff]   ;;  %v4004_v16 = vld [vmem:[%s5210_s1 + $0x40] sm:$0xff]   ;;  %v4012_v18 = vld [vmem:[%s5210_s1 + $0xf8] sm:$0xff]   ;;  %s314_s27 = scalar_lea.vmem %s5214_s5, %s5244_s18 }
  0x11   : > { %v4003_v15 = vld [vmem:[%s5210_s1 + $0x8] sm:$0xff]   ;;  %v4005_v17 = vld [vmem:[%s5210_s1] sm:$0xff]   ;;  %v4013_v21 = vld [vmem:[%s5210_s1 + $0x178] sm:$0xff]  }
  0x12   : > { %3432 = vmatpush3.bf16.msra.mxu0 %v3993_v3  ;;  %3958 = vmatpush3.bf16.msra.mxu1 %v3993_v3  ;;  %s4378_s23 = scalar_lea.vmem %s5209_s0, %s3965_s12  ;;  %v4014_v22 = vld [vmem:[%s5210_s1 + $0xb8] sm:$0xff]   ;;  %v4016_v24 = vld [vmem:[%s5210_s1 + $0xf0] sm:$0xff]   ;;  %v4024_v32 = vld [vmem:[%s5210_s1 + $0xe8] sm:$0xff]  }
  0x13   : > { %3433 = vmatprep.subr.bf16.mxu0 %v3994_v4  ;;  %3951 = vmatprep.subr.bf16.mxu1 %v3994_v4  ;;  %v4008_v11 = vld [vmem:[%s4378_s23 + $0x4] ss:$36 sps:$4 sm:$0xff]   ;;  %v4015_v23 = vld [vmem:[%s5210_s1 + $0x138] sm:$0xff]   ;;  %v4018_v25 = vld [vmem:[%s4378_s23 + $0x4c] ss:$36 sps:$4 sm:$0xff]  }
  0x14   : > { %v4011_v12 = vld [vmem:[%s4378_s23 + $0x364] ss:$36 sps:$4 sm:$0xff]   ;;  %1827 = vmatprep.mubr.bf16.mxu0 %v4008_v11  ;;  %v4020_v26 = vld [vmem:[%s4378_s23 + $0x3ac] ss:$36 sps:$4 sm:$0xff]   ;;  %v4030_v35 = vld [vmem:[%s4378_s23 + $0x94] ss:$36 sps:$4 sm:$0xff]  }
  0x15   : > { %1923 = vmatprep.mubr.bf16.mxu1 %v4011_v12  ;;  %v4006_v19 = vld [vmem:[%s4378_s23] ss:$36 sps:$4 sm:$0xff]   ;;  %v4027_v27 = vld [vmem:[%s5210_s1 + $0x170] sm:$0xff]   ;;  %v4022_v30 = vld [vmem:[%s4378_s23 + $0x48] ss:$36 sps:$4 sm:$0xff]  }
  0x16   : > { %3434 = vmatpush3.bf16.msra.mxu0 %v3995_v5  ;;  %3959 = vmatpush3.bf16.msra.mxu1 %v3995_v5  ;;  %v4009_v20 = vld [vmem:[%s4378_s23 + $0x360] ss:$36 sps:$4 sm:$0xff]   ;;  %v4017_v28 = vld [vmem:[%s5210_s1 + $0xb0] sm:$0xff]   ;;  %v4023_v31 = vld [vmem:[%s4378_s23 + $0x3a8] ss:$36 sps:$4 sm:$0xff]  }
  0x17   : > { %3435 = vmatprep.subr.bf16.mxu0 %v3996_v6  ;;  %3952 = vmatprep.subr.bf16.mxu1 %v3996_v6  ;;  %v4029_v29 = vld [vmem:[%s5210_s1 + $0x130] sm:$0xff]   ;;  %v4025_v33 = vld [vmem:[%s5210_s1 + $0xa8] sm:$0xff]   ;;  %v4026_v34 = vld [vmem:[%s5210_s1 + $0xe0] sm:$0xff]  }
  0x18   : > { %v4032_v36 = vld [vmem:[%s4378_s23 + $0x3f4] ss:$36 sps:$4 sm:$0xff]   ;;  %v4028_v37 = vld [vmem:[%s5210_s1 + $0xa0] sm:$0xff]   ;;  %v4047_v41 = vld [vmem:[%s5210_s1 + $0x168] sm:$0xff]  }
  0x19   : > { %v4036_v38 = vld [vmem:[%s5210_s1 + $0xd8] sm:$0xff]   ;;  %v4034_v39 = vld [vmem:[%s4378_s23 + $0x90] ss:$36 sps:$4 sm:$0xff]   ;;  %v4049_v44 = vld [vmem:[%s5210_s1 + $0x128] sm:$0xff]  }
  0x1a   : > { %3436 = vmatpush3.bf16.msra.mxu0 %v3997_v7  ;;  %3960 = vmatpush3.bf16.msra.mxu1 %v3997_v7  ;;  %v4035_v40 = vld [vmem:[%s4378_s23 + $0x3f0] ss:$36 sps:$4 sm:$0xff]   ;;  %v4037_v42 = vld [vmem:[%s5210_s1 + $0x98] sm:$0xff]   ;;  %v4046_v50 = vld [vmem:[%s5210_s1 + $0xc8] sm:$0xff]  }
  0x1b   : > { %3437 = vmatprep.subr.bf16.mxu0 %v3998_v8  ;;  %3953 = vmatprep.subr.bf16.mxu1 %v3998_v8  ;;  %v4038_v43 = vld [vmem:[%s5210_s1 + $0xd0] sm:$0xff]   ;;  %v4040_v45 = vld [vmem:[%s4378_s23 + $0xdc] ss:$36 sps:$4 sm:$0xff]   ;;  %v4048_v51 = vld [vmem:[%s5210_s1 + $0x88] sm:$0xff]  }
  0x1c   : > { %v4042_v46 = vld [vmem:[%s4378_s23 + $0x43c] ss:$36 sps:$4 sm:$0xff]   ;;  %v4039_v47 = vld [vmem:[%s5210_s1 + $0x90] sm:$0xff]   ;;  %v4052_v52 = vld [vmem:[%s4378_s23 + $0x124] ss:$36 sps:$4 sm:$0xff]  }
  0x1d   : > { %v4044_v48 = vld [vmem:[%s4378_s23 + $0xd8] ss:$36 sps:$4 sm:$0xff]   ;;  %v4050_v53 = vld [vmem:[%s5210_s1 + $0xc0] sm:$0xff]   ;;  %v4056_v56 = vld [vmem:[%s4378_s23 + $0xc] ss:$36 sps:$4 sm:$0xff]  }
  0x1e   : > { %3438 = vmatpush3.bf16.msra.mxu0 %v3999_v9  ;;  %3961 = vmatpush3.bf16.msra.mxu1 %v3999_v9  ;;  %v4045_v49 = vld [vmem:[%s4378_s23 + $0x438] ss:$36 sps:$4 sm:$0xff]   ;;  %v4060_v54 = vld [vmem:[%s5210_s1 + $0x160] sm:$0xff]   ;;  %v4054_v58 = vld [vmem:[%s4378_s23 + $0x8] ss:$36 sps:$4 sm:$0xff]  }
  0x1f   : > { %3439 = vmatprep.subr.bf16.mxu0 %v4000_v10  ;;  %3954 = vmatprep.subr.bf16.mxu1 %v4000_v10  ;;  %v4061_v55 = vld [vmem:[%s5210_s1 + $0x120] sm:$0xff]   ;;  %v4058_v60 = vld [vmem:[%s5210_s1 + $0x1f8] sm:$0xff]   ;;  %v4062_v62 = vld [vmem:[%s4378_s23 + $0x16c] ss:$36 sps:$4 sm:$0xff]  }
  0x20   : > { %v4051_v57 = vld [vmem:[%s5210_s1 + $0x80] sm:$0xff]   ;;  %v4059_v61 = vld [vmem:[%s5210_s1 + $0x1b8] sm:$0xff]   ;;  %v4075_v2 = vld [vmem:[%s5210_s1 + $0x1f0] sm:$0xff]  }
  0x21   : > { %v4057_v59 = vld [vmem:[%s4378_s23 + $0x120] ss:$36 sps:$4 sm:$0xff]   ;;  %v4074_v63 = vld [vmem:[%s5210_s1 + $0x158] sm:$0xff]   ;;  %v4077_v3 = vld [vmem:[%s5210_s1 + $0x1b0] sm:$0xff]  }
  0x22   : > { %3440 = vmatpush3.bf16.msra.mxu0 %v4001_v13  ;;  %3962 = vmatpush3.bf16.msra.mxu1 %v4001_v13  ;;  %v4064_v0 = vld [vmem:[%s4378_s23 + $0x54] ss:$36 sps:$4 sm:$0xff]   ;;  %v4066_v4 = vld [vmem:[%s4378_s23 + $0x168] ss:$36 sps:$4 sm:$0xff]   ;;  %v4070_v9 = vld [vmem:[%s4378_s23 + $0x9c] ss:$36 sps:$4 sm:$0xff]  }
  0x23   : > { %3441 = vmatprep.subr.bf16.mxu0 %v4002_v14  ;;  %3955 = vmatprep.subr.bf16.mxu1 %v4002_v14  ;;  %v4076_v1 = vld [vmem:[%s5210_s1 + $0x118] sm:$0xff]   ;;  %v4084_v5 = vld [vmem:[%s5210_s1 + $0x150] sm:$0xff]   ;;  %v4092_v10 = vld [vmem:[%s5210_s1 + $0x1e8] sm:$0xff]  }
  0x24   : > { %v4085_v6 = vld [vmem:[%s5210_s1 + $0x110] sm:$0xff]   ;;  %v4093_v11 = vld [vmem:[%s5210_s1 + $0x1a8] sm:$0xff]   ;;  %v4073_v13 = vld [vmem:[%s4378_s23 + $0x98] ss:$36 sps:$4 sm:$0xff]  }
  0x25   : > { %v4067_v7 = vld [vmem:[%s4378_s23 + $0x50] ss:$36 sps:$4 sm:$0xff]   ;;  %v4078_v14 = vld [vmem:[%s4378_s23 + $0x1fc] ss:$36 sps:$4 sm:$0xff]  }
  0x26   : > { %3442 = vmatpush3.bf16.msra.mxu0 %v4003_v15  ;;  %3963 = vmatpush3.bf16.msra.mxu1 %v4003_v15  ;;  %v4068_v8 = vld [vmem:[%s4378_s23 + $0x1b4] ss:$36 sps:$4 sm:$0xff]   ;;  %v4100_v15 = vld [vmem:[%s5210_s1 + $0x148] sm:$0xff]  }
  0x27   : > { %3443 = vmatprep.subr.bf16.mxu0 %v4004_v16  ;;  %3956 = vmatprep.subr.bf16.mxu1 %v4004_v16  ;;  %v4072_v12 = vld [vmem:[%s4378_s23 + $0x1b0] ss:$36 sps:$4 sm:$0xff]   ;;  %v4101_v16 = vld [vmem:[%s5210_s1 + $0x108] sm:$0xff]  }
  0x2a   : > { %3444 = vmatpush3.bf16.msra.mxu0 %v4005_v17  ;;  %3964 = vmatpush3.bf16.msra.mxu1 %v4005_v17  ;;  %v4080_v17 = vld [vmem:[%s4378_s23 + $0xe4] ss:$36 sps:$4 sm:$0xff]  }
  0x2b   : > { %3541 = vmatprep.subr.bf16.mxu1 %v4012_v18  ;;  %3653 = vmatprep.subr.bf16.mxu0 %v4013_v21  ;;  %v4108_v18 = vld [vmem:[%s5210_s1 + $0x1e0] sm:$0xff]  }
  0x2c   : > { %v4110_v21 = vld [vmem:[%s5210_s1 + $0x140] sm:$0xff]  }
  0x2d   : > { %1828 = vmatmul.mubr.bf16.vlgmr.msra.gmra.mxu0 %v4006_v19  ;;  %1924 = vmatmul.mubr.bf16.vlgmr.msra.gmra.mxu1 %v4009_v20  ;;  %v4109_v19 = vld [vmem:[%s5210_s1 + $0x1a0] sm:$0xff]   ;;  %v4082_v20 = vld [vmem:[%s4378_s23 + $0x1f8] ss:$36 sps:$4 sm:$0xff]  }
  0x2e   : > { %3542 = vmatpush3.bf16.msra.mxu1 %v4014_v22  ;;  %3654 = vmatpush3.bf16.msra.mxu0 %v4015_v23  ;;  %v4111_v22 = vld [vmem:[%s5210_s1 + $0x100] sm:$0xff]  }
  0x2f   : > { %3543 = vmatprep.subr.bf16.mxu1 %v4016_v24  ;;  %1835 = vmatprep.mubr.bf16.mxu0 %v4018_v25  ;;  %v4083_v23 = vld [vmem:[%s4378_s23 + $0xe0] ss:$36 sps:$4 sm:$0xff]   ;;  %v4088_v25 = vld [vmem:[%s4378_s23 + $0x12c] ss:$36 sps:$4 sm:$0xff]  }
  0x30   : > { %1931 = vmatprep.mubr.bf16.mxu1 %v4020_v26  ;;  %3655 = vmatprep.subr.bf16.mxu0 %v4027_v27  ;;  %v4086_v24 = vld [vmem:[%s4378_s23 + $0x244] ss:$36 sps:$4 sm:$0xff]   ;;  %v4124_v26 = vld [vmem:[%s5210_s1 + $0x1d8] sm:$0xff]  }
  0x31   : > { %v4090_v27 = vld [vmem:[%s4378_s23 + $0x240] ss:$36 sps:$4 sm:$0xff]  }
  0x32   : > { %3544 = vmatpush3.bf16.msra.mxu1 %v4017_v28  ;;  %3656 = vmatpush3.bf16.msra.mxu0 %v4029_v29  ;;  %v4125_v28 = vld [vmem:[%s5210_s1 + $0x238] sm:$0xff]  }
  0x33   : > { %3545 = vmatprep.subr.bf16.mxu1 %v4024_v32  ;;  %3657 = vmatprep.subr.bf16.mxu0 %v4047_v41  ;;  %v4126_v29 = vld [vmem:[%s5210_s1 + $0x198] sm:$0xff]   ;;  %v4154_v41 = vld [vmem:[%s5210_s1 + $0x1c8] sm:$0xff]  }
  0x34   : > { %v4096_v32 = vld [vmem:[%s4378_s23 + $0x174] ss:$36 sps:$4 sm:$0xff]  }
  0x35   : > { %1836 = vmatmul.mubr.bf16.gmra.mxu0 %v4022_v30  ;;  %1932 = vmatmul.mubr.bf16.gmra.mxu1 %v4023_v31  ;;  %v4091_v30 = vld [vmem:[%s4378_s23 + $0x128] ss:$36 sps:$4 sm:$0xff]  }
  0x36   : > { %3546 = vmatpush3.bf16.msra.mxu1 %v4025_v33  ;;  %1843 = vmatprep.mubr.bf16.mxu0 %v4030_v35  ;;  %v4094_v31 = vld [vmem:[%s4378_s23 + $0x28c] ss:$36 sps:$4 sm:$0xff]  }
  0x37   : > { %3547 = vmatprep.subr.bf16.mxu1 %v4026_v34  ;;  %1939 = vmatprep.mubr.bf16.mxu1 %v4032_v36  ;;  %v4139_v33 = vld [vmem:[%s5210_s1 + $0x1d0] sm:$0xff]   ;;  %v4098_v34 = vld [vmem:[%s4378_s23 + $0x288] ss:$36 sps:$4 sm:$0xff]  }
  0x38   : > { %3658 = vmatpush3.bf16.msra.mxu0 %v4049_v44  ;;  %v4099_v35 = vld [vmem:[%s4378_s23 + $0x170] ss:$36 sps:$4 sm:$0xff]   ;;  %v4114_v44 = vld [vmem:[%s4378_s23 + $0x204] ss:$36 sps:$4 sm:$0xff]  }
  0x39   : > { %3659 = vmatprep.subr.bf16.mxu0 %v4060_v54  ;;  %v4141_v36 = vld [vmem:[%s5210_s1 + $0x190] sm:$0xff]   ;;  %v4129_v54 = vld [vmem:[%s4378_s23 + $0x5c] ss:$36 sps:$4 sm:$0xff]  }
  0x3a   : > { %3548 = vmatpush3.bf16.msra.mxu1 %v4028_v37  ;;  %v4102_v37 = vld [vmem:[%s4378_s23 + $0x2d4] ss:$36 sps:$4 sm:$0xff]  }
  0x3b   : > { %3549 = vmatprep.subr.bf16.mxu1 %v4036_v38  ;;  %v4104_v38 = vld [vmem:[%s4378_s23 + $0x1bc] ss:$36 sps:$4 sm:$0xff]  }
  0x3c   : > { %3660 = vmatpush3.bf16.msra.mxu0 %v4061_v55  ;;  %v4140_v55 = vld [vmem:[%s5210_s1 + $0x230] sm:$0xff]  }
  0x3d   : > { %1844 = vmatmul.mubr.bf16.gmra.mxu0 %v4034_v39  ;;  %1940 = vmatmul.mubr.bf16.gmra.mxu1 %v4035_v40  ;;  %v4106_v39 = vld [vmem:[%s4378_s23 + $0x2d0] ss:$36 sps:$4 sm:$0xff]   ;;  %v4107_v40 = vld [vmem:[%s4378_s23 + $0x1b8] ss:$36 sps:$4 sm:$0xff]  }
  0x3e   : > { %3550 = vmatpush3.bf16.msra.mxu1 %v4037_v42  ;;  %1851 = vmatprep.mubr.bf16.mxu0 %v4040_v45  ;;  %v4112_v42 = vld [vmem:[%s4378_s23 + $0x31c] ss:$36 sps:$4 sm:$0xff]  }
  0x3f   : > { %3551 = vmatprep.subr.bf16.mxu1 %v4038_v43  ;;  %1947 = vmatprep.mubr.bf16.mxu1 %v4042_v46  ;;  %v4156_v43 = vld [vmem:[%s5210_s1 + $0x188] sm:$0xff]   ;;  %v4116_v45 = vld [vmem:[%s4378_s23 + $0x318] ss:$36 sps:$4 sm:$0xff]   ;;  %v4117_v46 = vld [vmem:[%s4378_s23 + $0x200] ss:$36 sps:$4 sm:$0xff]  }
  0x40   : > { %3661 = vmatprep.subr.bf16.mxu0 %v4074_v63  ;;  %v4184_v63 = vld [vmem:[%s5210_s1 + $0x218] sm:$0xff]  }
  0x41   : > { %3662 = vmatpush3.bf16.msra.mxu0 %v4076_v1  ;;  %v4142_v1 = vld [vmem:[%s4378_s23 + $0x324] ss:$36 sps:$4 sm:$0xff]  }
  0x42   : > { %3552 = vmatpush3.bf16.msra.mxu1 %v4039_v47  ;;  %3663 = vmatprep.subr.bf16.mxu0 %v4084_v5  ;;  %v4169_v47 = vld [vmem:[%s5210_s1 + $0x1c0] sm:$0xff]   ;;  %v4210_v5 = vld [vmem:[%s5210_s1 + $0x208] sm:$0xff]  }
  0x43   : > { %3553 = vmatprep.subr.bf16.mxu1 %v4046_v50  ;;  %v4122_v50 = vld [vmem:[%s4378_s23 + $0x14] ss:$36 sps:$4 sm:$0xff]  }
  0x45   : > { %1852 = vmatmul.mubr.bf16.gmra.mxu0 %v4044_v48  ;;  %1948 = vmatmul.mubr.bf16.gmra.mxu1 %v4045_v49  ;;  %v4118_v48 = vld [vmem:[%s4378_s23 + $0x24c] ss:$36 sps:$4 sm:$0xff]   ;;  %v4171_v49 = vld [vmem:[%s5210_s1 + $0x180] sm:$0xff]  }
  0x46   : > { %3554 = vmatpush3.bf16.msra.mxu1 %v4048_v51  ;;  %1859 = vmatprep.mubr.bf16.mxu0 %v4052_v52  ;;  %v4120_v51 = vld [vmem:[%s4378_s23 + $0x10] ss:$36 sps:$4 sm:$0xff]   ;;  %v4123_v52 = vld [vmem:[%s4378_s23 + $0x248] ss:$36 sps:$4 sm:$0xff]  }
  0x47   : > { %3555 = vmatprep.subr.bf16.mxu1 %v4050_v53  ;;  %1988 = vmatprep.mubr.bf16.mxu1 %v4056_v56  ;;  %v4127_v53 = vld [vmem:[%s4378_s23 + $0x294] ss:$36 sps:$4 sm:$0xff]   ;;  %v4155_v56 = vld [vmem:[%s5210_s1 + $0x228] sm:$0xff]  }
  0x48   : > { %3664 = vmatpush3.bf16.msra.mxu0 %v4085_v6  ;;  %v4147_v6 = vld [vmem:[%s4378_s23 + $0xe8] ss:$36 sps:$4 sm:$0xff]  }
  0x49   : > { %3665 = vmatprep.subr.bf16.mxu0 %v4100_v15  ;;  %v4162_v15 = vld [vmem:[%s4378_s23 + $0x178] ss:$36 sps:$4 sm:$0xff]  }
  0x4a   : > { %3556 = vmatpush3.bf16.msra.mxu1 %v4051_v57  ;;  %v4131_v57 = vld [vmem:[%s4378_s23 + $0x290] ss:$36 sps:$4 sm:$0xff]  }
  0x4b   : > { %3765 = vmatprep.subr.bf16.mxu1 %v4058_v60  ;;  %v4135_v60 = vld [vmem:[%s4378_s23 + $0xa4] ss:$36 sps:$4 sm:$0xff]  }
  0x4c   : > { %3666 = vmatpush3.bf16.msra.mxu0 %v4101_v16  ;;  %v4163_v16 = vld [vmem:[%s4378_s23 + $0x3fc] ss:$36 sps:$4 sm:$0xff]  }
  0x4d   : > { %1860 = vmatmul.mubr.bf16.gmra.mxu0 %v4057_v59  ;;  %1989 = vmatmul.mubr.bf16.vlgmr.msra.gmra.mxu1 %v4054_v58  ;;  %v4132_v58 = vld [vmem:[%s4378_s23 + $0x58] ss:$36 sps:$4 sm:$0xff]  }
  0x4e   : > { %3766 = vmatpush3.bf16.msra.mxu1 %v4059_v61  ;;  %1867 = vmatprep.mubr.bf16.mxu0 %v4062_v62  ;;  %v4133_v59 = vld [vmem:[%s4378_s23 + $0x2dc] ss:$36 sps:$4 sm:$0xff]  }
  0x4f   : > { %1996 = vmatprep.mubr.bf16.mxu1 %v4064_v0  ;;  %3767 = vmatprep.subr.bf16.mxu1 %v4075_v2  ;;  %v4170_v61 = vld [vmem:[%s5210_s1 + $0x220] sm:$0xff]   ;;  %v4137_v62 = vld [vmem:[%s4378_s23 + $0x2d8] ss:$36 sps:$4 sm:$0xff]   ;;  %v4144_v2 = vld [vmem:[%s4378_s23 + $0xec] ss:$36 sps:$4 sm:$0xff]  }
  0x50   : > { %3667 = vmatprep.subr.bf16.mxu0 %v4110_v21  ;;  %v4138_v0 = vld [vmem:[%s4378_s23 + $0xa0] ss:$36 sps:$4 sm:$0xff]   ;;  %v4174_v21 = vld [vmem:[%s4378_s23 + $0x20c] ss:$36 sps:$4 sm:$0xff]  }
  0x51   : > { %3668 = vmatpush3.bf16.msra.mxu0 %v4111_v22  ;;  %v4176_v22 = vld [vmem:[%s4378_s23 + $0x440] ss:$36 sps:$4 sm:$0xff]  }
  0x52   : > { %3768 = vmatpush3.bf16.msra.mxu1 %v4077_v3  ;;  %3901 = vmatprep.subr.bf16.mxu0 %v4125_v28  ;;  %v4197_v3 = vld [vmem:[%s5210_s1 + $0x210] sm:$0xff]  }
  0x53   : > { %3769 = vmatprep.subr.bf16.mxu1 %v4092_v10  ;;  %v4152_v10 = vld [vmem:[%s4378_s23 + $0x368] ss:$36 sps:$4 sm:$0xff]  }
  0x55   : > { %1868 = vmatmul.mubr.bf16.gmra.mxu0 %v4066_v4  ;;  %1997 = vmatmul.mubr.bf16.gmra.mxu1 %v4067_v7  ;;  %v4146_v4 = vld [vmem:[%s4378_s23 + $0x320] ss:$36 sps:$4 sm:$0xff]   ;;  %v4148_v7 = vld [vmem:[%s4378_s23 + $0x36c] ss:$36 sps:$4 sm:$0xff]  }
  0x56   : > { %1875 = vmatprep.mubr.bf16.mxu0 %v4068_v8  ;;  %2004 = vmatprep.mubr.bf16.mxu1 %v4070_v9  ;;  %v4150_v8 = vld [vmem:[%s4378_s23 + $0x134] ss:$36 sps:$4 sm:$0xff]   ;;  %v4223_v9 = vld [vmem:[%s5210_s1 + $0x200] sm:$0xff]  }
  0x57   : > { %3770 = vmatpush3.bf16.msra.mxu1 %v4093_v11  ;;  %v4153_v11 = vld [vmem:[%s4378_s23 + $0x130] ss:$36 sps:$4 sm:$0xff]  }
  0x58   : > { %3771 = vmatprep.subr.bf16.mxu1 %v4108_v18  ;;  %v4167_v18 = vld [vmem:[%s4378_s23 + $0x3f8] ss:$36 sps:$4 sm:$0xff]  }
  0x5b   : > { %3772 = vmatpush3.bf16.msra.mxu1 %v4109_v19  ;;  %v4168_v19 = vld [vmem:[%s4378_s23 + $0x1c0] ss:$36 sps:$4 sm:$0xff]  }
  0x5c   : > { %3773 = vmatprep.subr.bf16.mxu1 %v4124_v26  ;;  %v4180_v26 = vld [vmem:[%s4378_s23 + $0x18] ss:$36 sps:$4 sm:$0xff]  }
  0x5d   : > { %1876 = vmatmul.mubr.bf16.gmra.mxu0 %v4072_v12  ;;  %2005 = vmatmul.mubr.bf16.gmra.mxu1 %v4073_v13  ;;  %v4157_v12 = vld [vmem:[%s4378_s23 + $0x3b4] ss:$36 sps:$4 sm:$0xff]   ;;  %v4159_v13 = vld [vmem:[%s4378_s23 + $0x17c] ss:$36 sps:$4 sm:$0xff]  }
  0x5e   : > { %1883 = vmatprep.mubr.bf16.mxu0 %v4078_v14  ;;  %2012 = vmatprep.mubr.bf16.mxu1 %v4080_v17  ;;  %v4161_v14 = vld [vmem:[%s4378_s23 + $0x3b0] ss:$36 sps:$4 sm:$0xff]   ;;  %v4165_v17 = vld [vmem:[%s4378_s23 + $0x1c4] ss:$36 sps:$4 sm:$0xff]  }
  0x5f   : > { %3774 = vmatpush3.bf16.msra.mxu1 %v4126_v29  ;;  %v4187_v29 = vld [vmem:[%s4378_s23 + $0x64] ss:$36 sps:$4 sm:$0xff]  }
  0x60   : > { %3775 = vmatprep.subr.bf16.mxu1 %v4139_v33  ;;  %v4193_v33 = vld [vmem:[%s4378_s23 + $0xac] ss:$36 sps:$4 sm:$0xff]  }
  0x63   : > { %3776 = vmatpush3.bf16.msra.mxu1 %v4141_v36  ;;  %v4198_v36 = vld [vmem:[%s4378_s23 + $0x32c] ss:$36 sps:$4 sm:$0xff]  }
  0x64   : > { %3777 = vmatprep.subr.bf16.mxu1 %v4154_v41  ;;  %v4206_v41 = vld [vmem:[%s4378_s23 + $0x13c] ss:$36 sps:$4 sm:$0xff]  }
  0x65   : > { %1884 = vmatmul.mubr.bf16.gmra.mxu0 %v4082_v20  ;;  %2013 = vmatmul.mubr.bf16.gmra.mxu1 %v4083_v23  ;;  %v4172_v20 = vld [vmem:[%s4378_s23 + $0x444] ss:$36 sps:$4 sm:$0xff]  }
  0x66   : > { %1891 = vmatprep.mubr.bf16.mxu0 %v4086_v24  ;;  %2020 = vmatprep.mubr.bf16.mxu1 %v4088_v25  ;;  %v4177_v23 = vld [vmem:[%s4378_s23 + $0x208] ss:$36 sps:$4 sm:$0xff]   ;;  %v4178_v24 = vld [vmem:[%s4378_s23 + $0x254] ss:$36 sps:$4 sm:$0xff]   ;;  %v4182_v25 = vld [vmem:[%s4378_s23 + $0x1c] ss:$36 sps:$4 sm:$0xff]  }
  0x67   : > { %3778 = vmatpush3.bf16.msra.mxu1 %v4156_v43  ;;  %v4209_v43 = vld [vmem:[%s4378_s23 + $0x138] ss:$36 sps:$4 sm:$0xff]  }
  0x68   : > { %3779 = vmatprep.subr.bf16.mxu1 %v4169_v47 }
  0x6b   : > { %3780 = vmatpush3.bf16.msra.mxu1 %v4171_v49 }
  0x6d   : > { %1892 = vmatmul.mubr.bf16.gmra.mxu0 %v4090_v27  ;;  %2021 = vmatmul.mubr.bf16.gmra.mxu1 %v4091_v30  ;;  %v4183_v27 = vld [vmem:[%s4378_s23 + $0x250] ss:$36 sps:$4 sm:$0xff]   ;;  %v4189_v30 = vld [vmem:[%s4378_s23 + $0x298] ss:$36 sps:$4 sm:$0xff]  }
  0x6e   : > { %1899 = vmatprep.mubr.bf16.mxu0 %v4094_v31  ;;  %2028 = vmatprep.mubr.bf16.mxu1 %v4096_v32  ;;  %v4190_v31 = vld [vmem:[%s4378_s23 + $0x60] ss:$36 sps:$4 sm:$0xff]  }
  0x6f   : > { %v4191_v32 = vld [vmem:[%s4378_s23 + $0x2e4] ss:$36 sps:$4 sm:$0xff]  }
  0x75   : > { %1900 = vmatmul.mubr.bf16.gmra.mxu0 %v4098_v34  ;;  %2029 = vmatmul.mubr.bf16.gmra.mxu1 %v4099_v35  ;;  %v4195_v34 = vld [vmem:[%s4378_s23 + $0x2e0] ss:$36 sps:$4 sm:$0xff]   ;;  %v4196_v35 = vld [vmem:[%s4378_s23 + $0xa8] ss:$36 sps:$4 sm:$0xff]  }
  0x76   : > { %1907 = vmatprep.mubr.bf16.mxu0 %v4102_v37  ;;  %2036 = vmatprep.mubr.bf16.mxu1 %v4104_v38  ;;  %v4200_v37 = vld [vmem:[%s4378_s23 + $0xf4] ss:$36 sps:$4 sm:$0xff]   ;;  %v4202_v38 = vld [vmem:[%s4378_s23 + $0x328] ss:$36 sps:$4 sm:$0xff]  }
  0x7d   : > { %1908 = vmatmul.mubr.bf16.gmra.mxu0 %v4106_v39  ;;  %2037 = vmatmul.mubr.bf16.gmra.mxu1 %v4107_v40  ;;  %v4203_v39 = vld [vmem:[%s4378_s23 + $0xf0] ss:$36 sps:$4 sm:$0xff]  }
  0x7e   : > { %1915 = vmatprep.mubr.bf16.mxu0 %v4112_v42  ;;  %2044 = vmatprep.mubr.bf16.mxu1 %v4114_v44  ;;  %v4204_v40 = vld [vmem:[%s4378_s23 + $0x374] ss:$36 sps:$4 sm:$0xff]   ;;  %v4211_v44 = vld [vmem:[%s4378_s23 + $0x3bc] ss:$36 sps:$4 sm:$0xff]  }
  0x7f   : > { %v4208_v42 = vld [vmem:[%s4378_s23 + $0x370] ss:$36 sps:$4 sm:$0xff]  }
  0x85   : > { %1916 = vmatmul.mubr.bf16.gmra.mxu0 %v4116_v45  ;;  %2045 = vmatmul.mubr.bf16.gmra.mxu1 %v4117_v46  ;;  %v4213_v45 = vld [vmem:[%s4378_s23 + $0x184] ss:$36 sps:$4 sm:$0xff]  }
  0x86   : > { %2052 = vmatprep.mubr.bf16.mxu1 %v4118_v48  ;;  %2149 = vmatprep.mubr.bf16.mxu0 %v4122_v50 }
  0x8d   : > { %2053 = vmatmul.mubr.bf16.gmra.mxu1 %v4123_v52  ;;  %2150 = vmatmul.mubr.bf16.vlgmr.msra.gmra.mxu0 %v4120_v51 }
  0x8e   : > { %3902 = vmatpush3.bf16.msra.mxu0 %v4125_v28  ;;  %2060 = vmatprep.mubr.bf16.mxu1 %v4127_v53  ;;  %v4185_v28 = vld [vmem:[%s4378_s23 + $0x29c] ss:$36 sps:$4 sm:$0xff]  }
  0x8f   : > { %2157 = vmatprep.mubr.bf16.mxu0 %v4129_v54  ;;  %3903 = vmatprep.subr.bf16.mxu0 %v4140_v55  ;;  %v4215_v54 = vld [vmem:[%s4378_s23 + $0x3b8] ss:$36 sps:$4 sm:$0xff]  }
  0x92   : > { %3904 = vmatpush3.bf16.msra.mxu0 %v4140_v55  ;;  %v4216_v55 = vld [vmem:[%s4378_s23 + $0x180] ss:$36 sps:$4 sm:$0xff]  }
  0x93   : > { %3905 = vmatprep.subr.bf16.mxu0 %v4155_v56 }
  0x95   : > { %2061 = vmatmul.mubr.bf16.gmra.mxu1 %v4131_v57  ;;  %2158 = vmatmul.mubr.bf16.gmra.mxu0 %v4132_v58  ;;  %v4219_v57 = vld [vmem:[%s4378_s23 + $0x1cc] ss:$36 sps:$4 sm:$0xff]  }
  0x96   : > { %2068 = vmatprep.mubr.bf16.mxu1 %v4133_v59  ;;  %2165 = vmatprep.mubr.bf16.mxu0 %v4135_v60 }
  0x97   : > { %3906 = vmatpush3.bf16.msra.mxu0 %v4155_v56  ;;  %v4217_v56 = vld [vmem:[%s4378_s23 + $0x404] ss:$36 sps:$4 sm:$0xff]  }
  0x98   : > { %3907 = vmatprep.subr.bf16.mxu0 %v4170_v61 }
  0x9b   : > { %3908 = vmatpush3.bf16.msra.mxu0 %v4170_v61 }
  0x9c   : > { %3909 = vmatprep.subr.bf16.mxu0 %v4184_v63 }
  0x9d   : > { %2069 = vmatmul.mubr.bf16.gmra.mxu1 %v4137_v62  ;;  %2166 = vmatmul.mubr.bf16.gmra.mxu0 %v4138_v0 }
  0x9e   : > { %2076 = vmatprep.mubr.bf16.mxu1 %v4142_v1  ;;  %2173 = vmatprep.mubr.bf16.mxu0 %v4144_v2 }
  0x9f   : > { %3910 = vmatpush3.bf16.msra.mxu0 %v4184_v63 }
  0xa0   : > { %3911 = vmatprep.subr.bf16.mxu0 %v4197_v3 }
  0xa3   : > { %3912 = vmatpush3.bf16.msra.mxu0 %v4197_v3 }
  0xa4   : > { %3913 = vmatprep.subr.bf16.mxu0 %v4210_v5 }
  0xa5   : > { %2077 = vmatmul.mubr.bf16.gmra.mxu1 %v4146_v4  ;;  %2174 = vmatmul.mubr.bf16.gmra.mxu0 %v4147_v6  ;;  %v4221_v6 = vld [vmem:[%s4378_s23 + $0x400] ss:$36 sps:$4 sm:$0xff]  }
  0xa6   : > { %2084 = vmatprep.mubr.bf16.mxu1 %v4148_v7  ;;  %2181 = vmatprep.mubr.bf16.mxu0 %v4150_v8  ;;  %v4222_v7 = vld [vmem:[%s4378_s23 + $0x1c8] ss:$36 sps:$4 sm:$0xff]  }
  0xa7   : > { %3914 = vmatpush3.bf16.msra.mxu0 %v4210_v5  ;;  %v4224_v8 = vld [vmem:[%s4378_s23 + $0x44c] ss:$36 sps:$4 sm:$0xff]  }
  0xa8   : > { %3915 = vmatprep.subr.bf16.mxu0 %v4223_v9 }
  0xab   : > { %3916 = vmatpush3.bf16.msra.mxu0 %v4223_v9  ;;  %v4226_v9 = vld [vmem:[%s4378_s23 + $0x214] ss:$36 sps:$4 sm:$0xff]  }
  0xad   : > { %2085 = vmatmul.mubr.bf16.gmra.mxu1 %v4152_v10  ;;  %2182 = vmatmul.mubr.bf16.gmra.mxu0 %v4153_v11 }
  0xae   : > { %2092 = vmatprep.mubr.bf16.mxu1 %v4157_v12  ;;  %2189 = vmatprep.mubr.bf16.mxu0 %v4159_v13 }
  0xb5   : > { %2093 = vmatmul.mubr.bf16.gmra.mxu1 %v4161_v14  ;;  %2190 = vmatmul.mubr.bf16.gmra.mxu0 %v4162_v15 }
  0xb6   : > { %2100 = vmatprep.mubr.bf16.mxu1 %v4163_v16  ;;  %2197 = vmatprep.mubr.bf16.mxu0 %v4165_v17 }
  0xbd   : > { %2101 = vmatmul.mubr.bf16.gmra.mxu1 %v4167_v18  ;;  %2198 = vmatmul.mubr.bf16.gmra.mxu0 %v4168_v19 }
  0xbe   : > { %2108 = vmatprep.mubr.bf16.mxu1 %v4172_v20  ;;  %2205 = vmatprep.mubr.bf16.mxu0 %v4174_v21 }
  0xc5   : > { %2109 = vmatmul.mubr.bf16.gmra.mxu1 %v4176_v22  ;;  %2206 = vmatmul.mubr.bf16.gmra.mxu0 %v4177_v23  ;;  %v4228_v22 = vld [vmem:[%s4378_s23 + $0x448] ss:$36 sps:$4 sm:$0xff]   ;;  %v4229_v23 = vld [vmem:[%s4378_s23 + $0x210] ss:$36 sps:$4 sm:$0xff]  }
  0xc6   : > { %2213 = vmatprep.mubr.bf16.mxu0 %v4178_v24  ;;  %2310 = vmatprep.mubr.bf16.mxu1 %v4182_v25  ;;  %v4232_v24 = vld [vmem:[%s4378_s23 + $0x25c] ss:$36 sps:$4 sm:$0xff]  }
  0xc7   : > { %v4233_v25 = vld [vmem:[%s4378_s23 + $0x20] ss:$36 sps:$4 sm:$0xff]  }
  0xcd   : > { %2214 = vmatmul.mubr.bf16.gmra.mxu0 %v4183_v27  ;;  %2311 = vmatmul.mubr.bf16.vlgmr.msra.gmra.mxu1 %v4180_v26 }
  0xce   : > { %2221 = vmatprep.mubr.bf16.mxu0 %v4185_v28  ;;  %2318 = vmatprep.mubr.bf16.mxu1 %v4187_v29 }
  0xd5   : > { %2222 = vmatmul.mubr.bf16.gmra.mxu0 %v4189_v30  ;;  %2319 = vmatmul.mubr.bf16.gmra.mxu1 %v4190_v31 }
  0xd6   : > { %2229 = vmatprep.mubr.bf16.mxu0 %v4191_v32  ;;  %2326 = vmatprep.mubr.bf16.mxu1 %v4193_v33 }
  0xdd   : > { %2230 = vmatmul.mubr.bf16.gmra.mxu0 %v4195_v34  ;;  %2327 = vmatmul.mubr.bf16.gmra.mxu1 %v4196_v35 }
  0xde   : > { %2237 = vmatprep.mubr.bf16.mxu0 %v4198_v36  ;;  %2334 = vmatprep.mubr.bf16.mxu1 %v4200_v37 }
  0xe5   : > { %2238 = vmatmul.mubr.bf16.gmra.mxu0 %v4202_v38  ;;  %2335 = vmatmul.mubr.bf16.gmra.mxu1 %v4203_v39  ;;  %v4230_v38 = vld [vmem:[%s4378_s23 + $0x258] ss:$36 sps:$4 sm:$0xff]   ;;  %v4234_v39 = vld [vmem:[%s4378_s23 + $0x68] ss:$36 sps:$4 sm:$0xff]  }
  0xe6   : > { %2245 = vmatprep.mubr.bf16.mxu0 %v4204_v40  ;;  %2342 = vmatprep.mubr.bf16.mxu1 %v4206_v41  ;;  %v4237_v40 = vld [vmem:[%s4378_s23 + $0x2a4] ss:$36 sps:$4 sm:$0xff]   ;;  %v4238_v41 = vld [vmem:[%s4378_s23 + $0xb0] ss:$36 sps:$4 sm:$0xff]  }
  0xed   : > { %v3445_v46 = vpop.f32.mrf.mxu0  ;;  %v3517_v47 = vpop.f32.mrf.mxu1  ;;  %2246 = vmatmul.mubr.bf16.gmra.mxu0 %v4208_v42  ;;  %2343 = vmatmul.mubr.bf16.gmra.mxu1 %v4209_v43 }
  0xee   : > { %2253 = vmatprep.mubr.bf16.mxu0 %v4211_v44  ;;  %2350 = vmatprep.mubr.bf16.mxu1 %v4213_v45 }
  0xef   : > { %v3446_v48 = vpop.f32.mrf.mxu0  ;;  %v3518_v49 = vpop.f32.mrf.mxu1 }
  0xf0   : > { %v4671_v50 = vadd.f32 %v3446_v48, %v3445_v46  ;;  %v4673_v51 = vadd.f32 %v3518_v49, %v3517_v47  ;;  %v4722_v46 = vld [vmem:[%s5211_s2] ss:$0 sm:$0xff] }
  0xf1   : > { %v3448_v52 = vpop.f32.mrf.mxu0  ;;  %v3520_v53 = vpop.f32.mrf.mxu1 }
  0xf3   : > { %v3449_v58 = vpop.f32.mrf.mxu0  ;;  %v3521_v59 = vpop.f32.mrf.mxu1 }
  0xf4   : > { %v4679_v60 = vadd.f32 %v3449_v58, %v3448_v52  ;;  %v4681_v61 = vadd.f32 %v3521_v59, %v3520_v53  ;;  %v1830_v53 = vadd.f32 %v4671_v50, %v4722_v46  ;;  %v4235_v58 = vld [vmem:[%s4378_s23 + $0x2a0] ss:$36 sps:$4 sm:$0xff]   ;;  %v4239_v59 = vld [vmem:[%s4378_s23 + $0xf8] ss:$36 sps:$4 sm:$0xff]  }
  0xf5   : > { %v3451_v62 = vpop.f32.mrf.mxu0  ;;  %v3523_v63 = vpop.f32.mrf.mxu1  ;;  %2254 = vmatmul.mubr.bf16.gmra.mxu0 %v4215_v54  ;;  %2351 = vmatmul.mubr.bf16.gmra.mxu1 %v4216_v55 }
  0xf6   : > { %2261 = vmatprep.mubr.bf16.mxu0 %v4217_v56  ;;  %2358 = vmatprep.mubr.bf16.mxu1 %v4219_v57 }
  0xf7   : > { %v3452_v0 = vpop.f32.mrf.mxu0  ;;  %v3524_v1 = vpop.f32.mrf.mxu1 }
  0xf8   : > { %v4683_v2 = vadd.f32 %v3452_v0, %v3451_v62  ;;  %v4685_v3 = vadd.f32 %v3524_v1, %v3523_v63  ;;  %v4242_v63 = vld [vmem:[%s4378_s23 + $0x2ec] ss:$36 sps:$4 sm:$0xff]   ;;  %v4243_v0 = vld [vmem:[%s4378_s23 + $0x140] ss:$36 sps:$4 sm:$0xff]  }
  0xf9   : > { %v3454_v4 = vpop.f32.mrf.mxu0  ;;  %v3526_v5 = vpop.f32.mrf.mxu1 }
  0xfb   : > { %v3455_v10 = vpop.f32.mrf.mxu0  ;;  %v3527_v11 = vpop.f32.mrf.mxu1 }
  0xfc   : > { %v4691_v12 = vadd.f32 %v3455_v10, %v3454_v4  ;;  %v4693_v13 = vadd.f32 %v3527_v11, %v3526_v5  ;;  %v1833_v5 = vadd.f32 %v4679_v60, %v4722_v46  ;;  %v1838_v60 = vadd.f32 %v4683_v2, %v4722_v46 }
  0xfd   : > { %v3457_v14 = vpop.f32.mrf.mxu0  ;;  %v3529_v15 = vpop.f32.mrf.mxu1  ;;  %2262 = vmatmul.mubr.bf16.gmra.mxu0 %v4221_v6  ;;  %2359 = vmatmul.mubr.bf16.gmra.mxu1 %v4222_v7 }
  0xfe   : > { %2269 = vmatprep.mubr.bf16.mxu0 %v4224_v8  ;;  %2366 = vmatprep.mubr.bf16.mxu1 %v4226_v9 }
  0xff   : > { %v3458_v16 = vpop.f32.mrf.mxu0  ;;  %v3530_v17 = vpop.f32.mrf.mxu1 }
 0x100   : > { %v4695_v18 = vadd.f32 %v3458_v16, %v3457_v14  ;;  %v4697_v19 = vadd.f32 %v3530_v17, %v3529_v15 }
 0x101   : > { %v3460_v20 = vpop.f32.mrf.mxu0  ;;  %v3532_v21 = vpop.f32.mrf.mxu1 }
 0x103   : > { %v3461_v26 = vpop.f32.mrf.mxu0  ;;  %v3533_v27 = vpop.f32.mrf.mxu1 }
 0x104   : > { %v4703_v28 = vadd.f32 %v3461_v26, %v3460_v20  ;;  %v4705_v29 = vadd.f32 %v3533_v27, %v3532_v21  ;;  %v4240_v20 = vld [vmem:[%s4378_s23 + $0x2e8] ss:$36 sps:$4 sm:$0xff]   ;;  %v1841_v27 = vadd.f32 %v4691_v12, %v4722_v46  ;;  %v1846_v12 = vadd.f32 %v4695_v18, %v4722_v46 }
 0x105   : > { %v3463_v30 = vpop.f32.mrf.mxu0  ;;  %v3535_v31 = vpop.f32.mrf.mxu1  ;;  %2270 = vmatmul.mubr.bf16.gmra.mxu0 %v4228_v22  ;;  %2367 = vmatmul.mubr.bf16.gmra.mxu1 %v4229_v23  ;;  %v4244_v21 = vld [vmem:[%s4378_s23 + $0x188] ss:$36 sps:$4 sm:$0xff]   ;;  %v4247_v23 = vld [vmem:[%s4378_s23 + $0x334] ss:$36 sps:$4 sm:$0xff]  }
 0x106   : > { %2374 = vmatprep.mubr.bf16.mxu1 %v4232_v24  ;;  %3917 = vmatprep.mubr.bf16.mxu0 %v4233_v25  ;;  %v4248_v24 = vld [vmem:[%s4378_s23 + $0x1d0] ss:$36 sps:$4 sm:$0xff]  }
 0x107   : > { %v3464_v32 = vpop.f32.mrf.mxu0  ;;  %v3536_v33 = vpop.f32.mrf.mxu1 }
 0x108   : > { %v4707_v34 = vadd.f32 %v3464_v32, %v3463_v30  ;;  %v4709_v35 = vadd.f32 %v3536_v33, %v3535_v31 }
 0x109   : > { %v3466_v36 = vpop.f32.mrf.mxu0  ;;  %v3538_v37 = vpop.f32.mrf.mxu1 }
 0x10b   : > { %v3467_v42 = vpop.f32.mrf.mxu0  ;;  %v3539_v43 = vpop.f32.mrf.mxu1 }
 0x10c   : > { %v4715_v44 = vadd.f32 %v3467_v42, %v3466_v36  ;;  %v4717_v45 = vadd.f32 %v3539_v43, %v3538_v37  ;;  %v4245_v42 = vld [vmem:[%s4378_s23 + $0x330] ss:$36 sps:$4 sm:$0xff]   ;;  %v4249_v43 = vld [vmem:[%s4378_s23 + $0x218] ss:$36 sps:$4 sm:$0xff]  }
 0x10d   : > { %v3469_v47 = vpop.f32.mrf.mxu0  ;;  %v3557_v48 = vpop.f32.mrf.mxu1  ;;  %2375 = vmatmul.mubr.bf16.gmra.mxu1 %v4230_v38  ;;  %3918 = vmatmul.mubr.bf16.vlgmr.msra.gmra.mxu0 %v4234_v39 }
 0x10e   : > { %2382 = vmatprep.mubr.bf16.mxu1 %v4237_v40  ;;  %3921 = vmatprep.mubr.bf16.mxu0 %v4238_v41 }
 0x10f   : > { %v3470_v49 = vpop.f32.mrf.mxu0  ;;  %v3558_v52 = vpop.f32.mrf.mxu1 }
 0x110   : > { %v4726_v54 = vadd.f32 %v3470_v49, %v3469_v47  ;;  %v3559_v55 = vadd.f32 %v3558_v52, %v3557_v48  ;;  %v4252_v48 = vld [vmem:[%s4378_s23 + $0x37c] ss:$36 sps:$4 sm:$0xff]  }
 0x111   : > { %v3472_v56 = vpop.f32.mrf.mxu0  ;;  %v3560_v57 = vpop.f32.mrf.mxu1  ;;  %v4253_v49 = vld [vmem:[%s4378_s23 + $0x260] ss:$36 sps:$4 sm:$0xff]  }
 0x112   : > { %v4730_v62 = vadd.f32 %v3559_v55, %v1830_v53  ;;  %v1849_v55 = vadd.f32 %v4703_v28, %v4722_v46  ;;  %v1854_v28 = vadd.f32 %v4707_v34, %v4722_v46 }
 0x113   : > { %v3473_v1 = vpop.f32.mrf.mxu0  ;;  %v3561_v4 = vpop.f32.mrf.mxu1 }
 0x114   : > { %v4736_v6 = vadd.f32 %v3473_v1, %v3472_v56  ;;  %v3562_v50 = vadd.f32 %v3561_v4, %v3560_v57 }
 0x115   : > { %v3475_v7 = vpop.f32.mrf.mxu0  ;;  %v3563_v8 = vpop.f32.mrf.mxu1  ;;  %2383 = vmatmul.mubr.bf16.gmra.mxu1 %v4235_v58  ;;  %3922 = vmatmul.mubr.bf16.gmra.mxu0 %v4239_v59 }
 0x116   : > { %v4738_v9 = vadd.f32 %v3562_v50, %v1833_v5  ;;  %2390 = vmatprep.mubr.bf16.mxu1 %v4242_v63  ;;  %3925 = vmatprep.mubr.bf16.mxu0 %v4243_v0 }
 0x117   : > { %v3476_v10 = vpop.f32.mrf.mxu0  ;;  %v3564_v11 = vpop.f32.mrf.mxu1 }
 0x118   : > { %v4742_v14 = vadd.f32 %v3476_v10, %v3475_v7  ;;  %v3565_v15 = vadd.f32 %v3564_v11, %v3563_v8  ;;  %v4250_v7 = vld [vmem:[%s4378_s23 + $0x378] ss:$36 sps:$4 sm:$0xff]   ;;  %v4254_v8 = vld [vmem:[%s4378_s23 + $0x2a8] ss:$36 sps:$4 sm:$0xff]  }
 0x119   : > { %v3478_v16 = vpop.f32.mrf.mxu0  ;;  %v3566_v17 = vpop.f32.mrf.mxu1  ;;  %v4257_v11 = vld [vmem:[%s4378_s23 + $0x3c4] ss:$36 sps:$4 sm:$0xff]  }
 0x11a   : > { %v4746_v22 = vadd.f32 %v3565_v15, %v1838_v60  ;;  %v4258_v60 = vld [vmem:[%s4378_s23 + $0x2f0] ss:$36 sps:$4 sm:$0xff]  }
 0x11b   : > { %v3479_v25 = vpop.f32.mrf.mxu0  ;;  %v3567_v26 = vpop.f32.mrf.mxu1 }
 0x11c   : > { %v4752_v30 = vadd.f32 %v3479_v25, %v3478_v16  ;;  %v3568_v2 = vadd.f32 %v3567_v26, %v3566_v17  ;;  %v1857_v17 = vadd.f32 %v4715_v44, %v4722_v46  ;;  %v1862_v44 = vadd.f32 %v4726_v54, %v4722_v46 }
 0x11d   : > { %v3481_v31 = vpop.f32.mrf.mxu0  ;;  %v3569_v32 = vpop.f32.mrf.mxu1  ;;  %2391 = vmatmul.mubr.bf16.gmra.mxu1 %v4240_v20  ;;  %3926 = vmatmul.mubr.bf16.gmra.mxu0 %v4244_v21 }
 0x11e   : > { %v4754_v33 = vadd.f32 %v3568_v2, %v1841_v27  ;;  %2398 = vmatprep.mubr.bf16.mxu1 %v4247_v23  ;;  %3929 = vmatprep.mubr.bf16.mxu0 %v4248_v24 }
 0x11f   : > { %v3482_v36 = vpop.f32.mrf.mxu0  ;;  %v3570_v37 = vpop.f32.mrf.mxu1 }
 0x120   : > { %v4758_v38 = vadd.f32 %v3482_v36, %v3481_v31  ;;  %v3571_v39 = vadd.f32 %v3570_v37, %v3569_v32  ;;  %v4255_v36 = vld [vmem:[%s4378_s23 + $0x3c0] ss:$36 sps:$4 sm:$0xff]   ;;  %v4259_v37 = vld [vmem:[%s4378_s23 + $0x338] ss:$36 sps:$4 sm:$0xff]  }
 0x121   : > { %v3484_v40 = vpop.f32.mrf.mxu0  ;;  %v3572_v41 = vpop.f32.mrf.mxu1 }
 0x122   : > { %v4762_v47 = vadd.f32 %v3571_v39, %v1846_v12  ;;  %v4262_v39 = vld [vmem:[%s4378_s23 + $0x40c] ss:$36 sps:$4 sm:$0xff]  }
 0x123   : > { %v3485_v52 = vpop.f32.mrf.mxu0  ;;  %v3573_v53 = vpop.f32.mrf.mxu1 }
 0x124   : > { %v4768_v56 = vadd.f32 %v3485_v52, %v3484_v40  ;;  %v3574_v18 = vadd.f32 %v3573_v53, %v3572_v41  ;;  %v4263_v40 = vld [vmem:[%s4378_s23 + $0x380] ss:$36 sps:$4 sm:$0xff]  }
 0x125   : > { %v3487_v57 = vpop.f32.mrf.mxu0  ;;  %v3575_v58 = vpop.f32.mrf.mxu1  ;;  %2399 = vmatmul.mubr.bf16.gmra.mxu1 %v4245_v42  ;;  %3930 = vmatmul.mubr.bf16.gmra.mxu0 %v4249_v43  ;;  %v1865_v43 = vadd.f32 %v4736_v6, %v4722_v46  ;;  %v1870_v6 = vadd.f32 %v4742_v14, %v4722_v46 }
 0x126   : > { %v4770_v59 = vadd.f32 %v3574_v18, %v1849_v55  ;;  %2406 = vmatprep.mubr.bf16.mxu1 %v4252_v48  ;;  %3933 = vmatprep.mubr.bf16.mxu0 %v4253_v49 }
 0x127   : > { %v3488_v63 = vpop.f32.mrf.mxu0  ;;  %v3576_v0 = vpop.f32.mrf.mxu1 }
 0x128   : > { %v4774_v1 = vadd.f32 %v3488_v63, %v3487_v57  ;;  %v3577_v4 = vadd.f32 %v3576_v0, %v3575_v58 }
 0x129   : > { %v3490_v5 = vpop.f32.mrf.mxu0  ;;  %v3578_v50 = vpop.f32.mrf.mxu1 }
 0x12a   : > { %v4778_v10 = vadd.f32 %v3577_v4, %v1854_v28  ;;  %v4260_v28 = vld [vmem:[%s4378_s23 + $0x408] ss:$36 sps:$4 sm:$0xff]  }
 0x12b   : > { %v3491_v15 = vpop.f32.mrf.mxu0  ;;  %v3579_v16 = vpop.f32.mrf.mxu1  ;;  %v4264_v4 = vld [vmem:[%s4378_s23 + $0x3c8] ss:$36 sps:$4 sm:$0xff]  }
 0x12c   : > { %v4784_v20 = vadd.f32 %v3491_v15, %v3490_v5  ;;  %v3580_v34 = vadd.f32 %v3579_v16, %v3578_v50  ;;  %v4267_v50 = vld [vmem:[%s4378_s23 + $0x454] ss:$36 sps:$4 sm:$0xff]  }
 0x12d   : > { %v3493_v21 = vpop.f32.mrf.mxu0  ;;  %v3581_v23 = vpop.f32.mrf.mxu1  ;;  %2407 = vmatmul.mubr.bf16.gmra.mxu1 %v4250_v7  ;;  %3934 = vmatmul.mubr.bf16.gmra.mxu0 %v4254_v8  ;;  %v4268_v7 = vld [vmem:[%s4378_s23 + $0x410] ss:$36 sps:$4 sm:$0xff]  }
 0x12e   : > { %v4786_v24 = vadd.f32 %v3580_v34, %v1857_v17  ;;  %2414 = vmatprep.mubr.bf16.mxu1 %v4257_v11  ;;  %3937 = vmatprep.mubr.bf16.mxu0 %v4258_v60  ;;  %v1873_v60 = vadd.f32 %v4752_v30, %v4722_v46 }
 0x12f   : > { %v3494_v25 = vpop.f32.mrf.mxu0  ;;  %v3582_v26 = vpop.f32.mrf.mxu1 }
 0x130   : > { %v4790_v27 = vadd.f32 %v3494_v25, %v3493_v21  ;;  %v3583_v2 = vadd.f32 %v3582_v26, %v3581_v23  ;;  %v1878_v25 = vadd.f32 %v4758_v38, %v4722_v46 }
 0x131   : > { %v3496_v31 = vpop.f32.mrf.mxu0  ;;  %v3584_v32 = vpop.f32.mrf.mxu1 }
 0x132   : > { %v4794_v12 = vadd.f32 %v3583_v2, %v1862_v44 }
 0x133   : > { %v3497_v41 = vpop.f32.mrf.mxu0  ;;  %v3585_v42 = vpop.f32.mrf.mxu1 }
 0x134   : > { %v4800_v48 = vadd.f32 %v3497_v41, %v3496_v31  ;;  %v3586_v54 = vadd.f32 %v3585_v42, %v3584_v32  ;;  %v4265_v31 = vld [vmem:[%s4378_s23 + $0x450] ss:$36 sps:$4 sm:$0xff]   ;;  %v4269_v32 = vld [vmem:[%s4378_s23 + $0x458] ss:$36 sps:$4 sm:$0xff]   ;;  %s3050_s23 = sshll.u32 %s5242_s24, 2 }
 0x135   : > { %v3499_v49 = vpop.f32.mrf.mxu0  ;;  %v3587_v52 = vpop.f32.mrf.mxu1  ;;  %2415 = vmatmul.mubr.bf16.gmra.mxu1 %v4255_v36  ;;  %3938 = vmatmul.mubr.bf16.gmra.mxu0 %v4259_v37  ;;  %s5093_s24 = scalar_lea.vmem %s5212_s3, %s3050_s23 }
 0x136   : > { %v4802_v53 = vadd.f32 %v3586_v54, %v1865_v43  ;;  %2422 = vmatprep.mubr.bf16.mxu1 %v4262_v39  ;;  %3941 = vmatprep.mubr.bf16.mxu0 %v4263_v40  ;;  %v1881_v40 = vadd.f32 %v4768_v56, %v4722_v46 }
 0x137   : > { %v3500_v55 = vpop.f32.mrf.mxu0  ;;  %v3588_v18 = vpop.f32.mrf.mxu1 }
 0x138   : > { %v4806_v57 = vadd.f32 %v3500_v55, %v3499_v49  ;;  %v3589_v58 = vadd.f32 %v3588_v18, %v3587_v52  ;;  %v1886_v55 = vadd.f32 %v4774_v1, %v4722_v46 }
 0x139   : > { %v3502_v63 = vpop.f32.mrf.mxu0  ;;  %v3590_v0 = vpop.f32.mrf.mxu1 }
 0x13a   : > { %v4810_v5 = vadd.f32 %v3589_v58, %v1870_v6 }
 0x13b   : > { %v3503_v8 = vpop.f32.mrf.mxu0  ;;  %v3591_v11 = vpop.f32.mrf.mxu1 }
 0x13c   : > { %v4816_v15 = vadd.f32 %v3503_v8, %v3502_v63  ;;  %v3592_v14 = vadd.f32 %v3591_v11, %v3590_v0 }
 0x13d   : > { %v3505_v16 = vpop.f32.mrf.mxu0  ;;  %v3593_v17 = vpop.f32.mrf.mxu1  ;;  %2423 = vmatmul.mubr.bf16.gmra.mxu1 %v4260_v28  ;;  %3942 = vmatmul.mubr.bf16.gmra.mxu0 %v4264_v4  ;;  %v1889_v4 = vadd.f32 %v4784_v20, %v4722_v46 }
 0x13e   : > { %v4818_v34 = vadd.f32 %v3592_v14, %v1873_v60  ;;  %2430 = vmatprep.mubr.bf16.mxu1 %v4267_v50  ;;  %3945 = vmatprep.mubr.bf16.mxu0 %v4268_v7 }
 0x13f   : > { %v3506_v21 = vpop.f32.mrf.mxu0  ;;  %v3594_v23 = vpop.f32.mrf.mxu1 }
 0x140   : > { %v4822_v26 = vadd.f32 %v3506_v21, %v3505_v16  ;;  %v3595_v30 = vadd.f32 %v3594_v23, %v3593_v17  ;;  %v1894_v16 = vadd.f32 %v4790_v27, %v4722_v46 }
 0x141   : > { %v3508_v44 = vpop.f32.mrf.mxu0  ;;  %v3596_v2 = vpop.f32.mrf.mxu1 }
 0x142   : > { %v4826_v36 = vadd.f32 %v3595_v30, %v1878_v25 }
 0x143   : > { %v3509_v37 = vpop.f32.mrf.mxu0  ;;  %v3597_v39 = vpop.f32.mrf.mxu1 }
 0x144   : > { %v4830_v41 = vadd.f32 %v3509_v37, %v3508_v44  ;;  %v3598_v42 = vadd.f32 %v3597_v39, %v3596_v2 }
 0x145   : > { %v3511_v43 = vpop.f32.mrf.mxu0  ;;  %v3599_v54 = vpop.f32.mrf.mxu1  ;;  %2431 = vmatmul.mubr.bf16.gmra.mxu1 %v4265_v31  ;;  %3946 = vmatmul.mubr.bf16.gmra.mxu0 %v4269_v32  ;;  %v1897_v31 = vadd.f32 %v4800_v48, %v4722_v46 }
 0x146   : > { %v4832_v38 = vadd.f32 %v3598_v42, %v1881_v40 }
 0x147   : > { %v3512_v49 = vpop.f32.mrf.mxu0  ;;  %v3600_v52 = vpop.f32.mrf.mxu1 }
 0x148   : > { %v4836_v18 = vadd.f32 %v3512_v49, %v3511_v43  ;;  %v3601_v6 = vadd.f32 %v3600_v52, %v3599_v54 }
 0x149   : > { %v3514_v58 = vpop.f32.mrf.mxu0  ;;  %v3602_v63 = vpop.f32.mrf.mxu1 }
 0x14a   : > { %v4838_v56 = vadd.f32 %v3601_v6, %v1886_v55 }
 0x14b   : > { %v3515_v0 = vpop.f32.mrf.mxu0  ;;  %v3603_v28 = vpop.f32.mrf.mxu1 }
 0x14c   : > { %v4842_v50 = vadd.f32 %v3515_v0, %v3514_v58  ;;  %v3604_v7 = vadd.f32 %v3603_v28, %v3602_v63 }
 0x14d   : > { %v3605_v8 = vpop.f32.mrf.mxu1  ;;  %v3669_v11 = vpop.f32.mrf.mxu0 }
 0x14e   : > { %v4844_v60 = vadd.f32 %v3604_v7, %v1889_v4 }
 0x14f   : > { %v3606_v1 = vpop.f32.mrf.mxu1  ;;  %v3670_v14 = vpop.f32.mrf.mxu0 }
 0x150   : > { %v3607_v17 = vadd.f32 %v3606_v1, %v3605_v8  ;;  %v3671_v21 = vadd.f32 %v3670_v14, %v3669_v11 }
 0x151   : > { %v3608_v23 = vpop.f32.mrf.mxu1  ;;  %v3672_v25 = vpop.f32.mrf.mxu0 }
 0x152   : > { %v4848_v30 = vadd.f32 %v3607_v17, %v1894_v16  ;;  %v4851_v20 = vadd.f32 %v3671_v21, %v4730_v62  ;;  %v1902_v62 = vadd.f32 %v4806_v57, %v4722_v46 }
 0x153   : > { %v3609_v44 = vpop.f32.mrf.mxu1  ;;  %v3673_v2 = vpop.f32.mrf.mxu0 }
 0x154   : > { %v3610_v32 = vadd.f32 %v3609_v44, %v3608_v23  ;;  %v3674_v37 = vadd.f32 %v3673_v2, %v3672_v25 }
 0x155   : > { %v3611_v39 = vpop.f32.mrf.mxu1  ;;  %v3675_v40 = vpop.f32.mrf.mxu0 }
 0x156   : > { %v4855_v42 = vadd.f32 %v3610_v32, %v1897_v31  ;;  %v4858_v27 = vadd.f32 %v3674_v37, %v4738_v9  ;;  %v1905_v9 = vadd.f32 %v4816_v15, %v4722_v46 }
 0x157   : > { %v3612_v43 = vpop.f32.mrf.mxu1  ;;  %v3676_v54 = vpop.f32.mrf.mxu0 }
 0x158   : > { %v3613_v49 = vadd.f32 %v3612_v43, %v3611_v39  ;;  %v3677_v52 = vadd.f32 %v3676_v54, %v3675_v40 }
 0x159   : > { %v3614_v55 = vpop.f32.mrf.mxu1  ;;  %v3678_v6 = vpop.f32.mrf.mxu0 }
 0x15a   : > { %v4862_v58 = vadd.f32 %v3613_v49, %v1902_v62  ;;  %v4865_v48 = vadd.f32 %v3677_v52, %v4746_v22  ;;  %v1910_v22 = vadd.f32 %v4822_v26, %v4722_v46 }
 0x15b   : > { %v3615_v63 = vpop.f32.mrf.mxu1  ;;  %v3679_v0 = vpop.f32.mrf.mxu0 }
 0x15c   : > { %v3616_v28 = vadd.f32 %v3615_v63, %v3614_v55  ;;  %v3680_v4 = vadd.f32 %v3679_v0, %v3678_v6 }
 0x15d   : > { %v3617_v7 = vpop.f32.mrf.mxu1  ;;  %v3681_v8 = vpop.f32.mrf.mxu0 }
 0x15e   : > { %v4869_v11 = vadd.f32 %v3616_v28, %v1905_v9  ;;  %v4872_v57 = vadd.f32 %v3680_v4, %v4754_v33  ;;  %v1913_v33 = vadd.f32 %v4830_v41, %v4722_v46 }
 0x15f   : > { %v3618_v1 = vpop.f32.mrf.mxu1  ;;  %v3682_v14 = vpop.f32.mrf.mxu0 }
 0x160   : > { %v3619_v16 = vadd.f32 %v3618_v1, %v3617_v7  ;;  %v3683_v17 = vadd.f32 %v3682_v14, %v3681_v8 }
 0x161   : > { %v3620_v21 = vpop.f32.mrf.mxu1  ;;  %v3684_v23 = vpop.f32.mrf.mxu0 }
 0x162   : > { %v4876_v25 = vadd.f32 %v3619_v16, %v1910_v22  ;;  %v4879_v15 = vadd.f32 %v3683_v17, %v4762_v47  ;;  %v1918_v47 = vadd.f32 %v4836_v18, %v4722_v46 }
 0x163   : > { %v3621_v44 = vpop.f32.mrf.mxu1  ;;  %v3685_v2 = vpop.f32.mrf.mxu0 }
 0x164   : > { %v3622_v31 = vadd.f32 %v3621_v44, %v3620_v21  ;;  %v3686_v32 = vadd.f32 %v3685_v2, %v3684_v23 }
 0x165   : > { %v3623_v37 = vpop.f32.mrf.mxu1  ;;  %v3687_v39 = vpop.f32.mrf.mxu0 }
 0x166   : > { %v4883_v40 = vadd.f32 %v3622_v31, %v1913_v33  ;;  %v4886_v26 = vadd.f32 %v3686_v32, %v4770_v59  ;;  %v1921_v59 = vadd.f32 %v4842_v50, %v4722_v46 }
 0x167   : > { %v3624_v43 = vpop.f32.mrf.mxu1  ;;  %v3688_v54 = vpop.f32.mrf.mxu0 }
 0x168   : > { %v3625_v62 = vadd.f32 %v3624_v43, %v3623_v37  ;;  %v3689_v49 = vadd.f32 %v3688_v54, %v3687_v39 }
 0x169   : > { %v3626_v52 = vpop.f32.mrf.mxu1  ;;  %v3690_v55 = vpop.f32.mrf.mxu0 }
 0x16a   : > { %v4890_v6 = vadd.f32 %v3625_v62, %v1918_v47  ;;  %v4893_v41 = vadd.f32 %v3689_v49, %v4778_v10  ;;  %v1926_v10 = vadd.f32 %v4673_v51, %v4722_v46 }
 0x16b   : > { %v3627_v63 = vpop.f32.mrf.mxu1  ;;  %v3691_v0 = vpop.f32.mrf.mxu0 }
 0x16c   : > { %v3628_v9 = vadd.f32 %v3627_v63, %v3626_v52  ;;  %v3692_v28 = vadd.f32 %v3691_v0, %v3690_v55 }
 0x16d   : > { %v3629_v4 = vpop.f32.mrf.mxu1  ;;  %v3693_v7 = vpop.f32.mrf.mxu0 }
 0x16e   : > { %v4897_v8 = vadd.f32 %v3628_v9, %v1921_v59  ;;  %v4900_v18 = vadd.f32 %v3692_v28, %v4786_v24  ;;  %v1929_v24 = vadd.f32 %v4681_v61, %v4722_v46 }
 0x16f   : > { %v3630_v1 = vpop.f32.mrf.mxu1  ;;  %v3694_v14 = vpop.f32.mrf.mxu0 }
 0x170   : > { %v3631_v22 = vadd.f32 %v3630_v1, %v3629_v4  ;;  %v3695_v16 = vadd.f32 %v3694_v14, %v3693_v7 }
 0x171   : > { %v3632_v17 = vpop.f32.mrf.mxu1  ;;  %v3696_v21 = vpop.f32.mrf.mxu0 }
 0x172   : > { %v4904_v23 = vadd.f32 %v3631_v22, %v1926_v10  ;;  %v4907_v50 = vadd.f32 %v3695_v16, %v4794_v12  ;;  %v1934_v12 = vadd.f32 %v4685_v3, %v4722_v46 }
 0x173   : > { %v3633_v44 = vpop.f32.mrf.mxu1  ;;  %v3697_v2 = vpop.f32.mrf.mxu0 }
 0x174   : > { %v3634_v33 = vadd.f32 %v3633_v44, %v3632_v17  ;;  %v3698_v31 = vadd.f32 %v3697_v2, %v3696_v21 }
 0x175   : > { %v3635_v32 = vpop.f32.mrf.mxu1  ;;  %v3699_v37 = vpop.f32.mrf.mxu0 }
 0x176   : > { %v4911_v39 = vadd.f32 %v3634_v33, %v1929_v24  ;;  %v4914_v51 = vadd.f32 %v3698_v31, %v4802_v53  ;;  %v1937_v53 = vadd.f32 %v4693_v13, %v4722_v46 }
 0x177   : > { %v3636_v43 = vpop.f32.mrf.mxu1  ;;  %v3700_v54 = vpop.f32.mrf.mxu0 }
 0x178   : > { %v3637_v47 = vadd.f32 %v3636_v43, %v3635_v32  ;;  %v3701_v62 = vadd.f32 %v3700_v54, %v3699_v37 }
 0x179   : > { %v3638_v49 = vpop.f32.mrf.mxu1  ;;  %v3702_v52 = vpop.f32.mrf.mxu0 }
 0x17a   : > { %v4918_v55 = vadd.f32 %v3637_v47, %v1934_v12  ;;  %v4921_v61 = vadd.f32 %v3701_v62, %v4810_v5  ;;  %v1942_v5 = vadd.f32 %v4697_v19, %v4722_v46 }
 0x17b   : > { %v3639_v63 = vpop.f32.mrf.mxu1  ;;  %v3703_v0 = vpop.f32.mrf.mxu0 }
 0x17c   : > { %v3640_v59 = vadd.f32 %v3639_v63, %v3638_v49  ;;  %v3704_v9 = vadd.f32 %v3703_v0, %v3702_v52 }
 0x17d   : > { %v3641_v28 = vpop.f32.mrf.mxu1  ;;  %v3705_v4 = vpop.f32.mrf.mxu0 }
 0x17e   : > { %v4925_v7 = vadd.f32 %v3640_v59, %v1937_v53  ;;  %v4928_v3 = vadd.f32 %v3704_v9, %v4818_v34  ;;  %v1945_v34 = vadd.f32 %v4705_v29, %v4722_v46 }
 0x17f   : > { %v3642_v1 = vpop.f32.mrf.mxu1  ;;  %v3706_v14 = vpop.f32.mrf.mxu0 }
 0x180   : > { %v3643_v10 = vadd.f32 %v3642_v1, %v3641_v28  ;;  %v3707_v22 = vadd.f32 %v3706_v14, %v3705_v4 }
 0x181   : > { %v3644_v16 = vpop.f32.mrf.mxu1  ;;  %v3708_v17 = vpop.f32.mrf.mxu0 }
 0x182   : > { %v4932_v21 = vadd.f32 %v3643_v10, %v1942_v5  ;;  %v4935_v13 = vadd.f32 %v3707_v22, %v4826_v36  ;;  %v1950_v36 = vadd.f32 %v4709_v35, %v4722_v46 }
 0x183   : > { %v3645_v44 = vpop.f32.mrf.mxu1  ;;  %v3709_v2 = vpop.f32.mrf.mxu0 }
 0x184   : > { %v3646_v24 = vadd.f32 %v3645_v44, %v3644_v16  ;;  %v3710_v33 = vadd.f32 %v3709_v2, %v3708_v17 }
 0x185   : > { %v3647_v31 = vpop.f32.mrf.mxu1  ;;  %v3711_v32 = vpop.f32.mrf.mxu0 }
 0x186   : > { %v4939_v37 = vadd.f32 %v3646_v24, %v1945_v34  ;;  %v4942_v19 = vadd.f32 %v3710_v33, %v4832_v38  ;;  %v1953_v38 = vadd.f32 %v4717_v45, %v4722_v46 }
 0x187   : > { %v3648_v43 = vpop.f32.mrf.mxu1  ;;  %v3712_v54 = vpop.f32.mrf.mxu0 }
 0x188   : > { %v3649_v12 = vadd.f32 %v3648_v43, %v3647_v31  ;;  %v3713_v47 = vadd.f32 %v3712_v54, %v3711_v32 }
 0x189   : > { %v3650_v62 = vpop.f32.mrf.mxu1  ;;  %v3714_v49 = vpop.f32.mrf.mxu0 }
 0x18a   : > { %v4946_v52 = vadd.f32 %v3649_v12, %v1950_v36  ;;  %v4949_v29 = vadd.f32 %v3713_v47, %v4838_v56 }
 0x18b   : > { %v3651_v63 = vpop.f32.mrf.mxu1  ;;  %v3715_v0 = vpop.f32.mrf.mxu0 }
 0x18c   : > { %v3652_v53 = vadd.f32 %v3651_v63, %v3650_v62  ;;  %v3716_v59 = vadd.f32 %v3715_v0, %v3714_v49 }
 0x18d   : > { %v3717_v9 = vpop.f32.mrf.mxu0  ;;  %v3781_v28 = vpop.f32.mrf.mxu1 }
 0x18e   : > { %v4953_v4 = vadd.f32 %v3652_v53, %v1953_v38  ;;  %v4956_v35 = vadd.f32 %v3716_v59, %v4844_v60 }
 0x18f   : > { %v3718_v1 = vpop.f32.mrf.mxu0  ;;  %v3782_v14 = vpop.f32.mrf.mxu1 }
 0x190   : > { %v3719_v5 = vadd.f32 %v3718_v1, %v3717_v9  ;;  %v3783_v10 = vadd.f32 %v3782_v14, %v3781_v28 }
 0x191   : > { %v3720_v56 = vpop.f32.mrf.mxu0  ;;  %v4958_v22 = vpop.f32.mrf.mxu1 }
 0x192   : > { %v4961_v16 = vadd.f32 %v3719_v5, %v4848_v30  ;;  %v4964_v45 = vadd.f32 %v3783_v10, %v4851_v20 }
 0x193   : > { %v3721_v46 = vpop.f32.mrf.mxu0  ;;  %v4966_v17 = vpop.f32.mrf.mxu1 }
 0x194   : > { %v3722_v44 = vadd.f32 %v3721_v46, %v3720_v56 }
 0x195   : > { %v3723_v2 = vpop.f32.mrf.mxu0  ;;  %v4968_v60 = vpop.f32.mrf.mxu1 }
 0x196   : > { %v4971_v34 = vadd.f32 %v3722_v44, %v4855_v42 }
 0x197   : > { %v3724_v24 = vpop.f32.mrf.mxu0  ;;  %v4973_v33 = vpop.f32.mrf.mxu1 }
 0x198   : > { %v3725_v31 = vadd.f32 %v3724_v24, %v3723_v2 }
 0x199   : > { %v3726_v32 = vpop.f32.mrf.mxu0  ;;  %v4975_v30 = vpop.f32.mrf.mxu1 }
 0x19a   : > { %v4978_v20 = vadd.f32 %v3725_v31, %v4862_v58 }
 0x19b   : > { %v3727_v43 = vpop.f32.mrf.mxu0  ;;  %v4980_v54 = vpop.f32.mrf.mxu1 }
 0x19c   : > { %v3728_v36 = vadd.f32 %v3727_v43, %v3726_v32 }
 0x19d   : > { %v3729_v12 = vpop.f32.mrf.mxu0  ;;  %v4982_v47 = vpop.f32.mrf.mxu1 }
 0x19e   : > { %v4985_v42 = vadd.f32 %v3728_v36, %v4869_v11 }
 0x19f   : > { %v3730_v62 = vpop.f32.mrf.mxu0  ;;  %v4987_v49 = vpop.f32.mrf.mxu1 }
 0x1a0   : > { %v3731_v63 = vadd.f32 %v3730_v62, %v3729_v12 }
 0x1a1   : > { %v3732_v0 = vpop.f32.mrf.mxu0  ;;  %v4989_v38 = vpop.f32.mrf.mxu1 }
 0x1a2   : > { %v4992_v58 = vadd.f32 %v3731_v63, %v4876_v25 }
 0x1a3   : > { %v3733_v53 = vpop.f32.mrf.mxu0  ;;  %v4994_v59 = vpop.f32.mrf.mxu1 }
 0x1a4   : > { %v3734_v9 = vadd.f32 %v3733_v53, %v3732_v0 }
 0x1a5   : > { %v3735_v28 = vpop.f32.mrf.mxu0  ;;  %v4996_v1 = vpop.f32.mrf.mxu1 }
 0x1a6   : > { %v4999_v11 = vadd.f32 %v3734_v9, %v4883_v40 }
 0x1a7   : > { %v3736_v14 = vpop.f32.mrf.mxu0  ;;  %v5001_v5 = vpop.f32.mrf.mxu1 }
 0x1a8   : > { %5215 = vst [vmem:[#allocation2_spill] sm:$0xff] %v4999_v11  ;;  %v3737_v10 = vadd.f32 %v3736_v14, %v3735_v28 }
 0x1a9   : > { %v3738_v56 = vpop.f32.mrf.mxu0  ;;  %v5003_v46 = vpop.f32.mrf.mxu1 }
 0x1aa   : > { %v5006_v25 = vadd.f32 %v3737_v10, %v4890_v6 }
 0x1ab   : > { %v3739_v44 = vpop.f32.mrf.mxu0  ;;  %v5008_v2 = vpop.f32.mrf.mxu1 }
 0x1ac   : > { %5216 = vst [vmem:[#allocation3_spill] sm:$0xff] %v5006_v25  ;;  %v3740_v24 = vadd.f32 %v3739_v44, %v3738_v56 }
 0x1ad   : > { %v3741_v31 = vpop.f32.mrf.mxu0  ;;  %v5010_v32 = vpop.f32.mrf.mxu1 }
 0x1ae   : > { %v5013_v40 = vadd.f32 %v3740_v24, %v4897_v8 }
 0x1af   : > { %v3742_v43 = vpop.f32.mrf.mxu0  ;;  %v5015_v36 = vpop.f32.mrf.mxu1 }
 0x1b0   : > { %5217 = vst [vmem:[#allocation4_spill] sm:$0xff] %v5013_v40  ;;  %v3743_v12 = vadd.f32 %v3742_v43, %v3741_v31 }
 0x1b1   : > { %v3744_v62 = vpop.f32.mrf.mxu0  ;;  %v5017_v63 = vpop.f32.mrf.mxu1 }
 0x1b2   : > { %v5020_v6 = vadd.f32 %v3743_v12, %v4904_v23 }
 0x1b3   : > { %v3745_v0 = vpop.f32.mrf.mxu0  ;;  %v5022_v53 = vpop.f32.mrf.mxu1 }
 0x1b4   : > { %5218 = vst [vmem:[#allocation5_spill] sm:$0xff] %v5020_v6  ;;  %v3746_v9 = vadd.f32 %v3745_v0, %v3744_v62 }
 0x1b5   : > { %v3747_v28 = vpop.f32.mrf.mxu0  ;;  %v5024_v14 = vpop.f32.mrf.mxu1 }
 0x1b6   : > { %v5027_v8 = vadd.f32 %v3746_v9, %v4911_v39 }
 0x1b7   : > { %v3748_v10 = vpop.f32.mrf.mxu0  ;;  %v5029_v56 = vpop.f32.mrf.mxu1 }
 0x1b8   : > { %5219 = vst [vmem:[#allocation6_spill] sm:$0xff] %v5027_v8  ;;  %v3749_v44 = vadd.f32 %v3748_v10, %v3747_v28 }
 0x1b9   : > { %v3750_v24 = vpop.f32.mrf.mxu0  ;;  %v5031_v31 = vpop.f32.mrf.mxu1 }
 0x1ba   : > { %v5034_v23 = vadd.f32 %v3749_v44, %v4918_v55 }
 0x1bb   : > { %v3751_v43 = vpop.f32.mrf.mxu0  ;;  %v5036_v12 = vpop.f32.mrf.mxu1 }
 0x1bc   : > { %5220 = vst [vmem:[#allocation7_spill] sm:$0xff] %v5034_v23  ;;  %v3752_v62 = vadd.f32 %v3751_v43, %v3750_v24 }
 0x1bd   : > { %v3753_v0 = vpop.f32.mrf.mxu0  ;;  %v5038_v6 = vpop.f32.mrf.mxu1 }
 0x1be   : > { %v5041_v39 = vadd.f32 %v3752_v62, %v4925_v7 }
 0x1bf   : > { %v3754_v9 = vpop.f32.mrf.mxu0  ;;  %v5043_v8 = vpop.f32.mrf.mxu1 }
 0x1c0   : > { %5221 = vst [vmem:[#allocation8_spill] sm:$0xff] %v5041_v39  ;;  %v3755_v28 = vadd.f32 %v3754_v9, %v3753_v0 }
 0x1c1   : > { %v3756_v10 = vpop.f32.mrf.mxu0  ;;  %v5045_v11 = vpop.f32.mrf.mxu1 }
 0x1c2   : > { %v5048_v55 = vadd.f32 %v3755_v28, %v4932_v21 }
 0x1c3   : > { %v3757_v44 = vpop.f32.mrf.mxu0  ;;  %v5050_v23 = vpop.f32.mrf.mxu1 }
 0x1c4   : > { %5222 = vst [vmem:[#allocation9_spill] sm:$0xff] %v5048_v55  ;;  %v3758_v24 = vadd.f32 %v3757_v44, %v3756_v10  ;;  %v3789_v10 = vadd.f32 %v4973_v33, %v4968_v60 }
 0x1c5   : > { %v3759_v43 = vpop.f32.mrf.mxu0  ;;  %v5052_v40 = vpop.f32.mrf.mxu1 }
 0x1c6   : > { %v5055_v7 = vadd.f32 %v3758_v24, %v4939_v37  ;;  %v3792_v37 = vadd.f32 %v4980_v54, %v4975_v30 }
 0x1c7   : > { %v3760_v62 = vpop.f32.mrf.mxu0  ;;  %v5057_v39 = vpop.f32.mrf.mxu1 }
 0x1c8   : > { %5223 = vst [vmem:[#allocation10_spill] sm:$0xff] %v5055_v7  ;;  %v3761_v0 = vadd.f32 %v3760_v62, %v3759_v43  ;;  %v3786_v62 = vadd.f32 %v4966_v17, %v4958_v22  ;;  %v2324_v60 = vadd.f32 %v3792_v37, %v4872_v57  ;;  %v3801_v17 = vadd.f32 %v5001_v5, %v4996_v1 }
 0x1c9   : > { %v3762_v9 = vpop.f32.mrf.mxu0  ;;  %v5059_v25 = vpop.f32.mrf.mxu1 }
 0x1ca   : > { %v5062_v21 = vadd.f32 %v3761_v0, %v4946_v52  ;;  %v2316_v22 = vadd.f32 %v3786_v62, %v4858_v27 }
 0x1cb   : > { %v3763_v28 = vpop.f32.mrf.mxu0  ;;  %v5064_v55 = vpop.f32.mrf.mxu1 }
 0x1cc   : > { %5224 = vst [vmem:[#allocation11_spill] sm:$0xff] %v5062_v21  ;;  %v3764_v44 = vadd.f32 %v3763_v28, %v3762_v9  ;;  %v2321_v21 = vadd.f32 %v3789_v10, %v4865_v48 }
 0x1cd   : > { %v5070_v24 = vpop.f32.mrf.mxu1  ;;  %v3919_v43 = vpop.f32.mrf.mxu0 }
 0x1ce   : > { %v5075_v7 = vadd.f32 %v3764_v44, %v4953_v4  ;;  %v2482_v54 = vadd.f32 %v3919_v43, %v2321_v21  ;;  %v3795_v4 = vadd.f32 %v4987_v49, %v4982_v47  ;;  %v3798_v44 = vadd.f32 %v4994_v59, %v4989_v38 }
 0x1cf   : > { %v5077_v52 = vpop.f32.mrf.mxu1  ;;  %v2473_v0 = vpop.f32.mrf.mxu0  ;;  %v2337_v43 = vadd.f32 %v3801_v17, %v4893_v41 }
 0x1d0   : > { %5225 = vst [vmem:[#allocation12_spill] sm:$0xff] %v5075_v7  ;;  %v2474_v9 = vadd.f32 %v2473_v0, %v4964_v45  ;;  %v3804_v45 = vadd.f32 %v5008_v2, %v5003_v46  ;;  %v2329_v46 = vadd.f32 %v3795_v4, %v4879_v15  ;;  %v2640_v0 = vmul.f32 %v2482_v54, %v2482_v54 }
 0x1d1   : > { %v5082_v33 = vpop.f32.mrf.mxu1  ;;  %v3920_v30 = vpop.f32.mrf.mxu0  ;;  %v3807_v15 = vadd.f32 %v5015_v36, %v5010_v32  ;;  %v3816_v4 = vadd.f32 %v5036_v12, %v5031_v31  ;;  %v2332_v17 = vadd.f32 %v3798_v44, %v4886_v26  ;;  %v3810_v36 = vadd.f32 %v5022_v53, %v5017_v63 }
 0x1d2   : > { %v2485_v28 = vadd.f32 %v3920_v30, %v2324_v60  ;;  %v2638_v49 = vmul.f32 %v2474_v9, %v2474_v9 }
 0x1d3   : > { %v5095_v48 = vpop.f32.mrf.mxu1  ;;  %v2476_v57 = vpop.f32.mrf.mxu0  ;;  %v2345_v26 = vadd.f32 %v3807_v15, %v4907_v50  ;;  %v3819_v50 = vadd.f32 %v5043_v8, %v5038_v6  ;;  %v3825_v15 = vadd.f32 %v5057_v39, %v5052_v40 }
 0x1d4   : > { %v3342_v21 = vpack.c.bf16 %v2485_v28, %v2482_v54  ;;  %v2477_v27 = vadd.f32 %v2476_v57, %v2316_v22  ;;  %v2340_v22 = vadd.f32 %v3804_v45, %v4900_v18  ;;  %v2641_v57 = vmul.f32 %v2485_v28, %v2485_v28 }
 0x1d5   : > { %v5099_v10 = vpop.f32.mrf.mxu1  ;;  %v3923_v47 = vpop.f32.mrf.mxu0 }
 0x1d6   : > { %3414 = vst [vmem:[%s5093_s24 + $0x8] sm:$0xff] %v3342_v21   ;;  %v2600_v1 = vadd.f32 %v2477_v27, %v2474_v9  ;;  %v2639_v5 = vmul.f32 %v2477_v27, %v2477_v27  ;;  %v3337_v37 = vpack.c.bf16 %v2477_v27, %v2474_v9  ;;  %v2498_v38 = vadd.f32 %v3923_v47, %v2337_v43 }
 0x1d7   : > { %v5105_v62 = vpop.f32.mrf.mxu1  ;;  %v2489_v2 = vpop.f32.mrf.mxu0 }
 0x1d8   : > { %v2601_v60 = vadd.f32 %v2600_v1, %v2482_v54  ;;  %v2670_v30 = vadd.f32 %v2639_v5, %v2638_v49  ;;  %3338 = vst [vmem:[%s5093_s24] sm:$0xff] %v3337_v37   ;;  %v2490_v21 = vadd.f32 %v2489_v2, %v2329_v46  ;;  %v3813_v54 = vadd.f32 %v5029_v56, %v5024_v14 }
 0x1d9   : > { %v5110_v7 = vpop.f32.mrf.mxu1  ;;  %v3924_v9 = vpop.f32.mrf.mxu0  ;;  %v2356_v2 = vadd.f32 %v3816_v4, %v4928_v3 }
 0x1da   : > { %v2671_v27 = vadd.f32 %v2670_v30, %v2640_v0  ;;  %v2602_v59 = vadd.f32 %v2601_v60, %v2485_v28  ;;  %v2501_v41 = vadd.f32 %v3924_v9, %v2340_v22  ;;  %v2642_v1 = vmul.f32 %v2490_v21, %v2490_v21 }
 0x1db   : > { %v5118_v18 = vpop.f32.mrf.mxu1  ;;  %v2492_v45 = vpop.f32.mrf.mxu0  ;;  %v2353_v46 = vadd.f32 %v3813_v54, %v4921_v61  ;;  %v2644_v0 = vmul.f32 %v2498_v38, %v2498_v38  ;;  %v3828_v54 = vadd.f32 %v5064_v55, %v5059_v25  ;;  %v2361_v25 = vadd.f32 %v3819_v50, %v4935_v13 }
 0x1dc   : > { %v2603_v49 = vadd.f32 %v2602_v59, %v2490_v21  ;;  %v2672_v47 = vadd.f32 %v2671_v27, %v2641_v57  ;;  %v3352_v28 = vpack.c.bf16 %v2501_v41, %v2498_v38  ;;  %v2493_v5 = vadd.f32 %v2492_v45, %v2332_v17 }
 0x1dd   : > { %v5121_v37 = vpop.f32.mrf.mxu1  ;;  %v3927_v32 = vpop.f32.mrf.mxu0  ;;  %v2645_v27 = vmul.f32 %v2501_v41, %v2501_v41 }
 0x1de   : > { %v2673_v14 = vadd.f32 %v2672_v47, %v2642_v1  ;;  %3416 = vst [vmem:[%s5093_s24 + $0x18] sm:$0xff] %v3352_v28   ;;  %v2604_v56 = vadd.f32 %v2603_v49, %v2493_v5  ;;  %v2643_v31 = vmul.f32 %v2493_v5, %v2493_v5  ;;  %v3347_v12 = vpack.c.bf16 %v2493_v5, %v2490_v21 }
 0x1df   : > { %v5126_v43 = vpop.f32.mrf.mxu1  ;;  %v2505_v44 = vpop.f32.mrf.mxu0  ;;  %v2514_v57 = vadd.f32 %v3927_v32, %v2353_v46  ;;  %v2348_v21 = vadd.f32 %v3810_v36, %v4914_v51  ;;  %v2369_v5 = vadd.f32 %v3825_v15, %v4949_v29  ;;  %v2372_v32 = vadd.f32 %v3828_v54, %v4956_v35 }
 0x1e0   : > { %v2605_v60 = vadd.f32 %v2604_v56, %v2498_v38  ;;  %v2674_v30 = vadd.f32 %v2673_v14, %v2643_v31  ;;  %3415 = vst [vmem:[%s5093_s24 + $0x10] sm:$0xff] %v3347_v12   ;;  %v2506_v22 = vadd.f32 %v2505_v44, %v2345_v26  ;;  %v3831_v46 = vadd.f32 %v5077_v52, %v5070_v24 }
 0x1e1   : > { %v5132_v63 = vpop.f32.mrf.mxu1  ;;  %v3928_v53 = vpop.f32.mrf.mxu0  ;;  %v2648_v36 = vmul.f32 %v2514_v57, %v2514_v57  ;;  %v3837_v35 = vadd.f32 %v5105_v62, %v5099_v10  ;;  %v3834_v52 = vadd.f32 %v5095_v48, %v5082_v33 }
 0x1e2   : > { %v2517_v9 = vadd.f32 %v3928_v53, %v2356_v2  ;;  %v2675_v61 = vadd.f32 %v2674_v30, %v2644_v0  ;;  %v2606_v59 = vadd.f32 %v2605_v60, %v2501_v41  ;;  %v2646_v45 = vmul.f32 %v2506_v22, %v2506_v22 }
 0x1e3   : > { %v5137_v3 = vpop.f32.mrf.mxu1  ;;  %v2508_v38 = vpop.f32.mrf.mxu0  ;;  %v3822_v41 = vadd.f32 %v5050_v23, %v5045_v11  ;;  %v3840_v30 = vadd.f32 %v5118_v18, %v5110_v7  ;;  %v2377_v62 = vadd.f32 %v3831_v46, %v4961_v16  ;;  %v2385_v18 = vadd.f32 %v3837_v35, %v4978_v20  ;;  %v5228_v35 = vld [vmem:[#allocation2_spill] sm:$0xff] }
 0x1e4   : > { %v3362_v4 = vpack.c.bf16 %v2517_v9, %v2514_v57  ;;  %v2509_v17 = vadd.f32 %v2508_v38, %v2348_v21  ;;  %v2607_v51 = vadd.f32 %v2606_v59, %v2506_v22  ;;  %v2676_v49 = vadd.f32 %v2675_v61, %v2645_v27 }
 0x1e5   : > { %v5143_v6 = vpop.f32.mrf.mxu1  ;;  %v3931_v8 = vpop.f32.mrf.mxu0  ;;  %v2364_v44 = vadd.f32 %v3822_v41, %v4942_v19  ;;  %v2649_v13 = vmul.f32 %v2517_v9, %v2517_v9  ;;  %v2388_v38 = vadd.f32 %v3840_v30, %v4985_v42 }
 0x1e6   : > { %3418 = vst [vmem:[%s5093_s24 + $0x28] sm:$0xff] %v3362_v4   ;;  %v2647_v1 = vmul.f32 %v2509_v17, %v2509_v17  ;;  %v3357_v47 = vpack.c.bf16 %v2509_v17, %v2506_v22  ;;  %v2677_v28 = vadd.f32 %v2676_v49, %v2646_v45  ;;  %v2608_v40 = vadd.f32 %v2607_v51, %v2509_v17 }
 0x1e7   : > { %v3848_v39 = vpop.f32.mrf.mxu1  ;;  %v2521_v55 = vpop.f32.mrf.mxu0  ;;  %v2530_v23 = vadd.f32 %v3931_v8, %v2369_v5  ;;  %v2380_v49 = vadd.f32 %v3834_v52, %v4971_v34  ;;  %v3843_v8 = vadd.f32 %v5126_v43, %v5121_v37  ;;  %v3846_v37 = vadd.f32 %v5137_v3, %v5132_v63 }
 0x1e8   : > { %3417 = vst [vmem:[%s5093_s24 + $0x20] sm:$0xff] %v3357_v47   ;;  %v2609_v14 = vadd.f32 %v2608_v40, %v2514_v57  ;;  %v2678_v56 = vadd.f32 %v2677_v28, %v2647_v1  ;;  %v2522_v31 = vadd.f32 %v2521_v55, %v2361_v25  ;;  %v3849_v42 = vadd.f32 %v3848_v39, %v5143_v6 }
 0x1e9   : > { %v3850_v12 = vpop.f32.mrf.mxu1  ;;  %v3932_v11 = vpop.f32.mrf.mxu0  ;;  %v2652_v15 = vmul.f32 %v2530_v23, %v2530_v23  ;;  %v2393_v6 = vadd.f32 %v3843_v8, %v4992_v58  ;;  %v2396_v30 = vadd.f32 %v3846_v37, %v5228_v35  ;;  %v5231_v8 = vld [vmem:[#allocation8_spill] sm:$0xff] }
 0x1ea   : > { %v2533_v26 = vadd.f32 %v3932_v11, %v2372_v32  ;;  %v2679_v2 = vadd.f32 %v2678_v56, %v2648_v36  ;;  %v2610_v0 = vadd.f32 %v2609_v14, %v2517_v9  ;;  %v2650_v19 = vmul.f32 %v2522_v31, %v2522_v31 }
 0x1eb   : > { %v3851_v29 = vpop.f32.mrf.mxu1  ;;  %v2524_v60 = vpop.f32.mrf.mxu0 }
 0x1ec   : > { %v3372_v22 = vpack.c.bf16 %v2533_v26, %v2530_v23  ;;  %v2525_v53 = vadd.f32 %v2524_v60, %v2364_v44  ;;  %v2611_v57 = vadd.f32 %v2610_v0, %v2522_v31  ;;  %v2680_v21 = vadd.f32 %v2679_v2, %v2649_v13 }
 0x1ed   : > { %v3853_v50 = vpop.f32.mrf.mxu1  ;;  %v3935_v24 = vpop.f32.mrf.mxu0  ;;  %v2653_v16 = vmul.f32 %v2533_v26, %v2533_v26  ;;  %v3852_v28 = vadd.f32 %v3851_v29, %v3850_v12  ;;  %v5226_v12 = vld [vmem:[#allocation3_spill] sm:$0xff] }
 0x1ee   : > { %3420 = vst [vmem:[%s5093_s24 + $0x38] sm:$0xff] %v3372_v22   ;;  %v2651_v9 = vmul.f32 %v2525_v53, %v2525_v53  ;;  %v3367_v27 = vpack.c.bf16 %v2525_v53, %v2522_v31  ;;  %v2681_v61 = vadd.f32 %v2680_v21, %v2650_v19  ;;  %v2612_v59 = vadd.f32 %v2611_v57, %v2525_v53 }
 0x1ef   : > { %v3854_v10 = vpop.f32.mrf.mxu1  ;;  %v2537_v7 = vpop.f32.mrf.mxu0  ;;  %v2546_v48 = vadd.f32 %v3935_v24, %v2385_v18 }
 0x1f0   : > { %3419 = vst [vmem:[%s5093_s24 + $0x30] sm:$0xff] %v3367_v27   ;;  %v2613_v54 = vadd.f32 %v2612_v59, %v2530_v23  ;;  %v2682_v4 = vadd.f32 %v2681_v61, %v2651_v9  ;;  %v2538_v17 = vadd.f32 %v2537_v7, %v2377_v62  ;;  %v2401_v23 = vadd.f32 %v3849_v42, %v5226_v12 }
 0x1f1   : > { %v3856_v51 = vpop.f32.mrf.mxu1  ;;  %v3936_v33 = vpop.f32.mrf.mxu0  ;;  %v2656_v46 = vmul.f32 %v2546_v48, %v2546_v48  ;;  %v3855_v22 = vadd.f32 %v3854_v10, %v3853_v50 }
 0x1f2   : > { %v2549_v45 = vadd.f32 %v3936_v33, %v2388_v38  ;;  %v2683_v41 = vadd.f32 %v2682_v4, %v2652_v15  ;;  %v2614_v1 = vadd.f32 %v2613_v54, %v2533_v26  ;;  %v2654_v5 = vmul.f32 %v2538_v17, %v2538_v17  ;;  %v5227_v26 = vld [vmem:[#allocation4_spill] sm:$0xff] }
 0x1f3   : > { %v3857_v20 = vpop.f32.mrf.mxu1  ;;  %v2540_v47 = vpop.f32.mrf.mxu0  ;;  %v2404_v44 = vadd.f32 %v3852_v28, %v5227_v26 }
 0x1f4   : > { %v3382_v40 = vpack.c.bf16 %v2549_v45, %v2546_v48  ;;  %v2541_v25 = vadd.f32 %v2540_v47, %v2380_v49  ;;  %v2615_v55 = vadd.f32 %v2614_v1, %v2538_v17  ;;  %v2684_v32 = vadd.f32 %v2683_v41, %v2653_v16 }
 0x1f5   : > { %v3859_v36 = vpop.f32.mrf.mxu1  ;;  %v3939_v34 = vpop.f32.mrf.mxu0  ;;  %v2657_v53 = vmul.f32 %v2549_v45, %v2549_v45  ;;  %v3858_v38 = vadd.f32 %v3857_v20, %v3856_v51 }
 0x1f6   : > { %3422 = vst [vmem:[%s5093_s24 + $0x48] sm:$0xff] %v3382_v40   ;;  %v2655_v43 = vmul.f32 %v2541_v25, %v2541_v25  ;;  %v3377_v14 = vpack.c.bf16 %v2541_v25, %v2538_v17  ;;  %v2685_v56 = vadd.f32 %v2684_v32, %v2654_v5  ;;  %v2616_v31 = vadd.f32 %v2615_v55, %v2541_v25  ;;  %v5229_v17 = vld [vmem:[#allocation5_spill] sm:$0xff]  ;;  %v5232_v25 = vld [vmem:[#allocation6_spill] sm:$0xff] }
 0x1f7   : > { %v3860_v11 = vpop.f32.mrf.mxu1  ;;  %v2553_v39 = vpop.f32.mrf.mxu0  ;;  %v2562_v3 = vadd.f32 %v3939_v34, %v2401_v23  ;;  %v2409_v33 = vadd.f32 %v3855_v22, %v5229_v17  ;;  %v2412_v55 = vadd.f32 %v3858_v38, %v5232_v25 }
 0x1f8   : > { %3421 = vst [vmem:[%s5093_s24 + $0x40] sm:$0xff] %v3377_v14   ;;  %v2617_v13 = vadd.f32 %v2616_v31, %v2546_v48  ;;  %v2686_v2 = vadd.f32 %v2685_v56, %v2655_v43  ;;  %v2554_v0 = vadd.f32 %v2553_v39, %v2393_v6  ;;  %v3861_v24 = vadd.f32 %v3860_v11, %v3859_v36 }
 0x1f9   : > { %v3862_v29 = vpop.f32.mrf.mxu1  ;;  %v3940_v63 = vpop.f32.mrf.mxu0  ;;  %v2660_v41 = vmul.f32 %v2562_v3, %v2562_v3 }
 0x1fa   : > { %v2565_v60 = vadd.f32 %v3940_v63, %v2404_v44  ;;  %v2687_v58 = vadd.f32 %v2686_v2, %v2656_v46  ;;  %v2618_v57 = vadd.f32 %v2617_v13, %v2549_v45  ;;  %v2658_v59 = vmul.f32 %v2554_v0, %v2554_v0  ;;  %v5230_v45 = vld [vmem:[#allocation7_spill] sm:$0xff] }
 0x1fb   : > { %v3863_v19 = vpop.f32.mrf.mxu1  ;;  %v2556_v21 = vpop.f32.mrf.mxu0  ;;  %v2417_v49 = vadd.f32 %v3861_v24, %v5230_v45 }
 0x1fc   : > { %v3392_v52 = vpack.c.bf16 %v2565_v60, %v2562_v3  ;;  %v3864_v9 = vadd.f32 %v3863_v19, %v3862_v29  ;;  %v2557_v27 = vadd.f32 %v2556_v21, %v2396_v30  ;;  %v2619_v61 = vadd.f32 %v2618_v57, %v2554_v0  ;;  %v5234_v57 = vld [vmem:[#allocation11_spill] sm:$0xff]  ;;  %v5235_v21 = vld [vmem:[#allocation10_spill] sm:$0xff] }
 0x1fd   : > { %v2688_v62 = vadd.f32 %v2687_v58, %v2657_v53  ;;  %v3865_v7 = vpop.f32.mrf.mxu1  ;;  %v3943_v18 = vpop.f32.mrf.mxu0  ;;  %v2661_v5 = vmul.f32 %v2565_v60, %v2565_v60 }
 0x1fe   : > { %3424 = vst [vmem:[%s5093_s24 + $0x58] sm:$0xff] %v3392_v52   ;;  %v2659_v15 = vmul.f32 %v2557_v27, %v2557_v27  ;;  %v3387_v50 = vpack.c.bf16 %v2557_v27, %v2554_v0  ;;  %v2620_v54 = vadd.f32 %v2619_v61, %v2557_v27  ;;  %v2420_v16 = vadd.f32 %v3864_v9, %v5231_v8  ;;  %v5233_v0 = vld [vmem:[#allocation9_spill] sm:$0xff] }
 0x1ff   : > { %v2689_v10 = vadd.f32 %v2688_v62, %v2658_v59  ;;  %v3866_v4 = vpop.f32.mrf.mxu1  ;;  %v2569_v48 = vpop.f32.mrf.mxu0  ;;  %v2578_v20 = vadd.f32 %v3943_v18, %v2417_v49 }
 0x200   : > { %3423 = vst [vmem:[%s5093_s24 + $0x50] sm:$0xff] %v3387_v50   ;;  %v2621_v1 = vadd.f32 %v2620_v54, %v2562_v3  ;;  %v2570_v42 = vadd.f32 %v2569_v48, %v2409_v33  ;;  %v3867_v36 = vadd.f32 %v3866_v4, %v3865_v7 }
 0x201   : > { %v2690_v47 = vadd.f32 %v2689_v10, %v2659_v15  ;;  %v3868_v28 = vpop.f32.mrf.mxu1  ;;  %v3944_v51 = vpop.f32.mrf.mxu0  ;;  %v5236_v10 = vld [vmem:[#allocation12_spill] sm:$0xff] }
 0x202   : > { %v2581_v40 = vadd.f32 %v3944_v51, %v2420_v16  ;;  %v2622_v34 = vadd.f32 %v2621_v1, %v2565_v60  ;;  %v2662_v11 = vmul.f32 %v2570_v42, %v2570_v42  ;;  %v2425_v29 = vadd.f32 %v3867_v36, %v5233_v0 }
 0x203   : > { %v2691_v32 = vadd.f32 %v2690_v47, %v2660_v41  ;;  %v3869_v37 = vpop.f32.mrf.mxu1  ;;  %v2572_v43 = vpop.f32.mrf.mxu0  ;;  %v2664_v60 = vmul.f32 %v2578_v20, %v2578_v20 }
 0x204   : > { %v3402_v14 = vpack.c.bf16 %v2581_v40, %v2578_v20  ;;  %v2573_v56 = vadd.f32 %v2572_v43, %v2412_v55  ;;  %v2623_v31 = vadd.f32 %v2622_v34, %v2570_v42  ;;  %v3870_v23 = vadd.f32 %v3869_v37, %v3868_v28 }
 0x205   : > { %v2692_v6 = vadd.f32 %v2691_v32, %v2661_v5  ;;  %v3871_v39 = vpop.f32.mrf.mxu1  ;;  %v3947_v12 = vpop.f32.mrf.mxu0  ;;  %v2665_v52 = vmul.f32 %v2581_v40, %v2581_v40 }
 0x206   : > { %3426 = vst [vmem:[%s5093_s24 + $0x68] sm:$0xff] %v3402_v14   ;;  %v2663_v26 = vmul.f32 %v2573_v56, %v2573_v56  ;;  %v3397_v44 = vpack.c.bf16 %v2573_v56, %v2570_v42  ;;  %v2624_v13 = vadd.f32 %v2623_v31, %v2573_v56  ;;  %v2428_v24 = vadd.f32 %v3870_v23, %v5235_v21 }
 0x207   : > { %v2693_v46 = vadd.f32 %v2692_v6, %v2662_v11  ;;  %v3872_v2 = vpop.f32.mrf.mxu1  ;;  %v2585_v63 = vpop.f32.mrf.mxu0 }
 0x208   : > { %3425 = vst [vmem:[%s5093_s24 + $0x60] sm:$0xff] %v3397_v44   ;;  %v3873_v3 = vadd.f32 %v3872_v2, %v3871_v39  ;;  %v2625_v35 = vadd.f32 %v2624_v13, %v2578_v20  ;;  %v2586_v22 = vadd.f32 %v2585_v63, %v2425_v29 }
 0x209   : > { %v2694_v30 = vadd.f32 %v2693_v46, %v2663_v26  ;;  %v3874_v53 = vpop.f32.mrf.mxu1  ;;  %v3948_v58 = vpop.f32.mrf.mxu0 }
 0x20a   : > { %v2433_v19 = vadd.f32 %v3873_v3, %v5234_v57  ;;  %v2626_v27 = vadd.f32 %v2625_v35, %v2581_v40  ;;  %v2666_v15 = vmul.f32 %v2586_v22, %v2586_v22 }
 0x20b   : > { %v2695_v9 = vadd.f32 %v2694_v30, %v2664_v60  ;;  %v3875_v61 = vpop.f32.mrf.mxu1  ;;  %v2588_v59 = vpop.f32.mrf.mxu0 }
 0x20c   : > { %v3876_v62 = vadd.f32 %v3875_v61, %v3874_v53  ;;  %v2589_v7 = vadd.f32 %v2588_v59, %v2428_v24  ;;  %v2594_v18 = vadd.f32 %v3947_v12, %v2433_v19  ;;  %v2627_v38 = vadd.f32 %v2626_v27, %v2586_v22 }
 0x20d   : > { %v2696_v50 = vadd.f32 %v2695_v9, %v2665_v52 }
 0x20e   : > { %v2436_v54 = vadd.f32 %v3876_v62, %v5236_v10  ;;  %v2667_v4 = vmul.f32 %v2589_v7, %v2589_v7  ;;  %v3407_v17 = vpack.c.bf16 %v2589_v7, %v2586_v22  ;;  %v2628_v48 = vadd.f32 %v2627_v38, %v2589_v7 }
 0x20f   : > { %v2697_v33 = vadd.f32 %v2696_v50, %v2666_v15  ;;  %v2668_v49 = vmul.f32 %v2594_v18, %v2594_v18 }
 0x210   : > { %v2597_v45 = vadd.f32 %v3948_v58, %v2436_v54  ;;  %3427 = vst [vmem:[%s5093_s24 + $0x70] sm:$0xff] %v3407_v17   ;;  %v2629_v8 = vadd.f32 %v2628_v48, %v2594_v18 }
 0x211   : > { %v2698_v16 = vadd.f32 %v2697_v33, %v2667_v4 }
 0x212   : > { %v2669_v41 = vmul.f32 %v2597_v45, %v2597_v45  ;;  %v3412_v1 = vpack.c.bf16 %v2597_v45, %v2594_v18  ;;  %v2630_v47 = vadd.f32 %v2629_v8, %v2597_v45 }
 0x213   : > { %v2699_v42 = vadd.f32 %v2698_v16, %v2668_v49 }
 0x214   : > { %3428 = vst [vmem:[%s5093_s24 + $0x78] sm:$0xff] %v3412_v1   ;;  %v2631_v28 = vrot.slane %v2630_v47, 4 }
 0x215   : > { %v2700_v51 = vadd.f32 %v2699_v42, %v2669_v41 }
 0x216   : > { %v2632_v20 = vadd.f32 %v2631_v28, %v2630_v47 }
 0x217   : > { %v2701_v40 = vrot.slane %v2700_v51, 4 }
 0x218   : > { %v2633_v25 = vrot.slane %v2632_v20, 2 }
 0x219   : > { %v2702_v55 = vadd.f32 %v2701_v40, %v2700_v51 }
 0x21a   : > { %v2634_v5 = vadd.f32 %v2633_v25, %v2632_v20 }
 0x21b   : > { %v2703_v32 = vrot.slane %v2702_v55, 2 }
 0x21c   : > { %v2635_v36 = vrot.slane %v2634_v5, 1 }
 0x21d   : > { %v2704_v34 = vadd.f32 %v2703_v32, %v2702_v55 }
 0x21e   : > { %v2636_v37 = vadd.f32 %v2635_v36, %v2634_v5 }
 0x21f   : > { %v2705_v43 = vrot.slane %v2704_v34, 1 }
 0x220   : > { %2637 = vst [vmem:[%s308_s22] sm:$0x1] %v2636_v37 }
 0x221   : > { %v2706_v14 = vadd.f32 %v2705_v43, %v2704_v34 }
 0x223   : > { %2707 = vst [vmem:[%s314_s27] sm:$0x1] %v2706_v14 }
 0x224 PF: > { %s16_s20 = sadd.s32 1, %s4292_s20   ;;  %s5237_s18 = smov %s4288_s19 }
 0x225   : > { %p13_p6 = scmp.ge.s32.totalorder %s16_s20, 4   ;;  %s5238_s19 = smov %s5240_s21 }
 0x227   :  { %15 = sbr.rel (!%p13_p6) target bundleno = 2 (0x2), region = 92 }

// kernel: vqvae_forward.16
= control target key start
LH: loop header
LB: loop body
LE: loop exit
PB: predicated region body
PF: predicated region fallthrough
CT: control target
= control target key end

     0   :  { %s1094_s15 = smov 0   ;;  %s1247_s0 = inlined_call_operand.vmem [shape: bf16[512,128], index: 0, kind: input, shape index: {}]   ;;  %s1248_s1 = inlined_call_operand.vmem [shape: f32[1,128], index: 1, kind: input, shape index: {}]   ;;  %s1249_s2 = inlined_call_operand.vmem [shape: f32[1,128], index: 2, kind: input, shape index: {}]   ;;  %s1250_s3 = inlined_call_operand.vmem [shape: bf16[512,128], index: 3, kind: input, shape index: {}]   ;;  %s1251_s4 = inlined_call_operand.vmem [shape: bf16[512,128], index: 4, kind: output, shape index: {}]  }
   0x1 LB: > { %s721_s16 = sadd.s32 4294967295, %s1067_s15   ;;  %p725_p0 = scmp.ge.s32.totalorder %s1067_s15, 1  ;;  %s1067_s15 = sphi %s1094_s15, %s14_s15  }
   0x2   : > { %p174_p1 = scmp.lt.s32.totalorder %s1067_s15, 3 }
   0x4   : > { %p175_p2 = pnand %p725_p0, %p174_p1 }
   0x5   : > { %s726_s17 = sshll.u32 (!%p175_p2), %s721_s16, 5 }
   0x6   : > { %178 = sbr.rel (%p175_p2) target bundleno = 74 (0x4a), region = 36  ;;  %p206_p3 = scmp.lt.s32.totalorder (!%p175_p2), %s726_s17, 63 }
   0xb   : > { %s1253_s17 = smov (!%p206_p3, %s726_s17), 63  ;;  %v1119_v0 = vld [vmem:[%s1248_s1] ss:$0 sm:$0xff] }
   0xc   : > { %s1102_s18 = sshll.u32 %s1253_s17, 2  ;;  %v1130_v11 = vld [vmem:[%s1249_s2] ss:$0 sm:$0xff] }
   0xd   : > { %s1108_s21 = scalar_lea.vmem %s1247_s0, %s1102_s18  ;;  %s1114_s24 = scalar_lea.vmem %s1250_s3, %s1102_s18 }
   0xe   : > { %v801_v1 = vld [vmem:[%s1108_s21] sm:$0xff]   ;;  %v1008_v3 = vld [vmem:[%s1108_s21 + $0x8] sm:$0xff]   ;;  %v1009_v9 = vld [vmem:[%s1108_s21 + $0x10] sm:$0xff]   ;;  %s1153_s5 = scalar_lea.vmem %s1251_s4, %s1102_s18 }
   0xf   : > { %v865_v2 = vld [vmem:[%s1114_s24] sm:$0xff]   ;;  %v802_v4 = vunpack.c.l.bf16 %v801_v1  ;;  %v803_v5 = vunpack.c.h.bf16 %v801_v1  ;;  %v1023_v8 = vld [vmem:[%s1114_s24 + $0x8] sm:$0xff]   ;;  %v1024_v10 = vld [vmem:[%s1114_s24 + $0x10] sm:$0xff]   ;;  %v806_v12 = vunpack.c.l.bf16 %v1008_v3  ;;  %v807_v13 = vunpack.c.h.bf16 %v1008_v3 }
  0x10   : > { %v866_v6 = vunpack.c.l.bf16 %v865_v2  ;;  %v867_v7 = vunpack.c.h.bf16 %v865_v2  ;;  %v870_v14 = vunpack.c.l.bf16 %v1023_v8  ;;  %v871_v15 = vunpack.c.h.bf16 %v1023_v8  ;;  %v1010_v20 = vld [vmem:[%s1108_s21 + $0x18] sm:$0xff]   ;;  %v1011_v46 = vld [vmem:[%s1108_s21 + $0x20] sm:$0xff]   ;;  %v1012_v56 = vld [vmem:[%s1108_s21 + $0x28] sm:$0xff]  }
  0x11   : > { %v294_v16 = vmul.f32 %v802_v4, %v1119_v0  ;;  %v295_v17 = vmul.f32 %v803_v5, %v1119_v0  ;;  %v810_v18 = vunpack.c.l.bf16 %v1009_v9  ;;  %v811_v19 = vunpack.c.h.bf16 %v1009_v9  ;;  %v1025_v41 = vld [vmem:[%s1114_s24 + $0x18] sm:$0xff]   ;;  %v1026_v51 = vld [vmem:[%s1114_s24 + $0x20] sm:$0xff]   ;;  %v1027_v61 = vld [vmem:[%s1114_s24 + $0x28] sm:$0xff]  }
  0x12   : > { %v296_v21 = vmul.f32 %v806_v12, %v1119_v0  ;;  %v297_v22 = vmul.f32 %v807_v13, %v1119_v0  ;;  %v874_v23 = vunpack.c.l.bf16 %v1024_v10  ;;  %v875_v24 = vunpack.c.h.bf16 %v1024_v10  ;;  %v1028_v8 = vld [vmem:[%s1114_s24 + $0x30] sm:$0xff]  }
  0x13   : > { %v333_v25 = vadd.f32 %v1130_v11, %v294_v16  ;;  %v334_v26 = vadd.f32 %v1130_v11, %v295_v17  ;;  %v298_v27 = vmul.f32 %v810_v18, %v1119_v0  ;;  %v299_v28 = vmul.f32 %v811_v19, %v1119_v0 }
  0x14   : > { %v335_v29 = vadd.f32 %v1130_v11, %v296_v21  ;;  %v336_v30 = vadd.f32 %v1130_v11, %v297_v22  ;;  %v814_v31 = vunpack.c.l.bf16 %v1010_v20  ;;  %v815_v32 = vunpack.c.h.bf16 %v1010_v20  ;;  %v1014_v22 = vld [vmem:[%s1108_s21 + $0x38] sm:$0xff]  }
  0x15   : > { %v429_v33 = vadd.f32 %v866_v6, %v333_v25  ;;  %v430_v34 = vadd.f32 %v867_v7, %v334_v26  ;;  %v337_v35 = vadd.f32 %v1130_v11, %v298_v27  ;;  %v338_v36 = vadd.f32 %v1130_v11, %v299_v28  ;;  %v1013_v7 = vld [vmem:[%s1108_s21 + $0x30] sm:$0xff]  }
  0x16   : > { %v431_v37 = vadd.f32 %v870_v14, %v335_v29  ;;  %v432_v38 = vadd.f32 %v871_v15, %v336_v30  ;;  %v300_v39 = vmul.f32 %v814_v31, %v1119_v0  ;;  %v301_v40 = vmul.f32 %v815_v32, %v1119_v0  ;;  %v1029_v31 = vld [vmem:[%s1114_s24 + $0x38] sm:$0xff]  }
  0x17   : > { %v461_v42 = vmax.f32 %v429_v33, 0.0  ;;  %v462_v43 = vmax.f32 %v430_v34, 0.0  ;;  %v433_v44 = vadd.f32 %v874_v23, %v337_v35  ;;  %v434_v45 = vadd.f32 %v875_v24, %v338_v36 }
  0x18   : > { %v463_v47 = vmax.f32 %v431_v37, 0.0  ;;  %v464_v48 = vmax.f32 %v432_v38, 0.0  ;;  %v339_v49 = vadd.f32 %v1130_v11, %v300_v39  ;;  %v340_v50 = vadd.f32 %v1130_v11, %v301_v40  ;;  %v1015_v40 = vld [vmem:[%s1108_s21 + $0x40] sm:$0xff]  }
  0x19   : > { %v931_v52 = vpack.c.bf16 %v462_v43, %v461_v42  ;;  %v465_v53 = vmax.f32 %v433_v44, 0.0  ;;  %v466_v54 = vmax.f32 %v434_v45, 0.0  ;;  %v878_v55 = vunpack.c.l.bf16 %v1025_v41 }
  0x1a   : > { %v936_v57 = vpack.c.bf16 %v464_v48, %v463_v47  ;;  %v879_v58 = vunpack.c.h.bf16 %v1025_v41  ;;  %v818_v59 = vunpack.c.l.bf16 %v1011_v46  ;;  %v819_v60 = vunpack.c.h.bf16 %v1011_v46 }
  0x1b   : > { %932 = vst [vmem:[%s1153_s5] sm:$0xff] %v931_v52   ;;  %v941_v62 = vpack.c.bf16 %v466_v54, %v465_v53  ;;  %v435_v63 = vadd.f32 %v878_v55, %v339_v49  ;;  %v882_v1 = vunpack.c.l.bf16 %v1026_v51  ;;  %v883_v2 = vunpack.c.h.bf16 %v1026_v51  ;;  %v1030_v49 = vld [vmem:[%s1114_s24 + $0x40] sm:$0xff]   ;;  %v1016_v54 = vld [vmem:[%s1108_s21 + $0x48] sm:$0xff]  }
  0x1c   : > { %1038 = vst [vmem:[%s1153_s5 + $0x8] sm:$0xff] %v936_v57   ;;  %v436_v3 = vadd.f32 %v879_v58, %v340_v50  ;;  %v302_v4 = vmul.f32 %v818_v59, %v1119_v0  ;;  %v303_v5 = vmul.f32 %v819_v60, %v1119_v0  ;;  %v822_v6 = vunpack.c.l.bf16 %v1012_v56 }
  0x1d   : > { %1039 = vst [vmem:[%s1153_s5 + $0x10] sm:$0xff] %v941_v62   ;;  %v467_v9 = vmax.f32 %v435_v63, 0.0  ;;  %v823_v10 = vunpack.c.h.bf16 %v1012_v56  ;;  %v886_v12 = vunpack.c.l.bf16 %v1027_v61  ;;  %v887_v13 = vunpack.c.h.bf16 %v1027_v61  ;;  %v1031_v63 = vld [vmem:[%s1114_s24 + $0x48] sm:$0xff]  }
  0x1e   : > { %v468_v14 = vmax.f32 %v436_v3, 0.0  ;;  %v341_v15 = vadd.f32 %v1130_v11, %v302_v4  ;;  %v342_v16 = vadd.f32 %v1130_v11, %v303_v5  ;;  %v304_v17 = vmul.f32 %v822_v6, %v1119_v0  ;;  %v1017_v5 = vld [vmem:[%s1108_s21 + $0x50] sm:$0xff]  }
  0x1f   : > { %v305_v18 = vmul.f32 %v823_v10, %v1119_v0  ;;  %v826_v19 = vunpack.c.l.bf16 %v1013_v7  ;;  %v827_v20 = vunpack.c.h.bf16 %v1013_v7  ;;  %v890_v21 = vunpack.c.l.bf16 %v1028_v8  ;;  %v1032_v10 = vld [vmem:[%s1114_s24 + $0x50] sm:$0xff]  }
  0x20   : > { %v946_v23 = vpack.c.bf16 %v468_v14, %v467_v9  ;;  %v437_v24 = vadd.f32 %v882_v1, %v341_v15  ;;  %v438_v25 = vadd.f32 %v883_v2, %v342_v16  ;;  %v343_v26 = vadd.f32 %v1130_v11, %v304_v17 }
  0x21   : > { %v344_v27 = vadd.f32 %v1130_v11, %v305_v18  ;;  %v306_v28 = vmul.f32 %v826_v19, %v1119_v0  ;;  %v307_v29 = vmul.f32 %v827_v20, %v1119_v0  ;;  %v891_v30 = vunpack.c.h.bf16 %v1028_v8  ;;  %v1018_v20 = vld [vmem:[%s1108_s21 + $0x58] sm:$0xff]  }
  0x22   : > { %1040 = vst [vmem:[%s1153_s5 + $0x18] sm:$0xff] %v946_v23   ;;  %v469_v32 = vmax.f32 %v437_v24, 0.0  ;;  %v470_v33 = vmax.f32 %v438_v25, 0.0  ;;  %v439_v34 = vadd.f32 %v886_v12, %v343_v26  ;;  %v830_v35 = vunpack.c.l.bf16 %v1014_v22 }
  0x23   : > { %v440_v36 = vadd.f32 %v887_v13, %v344_v27  ;;  %v345_v37 = vadd.f32 %v1130_v11, %v306_v28  ;;  %v346_v38 = vadd.f32 %v1130_v11, %v307_v29  ;;  %v831_v39 = vunpack.c.h.bf16 %v1014_v22  ;;  %v1033_v29 = vld [vmem:[%s1114_s24 + $0x58] sm:$0xff]  }
  0x24   : > { %v951_v41 = vpack.c.bf16 %v470_v33, %v469_v32  ;;  %v471_v42 = vmax.f32 %v439_v34, 0.0  ;;  %v308_v43 = vmul.f32 %v830_v35, %v1119_v0  ;;  %v894_v44 = vunpack.c.l.bf16 %v1029_v31 }
  0x25   : > { %v472_v45 = vmax.f32 %v440_v36, 0.0  ;;  %v441_v46 = vadd.f32 %v890_v21, %v345_v37  ;;  %v442_v47 = vadd.f32 %v891_v30, %v346_v38  ;;  %v309_v48 = vmul.f32 %v831_v39, %v1119_v0  ;;  %v1019_v38 = vld [vmem:[%s1108_s21 + $0x60] sm:$0xff]  }
  0x26   : > { %1041 = vst [vmem:[%s1153_s5 + $0x20] sm:$0xff] %v951_v41   ;;  %v347_v50 = vadd.f32 %v1130_v11, %v308_v43  ;;  %v895_v51 = vunpack.c.h.bf16 %v1029_v31  ;;  %v834_v52 = vunpack.c.l.bf16 %v1015_v40  ;;  %v835_v53 = vunpack.c.h.bf16 %v1015_v40  ;;  %v1034_v43 = vld [vmem:[%s1114_s24 + $0x60] sm:$0xff]  }
  0x27   : > { %v956_v55 = vpack.c.bf16 %v472_v45, %v471_v42  ;;  %v473_v56 = vmax.f32 %v441_v46, 0.0  ;;  %v474_v57 = vmax.f32 %v442_v47, 0.0  ;;  %v348_v58 = vadd.f32 %v1130_v11, %v309_v48 }
  0x28   : > { %v443_v59 = vadd.f32 %v894_v44, %v347_v50  ;;  %v310_v60 = vmul.f32 %v834_v52, %v1119_v0  ;;  %v311_v61 = vmul.f32 %v835_v53, %v1119_v0  ;;  %v898_v62 = vunpack.c.l.bf16 %v1030_v49  ;;  %v1020_v52 = vld [vmem:[%s1108_s21 + $0x68] sm:$0xff]  }
  0x29   : > { %1042 = vst [vmem:[%s1153_s5 + $0x28] sm:$0xff] %v956_v55   ;;  %v961_v1 = vpack.c.bf16 %v474_v57, %v473_v56  ;;  %v444_v2 = vadd.f32 %v895_v51, %v348_v58  ;;  %v899_v3 = vunpack.c.h.bf16 %v1030_v49  ;;  %v838_v4 = vunpack.c.l.bf16 %v1016_v54 }
  0x2a   : > { %v475_v6 = vmax.f32 %v443_v59, 0.0  ;;  %v349_v7 = vadd.f32 %v1130_v11, %v310_v60  ;;  %v350_v8 = vadd.f32 %v1130_v11, %v311_v61  ;;  %v839_v9 = vunpack.c.h.bf16 %v1016_v54  ;;  %v1035_v61 = vld [vmem:[%s1114_s24 + $0x68] sm:$0xff]  }
  0x2b   : > { %1043 = vst [vmem:[%s1153_s5 + $0x30] sm:$0xff] %v961_v1   ;;  %v476_v12 = vmax.f32 %v444_v2, 0.0  ;;  %v312_v13 = vmul.f32 %v838_v4, %v1119_v0  ;;  %v902_v14 = vunpack.c.l.bf16 %v1031_v63  ;;  %v903_v15 = vunpack.c.h.bf16 %v1031_v63 }
  0x2c   : > { %v445_v16 = vadd.f32 %v898_v62, %v349_v7  ;;  %v446_v17 = vadd.f32 %v899_v3, %v350_v8  ;;  %v313_v18 = vmul.f32 %v839_v9, %v1119_v0  ;;  %v842_v19 = vunpack.c.l.bf16 %v1017_v5  ;;  %v1021_v3 = vld [vmem:[%s1108_s21 + $0x70] sm:$0xff]  }
  0x2d   : > { %v966_v21 = vpack.c.bf16 %v476_v12, %v475_v6  ;;  %v351_v22 = vadd.f32 %v1130_v11, %v312_v13  ;;  %v843_v23 = vunpack.c.h.bf16 %v1017_v5  ;;  %v906_v24 = vunpack.c.l.bf16 %v1032_v10  ;;  %v1036_v13 = vld [vmem:[%s1114_s24 + $0x70] sm:$0xff]  }
  0x2e   : > { %v477_v25 = vmax.f32 %v445_v16, 0.0  ;;  %v478_v26 = vmax.f32 %v446_v17, 0.0  ;;  %v352_v27 = vadd.f32 %v1130_v11, %v313_v18  ;;  %v314_v28 = vmul.f32 %v842_v19, %v1119_v0 }
  0x2f   : > { %1044 = vst [vmem:[%s1153_s5 + $0x38] sm:$0xff] %v966_v21   ;;  %v447_v30 = vadd.f32 %v902_v14, %v351_v22  ;;  %v315_v31 = vmul.f32 %v843_v23, %v1119_v0  ;;  %v907_v32 = vunpack.c.h.bf16 %v1032_v10  ;;  %v846_v33 = vunpack.c.l.bf16 %v1018_v20  ;;  %v1022_v22 = vld [vmem:[%s1108_s21 + $0x78] sm:$0xff]  }
  0x30   : > { %v971_v34 = vpack.c.bf16 %v478_v26, %v477_v25  ;;  %v448_v35 = vadd.f32 %v903_v15, %v352_v27  ;;  %v353_v36 = vadd.f32 %v1130_v11, %v314_v28  ;;  %v847_v37 = vunpack.c.h.bf16 %v1018_v20  ;;  %v1037_v27 = vld [vmem:[%s1114_s24 + $0x78] sm:$0xff]  }
  0x31   : > { %v479_v39 = vmax.f32 %v447_v30, 0.0  ;;  %v354_v40 = vadd.f32 %v1130_v11, %v315_v31  ;;  %v316_v41 = vmul.f32 %v846_v33, %v1119_v0  ;;  %v910_v42 = vunpack.c.l.bf16 %v1033_v29 }
  0x32   : > { %1045 = vst [vmem:[%s1153_s5 + $0x40] sm:$0xff] %v971_v34   ;;  %v480_v44 = vmax.f32 %v448_v35, 0.0  ;;  %v449_v45 = vadd.f32 %v906_v24, %v353_v36  ;;  %v317_v46 = vmul.f32 %v847_v37, %v1119_v0  ;;  %v911_v47 = vunpack.c.h.bf16 %v1033_v29 }
  0x33   : > { %v450_v48 = vadd.f32 %v907_v32, %v354_v40  ;;  %v355_v49 = vadd.f32 %v1130_v11, %v316_v41  ;;  %v850_v50 = vunpack.c.l.bf16 %v1019_v38  ;;  %v851_v51 = vunpack.c.h.bf16 %v1019_v38 }
  0x34   : > { %v976_v53 = vpack.c.bf16 %v480_v44, %v479_v39  ;;  %v481_v54 = vmax.f32 %v449_v45, 0.0  ;;  %v356_v55 = vadd.f32 %v1130_v11, %v317_v46  ;;  %v914_v56 = vunpack.c.l.bf16 %v1034_v43 }
  0x35   : > { %v482_v57 = vmax.f32 %v450_v48, 0.0  ;;  %v451_v58 = vadd.f32 %v910_v42, %v355_v49  ;;  %v318_v59 = vmul.f32 %v850_v50, %v1119_v0  ;;  %v319_v60 = vmul.f32 %v851_v51, %v1119_v0 }
  0x36   : > { %1046 = vst [vmem:[%s1153_s5 + $0x48] sm:$0xff] %v976_v53   ;;  %v452_v62 = vadd.f32 %v911_v47, %v356_v55  ;;  %v915_v63 = vunpack.c.h.bf16 %v1034_v43  ;;  %v854_v1 = vunpack.c.l.bf16 %v1020_v52  ;;  %v855_v2 = vunpack.c.h.bf16 %v1020_v52 }
  0x37   : > { %v981_v4 = vpack.c.bf16 %v482_v57, %v481_v54  ;;  %v483_v5 = vmax.f32 %v451_v58, 0.0  ;;  %v357_v6 = vadd.f32 %v1130_v11, %v318_v59  ;;  %v358_v7 = vadd.f32 %v1130_v11, %v319_v60 }
  0x38   : > { %v484_v8 = vmax.f32 %v452_v62, 0.0  ;;  %v320_v9 = vmul.f32 %v854_v1, %v1119_v0  ;;  %v321_v10 = vmul.f32 %v855_v2, %v1119_v0  ;;  %v918_v12 = vunpack.c.l.bf16 %v1035_v61 }
  0x39   : > { %1047 = vst [vmem:[%s1153_s5 + $0x50] sm:$0xff] %v981_v4   ;;  %v453_v14 = vadd.f32 %v914_v56, %v357_v6  ;;  %v454_v15 = vadd.f32 %v915_v63, %v358_v7  ;;  %v919_v16 = vunpack.c.h.bf16 %v1035_v61  ;;  %v858_v17 = vunpack.c.l.bf16 %v1021_v3 }
  0x3a   : > { %v986_v18 = vpack.c.bf16 %v484_v8, %v483_v5  ;;  %v359_v19 = vadd.f32 %v1130_v11, %v320_v9  ;;  %v360_v20 = vadd.f32 %v1130_v11, %v321_v10  ;;  %v859_v21 = vunpack.c.h.bf16 %v1021_v3 }
  0x3b   : > { %v485_v23 = vmax.f32 %v453_v14, 0.0  ;;  %v486_v24 = vmax.f32 %v454_v15, 0.0  ;;  %v322_v25 = vmul.f32 %v858_v17, %v1119_v0  ;;  %v922_v26 = vunpack.c.l.bf16 %v1036_v13 }
  0x3c   : > { %1048 = vst [vmem:[%s1153_s5 + $0x58] sm:$0xff] %v986_v18   ;;  %v455_v28 = vadd.f32 %v918_v12, %v359_v19  ;;  %v456_v29 = vadd.f32 %v919_v16, %v360_v20  ;;  %v323_v30 = vmul.f32 %v859_v21, %v1119_v0  ;;  %v923_v31 = vunpack.c.h.bf16 %v1036_v13 }
  0x3d   : > { %v991_v32 = vpack.c.bf16 %v486_v24, %v485_v23  ;;  %v361_v33 = vadd.f32 %v1130_v11, %v322_v25  ;;  %v862_v34 = vunpack.c.l.bf16 %v1022_v22  ;;  %v863_v35 = vunpack.c.h.bf16 %v1022_v22 }
  0x3e   : > { %v487_v36 = vmax.f32 %v455_v28, 0.0  ;;  %v488_v37 = vmax.f32 %v456_v29, 0.0  ;;  %v362_v38 = vadd.f32 %v1130_v11, %v323_v30  ;;  %v926_v39 = vunpack.c.l.bf16 %v1037_v27 }
  0x3f   : > { %1049 = vst [vmem:[%s1153_s5 + $0x60] sm:$0xff] %v991_v32   ;;  %v457_v40 = vadd.f32 %v922_v26, %v361_v33  ;;  %v324_v41 = vmul.f32 %v862_v34, %v1119_v0  ;;  %v325_v42 = vmul.f32 %v863_v35, %v1119_v0  ;;  %v927_v43 = vunpack.c.h.bf16 %v1037_v27 }
  0x40   : > { %v996_v44 = vpack.c.bf16 %v488_v37, %v487_v36  ;;  %v458_v45 = vadd.f32 %v923_v31, %v362_v38 }
  0x41   : > { %v489_v46 = vmax.f32 %v457_v40, 0.0  ;;  %v363_v47 = vadd.f32 %v1130_v11, %v324_v41  ;;  %v364_v48 = vadd.f32 %v1130_v11, %v325_v42 }
  0x42   : > { %1050 = vst [vmem:[%s1153_s5 + $0x68] sm:$0xff] %v996_v44   ;;  %v490_v49 = vmax.f32 %v458_v45, 0.0 }
  0x43   : > { %v459_v50 = vadd.f32 %v926_v39, %v363_v47  ;;  %v460_v51 = vadd.f32 %v927_v43, %v364_v48 }
  0x44   : > { %v1001_v52 = vpack.c.bf16 %v490_v49, %v489_v46 }
  0x45   : > { %v491_v53 = vmax.f32 %v459_v50, 0.0  ;;  %v492_v54 = vmax.f32 %v460_v51, 0.0 }
  0x46   : > { %1051 = vst [vmem:[%s1153_s5 + $0x70] sm:$0xff] %v1001_v52  }
  0x47   : > { %v1006_v55 = vpack.c.bf16 %v492_v54, %v491_v53 }
  0x49   : > { %1052 = vst [vmem:[%s1153_s5 + $0x78] sm:$0xff] %v1006_v55  }
  0x4a PF: > { %s14_s15 = sadd.s32 1, %s1067_s15  }
  0x4b   : > { %p11_p4 = scmp.ge.s32.totalorder %s14_s15, 4  }
  0x4d   :  { %13 = sbr.rel (!%p11_p4) target bundleno = 1 (0x1), region = 69 }

// kernel: vqvae_forward.18
= control target key start
LH: loop header
LB: loop body
LE: loop exit
PB: predicated region body
PF: predicated region fallthrough
CT: control target
= control target key end

     0   :  { %s662_s12 = smov 0   ;;  %s664_s13 = smov 0   ;;  %s732_s0 = inlined_call_operand.vmem [shape: bf16[128,128], index: 0, kind: input, shape index: {}]   ;;  %s733_s1 = inlined_call_operand.vmem [shape: bf16[128,128], index: 1, kind: input, shape index: {}]   ;;  %s734_s2 = inlined_call_operand.vmem [shape: f32[1,128], index: 2, kind: input, shape index: {}]   ;;  %s735_s3 = inlined_call_operand.vmem [shape: f32[128,128], index: 3, kind: output, shape index: {}]  }
   0x1   :  { %s666_s14 = smov 0  }
   0x2 LB: > { %s25_s15 = sadd.s32 1, %s636_s13  ;;  %p510_p0 = scmp.ge.s32.totalorder %s640_s14, 1  ;;  %s640_s14 = sphi %s666_s14, %s13_s14   ;;  %s636_s13 = sphi %s664_s13, %s737_s13   ;;  %s632_s12 = sphi %s662_s12, %s736_s12  }
   0x3   : > { %p27_p1 = scmp.ge.s32.totalorder %s25_s15, 2  ;;  %p169_p2 = scmp.lt.s32.totalorder %s640_s14, 3 }
   0x5   : > { %s739_s15 = smov (%p27_p1, %s25_s15), 0  ;;  %p170_p3 = pnand %p510_p0, %p169_p2 }
   0x6   : > { %s511_s18 = sshll.u32 (!%p170_p3), %s632_s12, 3 }
   0x7   : > { %173 = sbr.rel (%p170_p3) target bundleno = 247 (0xf7), region = 32  ;;  %p204_p4 = scmp.lt.s32.totalorder (!%p170_p3), %s511_s18, 15 }
   0xc   : > { %v606_v0 = vld [vmem:[%s733_s1 + $0x38] sm:$0xff]   ;;  %v607_v1 = vld [vmem:[%s733_s1 + $0x30] sm:$0xff]   ;;  %s741_s18 = smov (!%p204_p4, %s511_s18), 15  ;;  %v608_v2 = vld [vmem:[%s733_s1 + $0x28] sm:$0xff]  }
   0xd   : > { %542 = vmatprep.subr.bf16.mxu0 %v606_v0  ;;  %566 = vmatprep.subr.bf16.mxu1 %v606_v0  ;;  %s512_s23 = sshll.u32 %s741_s18, 2  ;;  %v609_v3 = vld [vmem:[%s733_s1 + $0x20] sm:$0xff]   ;;  %v610_v6 = vld [vmem:[%s733_s1 + $0x18] sm:$0xff]   ;;  %v611_v7 = vld [vmem:[%s733_s1 + $0x10] sm:$0xff]   ;;  %s514_s10 = sshll.u32 %s741_s18, 3 }
   0xe   : > { %543 = vmatpush3.bf16.msra.mxu0 %v606_v0  ;;  %574 = vmatpush3.bf16.msra.mxu1 %v606_v0  ;;  %s695_s26 = scalar_lea.vmem %s732_s0, %s512_s23  ;;  %v612_v8 = vld [vmem:[%s733_s1 + $0x8] sm:$0xff]   ;;  %v613_v9 = vld [vmem:[%s733_s1] sm:$0xff]   ;;  %s223_s19 = scalar_lea.vmem %s735_s3, %s514_s10 }
   0xf   : > { %544 = vmatprep.subr.bf16.mxu0 %v607_v1  ;;  %567 = vmatprep.subr.bf16.mxu1 %v607_v1  ;;  %v614_v4 = vld [vmem:[%s695_s26] sm:$0xff]   ;;  %v615_v5 = vld [vmem:[%s695_s26 + $0x10] sm:$0xff]   ;;  %v616_v10 = vld [vmem:[%s695_s26 + $0x8] sm:$0xff]  }
  0x10   : > { %558 = vmatprep.mubr.bf16.mxu0 %v614_v4  ;;  %562 = vmatprep.mubr.bf16.mxu1 %v615_v5  ;;  %v617_v11 = vld [vmem:[%s695_s26 + $0x18] sm:$0xff]   ;;  %v515_v12 = vld [vmem:[%s734_s2] ss:$0 sm:$0xff] }
  0x12   : > { %545 = vmatpush3.bf16.msra.mxu0 %v607_v1  ;;  %575 = vmatpush3.bf16.msra.mxu1 %v607_v1 }
  0x13   : > { %546 = vmatprep.subr.bf16.mxu0 %v608_v2  ;;  %568 = vmatprep.subr.bf16.mxu1 %v608_v2 }
  0x16   : > { %547 = vmatpush3.bf16.msra.mxu0 %v608_v2  ;;  %576 = vmatpush3.bf16.msra.mxu1 %v608_v2 }
  0x17   : > { %548 = vmatprep.subr.bf16.mxu0 %v609_v3  ;;  %569 = vmatprep.subr.bf16.mxu1 %v609_v3 }
  0x1a   : > { %549 = vmatpush3.bf16.msra.mxu0 %v609_v3  ;;  %577 = vmatpush3.bf16.msra.mxu1 %v609_v3 }
  0x1b   : > { %550 = vmatprep.subr.bf16.mxu0 %v610_v6  ;;  %570 = vmatprep.subr.bf16.mxu1 %v610_v6 }
  0x1e   : > { %551 = vmatpush3.bf16.msra.mxu0 %v610_v6  ;;  %578 = vmatpush3.bf16.msra.mxu1 %v610_v6 }
  0x1f   : > { %552 = vmatprep.subr.bf16.mxu0 %v611_v7  ;;  %571 = vmatprep.subr.bf16.mxu1 %v611_v7 }
  0x22   : > { %553 = vmatpush3.bf16.msra.mxu0 %v611_v7  ;;  %579 = vmatpush3.bf16.msra.mxu1 %v611_v7 }
  0x23   : > { %554 = vmatprep.subr.bf16.mxu0 %v612_v8  ;;  %572 = vmatprep.subr.bf16.mxu1 %v612_v8 }
  0x26   : > { %555 = vmatpush3.bf16.msra.mxu0 %v612_v8  ;;  %580 = vmatpush3.bf16.msra.mxu1 %v612_v8 }
  0x27   : > { %556 = vmatprep.subr.bf16.mxu0 %v613_v9  ;;  %573 = vmatprep.subr.bf16.mxu1 %v613_v9 }
  0x2a   : > { %557 = vmatpush3.bf16.msra.mxu0 %v613_v9  ;;  %581 = vmatpush3.bf16.msra.mxu1 %v613_v9 }
  0x2d   : > { %559 = vmatmul.mubr.bf16.vlgmr.msra.gmra.mxu0 %v616_v10  ;;  %563 = vmatmul.mubr.bf16.vlgmr.msra.gmra.mxu1 %v617_v11 }
  0xed   : > { %v560_v13 = vpop.f32.mrf.mxu0  ;;  %v564_v14 = vpop.f32.mrf.mxu1 }
  0xee   : > { %v372_v15 = vadd.f32 %v560_v13, %v515_v12  ;;  %v388_v16 = vadd.f32 %v564_v14, %v515_v12 }
  0xef   : > { %v363_v17 = vpop.f32.mrf.mxu0  ;;  %v379_v18 = vpop.f32.mrf.mxu1 }
  0xf0   : > { %396 = vst [vmem:[%s223_s19 + $0x10] sm:$0xff] %v372_v15  ;;  %400 = vst [vmem:[%s223_s19 + $0x30] sm:$0xff] %v388_v16  ;;  %v364_v19 = vadd.f32 %v515_v12, %v363_v17  ;;  %v380_v20 = vadd.f32 %v515_v12, %v379_v18 }
  0xf1   : > { %v561_v21 = vpop.f32.mrf.mxu0  ;;  %v565_v22 = vpop.f32.mrf.mxu1 }
  0xf2   : > { %394 = vst [vmem:[%s223_s19] sm:$0xff] %v364_v19  ;;  %398 = vst [vmem:[%s223_s19 + $0x20] sm:$0xff] %v380_v20  ;;  %v375_v23 = vadd.f32 %v561_v21, %v515_v12  ;;  %v391_v24 = vadd.f32 %v565_v22, %v515_v12 }
  0xf3   : > { %v366_v25 = vpop.f32.mrf.mxu0  ;;  %v382_v26 = vpop.f32.mrf.mxu1 }
  0xf4   : > { %397 = vst [vmem:[%s223_s19 + $0x18] sm:$0xff] %v375_v23  ;;  %401 = vst [vmem:[%s223_s19 + $0x38] sm:$0xff] %v391_v24  ;;  %v367_v27 = vadd.f32 %v515_v12, %v366_v25  ;;  %v383_v28 = vadd.f32 %v515_v12, %v382_v26 }
  0xf6   : > { %395 = vst [vmem:[%s223_s19 + $0x8] sm:$0xff] %v367_v27  ;;  %399 = vst [vmem:[%s223_s19 + $0x28] sm:$0xff] %v383_v28 }
  0xf7 PF: > { %s13_s14 = sadd.s32 1, %s640_s14   ;;  %s736_s12 = smov %s636_s13 }
  0xf8   : > { %p10_p5 = scmp.ge.s32.totalorder %s13_s14, 4   ;;  %s737_s13 = smov %s739_s15 }
  0xfa   :  { %12 = sbr.rel (!%p10_p5) target bundleno = 2 (0x2), region = 68 }

// kernel: vqvae_forward.19
= control target key start
LH: loop header
LB: loop body
LE: loop exit
PB: predicated region body
PF: predicated region fallthrough
CT: control target
= control target key end

     0   :  { %s990_s15 = smov 0   ;;  %s1142_s0 = inlined_call_operand.vmem [shape: f32[128,128], index: 0, kind: input, shape index: {}]   ;;  %s1143_s1 = inlined_call_operand.vmem [shape: f32[128,128], index: 1, kind: input, shape index: {}]   ;;  %s1144_s2 = inlined_call_operand.vmem [shape: f32[1,128], index: 2, kind: input, shape index: {}]   ;;  %s1145_s3 = inlined_call_operand.vmem [shape: s32[128,1], index: 3, kind: output, shape index: {0}]   ;;  %s1146_s4 = inlined_call_operand.vmem [shape: f32[128,128], index: 4, kind: output, shape index: {1}]  }
   0x1 LB: > { %s781_s16 = sadd.s32 4294967295, %s962_s15   ;;  %p785_p0 = scmp.ge.s32.totalorder %s962_s15, 1  ;;  %s962_s15 = sphi %s990_s15, %s15_s15  }
   0x2   : > { %p166_p1 = scmp.lt.s32.totalorder %s962_s15, 3 }
   0x4   : > { %p167_p2 = pnand %p785_p0, %p166_p1 }
   0x5   : > { %s786_s21 = sshll.u32 (!%p167_p2), %s781_s16, 3 }
   0x6   : > { %170 = sbr.rel (%p167_p2) target bundleno = 913 (0x391), region = 32  ;;  %p198_p3 = scmp.lt.s32.totalorder (!%p167_p2), %s786_s21, 15 }
   0xb   : > { %v238_v0 = vld [vmem:[%s1143_s1 + $0x78] sm:$0xff]  ;;  %v237_v1 = vld [vmem:[%s1143_s1 + $0x70] sm:$0xff]  ;;  %s1148_s21 = smov (!%p198_p3, %s786_s21), 15  ;;  %v236_v2 = vld [vmem:[%s1143_s1 + $0x68] sm:$0xff] }
   0xc   : > { %859 = vmatprep.subr.mxu0 %v238_v0  ;;  %903 = vmatprep.subr.mxu1 %v238_v0  ;;  %s1007_s24 = sshll.u32 %s1148_s21, 3  ;;  %v235_v3 = vld [vmem:[%s1143_s1 + $0x60] sm:$0xff]  ;;  %v234_v6 = vld [vmem:[%s1143_s1 + $0x58] sm:$0xff]  ;;  %v233_v13 = vld [vmem:[%s1143_s1 + $0x50] sm:$0xff] }
   0xd   : > { %860 = vmatpush3.xpose.msra.mxu0 %v238_v0  ;;  %904 = vmatpush3.msra.mxu1 %v238_v0  ;;  %s1016_s29 = scalar_lea.vmem %s1142_s0, %s1007_s24  ;;  %v232_v18 = vld [vmem:[%s1143_s1 + $0x48] sm:$0xff]  ;;  %v231_v23 = vld [vmem:[%s1143_s1 + $0x40] sm:$0xff]  ;;  %v230_v24 = vld [vmem:[%s1143_s1 + $0x38] sm:$0xff]  ;;  %s1109_s8 = scalar_lea.vmem %s1145_s3, %s1007_s24 }
   0xe   : > { %861 = vmatprep.subr.mxu0 %v237_v1  ;;  %905 = vmatprep.subr.mxu1 %v237_v1  ;;  %v215_v4 = vld [vmem:[%s1016_s29] sm:$0xff]  ;;  %v1020_v5 = vld [vmem:[%s1016_s29 + $0x10] sm:$0xff]  ;;  %v1028_v9 = vld [vmem:[%s1016_s29 + $0x8] sm:$0xff]  ;;  %s213_s11 = scalar_lea.vmem %s1146_s4, %s1007_s24 }
   0xf   : > { %906 = vmatpush3.msra.mxu1 %v237_v1  ;;  %891 = vmatprep.mubr.f32.mxu0 %v215_v4  ;;  %v239_v7 = vmul.f32 %v215_v4, %v215_v4  ;;  %v241_v8 = vmul.f32 %v1020_v5, %v1020_v5  ;;  %v1031_v10 = vld [vmem:[%s1016_s29 + $0x18] sm:$0xff]  ;;  %v240_v11 = vmul.f32 %v1028_v9, %v1028_v9  ;;  %v1041_v14 = vld [vmem:[%s1016_s29 + $0x20] sm:$0xff]  ;;  %v1044_v15 = vld [vmem:[%s1016_s29 + $0x28] sm:$0xff] }
  0x10   : > { %907 = vmatprep.subr.mxu1 %v236_v2  ;;  %v242_v12 = vmul.f32 %v1031_v10, %v1031_v10  ;;  %v243_v16 = vmul.f32 %v1041_v14, %v1041_v14  ;;  %v244_v17 = vmul.f32 %v1044_v15, %v1044_v15  ;;  %v1054_v19 = vld [vmem:[%s1016_s29 + $0x30] sm:$0xff]  ;;  %v222_v20 = vld [vmem:[%s1016_s29 + $0x38] sm:$0xff]  ;;  %v228_v26 = vld [vmem:[%s1143_s1 + $0x28] sm:$0xff] }
  0x11   : > { %862 = vmatpush3.xpose.msra.mxu0 %v237_v1  ;;  %908 = vmatpush3.msra.mxu1 %v236_v2  ;;  %v245_v21 = vmul.f32 %v1054_v19, %v1054_v19  ;;  %v246_v22 = vmul.f32 %v222_v20, %v222_v20  ;;  %v229_v25 = vld [vmem:[%s1143_s1 + $0x30] sm:$0xff]  ;;  %v227_v27 = vld [vmem:[%s1143_s1 + $0x20] sm:$0xff]  ;;  %v226_v28 = vld [vmem:[%s1143_s1 + $0x18] sm:$0xff] }
  0x12   : > { %863 = vmatprep.subr.mxu0 %v236_v2  ;;  %909 = vmatprep.subr.mxu1 %v235_v3  ;;  %v225_v29 = vld [vmem:[%s1143_s1 + $0x10] sm:$0xff]  ;;  %v224_v30 = vld [vmem:[%s1143_s1 + $0x8] sm:$0xff]  ;;  %v223_v31 = vld [vmem:[%s1143_s1] sm:$0xff] }
  0x13   : > { %910 = vmatpush3.msra.mxu1 %v235_v3  ;;  %247 = vadd.xlane.f32.xlu0 %v239_v7  ;;  %v792_v39 = vld [vmem:[%s1144_s2] ss:$0 sm:$0xff] }
  0x14   : > { %911 = vmatprep.subr.mxu1 %v234_v6  ;;  %251 = vadd.xlane.f32.xlu1 %v241_v8 }
  0x15   : > { %864 = vmatpush3.xpose.msra.mxu0 %v236_v2  ;;  %912 = vmatpush3.msra.mxu1 %v234_v6 }
  0x16   : > { %865 = vmatprep.subr.mxu0 %v235_v3  ;;  %913 = vmatprep.subr.mxu1 %v233_v13 }
  0x17   : > { %249 = vadd.xlane.f32.xlu0 %v240_v11  ;;  %914 = vmatpush3.msra.mxu1 %v233_v13 }
  0x18   : > { %253 = vadd.xlane.f32.xlu1 %v242_v12  ;;  %915 = vmatprep.subr.mxu1 %v232_v18 }
  0x19   : > { %866 = vmatpush3.xpose.msra.mxu0 %v235_v3  ;;  %916 = vmatpush3.msra.mxu1 %v232_v18 }
  0x1a   : > { %867 = vmatprep.subr.mxu0 %v234_v6  ;;  %917 = vmatprep.subr.mxu1 %v231_v23 }
  0x1b   : > { %255 = vadd.xlane.f32.xlu0 %v243_v16  ;;  %918 = vmatpush3.msra.mxu1 %v231_v23 }
  0x1c   : > { %257 = vadd.xlane.f32.xlu1 %v244_v17  ;;  %919 = vmatprep.subr.mxu1 %v230_v24 }
  0x1d   : > { %868 = vmatpush3.xpose.msra.mxu0 %v234_v6  ;;  %920 = vmatpush3.msra.mxu1 %v230_v24 }
  0x1e   : > { %869 = vmatprep.subr.mxu0 %v233_v13  ;;  %921 = vmatprep.subr.mxu1 %v229_v25 }
  0x1f   : > { %259 = vadd.xlane.f32.xlu0 %v245_v21  ;;  %922 = vmatpush3.msra.mxu1 %v229_v25 }
  0x20   : > { %261 = vadd.xlane.f32.xlu1 %v246_v22  ;;  %923 = vmatprep.subr.mxu1 %v228_v26 }
  0x21   : > { %870 = vmatpush3.xpose.msra.mxu0 %v233_v13  ;;  %924 = vmatpush3.msra.mxu1 %v228_v26 }
  0x22   : > { %871 = vmatprep.subr.mxu0 %v232_v18  ;;  %925 = vmatprep.subr.mxu1 %v227_v27 }
  0x23   : > { %926 = vmatpush3.msra.mxu1 %v227_v27 }
  0x24   : > { %927 = vmatprep.subr.mxu1 %v226_v28 }
  0x25   : > { %872 = vmatpush3.xpose.msra.mxu0 %v232_v18  ;;  %928 = vmatpush3.msra.mxu1 %v226_v28 }
  0x26   : > { %873 = vmatprep.subr.mxu0 %v231_v23  ;;  %929 = vmatprep.subr.mxu1 %v225_v29 }
  0x27   : > { %930 = vmatpush3.msra.mxu1 %v225_v29 }
  0x28   : > { %931 = vmatprep.subr.mxu1 %v224_v30 }
  0x29   : > { %874 = vmatpush3.xpose.msra.mxu0 %v231_v23  ;;  %932 = vmatpush3.msra.mxu1 %v224_v30 }
  0x2a   : > { %875 = vmatprep.subr.mxu0 %v230_v24  ;;  %933 = vmatprep.subr.mxu1 %v223_v31 }
  0x2b   : > { %934 = vmatpush3.msra.mxu1 %v223_v31 }
  0x2d   : > { %876 = vmatpush3.xpose.msra.mxu0 %v230_v24 }
  0x2e   : > { %877 = vmatprep.subr.mxu0 %v229_v25 }
  0x31   : > { %878 = vmatpush3.xpose.msra.mxu0 %v229_v25 }
  0x32   : > { %879 = vmatprep.subr.mxu0 %v228_v26 }
  0x35   : > { %880 = vmatpush3.xpose.msra.mxu0 %v228_v26 }
  0x36   : > { %881 = vmatprep.subr.mxu0 %v227_v27 }
  0x39   : > { %882 = vmatpush3.xpose.msra.mxu0 %v227_v27 }
  0x3a   : > { %883 = vmatprep.subr.mxu0 %v226_v28 }
  0x3d   : > { %884 = vmatpush3.xpose.msra.mxu0 %v226_v28 }
  0x3e   : > { %885 = vmatprep.subr.mxu0 %v225_v29 }
  0x41   : > { %886 = vmatpush3.xpose.msra.mxu0 %v225_v29 }
  0x42   : > { %887 = vmatprep.subr.mxu0 %v224_v30 }
  0x45   : > { %888 = vmatpush3.xpose.msra.mxu0 %v224_v30 }
  0x46   : > { %889 = vmatprep.subr.mxu0 %v223_v31 }
  0x49   : > { %890 = vmatpush3.xpose.msra.mxu0 %v223_v31 }
  0x4c   : > { %892 = vmatmul.mubr.f32.vlgmr.msra.gmra.mxu0 %v1028_v9  ;;  %v415_v9 = vlaneseq }
  0x4d   : > { %894 = vmatprep.mubr.f32.mxu0 %v1020_v5 }
  0x50   : > { %895 = vmatmul.mubr.f32.gmra.mxu0 %v1031_v10  ;;  %v1095_v10 = vand.u32 127, %v415_v9 }
  0x51   : > { %897 = vmatprep.mubr.f32.mxu0 %v1041_v14 }
  0x54   : > { %898 = vmatmul.mubr.f32.gmra.mxu0 %v1044_v15 }
  0x55   : > { %900 = vmatprep.mubr.f32.mxu0 %v1054_v19 }
  0x58   : > { %901 = vmatmul.mubr.f32.gmra.mxu0 %v222_v20 }
  0x9c   : > { %v248_v32 = vpop.xlane.xlu0 %247 }
  0x9d   : > { %v252_v33 = vpop.xlane.xlu1 %251 }
  0xa0   : > { %v250_v34 = vpop.xlane.xlu0 %249 }
  0xa1   : > { %v254_v36 = vpop.xlane.xlu1 %253 }
  0xa4   : > { %v256_v52 = vpop.xlane.xlu0 %255 }
  0xa5   : > { %v258_v47 = vpop.xlane.xlu1 %257 }
  0xa8   : > { %v260_v2 = vpop.xlane.xlu0 %259 }
  0xa9   : > { %v262_v61 = vpop.xlane.xlu1 %261 }
 0x10c   : > { %v893_v35 = vpop.f32.mrf.mxu0 }
 0x10d   : > { %v369_v37 = vmul.f32 2.0, %v893_v35 }
 0x10e   : > { %v329_v38 = vpop.f32.mrf.mxu0 }
 0x10f   : > { %v368_v40 = vmul.f32 2.0, %v329_v38  ;;  %v377_v41 = vsub.f32 %v250_v34, %v369_v37 }
 0x110   : > { %v896_v42 = vpop.f32.mrf.mxu0 }
 0x111   : > { %v376_v43 = vsub.f32 %v248_v32, %v368_v40  ;;  %v371_v44 = vmul.f32 2.0, %v896_v42  ;;  %v392_v45 = vadd.f32 %v792_v39, %v377_v41 }
 0x112   : > { %v339_v46 = vpop.f32.mrf.mxu0 }
 0x113   : > { %v379_v48 = vsub.f32 %v254_v36, %v371_v44  ;;  %v370_v49 = vmul.f32 2.0, %v339_v46  ;;  %401 = vmin.xlane.f32.xlu1 %v392_v45  ;;  %v391_v50 = vadd.f32 %v792_v39, %v376_v43 }
 0x114   : > { %v899_v51 = vpop.f32.mrf.mxu0 }
 0x115   : > { %v378_v53 = vsub.f32 %v252_v33, %v370_v49  ;;  %v373_v54 = vmul.f32 2.0, %v899_v51  ;;  %399 = vmin.xlane.f32.xlu0 %v391_v50  ;;  %v394_v55 = vadd.f32 %v792_v39, %v379_v48 }
 0x116   : > { %v349_v56 = vpop.f32.mrf.mxu0 }
 0x117   : > { %v381_v57 = vsub.f32 %v258_v47, %v373_v54  ;;  %v372_v58 = vmul.f32 2.0, %v349_v56  ;;  %405 = vmin.xlane.f32.xlu1 %v394_v55  ;;  %v393_v59 = vadd.f32 %v792_v39, %v378_v53 }
 0x118   : > { %v902_v60 = vpop.f32.mrf.mxu0 }
 0x119   : > { %v375_v62 = vmul.f32 2.0, %v902_v60  ;;  %v380_v63 = vsub.f32 %v256_v52, %v372_v58  ;;  %403 = vmin.xlane.f32.xlu0 %v393_v59  ;;  %v396_v0 = vadd.f32 %v792_v39, %v381_v57 }
 0x11a   : > { %v359_v1 = vpop.f32.mrf.mxu0 }
 0x11b   : > { %v383_v3 = vsub.f32 %v262_v61, %v375_v62  ;;  %v374_v4 = vmul.f32 2.0, %v359_v1  ;;  %409 = vmin.xlane.f32.xlu1 %v396_v0  ;;  %v395_v5 = vadd.f32 %v792_v39, %v380_v63 }
 0x11d   : > { %v382_v6 = vsub.f32 %v260_v2, %v374_v4  ;;  %407 = vmin.xlane.f32.xlu0 %v395_v5  ;;  %v398_v7 = vadd.f32 %v792_v39, %v383_v3 }
 0x11f   : > { %413 = vmin.xlane.f32.xlu1 %v398_v7  ;;  %v397_v8 = vadd.f32 %v792_v39, %v382_v6 }
 0x121   : > { %411 = vmin.xlane.f32.xlu0 %v397_v8 }
 0x19c   : > { %v402_v11 = vpop.xlane.xlu1 %401 }
 0x19d   : > { %vm418_vm0 = vcmp.le.f32.partialorder %v392_v45, %v402_v11 }
 0x19e   : > { %v426_v12 = vsel %vm418_vm0, %v1095_v10, 128  ;;  %v400_v13 = vpop.xlane.xlu0 %399  ;;  %vm545_vm0 = vcmask 7168  }
 0x19f   : > { %vm417_vm1 = vcmp.le.f32.partialorder %v391_v50, %v400_v13  ;;  %v448_v14 = vshra.s32 %v426_v12, 16  ;;  %v447_v43 = vand.u32 65535, %v426_v12 }
 0x1a0   : > { %v425_v15 = vsel %vm417_vm1, %v1095_v10, 128  ;;  %v406_v16 = vpop.xlane.xlu1 %405 }
 0x1a1   : > { %vm420_vm2 = vcmp.le.f32.partialorder %v394_v55, %v406_v16  ;;  %v450_v17 = vcvt.s32.f32 %v448_v14  ;;  %v434_v18 = vshra.s32 %v425_v15, 16  ;;  %v433_v44 = vand.u32 65535, %v425_v15 }
 0x1a2   : > { %v428_v19 = vsel %vm420_vm2, %v1095_v10, 128  ;;  %v404_v20 = vpop.xlane.xlu0 %403  ;;  %v449_v47 = vcvt.s32.f32 %v447_v43 }
 0x1a3   : > { %vm419_vm3 = vcmp.le.f32.partialorder %v393_v59, %v404_v20  ;;  %451 = vmin.xlane.f32.xlu1 %v450_v17  ;;  %v436_v21 = vcvt.s32.f32 %v434_v18  ;;  %v476_v22 = vshra.s32 %v428_v19, 16  ;;  %v475_v45 = vand.u32 65535, %v428_v19 }
 0x1a4   : > { %v427_v23 = vsel %vm419_vm3, %v1095_v10, 128  ;;  %v410_v24 = vpop.xlane.xlu1 %409  ;;  %v435_v51 = vcvt.s32.f32 %v433_v44 }
 0x1a5   : > { %vm422_vm4 = vcmp.le.f32.partialorder %v396_v0, %v410_v24  ;;  %437 = vmin.xlane.f32.xlu0 %v436_v21  ;;  %v478_v25 = vcvt.s32.f32 %v476_v22  ;;  %v462_v26 = vshra.s32 %v427_v23, 16  ;;  %v461_v48 = vand.u32 65535, %v427_v23 }
 0x1a6   : > { %v430_v27 = vsel %vm422_vm4, %v1095_v10, 128  ;;  %v408_v28 = vpop.xlane.xlu0 %407  ;;  %v477_v55 = vcvt.s32.f32 %v475_v45 }
 0x1a7   : > { %vm421_vm5 = vcmp.le.f32.partialorder %v395_v5, %v408_v28  ;;  %479 = vmin.xlane.f32.xlu1 %v478_v25  ;;  %v464_v29 = vcvt.s32.f32 %v462_v26  ;;  %v504_v30 = vshra.s32 %v430_v27, 16  ;;  %v503_v52 = vand.u32 65535, %v430_v27 }
 0x1a8   : > { %v429_v31 = vsel %vm421_vm5, %v1095_v10, 128  ;;  %v414_v32 = vpop.xlane.xlu1 %413  ;;  %v463_v59 = vcvt.s32.f32 %v461_v48 }
 0x1a9   : > { %vm424_vm6 = vcmp.le.f32.partialorder %v398_v7, %v414_v32  ;;  %465 = vmin.xlane.f32.xlu0 %v464_v29  ;;  %v506_v33 = vcvt.s32.f32 %v504_v30  ;;  %v490_v34 = vshra.s32 %v429_v31, 16  ;;  %v489_v56 = vand.u32 65535, %v429_v31 }
 0x1aa   : > { %v432_v35 = vsel %vm424_vm6, %v1095_v10, 128  ;;  %v412_v36 = vpop.xlane.xlu0 %411  ;;  %v505_v63 = vcvt.s32.f32 %v503_v52 }
 0x1ab   : > { %vm423_vm7 = vcmp.le.f32.partialorder %v397_v8, %v412_v36  ;;  %507 = vmin.xlane.f32.xlu1 %v506_v33  ;;  %v492_v37 = vcvt.s32.f32 %v490_v34  ;;  %v532_v38 = vshra.s32 %v432_v35, 16  ;;  %v531_v60 = vand.u32 65535, %v432_v35 }
 0x1ac   : > { %v431_v39 = vsel %vm423_vm7, %v1095_v10, 128  ;;  %v491_v3 = vcvt.s32.f32 %v489_v56  ;;  %v964_v34 = vmov 1.0  }
 0x1ad   : > { %493 = vmin.xlane.f32.xlu0 %v492_v37  ;;  %v534_v40 = vcvt.s32.f32 %v532_v38  ;;  %v518_v41 = vshra.s32 %v431_v39, 16  ;;  %v517_v0 = vand.u32 65535, %v431_v39  ;;  %v533_v6 = vcvt.s32.f32 %v531_v60 }
 0x1af   : > { %535 = vmin.xlane.f32.xlu1 %v534_v40  ;;  %v520_v42 = vcvt.s32.f32 %v518_v41  ;;  %v519_v9 = vcvt.s32.f32 %v517_v0 }
 0x1b1   : > { %521 = vmin.xlane.f32.xlu0 %v520_v42 }
 0x22c   : > { %v452_v46 = vpop.xlane.xlu1 %451 }
 0x22d   : > { %vm453_vm8 = vcmp.eq.f32.partialorder %v450_v17, %v452_v46  ;;  %v458_v12 = vcvt.f32.s32 %v452_v46 }
 0x22e   : > { %v438_v49 = vpop.xlane.xlu0 %437  ;;  %v454_v50 = vsel %vm453_vm8, %v449_v47, inf }
 0x22f   : > { %455 = vmin.xlane.f32.xlu1 %v454_v50  ;;  %vm439_vm9 = vcmp.eq.f32.partialorder %v436_v21, %v438_v49  ;;  %v444_v13 = vcvt.f32.s32 %v438_v49  ;;  %v459_v16 = vshll.u32 %v458_v12, 16 }
 0x230   : > { %v480_v53 = vpop.xlane.xlu1 %479  ;;  %v440_v54 = vsel %vm439_vm9, %v435_v51, inf }
 0x231   : > { %441 = vmin.xlane.f32.xlu0 %v440_v54  ;;  %vm481_vm10 = vcmp.eq.f32.partialorder %v478_v25, %v480_v53  ;;  %v486_v14 = vcvt.f32.s32 %v480_v53  ;;  %v445_v19 = vshll.u32 %v444_v13, 16 }
 0x232   : > { %v466_v57 = vpop.xlane.xlu0 %465  ;;  %v482_v58 = vsel %vm481_vm10, %v477_v55, inf }
 0x233   : > { %483 = vmin.xlane.f32.xlu1 %v482_v58  ;;  %vm467_vm11 = vcmp.eq.f32.partialorder %v464_v29, %v466_v57  ;;  %v472_v20 = vcvt.f32.s32 %v466_v57  ;;  %v487_v23 = vshll.u32 %v486_v14, 16 }
 0x234   : > { %v508_v61 = vpop.xlane.xlu1 %507  ;;  %v468_v62 = vsel %vm467_vm11, %v463_v59, inf }
 0x235   : > { %469 = vmin.xlane.f32.xlu0 %v468_v62  ;;  %vm509_vm12 = vcmp.eq.f32.partialorder %v506_v33, %v508_v61  ;;  %v514_v25 = vcvt.f32.s32 %v508_v61  ;;  %v473_v30 = vshll.u32 %v472_v20, 16 }
 0x236   : > { %v494_v1 = vpop.xlane.xlu0 %493  ;;  %v510_v2 = vsel %vm509_vm12, %v505_v63, inf }
 0x237   : > { %511 = vmin.xlane.f32.xlu1 %v510_v2  ;;  %vm495_vm13 = vcmp.eq.f32.partialorder %v492_v37, %v494_v1  ;;  %v500_v28 = vcvt.f32.s32 %v494_v1  ;;  %v515_v35 = vshll.u32 %v514_v25, 16 }
 0x238   : > { %v536_v4 = vpop.xlane.xlu1 %535  ;;  %v496_v5 = vsel %vm495_vm13, %v491_v3, inf }
 0x239   : > { %497 = vmin.xlane.f32.xlu0 %v496_v5  ;;  %vm537_vm14 = vcmp.eq.f32.partialorder %v534_v40, %v536_v4  ;;  %v542_v36 = vcvt.f32.s32 %v536_v4  ;;  %v501_v39 = vshll.u32 %v500_v28, 16 }
 0x23a   : > { %v522_v7 = vpop.xlane.xlu0 %521  ;;  %v538_v8 = vsel %vm537_vm14, %v533_v6, inf }
 0x23b   : > { %539 = vmin.xlane.f32.xlu1 %v538_v8  ;;  %vm523_vm15 = vcmp.eq.f32.partialorder %v520_v42, %v522_v7  ;;  %v528_v41 = vcvt.f32.s32 %v522_v7  ;;  %v543_v45 = vshll.u32 %v542_v36, 16 }
 0x23c   : > { %v524_v11 = vsel %vm523_vm15, %v519_v9, inf }
 0x23d   : > { %525 = vmin.xlane.f32.xlu0 %v524_v11  ;;  %v529_v49 = vshll.u32 %v528_v41, 16 }
 0x2b8   : > { %v456_v15 = vpop.xlane.xlu1 %455 }
 0x2b9   : > { %v457_v17 = vcvt.f32.s32 %v456_v15 }
 0x2ba   : > { %v442_v18 = vpop.xlane.xlu0 %441 }
 0x2bb   : > { %v460_v21 = vadd.s32 %v459_v16, %v457_v17  ;;  %v443_v22 = vcvt.f32.s32 %v442_v18 }
 0x2bc   : > { %v484_v24 = vpop.xlane.xlu1 %483 }
 0x2bd   : > { %547 = vst.msk [vmem:[%s1109_s8 + $0x8] sm:$0xff] %vm545_vm0, %v460_v21  ;;  %v485_v26 = vcvt.f32.s32 %v484_v24  ;;  %v446_v27 = vadd.s32 %v445_v19, %v443_v22  ;;  %vm555_vm2 = vcmp.eq.s32.totalorder %v1095_v10, %v460_v21 }
 0x2be   : > { %v470_v29 = vpop.xlane.xlu0 %469 }
 0x2bf   : > { %v488_v31 = vadd.s32 %v487_v23, %v485_v26  ;;  %v471_v32 = vcvt.f32.s32 %v470_v29  ;;  %546 = vst.msk [vmem:[%s1109_s8] sm:$0xff] %vm545_vm0, %v446_v27  ;;  %vm554_vm1 = vcmp.eq.s32.totalorder %v1095_v10, %v446_v27 }
 0x2c0   : > { %v512_v33 = vpop.xlane.xlu1 %511  ;;  %935 = vmatprep.mubr.msk.f32.mxu1 %vm554_vm1, %v964_v34 }
 0x2c1   : > { %549 = vst.msk [vmem:[%s1109_s8 + $0x18] sm:$0xff] %vm545_vm0, %v488_v31  ;;  %v474_v37 = vadd.s32 %v473_v30, %v471_v32  ;;  %v513_v38 = vcvt.f32.s32 %v512_v33  ;;  %936 = vmatmul.mubr.msk.f32.vlgmr.msra.gmra.mxu1 %vm555_vm2, %v964_v34  ;;  %vm557_vm4 = vcmp.eq.s32.totalorder %v1095_v10, %v488_v31 }
 0x2c2   : > { %v498_v40 = vpop.xlane.xlu0 %497 }
 0x2c3   : > { %548 = vst.msk [vmem:[%s1109_s8 + $0x10] sm:$0xff] %vm545_vm0, %v474_v37  ;;  %v516_v42 = vadd.s32 %v515_v35, %v513_v38  ;;  %v499_v43 = vcvt.f32.s32 %v498_v40  ;;  %vm556_vm3 = vcmp.eq.s32.totalorder %v1095_v10, %v474_v37 }
 0x2c4   : > { %v540_v44 = vpop.xlane.xlu1 %539  ;;  %938 = vmatprep.mubr.msk.f32.mxu1 %vm556_vm3, %v964_v34 }
 0x2c5   : > { %551 = vst.msk [vmem:[%s1109_s8 + $0x28] sm:$0xff] %vm545_vm0, %v516_v42  ;;  %v502_v46 = vadd.s32 %v501_v39, %v499_v43  ;;  %v541_v47 = vcvt.f32.s32 %v540_v44  ;;  %939 = vmatmul.mubr.msk.f32.gmra.mxu1 %vm557_vm4, %v964_v34  ;;  %vm559_vm6 = vcmp.eq.s32.totalorder %v1095_v10, %v516_v42 }
 0x2c6   : > { %v526_v48 = vpop.xlane.xlu0 %525 }
 0x2c7   : > { %550 = vst.msk [vmem:[%s1109_s8 + $0x20] sm:$0xff] %vm545_vm0, %v502_v46  ;;  %v544_v50 = vadd.s32 %v543_v45, %v541_v47  ;;  %v527_v51 = vcvt.f32.s32 %v526_v48  ;;  %vm558_vm5 = vcmp.eq.s32.totalorder %v1095_v10, %v502_v46 }
 0x2c8   : > { %941 = vmatprep.mubr.msk.f32.mxu1 %vm558_vm5, %v964_v34 }
 0x2c9   : > { %553 = vst.msk [vmem:[%s1109_s8 + $0x38] sm:$0xff] %vm545_vm0, %v544_v50  ;;  %v530_v52 = vadd.s32 %v529_v49, %v527_v51  ;;  %942 = vmatmul.mubr.msk.f32.gmra.mxu1 %vm559_vm6, %v964_v34  ;;  %vm561_vm8 = vcmp.eq.s32.totalorder %v1095_v10, %v544_v50 }
 0x2cb   : > { %552 = vst.msk [vmem:[%s1109_s8 + $0x30] sm:$0xff] %vm545_vm0, %v530_v52  ;;  %vm560_vm7 = vcmp.eq.s32.totalorder %v1095_v10, %v530_v52 }
 0x2cc   : > { %944 = vmatprep.mubr.msk.f32.mxu1 %vm560_vm7, %v964_v34 }
 0x2cd   : > { %945 = vmatmul.mubr.msk.f32.gmra.mxu1 %vm561_vm8, %v964_v34 }
 0x381   : > { %v937_v53 = vpop.f32.mrf.mxu1 }
 0x382   : > { %684 = vst [vmem:[%s213_s11 + $0x8] sm:$0xff] %v937_v53 }
 0x383   : > { %v644_v54 = vpop.f32.mrf.mxu1 }
 0x384   : > { %683 = vst [vmem:[%s213_s11] sm:$0xff] %v644_v54 }
 0x385   : > { %v940_v55 = vpop.f32.mrf.mxu1 }
 0x386   : > { %686 = vst [vmem:[%s213_s11 + $0x18] sm:$0xff] %v940_v55 }
 0x387   : > { %v654_v56 = vpop.f32.mrf.mxu1 }
 0x388   : > { %685 = vst [vmem:[%s213_s11 + $0x10] sm:$0xff] %v654_v56 }
 0x389   : > { %v943_v57 = vpop.f32.mrf.mxu1 }
 0x38a   : > { %688 = vst [vmem:[%s213_s11 + $0x28] sm:$0xff] %v943_v57 }
 0x38b   : > { %v664_v58 = vpop.f32.mrf.mxu1 }
 0x38c   : > { %687 = vst [vmem:[%s213_s11 + $0x20] sm:$0xff] %v664_v58 }
 0x38d   : > { %v946_v59 = vpop.f32.mrf.mxu1 }
 0x38e   : > { %690 = vst [vmem:[%s213_s11 + $0x38] sm:$0xff] %v946_v59 }
 0x38f   : > { %v674_v10 = vpop.f32.mrf.mxu1 }
 0x390   : > { %689 = vst [vmem:[%s213_s11 + $0x30] sm:$0xff] %v674_v10 }
 0x391 PF: > { %s15_s15 = sadd.s32 1, %s962_s15  }
 0x392   : > { %p12_p4 = scmp.ge.s32.totalorder %s15_s15, 4  }
 0x394   :  { %14 = sbr.rel (!%p12_p4) target bundleno = 1 (0x1), region = 74 }

// kernel: vqvae_forward.17
= control target key start
LH: loop header
LB: loop body
LE: loop exit
PB: predicated region body
PF: predicated region fallthrough
CT: control target
= control target key end

     0   :  { %s3077_s12 = smov 0   ;;  %s3079_s13 = smov 0   ;;  %s3732_s0 = inlined_call_operand.vmem [shape: bf16[128,2048], index: 0, kind: input, shape index: {}]   ;;  %s3733_s1 = inlined_call_operand.vmem [shape: bf16[2048,128], index: 1, kind: input, shape index: {}]   ;;  %s3734_s2 = inlined_call_operand.vmem [shape: f32[1,128], index: 2, kind: input, shape index: {}]   ;;  %s3735_s3 = inlined_call_operand.vmem [shape: bf16[128,128], index: 3, kind: output, shape index: {}]  }
   0x1   :  { %s3081_s14 = smov 0  }
   0x2 LB: > { %s25_s15 = sadd.s32 1, %s3051_s13  ;;  %p2320_p0 = scmp.ge.s32.totalorder %s3055_s14, 1  ;;  %s3055_s14 = sphi %s3081_s14, %s13_s14   ;;  %s3051_s13 = sphi %s3079_s13, %s3769_s13   ;;  %s3047_s12 = sphi %s3077_s12, %s3768_s12  }
   0x3   : > { %p27_p1 = scmp.ge.s32.totalorder %s25_s15, 2  ;;  %p170_p2 = scmp.lt.s32.totalorder %s3055_s14, 3 }
   0x5   : > { %s3771_s15 = smov (%p27_p1, %s25_s15), 0  ;;  %p171_p3 = pnand %p2320_p0, %p170_p2 }
   0x7   : > { %174 = sbr.rel (%p171_p3) target bundleno = 376 (0x178), region = 32 }
   0xc   : > { %v2905_v0 = vld [vmem:[%s3733_s1 + $0x78] sm:$0xff]   ;;  %v2909_v4 = vld [vmem:[%s3733_s1 + $0x70] sm:$0xff]   ;;  %v2913_v8 = vld [vmem:[%s3733_s1 + $0x68] sm:$0xff]   ;;  %s2321_s25 = sshll.u32 %s3047_s12, 3 }
   0xd   : > { %v2906_v1 = vld [vmem:[%s3733_s1 + $0xf8] sm:$0xff]   ;;  %2561 = vmatprep.subr.bf16.mxu0 %v2905_v0  ;;  %v2910_v5 = vld [vmem:[%s3733_s1 + $0xf0] sm:$0xff]   ;;  %v2914_v9 = vld [vmem:[%s3733_s1 + $0xe8] sm:$0xff]   ;;  %p206_p4 = scmp.lt.s32.totalorder %s2321_s25, 15 }
   0xe   : > { %v2907_v2 = vld [vmem:[%s3733_s1 + $0x38] sm:$0xff]   ;;  %2601 = vmatprep.subr.bf16.mxu1 %v2906_v1  ;;  %v2911_v6 = vld [vmem:[%s3733_s1 + $0x30] sm:$0xff]   ;;  %v2915_v10 = vld [vmem:[%s3733_s1 + $0x28] sm:$0xff]  }
   0xf   : > { %v2908_v3 = vld [vmem:[%s3733_s1 + $0xb8] sm:$0xff]   ;;  %2562 = vmatpush3.bf16.msra.mxu0 %v2907_v2  ;;  %v2912_v7 = vld [vmem:[%s3733_s1 + $0xb0] sm:$0xff]   ;;  %v2916_v11 = vld [vmem:[%s3733_s1 + $0xa8] sm:$0xff]   ;;  %s3773_s25 = smov (!%p206_p4, %s2321_s25), 15 }
  0x10   : > { %2602 = vmatpush3.bf16.msra.mxu1 %v2908_v3  ;;  %2563 = vmatprep.subr.bf16.mxu0 %v2909_v4  ;;  %v2917_v12 = vld [vmem:[%s3733_s1 + $0x60] sm:$0xff]   ;;  %v2921_v16 = vld [vmem:[%s3733_s1 + $0x58] sm:$0xff]   ;;  %v2925_v20 = vld [vmem:[%s3733_s1 + $0x50] sm:$0xff]   ;;  %s2529_s24 = sshll.u32 %s3773_s25, 6 }
  0x11   : > { %2603 = vmatprep.subr.bf16.mxu1 %v2910_v5  ;;  %v2918_v13 = vld [vmem:[%s3733_s1 + $0xe0] sm:$0xff]   ;;  %v2922_v17 = vld [vmem:[%s3733_s1 + $0xd8] sm:$0xff]   ;;  %v2926_v21 = vld [vmem:[%s3733_s1 + $0xd0] sm:$0xff]   ;;  %s3194_s12 = scalar_lea.vmem %s3732_s0, %s2529_s24 }
  0x12   : > { %v2919_v14 = vld [vmem:[%s3733_s1 + $0x20] sm:$0xff]   ;;  %v2923_v18 = vld [vmem:[%s3733_s1 + $0x18] sm:$0xff]   ;;  %v2927_v22 = vld [vmem:[%s3733_s1 + $0x10] sm:$0xff]  }
  0x13   : > { %2564 = vmatpush3.bf16.msra.mxu0 %v2911_v6  ;;  %v2920_v15 = vld [vmem:[%s3733_s1 + $0xa0] sm:$0xff]   ;;  %v2924_v19 = vld [vmem:[%s3733_s1 + $0x98] sm:$0xff]   ;;  %v2928_v23 = vld [vmem:[%s3733_s1 + $0x90] sm:$0xff]  }
  0x14   : > { %2604 = vmatpush3.bf16.msra.mxu1 %v2912_v7  ;;  %2565 = vmatprep.subr.bf16.mxu0 %v2913_v8  ;;  %v2929_v24 = vld [vmem:[%s3733_s1 + $0x48] sm:$0xff]   ;;  %v2933_v28 = vld [vmem:[%s3733_s1 + $0x40] sm:$0xff]   ;;  %v2937_v40 = vld [vmem:[%s3733_s1 + $0x178] sm:$0xff]  }
  0x15   : > { %2605 = vmatprep.subr.bf16.mxu1 %v2914_v9  ;;  %v2930_v25 = vld [vmem:[%s3733_s1 + $0xc8] sm:$0xff]   ;;  %v2934_v29 = vld [vmem:[%s3733_s1 + $0xc0] sm:$0xff]   ;;  %v2938_v41 = vld [vmem:[%s3733_s1 + $0x1f8] sm:$0xff]  }
  0x16   : > { %v2931_v26 = vld [vmem:[%s3733_s1 + $0x8] sm:$0xff]   ;;  %v2935_v30 = vld [vmem:[%s3733_s1] sm:$0xff]   ;;  %v2939_v42 = vld [vmem:[%s3733_s1 + $0x138] sm:$0xff]  }
  0x17   : > { %2566 = vmatpush3.bf16.msra.mxu0 %v2915_v10  ;;  %v2932_v27 = vld [vmem:[%s3733_s1 + $0x88] sm:$0xff]   ;;  %v2936_v31 = vld [vmem:[%s3733_s1 + $0x80] sm:$0xff]   ;;  %v2940_v43 = vld [vmem:[%s3733_s1 + $0x1b8] sm:$0xff]  }
  0x18   : > { %2606 = vmatpush3.bf16.msra.mxu1 %v2916_v11  ;;  %2567 = vmatprep.subr.bf16.mxu0 %v2917_v12  ;;  %v229_v32 = vld [vmem:[%s3194_s12] sm:$0xff]  ;;  %v230_v34 = vld [vmem:[%s3194_s12 + $0x8] sm:$0xff]  ;;  %v2941_v44 = vld [vmem:[%s3733_s1 + $0x170] sm:$0xff]  }
  0x19   : > { %2607 = vmatprep.subr.bf16.mxu1 %v2918_v13  ;;  %v237_v33 = vld [vmem:[%s3194_s12 + $0x40] sm:$0xff]  ;;  %v238_v37 = vld [vmem:[%s3194_s12 + $0x48] sm:$0xff]  ;;  %v2942_v45 = vld [vmem:[%s3733_s1 + $0x1f0] sm:$0xff]  }
  0x1a   : > { %v2327_v35 = vcombine.low %v229_v32, %v237_v33  ;;  %v2328_v36 = vcombine.high %v229_v32, %v237_v33  ;;  %v2329_v38 = vcombine.low %v230_v34, %v238_v37  ;;  %v2330_v39 = vcombine.high %v230_v34, %v238_v37  ;;  %v2943_v46 = vld [vmem:[%s3733_s1 + $0x130] sm:$0xff]   ;;  %v245_v48 = vld [vmem:[%s3194_s12 + $0x80] sm:$0xff]  ;;  %v246_v51 = vld [vmem:[%s3194_s12 + $0x88] sm:$0xff] }
  0x1b   : > { %2568 = vmatpush3.bf16.msra.mxu0 %v2919_v14  ;;  %v2944_v47 = vld [vmem:[%s3733_s1 + $0x1b0] sm:$0xff]   ;;  %v253_v49 = vld [vmem:[%s3194_s12 + $0xc0] sm:$0xff]  ;;  %v254_v52 = vld [vmem:[%s3194_s12 + $0xc8] sm:$0xff] }
  0x1c   : > { %2608 = vmatpush3.bf16.msra.mxu1 %v2920_v15  ;;  %2569 = vmatprep.subr.bf16.mxu0 %v2921_v16  ;;  %v2344_v50 = vcombine.high %v245_v48, %v253_v49  ;;  %v2343_v53 = vcombine.low %v245_v48, %v253_v49  ;;  %v2346_v54 = vcombine.high %v246_v51, %v254_v52  ;;  %v2945_v56 = vld [vmem:[%s3733_s1 + $0x168] sm:$0xff]   ;;  %v2949_v60 = vld [vmem:[%s3733_s1 + $0x160] sm:$0xff]   ;;  %v2953_v8 = vld [vmem:[%s3733_s1 + $0x158] sm:$0xff]  }
  0x1d   : > { %2609 = vmatprep.subr.bf16.mxu1 %v2922_v17  ;;  %1676 = vmatprep.mubr.bf16.mxu0 %v2328_v36  ;;  %v2345_v55 = vcombine.low %v246_v51, %v254_v52  ;;  %v2946_v57 = vld [vmem:[%s3733_s1 + $0x1e8] sm:$0xff]   ;;  %v2950_v61 = vld [vmem:[%s3733_s1 + $0x1e0] sm:$0xff]   ;;  %v2954_v9 = vld [vmem:[%s3733_s1 + $0x1d8] sm:$0xff]  }
  0x1e   : > { %1741 = vmatprep.mubr.bf16.mxu1 %v2330_v39  ;;  %v2947_v58 = vld [vmem:[%s3733_s1 + $0x128] sm:$0xff]   ;;  %v2951_v62 = vld [vmem:[%s3733_s1 + $0x120] sm:$0xff]   ;;  %v2955_v10 = vld [vmem:[%s3733_s1 + $0x118] sm:$0xff]  }
  0x1f   : > { %2570 = vmatpush3.bf16.msra.mxu0 %v2923_v18  ;;  %v2948_v59 = vld [vmem:[%s3733_s1 + $0x1a8] sm:$0xff]   ;;  %v2952_v63 = vld [vmem:[%s3733_s1 + $0x1a0] sm:$0xff]   ;;  %v2956_v11 = vld [vmem:[%s3733_s1 + $0x198] sm:$0xff]  }
  0x20   : > { %2610 = vmatpush3.bf16.msra.mxu1 %v2924_v19  ;;  %2571 = vmatprep.subr.bf16.mxu0 %v2925_v20  ;;  %v261_v0 = vld [vmem:[%s3194_s12 + $0x100] sm:$0xff]  ;;  %v262_v2 = vld [vmem:[%s3194_s12 + $0x108] sm:$0xff]  ;;  %v2957_v12 = vld [vmem:[%s3733_s1 + $0x150] sm:$0xff]  }
  0x21   : > { %2611 = vmatprep.subr.bf16.mxu1 %v2926_v21  ;;  %v269_v1 = vld [vmem:[%s3194_s12 + $0x140] sm:$0xff]  ;;  %v270_v3 = vld [vmem:[%s3194_s12 + $0x148] sm:$0xff]  ;;  %v2958_v13 = vld [vmem:[%s3733_s1 + $0x1d0] sm:$0xff]  }
  0x22   : > { %v2360_v4 = vcombine.high %v261_v0, %v269_v1  ;;  %v2362_v5 = vcombine.high %v262_v2, %v270_v3  ;;  %v2359_v6 = vcombine.low %v261_v0, %v269_v1  ;;  %v2361_v7 = vcombine.low %v262_v2, %v270_v3  ;;  %v2959_v14 = vld [vmem:[%s3733_s1 + $0x110] sm:$0xff]   ;;  %v277_v16 = vld [vmem:[%s3194_s12 + $0x180] sm:$0xff]  ;;  %v278_v18 = vld [vmem:[%s3194_s12 + $0x188] sm:$0xff] }
  0x23   : > { %2572 = vmatpush3.bf16.msra.mxu0 %v2927_v22  ;;  %v2960_v15 = vld [vmem:[%s3733_s1 + $0x190] sm:$0xff]   ;;  %v285_v17 = vld [vmem:[%s3194_s12 + $0x1c0] sm:$0xff]  ;;  %v286_v20 = vld [vmem:[%s3194_s12 + $0x1c8] sm:$0xff] }
  0x24   : > { %2612 = vmatpush3.bf16.msra.mxu1 %v2928_v23  ;;  %2573 = vmatprep.subr.bf16.mxu0 %v2929_v24  ;;  %v2376_v19 = vcombine.high %v277_v16, %v285_v17  ;;  %v2375_v21 = vcombine.low %v277_v16, %v285_v17  ;;  %v2378_v22 = vcombine.high %v278_v18, %v286_v20  ;;  %v2961_v24 = vld [vmem:[%s3733_s1 + $0x148] sm:$0xff]   ;;  %v231_v32 = vld [vmem:[%s3194_s12 + $0x10] sm:$0xff]  ;;  %v232_v36 = vld [vmem:[%s3194_s12 + $0x18] sm:$0xff] }
  0x25   : > { %2613 = vmatprep.subr.bf16.mxu1 %v2930_v25  ;;  %v2377_v23 = vcombine.low %v278_v18, %v286_v20  ;;  %v2962_v25 = vld [vmem:[%s3733_s1 + $0x1c8] sm:$0xff]   ;;  %v239_v33 = vld [vmem:[%s3194_s12 + $0x50] sm:$0xff]  ;;  %v240_v37 = vld [vmem:[%s3194_s12 + $0x58] sm:$0xff] }
  0x26   : > { %v2331_v34 = vcombine.low %v231_v32, %v239_v33  ;;  %v2334_v39 = vcombine.high %v232_v36, %v240_v37  ;;  %v247_v48 = vld [vmem:[%s3194_s12 + $0x90] sm:$0xff]  ;;  %v256_v51 = vld [vmem:[%s3194_s12 + $0xd8] sm:$0xff] }
  0x27   : > { %2574 = vmatpush3.bf16.msra.mxu0 %v2931_v26  ;;  %v2963_v26 = vld [vmem:[%s3733_s1 + $0x108] sm:$0xff]   ;;  %v255_v49 = vld [vmem:[%s3194_s12 + $0xd0] sm:$0xff]  ;;  %v264_v2 = vld [vmem:[%s3194_s12 + $0x118] sm:$0xff] }
  0x28   : > { %2614 = vmatpush3.bf16.msra.mxu1 %v2932_v27  ;;  %2575 = vmatprep.subr.bf16.mxu0 %v2933_v28  ;;  %v2964_v27 = vld [vmem:[%s3733_s1 + $0x188] sm:$0xff]   ;;  %v2965_v28 = vld [vmem:[%s3733_s1 + $0x140] sm:$0xff]   ;;  %v2348_v52 = vcombine.high %v247_v48, %v255_v49  ;;  %v263_v0 = vld [vmem:[%s3194_s12 + $0x110] sm:$0xff] }
  0x29   : > { %2615 = vmatprep.subr.bf16.mxu1 %v2934_v29  ;;  %v2966_v29 = vld [vmem:[%s3733_s1 + $0x1c0] sm:$0xff]   ;;  %v271_v1 = vld [vmem:[%s3194_s12 + $0x150] sm:$0xff]  ;;  %v288_v20 = vld [vmem:[%s3194_s12 + $0x1d8] sm:$0xff] }
  0x2a   : > { %v2364_v3 = vcombine.high %v263_v0, %v271_v1  ;;  %v279_v16 = vld [vmem:[%s3194_s12 + $0x190] sm:$0xff] }
  0x2b   : > { %2576 = vmatpush3.bf16.msra.mxu0 %v2935_v30  ;;  %v2967_v30 = vld [vmem:[%s3733_s1 + $0x100] sm:$0xff]   ;;  %v287_v17 = vld [vmem:[%s3194_s12 + $0x1d0] sm:$0xff] }
  0x2c   : > { %2616 = vmatpush3.bf16.msra.mxu1 %v2936_v31  ;;  %2641 = vmatprep.subr.bf16.mxu0 %v2937_v40  ;;  %v2968_v31 = vld [vmem:[%s3733_s1 + $0x180] sm:$0xff]   ;;  %v2969_v40 = vld [vmem:[%s3733_s1 + $0x278] sm:$0xff]   ;;  %v2380_v18 = vcombine.high %v279_v16, %v287_v17 }
  0x2d   : > { %2681 = vmatprep.subr.bf16.mxu1 %v2938_v41  ;;  %v2970_v41 = vld [vmem:[%s3733_s1 + $0x2f8] sm:$0xff]  }
  0x2e   : > { %1677 = vmatmul.mubr.bf16.vlgmr.msra.gmra.mxu0 %v2327_v35  ;;  %v2332_v35 = vcombine.high %v231_v32, %v239_v33  ;;  %v233_v32 = vld [vmem:[%s3194_s12 + $0x20] sm:$0xff] }
  0x2f   : > { %1742 = vmatmul.mubr.bf16.vlgmr.msra.gmra.mxu1 %v2329_v38  ;;  %2642 = vmatpush3.bf16.msra.mxu0 %v2939_v42  ;;  %v2333_v38 = vcombine.low %v232_v36, %v240_v37  ;;  %v2971_v42 = vld [vmem:[%s3733_s1 + $0x238] sm:$0xff]   ;;  %v241_v33 = vld [vmem:[%s3194_s12 + $0x60] sm:$0xff] }
  0x30   : > { %2682 = vmatpush3.bf16.msra.mxu1 %v2940_v43  ;;  %2643 = vmatprep.subr.bf16.mxu0 %v2941_v44  ;;  %v2972_v43 = vld [vmem:[%s3733_s1 + $0x2b8] sm:$0xff]   ;;  %v2973_v44 = vld [vmem:[%s3733_s1 + $0x270] sm:$0xff]   ;;  %v2335_v36 = vcombine.low %v233_v32, %v241_v33  ;;  %v2336_v37 = vcombine.high %v233_v32, %v241_v33 }
  0x31   : > { %2683 = vmatprep.subr.bf16.mxu1 %v2942_v45  ;;  %1684 = vmatprep.mubr.bf16.mxu0 %v2344_v50  ;;  %v2974_v45 = vld [vmem:[%s3733_s1 + $0x2f0] sm:$0xff]   ;;  %v248_v50 = vld [vmem:[%s3194_s12 + $0x98] sm:$0xff] }
  0x32   : > { %1749 = vmatprep.mubr.bf16.mxu1 %v2346_v54  ;;  %v2347_v54 = vcombine.low %v247_v48, %v255_v49  ;;  %v249_v48 = vld [vmem:[%s3194_s12 + $0xa0] sm:$0xff]  ;;  %v235_v32 = vld [vmem:[%s3194_s12 + $0x30] sm:$0xff] }
  0x33   : > { %2644 = vmatpush3.bf16.msra.mxu0 %v2943_v46  ;;  %v2975_v46 = vld [vmem:[%s3733_s1 + $0x230] sm:$0xff]   ;;  %v257_v49 = vld [vmem:[%s3194_s12 + $0xe0] sm:$0xff] }
  0x34   : > { %2684 = vmatpush3.bf16.msra.mxu1 %v2944_v47  ;;  %2645 = vmatprep.subr.bf16.mxu0 %v2945_v56  ;;  %v2976_v47 = vld [vmem:[%s3733_s1 + $0x2b0] sm:$0xff]   ;;  %v2977_v56 = vld [vmem:[%s3733_s1 + $0x268] sm:$0xff]  }
  0x35   : > { %2685 = vmatprep.subr.bf16.mxu1 %v2946_v57  ;;  %v2978_v57 = vld [vmem:[%s3733_s1 + $0x2e8] sm:$0xff]   ;;  %v243_v33 = vld [vmem:[%s3194_s12 + $0x70] sm:$0xff] }
  0x36   : > { %1685 = vmatmul.mubr.bf16.gmra.mxu0 %v2343_v53  ;;  %v2350_v53 = vcombine.high %v248_v50, %v256_v51 }
  0x37   : > { %1750 = vmatmul.mubr.bf16.gmra.mxu1 %v2345_v55  ;;  %2646 = vmatpush3.bf16.msra.mxu0 %v2947_v58  ;;  %v2349_v55 = vcombine.low %v248_v50, %v256_v51  ;;  %v2979_v58 = vld [vmem:[%s3733_s1 + $0x228] sm:$0xff]   ;;  %v2352_v51 = vcombine.high %v249_v48, %v257_v49 }
  0x38   : > { %2686 = vmatpush3.bf16.msra.mxu1 %v2948_v59  ;;  %2647 = vmatprep.subr.bf16.mxu0 %v2949_v60  ;;  %v2980_v59 = vld [vmem:[%s3733_s1 + $0x2a8] sm:$0xff]   ;;  %v2981_v60 = vld [vmem:[%s3733_s1 + $0x260] sm:$0xff]  }
  0x39   : > { %2687 = vmatprep.subr.bf16.mxu1 %v2950_v61  ;;  %1692 = vmatprep.mubr.bf16.mxu0 %v2360_v4  ;;  %v2982_v61 = vld [vmem:[%s3733_s1 + $0x2e0] sm:$0xff]   ;;  %v272_v4 = vld [vmem:[%s3194_s12 + $0x158] sm:$0xff]  ;;  %v250_v50 = vld [vmem:[%s3194_s12 + $0xa8] sm:$0xff] }
  0x3a   : > { %1757 = vmatprep.mubr.bf16.mxu1 %v2362_v5  ;;  %v2363_v5 = vcombine.low %v263_v0, %v271_v1  ;;  %v265_v0 = vld [vmem:[%s3194_s12 + $0x120] sm:$0xff] }
  0x3b   : > { %2648 = vmatpush3.bf16.msra.mxu0 %v2951_v62  ;;  %v2983_v62 = vld [vmem:[%s3733_s1 + $0x220] sm:$0xff]  }
  0x3c   : > { %2688 = vmatpush3.bf16.msra.mxu1 %v2952_v63  ;;  %2649 = vmatprep.subr.bf16.mxu0 %v2953_v8  ;;  %v2984_v63 = vld [vmem:[%s3733_s1 + $0x2a0] sm:$0xff]   ;;  %v2985_v8 = vld [vmem:[%s3733_s1 + $0x258] sm:$0xff]  }
  0x3d   : > { %2689 = vmatprep.subr.bf16.mxu1 %v2954_v9  ;;  %v2986_v9 = vld [vmem:[%s3733_s1 + $0x2d8] sm:$0xff]   ;;  %v273_v1 = vld [vmem:[%s3194_s12 + $0x160] sm:$0xff] }
  0x3e   : > { %1693 = vmatmul.mubr.bf16.gmra.mxu0 %v2359_v6  ;;  %v2366_v6 = vcombine.high %v264_v2, %v272_v4 }
  0x3f   : > { %1758 = vmatmul.mubr.bf16.gmra.mxu1 %v2361_v7  ;;  %2650 = vmatpush3.bf16.msra.mxu0 %v2955_v10  ;;  %v2365_v7 = vcombine.low %v264_v2, %v272_v4  ;;  %v2987_v10 = vld [vmem:[%s3733_s1 + $0x218] sm:$0xff]   ;;  %v2368_v2 = vcombine.high %v265_v0, %v273_v1  ;;  %v274_v4 = vld [vmem:[%s3194_s12 + $0x168] sm:$0xff] }
  0x40   : > { %2690 = vmatpush3.bf16.msra.mxu1 %v2956_v11  ;;  %2651 = vmatprep.subr.bf16.mxu0 %v2957_v12  ;;  %v2988_v11 = vld [vmem:[%s3733_s1 + $0x298] sm:$0xff]   ;;  %v2989_v12 = vld [vmem:[%s3733_s1 + $0x250] sm:$0xff]  }
  0x41   : > { %2691 = vmatprep.subr.bf16.mxu1 %v2958_v13  ;;  %1700 = vmatprep.mubr.bf16.mxu0 %v2376_v19  ;;  %v2990_v13 = vld [vmem:[%s3733_s1 + $0x2d0] sm:$0xff]   ;;  %v280_v19 = vld [vmem:[%s3194_s12 + $0x198] sm:$0xff] }
  0x42   : > { %1765 = vmatprep.mubr.bf16.mxu1 %v2378_v22  ;;  %v2382_v22 = vcombine.high %v280_v19, %v288_v20 }
  0x43   : > { %2652 = vmatpush3.bf16.msra.mxu0 %v2959_v14  ;;  %v2991_v14 = vld [vmem:[%s3733_s1 + $0x210] sm:$0xff]  }
  0x44   : > { %2692 = vmatpush3.bf16.msra.mxu1 %v2960_v15  ;;  %2653 = vmatprep.subr.bf16.mxu0 %v2961_v24  ;;  %v2992_v15 = vld [vmem:[%s3733_s1 + $0x290] sm:$0xff]   ;;  %v2993_v24 = vld [vmem:[%s3733_s1 + $0x248] sm:$0xff]  }
  0x45   : > { %2693 = vmatprep.subr.bf16.mxu1 %v2962_v25  ;;  %v2994_v25 = vld [vmem:[%s3733_s1 + $0x2c8] sm:$0xff]  }
  0x46   : > { %1701 = vmatmul.mubr.bf16.gmra.mxu0 %v2375_v21  ;;  %v2379_v21 = vcombine.low %v279_v16, %v287_v17  ;;  %v281_v16 = vld [vmem:[%s3194_s12 + $0x1a0] sm:$0xff] }
  0x47   : > { %1766 = vmatmul.mubr.bf16.gmra.mxu1 %v2377_v23  ;;  %2654 = vmatpush3.bf16.msra.mxu0 %v2963_v26  ;;  %v2381_v23 = vcombine.low %v280_v19, %v288_v20  ;;  %v2995_v26 = vld [vmem:[%s3733_s1 + $0x208] sm:$0xff]   ;;  %v289_v17 = vld [vmem:[%s3194_s12 + $0x1e0] sm:$0xff] }
  0x48   : > { %2694 = vmatpush3.bf16.msra.mxu1 %v2964_v27  ;;  %2655 = vmatprep.subr.bf16.mxu0 %v2965_v28  ;;  %v2996_v27 = vld [vmem:[%s3733_s1 + $0x288] sm:$0xff]   ;;  %v2997_v28 = vld [vmem:[%s3733_s1 + $0x240] sm:$0xff]   ;;  %v2384_v20 = vcombine.high %v281_v16, %v289_v17 }
  0x49   : > { %2695 = vmatprep.subr.bf16.mxu1 %v2966_v29  ;;  %1806 = vmatprep.mubr.bf16.mxu0 %v2332_v35  ;;  %v2998_v29 = vld [vmem:[%s3733_s1 + $0x2c0] sm:$0xff]   ;;  %v242_v35 = vld [vmem:[%s3194_s12 + $0x68] sm:$0xff] }
  0x4a   : > { %1871 = vmatprep.mubr.bf16.mxu1 %v2334_v39  ;;  %v290_v19 = vld [vmem:[%s3194_s12 + $0x1e8] sm:$0xff] }
  0x4b   : > { %2656 = vmatpush3.bf16.msra.mxu0 %v2967_v30  ;;  %v2999_v30 = vld [vmem:[%s3733_s1 + $0x200] sm:$0xff]  }
  0x4c   : > { %2696 = vmatpush3.bf16.msra.mxu1 %v2968_v31  ;;  %2721 = vmatprep.subr.bf16.mxu0 %v2969_v40  ;;  %v3000_v31 = vld [vmem:[%s3733_s1 + $0x280] sm:$0xff]   ;;  %v3001_v40 = vld [vmem:[%s3733_s1 + $0x378] sm:$0xff]  }
  0x4d   : > { %2761 = vmatprep.subr.bf16.mxu1 %v2970_v41  ;;  %v3002_v41 = vld [vmem:[%s3733_s1 + $0x3f8] sm:$0xff]  }
  0x4e   : > { %1807 = vmatmul.mubr.bf16.vlgmr.msra.gmra.mxu0 %v2331_v34  ;;  %v234_v34 = vld [vmem:[%s3194_s12 + $0x28] sm:$0xff] }
  0x4f   : > { %1872 = vmatmul.mubr.bf16.vlgmr.msra.gmra.mxu1 %v2333_v38  ;;  %2722 = vmatpush3.bf16.msra.mxu0 %v2971_v42  ;;  %v2337_v38 = vcombine.low %v234_v34, %v242_v35  ;;  %v2338_v39 = vcombine.high %v234_v34, %v242_v35  ;;  %v3003_v42 = vld [vmem:[%s3733_s1 + $0x338] sm:$0xff]   ;;  %v2339_v35 = vcombine.low %v235_v32, %v243_v33 }
  0x50   : > { %2762 = vmatpush3.bf16.msra.mxu1 %v2972_v43  ;;  %2723 = vmatprep.subr.bf16.mxu0 %v2973_v44  ;;  %v3004_v43 = vld [vmem:[%s3733_s1 + $0x3b8] sm:$0xff]   ;;  %v3005_v44 = vld [vmem:[%s3733_s1 + $0x370] sm:$0xff]  }
  0x51   : > { %2763 = vmatprep.subr.bf16.mxu1 %v2974_v45  ;;  %1814 = vmatprep.mubr.bf16.mxu0 %v2348_v52  ;;  %v3006_v45 = vld [vmem:[%s3733_s1 + $0x3f0] sm:$0xff]   ;;  %v258_v52 = vld [vmem:[%s3194_s12 + $0xe8] sm:$0xff]  ;;  %v236_v34 = vld [vmem:[%s3194_s12 + $0x38] sm:$0xff] }
  0x52   : > { %1879 = vmatprep.mubr.bf16.mxu1 %v2350_v53  ;;  %v2351_v53 = vcombine.low %v249_v48, %v257_v49  ;;  %v268_v48 = vld [vmem:[%s3194_s12 + $0x138] sm:$0xff] }
  0x53   : > { %2724 = vmatpush3.bf16.msra.mxu0 %v2975_v46  ;;  %v3007_v46 = vld [vmem:[%s3733_s1 + $0x330] sm:$0xff]   ;;  %v276_v49 = vld [vmem:[%s3194_s12 + $0x178] sm:$0xff] }
  0x54   : > { %2764 = vmatpush3.bf16.msra.mxu1 %v2976_v47  ;;  %2725 = vmatprep.subr.bf16.mxu0 %v2977_v56  ;;  %v3008_v47 = vld [vmem:[%s3733_s1 + $0x3b0] sm:$0xff]   ;;  %v3009_v56 = vld [vmem:[%s3733_s1 + $0x368] sm:$0xff]  }
  0x55   : > { %2765 = vmatprep.subr.bf16.mxu1 %v2978_v57  ;;  %v3010_v57 = vld [vmem:[%s3733_s1 + $0x3e8] sm:$0xff]  }
  0x56   : > { %1815 = vmatmul.mubr.bf16.gmra.mxu0 %v2347_v54  ;;  %v2354_v54 = vcombine.high %v250_v50, %v258_v52 }
  0x57   : > { %1880 = vmatmul.mubr.bf16.gmra.mxu1 %v2349_v55  ;;  %2726 = vmatpush3.bf16.msra.mxu0 %v2979_v58  ;;  %v2353_v55 = vcombine.low %v250_v50, %v258_v52  ;;  %v3011_v58 = vld [vmem:[%s3733_s1 + $0x328] sm:$0xff]  }
  0x58   : > { %2766 = vmatpush3.bf16.msra.mxu1 %v2980_v59  ;;  %2727 = vmatprep.subr.bf16.mxu0 %v2981_v60  ;;  %v3012_v59 = vld [vmem:[%s3733_s1 + $0x3a8] sm:$0xff]   ;;  %v3013_v60 = vld [vmem:[%s3733_s1 + $0x360] sm:$0xff]  }
  0x59   : > { %2767 = vmatprep.subr.bf16.mxu1 %v2982_v61  ;;  %1822 = vmatprep.mubr.bf16.mxu0 %v2364_v3  ;;  %v3014_v61 = vld [vmem:[%s3733_s1 + $0x3e0] sm:$0xff]   ;;  %v266_v3 = vld [vmem:[%s3194_s12 + $0x128] sm:$0xff] }
  0x5a   : > { %1887 = vmatprep.mubr.bf16.mxu1 %v2366_v6  ;;  %v2370_v6 = vcombine.high %v266_v3, %v274_v4 }
  0x5b   : > { %2728 = vmatpush3.bf16.msra.mxu0 %v2983_v62  ;;  %v3015_v62 = vld [vmem:[%s3733_s1 + $0x320] sm:$0xff]  }
  0x5c   : > { %2768 = vmatpush3.bf16.msra.mxu1 %v2984_v63  ;;  %2729 = vmatprep.subr.bf16.mxu0 %v2985_v8  ;;  %v3016_v63 = vld [vmem:[%s3733_s1 + $0x3a0] sm:$0xff]   ;;  %v3017_v8 = vld [vmem:[%s3733_s1 + $0x358] sm:$0xff]  }
  0x5d   : > { %2769 = vmatprep.subr.bf16.mxu1 %v2986_v9  ;;  %v3018_v9 = vld [vmem:[%s3733_s1 + $0x3d8] sm:$0xff]  }
  0x5e   : > { %1823 = vmatmul.mubr.bf16.gmra.mxu0 %v2363_v5  ;;  %v2367_v5 = vcombine.low %v265_v0, %v273_v1 }
  0x5f   : > { %1888 = vmatmul.mubr.bf16.gmra.mxu1 %v2365_v7  ;;  %2730 = vmatpush3.bf16.msra.mxu0 %v2987_v10  ;;  %v2369_v7 = vcombine.low %v266_v3, %v274_v4  ;;  %v3019_v10 = vld [vmem:[%s3733_s1 + $0x318] sm:$0xff]  }
  0x60   : > { %2770 = vmatpush3.bf16.msra.mxu1 %v2988_v11  ;;  %2731 = vmatprep.subr.bf16.mxu0 %v2989_v12  ;;  %v3020_v11 = vld [vmem:[%s3733_s1 + $0x398] sm:$0xff]   ;;  %v3021_v12 = vld [vmem:[%s3733_s1 + $0x350] sm:$0xff]  }
  0x61   : > { %2771 = vmatprep.subr.bf16.mxu1 %v2990_v13  ;;  %1830 = vmatprep.mubr.bf16.mxu0 %v2380_v18  ;;  %v3022_v13 = vld [vmem:[%s3733_s1 + $0x3d0] sm:$0xff]   ;;  %v282_v18 = vld [vmem:[%s3194_s12 + $0x1a8] sm:$0xff] }
  0x62   : > { %1895 = vmatprep.mubr.bf16.mxu1 %v2382_v22  ;;  %v2383_v22 = vcombine.low %v281_v16, %v289_v17 }
  0x63   : > { %2732 = vmatpush3.bf16.msra.mxu0 %v2991_v14  ;;  %v3023_v14 = vld [vmem:[%s3733_s1 + $0x310] sm:$0xff]  }
  0x64   : > { %2772 = vmatpush3.bf16.msra.mxu1 %v2992_v15  ;;  %2733 = vmatprep.subr.bf16.mxu0 %v2993_v24  ;;  %v3024_v15 = vld [vmem:[%s3733_s1 + $0x390] sm:$0xff]   ;;  %v3025_v24 = vld [vmem:[%s3733_s1 + $0x348] sm:$0xff]  }
  0x65   : > { %2773 = vmatprep.subr.bf16.mxu1 %v2994_v25  ;;  %v3026_v25 = vld [vmem:[%s3733_s1 + $0x3c8] sm:$0xff]  }
  0x66   : > { %1831 = vmatmul.mubr.bf16.gmra.mxu0 %v2379_v21  ;;  %v2386_v21 = vcombine.high %v282_v18, %v290_v19 }
  0x67   : > { %1896 = vmatmul.mubr.bf16.gmra.mxu1 %v2381_v23  ;;  %2734 = vmatpush3.bf16.msra.mxu0 %v2995_v26  ;;  %v2385_v23 = vcombine.low %v282_v18, %v290_v19  ;;  %v3027_v26 = vld [vmem:[%s3733_s1 + $0x308] sm:$0xff]  }
  0x68   : > { %2774 = vmatpush3.bf16.msra.mxu1 %v2996_v27  ;;  %2735 = vmatprep.subr.bf16.mxu0 %v2997_v28  ;;  %v3028_v27 = vld [vmem:[%s3733_s1 + $0x388] sm:$0xff]   ;;  %v3029_v28 = vld [vmem:[%s3733_s1 + $0x340] sm:$0xff]  }
  0x69   : > { %2775 = vmatprep.subr.bf16.mxu1 %v2998_v29  ;;  %1936 = vmatprep.mubr.bf16.mxu0 %v2336_v37  ;;  %v3030_v29 = vld [vmem:[%s3733_s1 + $0x3c0] sm:$0xff]   ;;  %v244_v37 = vld [vmem:[%s3194_s12 + $0x78] sm:$0xff] }
  0x6a   : > { %2001 = vmatprep.mubr.bf16.mxu1 %v2338_v39  ;;  %v259_v39 = vld [vmem:[%s3194_s12 + $0xf0] sm:$0xff] }
  0x6b   : > { %2736 = vmatpush3.bf16.msra.mxu0 %v2999_v30  ;;  %v3031_v30 = vld [vmem:[%s3733_s1 + $0x300] sm:$0xff]  }
  0x6c   : > { %2776 = vmatpush3.bf16.msra.mxu1 %v3000_v31  ;;  %2801 = vmatprep.subr.bf16.mxu0 %v3001_v40  ;;  %v3032_v31 = vld [vmem:[%s3733_s1 + $0x380] sm:$0xff]   ;;  %v2341_v40 = vcombine.low %v236_v34, %v244_v37 }
  0x6d   : > { %2841 = vmatprep.subr.bf16.mxu1 %v3002_v41  ;;  %v2342_v41 = vcombine.high %v236_v34, %v244_v37 }
  0x6e   : > { %1937 = vmatmul.mubr.bf16.vlgmr.msra.gmra.mxu0 %v2335_v36  ;;  %v2340_v36 = vcombine.high %v235_v32, %v243_v33 }
  0x6f   : > { %2002 = vmatmul.mubr.bf16.vlgmr.msra.gmra.mxu1 %v2337_v38  ;;  %2802 = vmatpush3.bf16.msra.mxu0 %v3003_v42  ;;  %v251_v38 = vld [vmem:[%s3194_s12 + $0xb0] sm:$0xff] }
  0x70   : > { %2842 = vmatpush3.bf16.msra.mxu1 %v3004_v43  ;;  %2803 = vmatprep.subr.bf16.mxu0 %v3005_v44  ;;  %v2356_v42 = vcombine.high %v251_v38, %v259_v39  ;;  %v252_v43 = vld [vmem:[%s3194_s12 + $0xb8] sm:$0xff]  ;;  %v2355_v50 = vcombine.low %v251_v38, %v259_v39 }
  0x71   : > { %2843 = vmatprep.subr.bf16.mxu1 %v3006_v45  ;;  %1944 = vmatprep.mubr.bf16.mxu0 %v2352_v51  ;;  %v260_v44 = vld [vmem:[%s3194_s12 + $0xf8] sm:$0xff] }
  0x72   : > { %2009 = vmatprep.mubr.bf16.mxu1 %v2354_v54  ;;  %v2358_v45 = vcombine.high %v252_v43, %v260_v44  ;;  %v2357_v51 = vcombine.low %v252_v43, %v260_v44  ;;  %v283_v54 = vld [vmem:[%s3194_s12 + $0x1b0] sm:$0xff] }
  0x73   : > { %2804 = vmatpush3.bf16.msra.mxu0 %v3007_v46  ;;  %v267_v46 = vld [vmem:[%s3194_s12 + $0x130] sm:$0xff] }
  0x74   : > { %2844 = vmatpush3.bf16.msra.mxu1 %v3008_v47  ;;  %2805 = vmatprep.subr.bf16.mxu0 %v3009_v56  ;;  %v275_v47 = vld [vmem:[%s3194_s12 + $0x170] sm:$0xff]  ;;  %v284_v56 = vld [vmem:[%s3194_s12 + $0x1b8] sm:$0xff] }
  0x75   : > { %2845 = vmatprep.subr.bf16.mxu1 %v3010_v57  ;;  %v2372_v52 = vcombine.high %v267_v46, %v275_v47  ;;  %v292_v57 = vld [vmem:[%s3194_s12 + $0x1f8] sm:$0xff] }
  0x76   : > { %1945 = vmatmul.mubr.bf16.gmra.mxu0 %v2351_v53  ;;  %v2374_v53 = vcombine.high %v268_v48, %v276_v49 }
  0x77   : > { %2010 = vmatmul.mubr.bf16.gmra.mxu1 %v2353_v55  ;;  %2806 = vmatpush3.bf16.msra.mxu0 %v3011_v58  ;;  %v291_v55 = vld [vmem:[%s3194_s12 + $0x1f0] sm:$0xff]  ;;  %v2371_v58 = vcombine.low %v267_v46, %v275_v47  ;;  %s2325_s12 = sshll.u32 %s3773_s25, 2 }
  0x78   : > { %2846 = vmatpush3.bf16.msra.mxu1 %v3012_v59  ;;  %2807 = vmatprep.subr.bf16.mxu0 %v3013_v60  ;;  %v2373_v59 = vcombine.low %v268_v48, %v276_v49  ;;  %v2388_v60 = vcombine.high %v283_v54, %v291_v55  ;;  %s3697_s8 = scalar_lea.vmem %s3735_s3, %s2325_s12 }
  0x79   : > { %2847 = vmatprep.subr.bf16.mxu1 %v3014_v61  ;;  %1952 = vmatprep.mubr.bf16.mxu0 %v2368_v2  ;;  %v2390_v61 = vcombine.high %v284_v56, %v292_v57  ;;  %v2326_v2 = vld [vmem:[%s3734_s2] ss:$0 sm:$0xff] }
  0x7a   : > { %2017 = vmatprep.mubr.bf16.mxu1 %v2370_v6 }
  0x7b   : > { %2808 = vmatpush3.bf16.msra.mxu0 %v3015_v62  ;;  %v2387_v62 = vcombine.low %v283_v54, %v291_v55 }
  0x7c   : > { %2848 = vmatpush3.bf16.msra.mxu1 %v3016_v63  ;;  %2809 = vmatprep.subr.bf16.mxu0 %v3017_v8  ;;  %v2389_v63 = vcombine.low %v284_v56, %v292_v57 }
  0x7d   : > { %2849 = vmatprep.subr.bf16.mxu1 %v3018_v9 }
  0x7e   : > { %1953 = vmatmul.mubr.bf16.gmra.mxu0 %v2367_v5 }
  0x7f   : > { %2018 = vmatmul.mubr.bf16.gmra.mxu1 %v2369_v7  ;;  %2810 = vmatpush3.bf16.msra.mxu0 %v3019_v10 }
  0x80   : > { %2850 = vmatpush3.bf16.msra.mxu1 %v3020_v11  ;;  %2811 = vmatprep.subr.bf16.mxu0 %v3021_v12 }
  0x81   : > { %2851 = vmatprep.subr.bf16.mxu1 %v3022_v13  ;;  %1960 = vmatprep.mubr.bf16.mxu0 %v2384_v20 }
  0x82   : > { %2025 = vmatprep.mubr.bf16.mxu1 %v2386_v21 }
  0x83   : > { %2812 = vmatpush3.bf16.msra.mxu0 %v3023_v14 }
  0x84   : > { %2852 = vmatpush3.bf16.msra.mxu1 %v3024_v15  ;;  %2813 = vmatprep.subr.bf16.mxu0 %v3025_v24 }
  0x85   : > { %2853 = vmatprep.subr.bf16.mxu1 %v3026_v25 }
  0x86   : > { %1961 = vmatmul.mubr.bf16.gmra.mxu0 %v2383_v22 }
  0x87   : > { %2026 = vmatmul.mubr.bf16.gmra.mxu1 %v2385_v23  ;;  %2814 = vmatpush3.bf16.msra.mxu0 %v3027_v26 }
  0x88   : > { %2854 = vmatpush3.bf16.msra.mxu1 %v3028_v27  ;;  %2815 = vmatprep.subr.bf16.mxu0 %v3029_v28 }
  0x89   : > { %2855 = vmatprep.subr.bf16.mxu1 %v3030_v29  ;;  %2066 = vmatprep.mubr.bf16.mxu0 %v2340_v36 }
  0x8a   : > { %2131 = vmatprep.mubr.bf16.mxu1 %v2342_v41 }
  0x8b   : > { %2816 = vmatpush3.bf16.msra.mxu0 %v3031_v30 }
  0x8c   : > { %2856 = vmatpush3.bf16.msra.mxu1 %v3032_v31 }
  0x8e   : > { %2067 = vmatmul.mubr.bf16.vlgmr.msra.gmra.mxu0 %v2339_v35 }
  0x8f   : > { %2132 = vmatmul.mubr.bf16.vlgmr.msra.gmra.mxu1 %v2341_v40  ;;  %2074 = vmatprep.mubr.bf16.mxu0 %v2356_v42 }
  0x90   : > { %2139 = vmatprep.mubr.bf16.mxu1 %v2358_v45 }
  0x96   : > { %2075 = vmatmul.mubr.bf16.gmra.mxu0 %v2355_v50 }
  0x97   : > { %2140 = vmatmul.mubr.bf16.gmra.mxu1 %v2357_v51  ;;  %2082 = vmatprep.mubr.bf16.mxu0 %v2372_v52 }
  0x98   : > { %2147 = vmatprep.mubr.bf16.mxu1 %v2374_v53 }
  0x9e   : > { %2083 = vmatmul.mubr.bf16.gmra.mxu0 %v2371_v58 }
  0x9f   : > { %2148 = vmatmul.mubr.bf16.gmra.mxu1 %v2373_v59  ;;  %2090 = vmatprep.mubr.bf16.mxu0 %v2388_v60 }
  0xa0   : > { %2155 = vmatprep.mubr.bf16.mxu1 %v2390_v61 }
  0xa6   : > { %2091 = vmatmul.mubr.bf16.gmra.mxu0 %v2387_v62 }
  0xa7   : > { %2156 = vmatmul.mubr.bf16.gmra.mxu1 %v2389_v63 }
  0xee   : > { %v2577_v0 = vpop.f32.mrf.mxu0 }
  0xef   : > { %v2617_v1 = vpop.f32.mrf.mxu1 }
  0xf0   : > { %v2578_v3 = vpop.f32.mrf.mxu0 }
  0xf1   : > { %v2579_v4 = vadd.f32 %v2578_v3, %v2577_v0  ;;  %v2618_v5 = vpop.f32.mrf.mxu1 }
  0xf2   : > { %v2619_v6 = vadd.f32 %v2618_v5, %v2617_v1  ;;  %v2580_v7 = vpop.f32.mrf.mxu0 }
  0xf3   : > { %v1679_v8 = vadd.f32 %v2579_v4, %v2326_v2  ;;  %v2620_v9 = vpop.f32.mrf.mxu1 }
  0xf4   : > { %v2581_v10 = vpop.f32.mrf.mxu0 }
  0xf5   : > { %v3557_v11 = vadd.f32 %v2619_v6, %v1679_v8  ;;  %v2582_v12 = vadd.f32 %v2581_v10, %v2580_v7  ;;  %v2621_v13 = vpop.f32.mrf.mxu1 }
  0xf6   : > { %v2622_v14 = vadd.f32 %v2621_v13, %v2620_v9  ;;  %v2583_v16 = vpop.f32.mrf.mxu0 }
  0xf7   : > { %v1682_v15 = vadd.f32 %v2582_v12, %v2326_v2  ;;  %v2623_v17 = vpop.f32.mrf.mxu1 }
  0xf8   : > { %v2584_v19 = vpop.f32.mrf.mxu0 }
  0xf9   : > { %v3559_v18 = vadd.f32 %v2622_v14, %v1682_v15  ;;  %v2585_v20 = vadd.f32 %v2584_v19, %v2583_v16  ;;  %v2624_v21 = vpop.f32.mrf.mxu1 }
  0xfa   : > { %v2625_v22 = vadd.f32 %v2624_v21, %v2623_v17  ;;  %v2586_v23 = vpop.f32.mrf.mxu0 }
  0xfb   : > { %v1687_v24 = vadd.f32 %v2585_v20, %v2326_v2  ;;  %v2626_v25 = vpop.f32.mrf.mxu1 }
  0xfc   : > { %v2587_v26 = vpop.f32.mrf.mxu0 }
  0xfd   : > { %v3561_v27 = vadd.f32 %v2625_v22, %v1687_v24  ;;  %v2588_v28 = vadd.f32 %v2587_v26, %v2586_v23  ;;  %v2627_v29 = vpop.f32.mrf.mxu1 }
  0xfe   : > { %v2628_v30 = vadd.f32 %v2627_v29, %v2626_v25  ;;  %v2589_v32 = vpop.f32.mrf.mxu0 }
  0xff   : > { %v1690_v31 = vadd.f32 %v2588_v28, %v2326_v2  ;;  %v2629_v33 = vpop.f32.mrf.mxu1 }
 0x100   : > { %v2590_v35 = vpop.f32.mrf.mxu0 }
 0x101   : > { %v3563_v34 = vadd.f32 %v2628_v30, %v1690_v31  ;;  %v2630_v36 = vpop.f32.mrf.mxu1  ;;  %v2591_v37 = vadd.f32 %v2590_v35, %v2589_v32 }
 0x102   : > { %v2631_v38 = vadd.f32 %v2630_v36, %v2629_v33  ;;  %v2592_v39 = vpop.f32.mrf.mxu0 }
 0x103   : > { %v2632_v40 = vpop.f32.mrf.mxu1  ;;  %v1695_v41 = vadd.f32 %v2591_v37, %v2326_v2 }
 0x104   : > { %v2593_v42 = vpop.f32.mrf.mxu0 }
 0x105   : > { %v2633_v43 = vpop.f32.mrf.mxu1  ;;  %v3565_v44 = vadd.f32 %v2631_v38, %v1695_v41  ;;  %v2594_v45 = vadd.f32 %v2593_v42, %v2592_v39 }
 0x106   : > { %v2634_v46 = vadd.f32 %v2633_v43, %v2632_v40  ;;  %v2595_v48 = vpop.f32.mrf.mxu0 }
 0x107   : > { %v1698_v47 = vadd.f32 %v2594_v45, %v2326_v2  ;;  %v2635_v49 = vpop.f32.mrf.mxu1 }
 0x108   : > { %v2596_v51 = vpop.f32.mrf.mxu0 }
 0x109   : > { %v3567_v50 = vadd.f32 %v2634_v46, %v1698_v47  ;;  %v2597_v52 = vadd.f32 %v2596_v51, %v2595_v48  ;;  %v2636_v53 = vpop.f32.mrf.mxu1 }
 0x10a   : > { %v2637_v54 = vadd.f32 %v2636_v53, %v2635_v49  ;;  %v2598_v55 = vpop.f32.mrf.mxu0 }
 0x10b   : > { %v1703_v56 = vadd.f32 %v2597_v52, %v2326_v2  ;;  %v2638_v57 = vpop.f32.mrf.mxu1 }
 0x10c   : > { %v2599_v58 = vpop.f32.mrf.mxu0 }
 0x10d   : > { %v3569_v59 = vadd.f32 %v2637_v54, %v1703_v56  ;;  %v2600_v60 = vadd.f32 %v2599_v58, %v2598_v55  ;;  %v2639_v61 = vpop.f32.mrf.mxu1 }
 0x10e   : > { %v2640_v62 = vadd.f32 %v2639_v61, %v2638_v57  ;;  %v2657_v0 = vpop.f32.mrf.mxu0 }
 0x10f   : > { %3736 = vst [vmem:[#allocation2_spill] sm:$0xff] %v3569_v59  ;;  %v1706_v63 = vadd.f32 %v2600_v60, %v2326_v2  ;;  %v3571_v1 = vpop.f32.mrf.mxu1 }
 0x110   : > { %v2658_v4 = vpop.f32.mrf.mxu0 }
 0x111   : > { %v3573_v3 = vadd.f32 %v2640_v62, %v1706_v63  ;;  %v2698_v5 = vpop.f32.mrf.mxu1 }
 0x112   : > { %v2660_v6 = vpop.f32.mrf.mxu0 }
 0x113   : > { %3737 = vst [vmem:[#allocation3_spill] sm:$0xff] %v3573_v3  ;;  %v3575_v7 = vpop.f32.mrf.mxu1 }
 0x114   : > { %v2661_v8 = vpop.f32.mrf.mxu0 }
 0x115   : > { %v3577_v9 = vpop.f32.mrf.mxu1 }
 0x116   : > { %v2663_v10 = vpop.f32.mrf.mxu0 }
 0x117   : > { %v3579_v12 = vpop.f32.mrf.mxu1 }
 0x118   : > { %v2664_v13 = vpop.f32.mrf.mxu0 }
 0x119   : > { %v3581_v14 = vpop.f32.mrf.mxu1 }
 0x11a   : > { %v3583_v2 = vpop.f32.mrf.mxu0 }
 0x11b   : > { %v3585_v15 = vpop.f32.mrf.mxu1 }
 0x11c   : > { %v2667_v16 = vpop.f32.mrf.mxu0 }
 0x11d   : > { %v3587_v17 = vpop.f32.mrf.mxu1 }
 0x11e   : > { %v3589_v19 = vpop.f32.mrf.mxu0 }
 0x11f   : > { %v3591_v20 = vpop.f32.mrf.mxu1 }
 0x120   : > { %v3593_v21 = vpop.f32.mrf.mxu0 }
 0x121   : > { %v3595_v22 = vpop.f32.mrf.mxu1 }
 0x122   : > { %v3597_v23 = vpop.f32.mrf.mxu0 }
 0x123   : > { %v3599_v24 = vpop.f32.mrf.mxu1 }
 0x124   : > { %v3601_v25 = vpop.f32.mrf.mxu0 }
 0x125   : > { %v3603_v26 = vpop.f32.mrf.mxu1 }
 0x126   : > { %v3605_v28 = vpop.f32.mrf.mxu0 }
 0x127   : > { %v3607_v29 = vpop.f32.mrf.mxu1 }
 0x128   : > { %3738 = vst [vmem:[#allocation4_spill] sm:$0xff] %v3607_v29  ;;  %v3609_v30 = vpop.f32.mrf.mxu0  ;;  %v2662_v29 = vadd.f32 %v2661_v8, %v2660_v6 }
 0x129   : > { %v3611_v31 = vpop.f32.mrf.mxu1 }
 0x12a   : > { %3739 = vst [vmem:[#allocation5_spill] sm:$0xff] %v3611_v31  ;;  %v3613_v32 = vpop.f32.mrf.mxu0 }
 0x12b   : > { %3740 = vst [vmem:[#allocation6_spill] sm:$0xff] %v3613_v32  ;;  %v3615_v33 = vpop.f32.mrf.mxu1 }
 0x12c   : > { %3741 = vst [vmem:[#allocation7_spill] sm:$0xff] %v3615_v33  ;;  %v3617_v35 = vpop.f32.mrf.mxu0 }
 0x12d   : > { %3742 = vst [vmem:[#allocation8_spill] sm:$0xff] %v3617_v35  ;;  %v3619_v36 = vpop.f32.mrf.mxu1 }
 0x12e   : > { %3743 = vst [vmem:[#allocation9_spill] sm:$0xff] %v3619_v36  ;;  %v2737_v37 = vpop.f32.mrf.mxu0  ;;  %v2659_v36 = vadd.f32 %v2658_v4, %v2657_v0  ;;  %v1812_v0 = vadd.f32 %v2662_v29, %v3559_v18  ;;  %v2665_v4 = vadd.f32 %v2664_v13, %v2663_v10  ;;  %v2705_v18 = vadd.f32 %v3581_v14, %v3579_v12 }
 0x12f   : > { %v2777_v38 = vpop.f32.mrf.mxu1 }
 0x130   : > { %v2738_v39 = vpop.f32.mrf.mxu0  ;;  %v1809_v31 = vadd.f32 %v2659_v36, %v3557_v11  ;;  %v2702_v11 = vadd.f32 %v3577_v9, %v3575_v7  ;;  %v2671_v9 = vadd.f32 %v3593_v21, %v3589_v19  ;;  %v2674_v19 = vadd.f32 %v3601_v25, %v3597_v23 }
 0x131   : > { %v2778_v40 = vpop.f32.mrf.mxu1  ;;  %v2739_v32 = vadd.f32 %v2738_v39, %v2737_v37  ;;  %v1817_v37 = vadd.f32 %v2665_v4, %v3561_v27 }
 0x132   : > { %v2740_v41 = vpop.f32.mrf.mxu0  ;;  %v1877_v36 = vadd.f32 %v2702_v11, %v1812_v0  ;;  %v2779_v39 = vadd.f32 %v2778_v40, %v2777_v38  ;;  %v2708_v40 = vadd.f32 %v3587_v17, %v3585_v15  ;;  %v1825_v0 = vadd.f32 %v2671_v9, %v3565_v44 }
 0x133   : > { %v2780_v42 = vpop.f32.mrf.mxu1 }
 0x134   : > { %v2741_v43 = vpop.f32.mrf.mxu0 }
 0x135   : > { %v2781_v45 = vpop.f32.mrf.mxu1  ;;  %v2742_v8 = vadd.f32 %v2741_v43, %v2740_v41 }
 0x136   : > { %v2743_v46 = vpop.f32.mrf.mxu0 }
 0x137   : > { %v3621_v47 = vpop.f32.mrf.mxu1  ;;  %v1942_v29 = vadd.f32 %v2742_v8, %v1877_v36 }
 0x138   : > { %v2744_v48 = vpop.f32.mrf.mxu0 }
 0x139   : > { %v3623_v49 = vpop.f32.mrf.mxu1 }
 0x13a   : > { %v2746_v51 = vpop.f32.mrf.mxu0 }
 0x13b   : > { %v3625_v52 = vpop.f32.mrf.mxu1 }
 0x13c   : > { %v2747_v53 = vpop.f32.mrf.mxu0 }
 0x13d   : > { %v3627_v54 = vpop.f32.mrf.mxu1  ;;  %v2748_v12 = vadd.f32 %v2747_v53, %v2746_v51 }
 0x13e   : > { %v3629_v55 = vpop.f32.mrf.mxu0 }
 0x13f   : > { %v3631_v56 = vpop.f32.mrf.mxu1 }
 0x140   : > { %3744 = vst [vmem:[#allocation10_spill] sm:$0xff] %v3631_v56  ;;  %v3633_v57 = vpop.f32.mrf.mxu0 }
 0x141   : > { %v3635_v58 = vpop.f32.mrf.mxu1  ;;  %v2751_v44 = vadd.f32 %v3633_v57, %v3629_v55  ;;  %v2714_v55 = vadd.f32 %v3603_v26, %v3599_v24  ;;  %v3753_v24 = vld [vmem:[#allocation6_spill] sm:$0xff]  ;;  %v3754_v26 = vld [vmem:[#allocation8_spill] sm:$0xff] }
 0x142   : > { %3745 = vst [vmem:[#allocation11_spill] sm:$0xff] %v3635_v58  ;;  %v3637_v60 = vpop.f32.mrf.mxu0  ;;  %v2699_v58 = vadd.f32 %v2698_v5, %v3571_v1  ;;  %v2668_v1 = vadd.f32 %v2667_v16, %v3583_v2  ;;  %v1882_v16 = vadd.f32 %v2705_v18, %v1817_v37  ;;  %v3752_v18 = vld [vmem:[#allocation2_spill] sm:$0xff] }
 0x143   : > { %v3639_v61 = vpop.f32.mrf.mxu1 }
 0x144   : > { %3746 = vst [vmem:[#allocation12_spill] sm:$0xff] %v3639_v61  ;;  %v3641_v62 = vpop.f32.mrf.mxu0  ;;  %v1820_v7 = vadd.f32 %v2668_v1, %v3563_v34 }
 0x145   : > { %v3643_v63 = vpop.f32.mrf.mxu1  ;;  %v2754_v37 = vadd.f32 %v3641_v62, %v3637_v60 }
 0x146   : > { %3747 = vst [vmem:[#allocation13_spill] sm:$0xff] %v3643_v63  ;;  %v3645_v33 = vpop.f32.mrf.mxu0  ;;  %v1874_v63 = vadd.f32 %v2699_v58, %v1809_v31  ;;  %v2745_v58 = vadd.f32 %v2744_v48, %v2743_v46  ;;  %v1885_v34 = vadd.f32 %v2708_v40, %v1820_v7 }
 0x147   : > { %3748 = vst [vmem:[#allocation14_spill] sm:$0xff] %v3645_v33  ;;  %v3647_v3 = vpop.f32.mrf.mxu1  ;;  %v3755_v60 = vld [vmem:[#allocation10_spill] sm:$0xff] }
 0x148   : > { %3749 = vst [vmem:[#allocation15_spill] sm:$0xff] %v3647_v3  ;;  %v3650_v56 = vpop.f32.mrf.mxu0  ;;  %v1939_v6 = vadd.f32 %v2739_v32, %v1874_v63  ;;  %v2782_v32 = vadd.f32 %v2781_v45, %v2780_v42  ;;  %v1947_v43 = vadd.f32 %v2745_v58, %v1882_v16  ;;  %v1950_v51 = vadd.f32 %v2748_v12, %v1885_v34 }
 0x149   : > { %v3652_v35 = vpop.f32.mrf.mxu1  ;;  %v3756_v62 = vld [vmem:[#allocation11_spill] sm:$0xff] }
 0x14a   : > { %v3655_v61 = vpop.f32.mrf.mxu0  ;;  %v2004_v13 = vadd.f32 %v2779_v39, %v1939_v6  ;;  %v2007_v41 = vadd.f32 %v2782_v32, %v1942_v29  ;;  %v1828_v6 = vadd.f32 %v2674_v19, %v3567_v50  ;;  %v2791_v58 = vadd.f32 %v3756_v62, %v3755_v60  ;;  %v3757_v32 = vld [vmem:[#allocation4_spill] sm:$0xff] }
 0x14b   : > { %v3657_v59 = vpop.f32.mrf.mxu1 }
 0x14c   : > { %3750 = vst [vmem:[#allocation16_spill] sm:$0xff] %v3657_v59  ;;  %v3660_v33 = vpop.f32.mrf.mxu0 }
 0x14d   : > { %v3662_v3 = vpop.f32.mrf.mxu1 }
 0x14e   : > { %3751 = vst [vmem:[#allocation17_spill] sm:$0xff] %v3662_v3  ;;  %v2817_v5 = vpop.f32.mrf.mxu0  ;;  %v3759_v12 = vld [vmem:[#allocation14_spill] sm:$0xff] }
 0x14f   : > { %v2857_v31 = vpop.f32.mrf.mxu1 }
 0x150   : > { %v2818_v10 = vpop.f32.mrf.mxu0 }
 0x151   : > { %v2819_v3 = vadd.f32 %v2818_v10, %v2817_v5  ;;  %v2858_v59 = vpop.f32.mrf.mxu1 }
 0x152   : > { %v2820_v2 = vpop.f32.mrf.mxu0  ;;  %v2859_v46 = vadd.f32 %v2858_v59, %v2857_v31  ;;  %v2711_v59 = vadd.f32 %v3595_v22, %v3591_v20  ;;  %v1893_v31 = vadd.f32 %v2714_v55, %v1828_v6 }
 0x153   : > { %v2069_v27 = vadd.f32 %v2819_v3, %v2004_v13  ;;  %v2860_v38 = vpop.f32.mrf.mxu1  ;;  %v2785_v3 = vadd.f32 %v3623_v49, %v3621_v47  ;;  %v2677_v47 = vadd.f32 %v3609_v30, %v3605_v28  ;;  %v2788_v49 = vadd.f32 %v3627_v54, %v3625_v52 }
 0x154   : > { %v2821_v14 = vpop.f32.mrf.mxu0  ;;  %v1890_v20 = vadd.f32 %v2711_v59, %v1825_v0  ;;  %v2680_v13 = vadd.f32 %v3754_v26, %v3753_v24  ;;  %v1958_v40 = vadd.f32 %v2754_v37, %v1893_v31  ;;  %v3760_v0 = vld [vmem:[#allocation3_spill] sm:$0xff] }
 0x155   : > { %v2822_v48 = vadd.f32 %v2821_v14, %v2820_v2  ;;  %v2861_v63 = vpop.f32.mrf.mxu1  ;;  %v2134_v42 = vadd.f32 %v2859_v46, %v2069_v27  ;;  %v2012_v4 = vadd.f32 %v2785_v3, %v1947_v43  ;;  %v2015_v57 = vadd.f32 %v2788_v49, %v1950_v51  ;;  %v3758_v27 = vld [vmem:[#allocation5_spill] sm:$0xff] }
 0x156   : > { %v2823_v21 = vpop.f32.mrf.mxu0  ;;  %v2862_v17 = vadd.f32 %v2861_v63, %v2860_v38  ;;  %v1955_v28 = vadd.f32 %v2751_v44, %v1890_v20  ;;  %v1833_v10 = vadd.f32 %v2677_v47, %v3752_v18  ;;  %v2717_v38 = vadd.f32 %v3758_v27, %v3757_v32  ;;  %v3762_v3 = vld [vmem:[#allocation13_spill] sm:$0xff] }
 0x157   : > { %v2072_v15 = vadd.f32 %v2822_v48, %v2007_v41  ;;  %v2863_v45 = vpop.f32.mrf.mxu1  ;;  %v2164_v22 = vmax.f32 %v2134_v42, 0.0  ;;  %v2757_v14 = vadd.f32 %v3650_v56, %v3759_v12  ;;  %v1836_v19 = vadd.f32 %v2680_v13, %v3760_v0  ;;  %v3767_v31 = vld [vmem:[#allocation17_spill] sm:$0xff] }
 0x158   : > { %v2824_v53 = vpop.f32.mrf.mxu0  ;;  %v2020_v43 = vadd.f32 %v2791_v58, %v1955_v28  ;;  %v1898_v34 = vadd.f32 %v2717_v38, %v1833_v10 }
 0x159   : > { %v2137_v11 = vadd.f32 %v2862_v17, %v2072_v15  ;;  %v2825_v23 = vadd.f32 %v2824_v53, %v2823_v21  ;;  %v2864_v25 = vpop.f32.mrf.mxu1  ;;  %v3761_v21 = vld [vmem:[#allocation12_spill] sm:$0xff]  ;;  %v3763_v53 = vld [vmem:[#allocation7_spill] sm:$0xff] }
 0x15a   : > { %v2826_v8 = vpop.f32.mrf.mxu0  ;;  %v2865_v52 = vadd.f32 %v2864_v25, %v2863_v45  ;;  %v2794_v42 = vadd.f32 %v3762_v3, %v3761_v21  ;;  %v2760_v25 = vadd.f32 %v3660_v33, %v3655_v61 }
 0x15b   : > { %v2165_v1 = vmax.f32 %v2137_v11, 0.0  ;;  %v2077_v5 = vadd.f32 %v2825_v23, %v2012_v4  ;;  %v2866_v36 = vpop.f32.mrf.mxu1  ;;  %v3764_v4 = vld [vmem:[#allocation9_spill] sm:$0xff]  ;;  %v1963_v11 = vadd.f32 %v2757_v14, %v1898_v34 }
 0x15c   : > { %v2827_v50 = vpop.f32.mrf.mxu0  ;;  %v2720_v56 = vadd.f32 %v3764_v4, %v3763_v53  ;;  %v2023_v44 = vadd.f32 %v2794_v42, %v1958_v40 }
 0x15d   : > { %v2541_v30 = vpack.c.bf16 %v2165_v1, %v2164_v22  ;;  %v2828_v54 = vadd.f32 %v2827_v50, %v2826_v8  ;;  %v2867_v39 = vpop.f32.mrf.mxu1  ;;  %v2142_v7 = vadd.f32 %v2865_v52, %v2077_v5  ;;  %v3765_v1 = vld [vmem:[#allocation15_spill] sm:$0xff] }
 0x15e   : > { %v2829_v29 = vpop.f32.mrf.mxu0  ;;  %v2868_v2 = vadd.f32 %v2867_v39, %v2866_v36  ;;  %v1901_v20 = vadd.f32 %v2720_v56, %v1836_v19  ;;  %v2797_v5 = vadd.f32 %v3652_v35, %v3765_v1  ;;  %v3766_v39 = vld [vmem:[#allocation16_spill] sm:$0xff] }
 0x15f   : > { %2542 = vst [vmem:[%s3697_s8] sm:$0xff] %v2541_v30   ;;  %v2080_v9 = vadd.f32 %v2828_v54, %v2015_v57  ;;  %v2869_v16 = vpop.f32.mrf.mxu1  ;;  %v2166_v17 = vmax.f32 %v2142_v7, 0.0  ;;  %v2800_v18 = vadd.f32 %v3767_v31, %v3766_v39 }
 0x160   : > { %v2830_v41 = vpop.f32.mrf.mxu0  ;;  %v2028_v28 = vadd.f32 %v2797_v5, %v1963_v11  ;;  %v1966_v30 = vadd.f32 %v2760_v25, %v1901_v20 }
 0x161   : > { %v2145_v46 = vadd.f32 %v2868_v2, %v2080_v9  ;;  %v2831_v48 = vadd.f32 %v2830_v41, %v2829_v29  ;;  %v2870_v63 = vpop.f32.mrf.mxu1 }
 0x162   : > { %v2832_v15 = vpop.f32.mrf.mxu0  ;;  %v2871_v47 = vadd.f32 %v2870_v63, %v2869_v16  ;;  %v2031_v29 = vadd.f32 %v2800_v18, %v1966_v30 }
 0x163   : > { %v2167_v45 = vmax.f32 %v2145_v46, 0.0  ;;  %v2085_v59 = vadd.f32 %v2831_v48, %v2020_v43  ;;  %v2872_v51 = vpop.f32.mrf.mxu1 }
 0x164   : > { %v2833_v23 = vpop.f32.mrf.mxu0 }
 0x165   : > { %v2546_v6 = vpack.c.bf16 %v2167_v45, %v2166_v17  ;;  %v2834_v49 = vadd.f32 %v2833_v23, %v2832_v15  ;;  %v2873_v8 = vpop.f32.mrf.mxu1  ;;  %v2150_v36 = vadd.f32 %v2871_v47, %v2085_v59 }
 0x166   : > { %v2835_v22 = vpop.f32.mrf.mxu0  ;;  %v2874_v57 = vadd.f32 %v2873_v8, %v2872_v51 }
 0x167   : > { %2558 = vst [vmem:[%s3697_s8 + $0x8] sm:$0xff] %v2546_v6   ;;  %v2088_v55 = vadd.f32 %v2834_v49, %v2023_v44  ;;  %v2875_v37 = vpop.f32.mrf.mxu1  ;;  %v2168_v10 = vmax.f32 %v2150_v36, 0.0 }
 0x168   : > { %v2836_v50 = vpop.f32.mrf.mxu0 }
 0x169   : > { %v2153_v52 = vadd.f32 %v2874_v57, %v2088_v55  ;;  %v2837_v33 = vadd.f32 %v2836_v50, %v2835_v22  ;;  %v2876_v61 = vpop.f32.mrf.mxu1 }
 0x16a   : > { %v2838_v54 = vpop.f32.mrf.mxu0  ;;  %v2877_v62 = vadd.f32 %v2876_v61, %v2875_v37 }
 0x16b   : > { %v2169_v24 = vmax.f32 %v2153_v52, 0.0  ;;  %v2093_v26 = vadd.f32 %v2837_v33, %v2028_v28  ;;  %v2878_v35 = vpop.f32.mrf.mxu1 }
 0x16c   : > { %v2839_v13 = vpop.f32.mrf.mxu0 }
 0x16d   : > { %v2551_v60 = vpack.c.bf16 %v2169_v24, %v2168_v10  ;;  %v2840_v58 = vadd.f32 %v2839_v13, %v2838_v54  ;;  %v2879_v7 = vpop.f32.mrf.mxu1  ;;  %v2158_v9 = vadd.f32 %v2877_v62, %v2093_v26 }
 0x16e   : > { %v2880_v16 = vadd.f32 %v2879_v7, %v2878_v35 }
 0x16f   : > { %2559 = vst [vmem:[%s3697_s8 + $0x10] sm:$0xff] %v2551_v60   ;;  %v2096_v2 = vadd.f32 %v2840_v58, %v2031_v29  ;;  %v2170_v27 = vmax.f32 %v2158_v9, 0.0 }
 0x171   : > { %v2161_v32 = vadd.f32 %v2880_v16, %v2096_v2 }
 0x173   : > { %v2171_v38 = vmax.f32 %v2161_v32, 0.0 }
 0x175   : > { %v2556_v40 = vpack.c.bf16 %v2171_v38, %v2170_v27 }
 0x177   : > { %2560 = vst [vmem:[%s3697_s8 + $0x18] sm:$0xff] %v2556_v40  }
 0x178 PF: > { %s13_s14 = sadd.s32 1, %s3055_s14   ;;  %s3768_s12 = smov %s3051_s13 }
 0x179   : > { %p10_p5 = scmp.ge.s32.totalorder %s13_s14, 4   ;;  %s3769_s13 = smov %s3771_s15 }
 0x17b   :  { %12 = sbr.rel (!%p10_p5) target bundleno = 2 (0x2), region = 68 }

// kernel: vqvae_forward.20
= control target key start
LH: loop header
LB: loop body
LE: loop exit
PB: predicated region body
PF: predicated region fallthrough
CT: control target
= control target key end

     0   :  { %s705_s12 = smov 0   ;;  %s707_s13 = smov 0   ;;  %s779_s0 = inlined_call_operand.vmem [shape: f32[128,128], index: 0, kind: input, shape index: {}]   ;;  %s780_s1 = inlined_call_operand.vmem [shape: bf16[128,128], index: 1, kind: input, shape index: {}]   ;;  %s781_s2 = inlined_call_operand.vmem [shape: f32[1,128], index: 2, kind: input, shape index: {}]   ;;  %s782_s3 = inlined_call_operand.vmem [shape: bf16[128,128], index: 3, kind: output, shape index: {}]  }
   0x1   :  { %s709_s14 = smov 0  }
   0x2 LB: > { %s25_s15 = sadd.s32 1, %s679_s13  ;;  %p522_p0 = scmp.ge.s32.totalorder %s683_s14, 1  ;;  %s683_s14 = sphi %s709_s14, %s13_s14   ;;  %s679_s13 = sphi %s707_s13, %s784_s13   ;;  %s675_s12 = sphi %s705_s12, %s783_s12  }
   0x3   : > { %p27_p1 = scmp.ge.s32.totalorder %s25_s15, 2  ;;  %p169_p2 = scmp.lt.s32.totalorder %s683_s14, 3 }
   0x5   : > { %s786_s15 = smov (%p27_p1, %s25_s15), 0  ;;  %p170_p3 = pnand %p522_p0, %p169_p2 }
   0x6   : > { %s523_s18 = sshll.u32 (!%p170_p3), %s675_s12, 3 }
   0x7   : > { %173 = sbr.rel (%p170_p3) target bundleno = 249 (0xf9), region = 32  ;;  %p204_p4 = scmp.lt.s32.totalorder (!%p170_p3), %s523_s18, 15 }
   0xc   : > { %v653_v0 = vld [vmem:[%s780_s1 + $0x38] sm:$0xff]   ;;  %v654_v1 = vld [vmem:[%s780_s1 + $0x30] sm:$0xff]   ;;  %s788_s18 = smov (!%p204_p4, %s523_s18), 15  ;;  %v655_v2 = vld [vmem:[%s780_s1 + $0x28] sm:$0xff]  }
   0xd   : > { %589 = vmatprep.subr.bf16.mxu0 %v653_v0  ;;  %613 = vmatprep.subr.bf16.mxu1 %v653_v0  ;;  %s524_s23 = sshll.u32 %s788_s18, 3  ;;  %v656_v3 = vld [vmem:[%s780_s1 + $0x20] sm:$0xff]   ;;  %v657_v10 = vld [vmem:[%s780_s1 + $0x18] sm:$0xff]   ;;  %v658_v11 = vld [vmem:[%s780_s1 + $0x10] sm:$0xff]   ;;  %s526_s12 = sshll.u32 %s788_s18, 2 }
   0xe   : > { %590 = vmatpush3.bf16.msra.mxu0 %v653_v0  ;;  %621 = vmatpush3.bf16.msra.mxu1 %v653_v0  ;;  %s738_s26 = scalar_lea.vmem %s779_s0, %s524_s23  ;;  %v659_v12 = vld [vmem:[%s780_s1 + $0x8] sm:$0xff]   ;;  %v660_v13 = vld [vmem:[%s780_s1] sm:$0xff]   ;;  %s223_s19 = scalar_lea.vmem %s782_s3, %s526_s12 }
   0xf   : > { %591 = vmatprep.subr.bf16.mxu0 %v654_v1  ;;  %614 = vmatprep.subr.bf16.mxu1 %v654_v1  ;;  %v226_v4 = vld [vmem:[%s738_s26] sm:$0xff]  ;;  %v227_v5 = vld [vmem:[%s738_s26 + $0x8] sm:$0xff]  ;;  %v228_v14 = vld [vmem:[%s738_s26 + $0x10] sm:$0xff] }
  0x10   : > { %v230_v6 = vld [vmem:[%s738_s26 + $0x20] sm:$0xff]  ;;  %v234_v7 = vpack.c.bf16 %v227_v5, %v226_v4  ;;  %v231_v8 = vld [vmem:[%s738_s26 + $0x28] sm:$0xff]  ;;  %v229_v15 = vld [vmem:[%s738_s26 + $0x18] sm:$0xff] }
  0x11   : > { %v236_v9 = vpack.c.bf16 %v231_v8, %v230_v6  ;;  %v232_v16 = vld [vmem:[%s738_s26 + $0x30] sm:$0xff]  ;;  %v233_v17 = vld [vmem:[%s738_s26 + $0x38] sm:$0xff]  ;;  %v235_v18 = vpack.c.bf16 %v229_v15, %v228_v14  ;;  %v527_v22 = vld [vmem:[%s781_s2] ss:$0 sm:$0xff] }
  0x12   : > { %592 = vmatpush3.bf16.msra.mxu0 %v654_v1  ;;  %622 = vmatpush3.bf16.msra.mxu1 %v654_v1  ;;  %v237_v19 = vpack.c.bf16 %v233_v17, %v232_v16 }
  0x13   : > { %593 = vmatprep.subr.bf16.mxu0 %v655_v2  ;;  %615 = vmatprep.subr.bf16.mxu1 %v655_v2 }
  0x14   : > { %605 = vmatprep.mubr.bf16.mxu0 %v234_v7  ;;  %609 = vmatprep.mubr.bf16.mxu1 %v236_v9 }
  0x16   : > { %594 = vmatpush3.bf16.msra.mxu0 %v655_v2  ;;  %623 = vmatpush3.bf16.msra.mxu1 %v655_v2 }
  0x17   : > { %595 = vmatprep.subr.bf16.mxu0 %v656_v3  ;;  %616 = vmatprep.subr.bf16.mxu1 %v656_v3 }
  0x1a   : > { %596 = vmatpush3.bf16.msra.mxu0 %v656_v3  ;;  %624 = vmatpush3.bf16.msra.mxu1 %v656_v3 }
  0x1b   : > { %597 = vmatprep.subr.bf16.mxu0 %v657_v10  ;;  %617 = vmatprep.subr.bf16.mxu1 %v657_v10 }
  0x1e   : > { %598 = vmatpush3.bf16.msra.mxu0 %v657_v10  ;;  %625 = vmatpush3.bf16.msra.mxu1 %v657_v10 }
  0x1f   : > { %599 = vmatprep.subr.bf16.mxu0 %v658_v11  ;;  %618 = vmatprep.subr.bf16.mxu1 %v658_v11 }
  0x22   : > { %600 = vmatpush3.bf16.msra.mxu0 %v658_v11  ;;  %626 = vmatpush3.bf16.msra.mxu1 %v658_v11 }
  0x23   : > { %601 = vmatprep.subr.bf16.mxu0 %v659_v12  ;;  %619 = vmatprep.subr.bf16.mxu1 %v659_v12 }
  0x26   : > { %602 = vmatpush3.bf16.msra.mxu0 %v659_v12  ;;  %627 = vmatpush3.bf16.msra.mxu1 %v659_v12 }
  0x27   : > { %603 = vmatprep.subr.bf16.mxu0 %v660_v13  ;;  %620 = vmatprep.subr.bf16.mxu1 %v660_v13 }
  0x2a   : > { %604 = vmatpush3.bf16.msra.mxu0 %v660_v13  ;;  %628 = vmatpush3.bf16.msra.mxu1 %v660_v13 }
  0x2d   : > { %606 = vmatmul.mubr.bf16.vlgmr.msra.gmra.mxu0 %v235_v18  ;;  %610 = vmatmul.mubr.bf16.vlgmr.msra.gmra.mxu1 %v237_v19 }
  0xed   : > { %v607_v20 = vpop.f32.mrf.mxu0  ;;  %v611_v21 = vpop.f32.mrf.mxu1 }
  0xee   : > { %v352_v27 = vadd.f32 %v607_v20, %v527_v22  ;;  %v368_v28 = vadd.f32 %v611_v21, %v527_v22 }
  0xef   : > { %v343_v23 = vpop.f32.mrf.mxu0  ;;  %v359_v24 = vpop.f32.mrf.mxu1 }
  0xf0   : > { %v344_v31 = vadd.f32 %v527_v22, %v343_v23  ;;  %v360_v32 = vadd.f32 %v527_v22, %v359_v24 }
  0xf1   : > { %v608_v25 = vpop.f32.mrf.mxu0  ;;  %v612_v26 = vpop.f32.mrf.mxu1 }
  0xf2   : > { %v355_v29 = vadd.f32 %v608_v25, %v527_v22  ;;  %v371_v30 = vadd.f32 %v612_v26, %v527_v22 }
  0xf3   : > { %v346_v33 = vpop.f32.mrf.mxu0  ;;  %v362_v34 = vpop.f32.mrf.mxu1 }
  0xf4   : > { %v562_v35 = vpack.c.bf16 %v355_v29, %v352_v27  ;;  %v572_v36 = vpack.c.bf16 %v371_v30, %v368_v28  ;;  %v347_v37 = vadd.f32 %v527_v22, %v346_v33  ;;  %v363_v38 = vadd.f32 %v527_v22, %v362_v34 }
  0xf6   : > { %574 = vst [vmem:[%s223_s19 + $0x8] sm:$0xff] %v562_v35   ;;  %576 = vst [vmem:[%s223_s19 + $0x18] sm:$0xff] %v572_v36   ;;  %v557_v39 = vpack.c.bf16 %v347_v37, %v344_v31  ;;  %v567_v40 = vpack.c.bf16 %v363_v38, %v360_v32 }
  0xf8   : > { %558 = vst [vmem:[%s223_s19] sm:$0xff] %v557_v39   ;;  %575 = vst [vmem:[%s223_s19 + $0x10] sm:$0xff] %v567_v40  }
  0xf9 PF: > { %s13_s14 = sadd.s32 1, %s683_s14   ;;  %s783_s12 = smov %s679_s13 }
  0xfa   : > { %p10_p5 = scmp.ge.s32.totalorder %s13_s14, 4   ;;  %s784_s13 = smov %s786_s15 }
  0xfc   :  { %12 = sbr.rel (!%p10_p5) target bundleno = 2 (0x2), region = 68 }

// kernel: vqvae_forward.21
= control target key start
LH: loop header
LB: loop body
LE: loop exit
PB: predicated region body
PF: predicated region fallthrough
CT: control target
= control target key end

     0   :  { %s2272_s18 = smov 0   ;;  %s2274_s19 = smov 0   ;;  %s2619_s0 = inlined_call_operand.vmem [shape: bf16[128,1152], index: 0, kind: input, shape index: {}]   ;;  %s2620_s1 = inlined_call_operand.vmem [shape: bf16[1152,128], index: 1, kind: input, shape index: {}]   ;;  %s2621_s2 = inlined_call_operand.vmem [shape: f32[1,128], index: 2, kind: input, shape index: {}]   ;;  %s2622_s3 = inlined_call_operand.vmem [shape: bf16[128,128], index: 3, kind: output, shape index: {0}]   ;;  %s2623_s4 = inlined_call_operand.vmem [shape: f32[2,1,128], index: 4, kind: output, shape index: {1}]   ;;  %s2624_s5 = inlined_call_operand.vmem [shape: f32[2,1,128], index: 5, kind: output, shape index: {2}]  }
   0x1   :  { %s2276_s20 = smov 0  }
   0x2 LB: > { %s28_s21 = sadd.s32 1, %s2236_s19  ;;  %p1702_p0 = scmp.ge.s32.totalorder %s2240_s20, 1  ;;  %s2240_s20 = sphi %s2276_s20, %s16_s20   ;;  %s2236_s19 = sphi %s2274_s19, %s2636_s19   ;;  %s2232_s18 = sphi %s2272_s18, %s2635_s18  }
   0x3   : > { %p30_p1 = scmp.ge.s32.totalorder %s28_s21, 2  ;;  %p229_p2 = scmp.lt.s32.totalorder %s2240_s20, 3 }
   0x5   : > { %s2638_s21 = smov (%p30_p1, %s28_s21), 0  ;;  %p230_p3 = pnand %p1702_p0, %p229_p2 }
   0x7   : > { %233 = sbr.rel (%p230_p3) target bundleno = 341 (0x155), region = 32 }
   0xc   : > { %v2094_v0 = vld [vmem:[%s2620_s1 + $0x78] sm:$0xff]   ;;  %v2098_v4 = vld [vmem:[%s2620_s1 + $0x70] sm:$0xff]   ;;  %v2102_v8 = vld [vmem:[%s2620_s1 + $0x68] sm:$0xff]   ;;  %s1703_s6 = sshll.u32 %s2232_s18, 3  ;;  %p303_p5 = scmp.lt.s32.totalorder %s2232_s18, 1 }
   0xd   : > { %v2095_v1 = vld [vmem:[%s2620_s1 + $0xf8] sm:$0xff]   ;;  %1857 = vmatprep.subr.bf16.mxu0 %v2094_v0  ;;  %v2099_v5 = vld [vmem:[%s2620_s1 + $0xf0] sm:$0xff]   ;;  %v2103_v9 = vld [vmem:[%s2620_s1 + $0xe8] sm:$0xff]   ;;  %p281_p4 = scmp.lt.s32.totalorder %s1703_s6, 15 }
   0xe   : > { %v2096_v2 = vld [vmem:[%s2620_s1 + $0x38] sm:$0xff]   ;;  %1897 = vmatprep.subr.bf16.mxu1 %v2095_v1  ;;  %v2100_v6 = vld [vmem:[%s2620_s1 + $0x30] sm:$0xff]   ;;  %v2104_v10 = vld [vmem:[%s2620_s1 + $0x28] sm:$0xff]   ;;  %s2642_s18 = smov (!%p303_p5, %s2232_s18), 1 }
   0xf   : > { %v2097_v3 = vld [vmem:[%s2620_s1 + $0xb8] sm:$0xff]   ;;  %1858 = vmatpush3.bf16.msra.mxu0 %v2096_v2  ;;  %v2101_v7 = vld [vmem:[%s2620_s1 + $0xb0] sm:$0xff]   ;;  %v2105_v11 = vld [vmem:[%s2620_s1 + $0xa8] sm:$0xff]   ;;  %s2640_s6 = smov (!%p281_p4, %s1703_s6), 15  ;;  %s308_s15 = scalar_lea.vmem %s2623_s4, %s2642_s18 }
  0x10   : > { %1898 = vmatpush3.bf16.msra.mxu1 %v2097_v3  ;;  %1859 = vmatprep.subr.bf16.mxu0 %v2098_v4  ;;  %v2106_v12 = vld [vmem:[%s2620_s1 + $0x60] sm:$0xff]   ;;  %v2110_v16 = vld [vmem:[%s2620_s1 + $0x58] sm:$0xff]   ;;  %v2114_v20 = vld [vmem:[%s2620_s1 + $0x50] sm:$0xff]   ;;  %s2069_s9 = smul.u32 36, %s2640_s6  ;;  %s1706_s10 = sshll.u32 %s2640_s6, 2 }
  0x11   : > { %1899 = vmatprep.subr.bf16.mxu1 %v2099_v5  ;;  %v2107_v13 = vld [vmem:[%s2620_s1 + $0xe0] sm:$0xff]   ;;  %v2111_v17 = vld [vmem:[%s2620_s1 + $0xd8] sm:$0xff]   ;;  %v2115_v21 = vld [vmem:[%s2620_s1 + $0xd0] sm:$0xff]   ;;  %s301_s13 = scalar_lea.vmem %s2622_s3, %s1706_s10  ;;  %s314_s22 = scalar_lea.vmem %s2624_s5, %s2642_s18 }
  0x12   : > { %v2108_v14 = vld [vmem:[%s2620_s1 + $0x20] sm:$0xff]   ;;  %v2112_v18 = vld [vmem:[%s2620_s1 + $0x18] sm:$0xff]   ;;  %v2116_v22 = vld [vmem:[%s2620_s1 + $0x10] sm:$0xff]   ;;  %s2389_s24 = scalar_lea.vmem %s2619_s0, %s2069_s9 }
  0x13   : > { %1860 = vmatpush3.bf16.msra.mxu0 %v2100_v6  ;;  %v2109_v15 = vld [vmem:[%s2620_s1 + $0xa0] sm:$0xff]   ;;  %v2113_v19 = vld [vmem:[%s2620_s1 + $0x98] sm:$0xff]   ;;  %v2117_v23 = vld [vmem:[%s2620_s1 + $0x90] sm:$0xff]  }
  0x14   : > { %1900 = vmatpush3.bf16.msra.mxu1 %v2101_v7  ;;  %1861 = vmatprep.subr.bf16.mxu0 %v2102_v8  ;;  %v2118_v24 = vld [vmem:[%s2620_s1 + $0x48] sm:$0xff]   ;;  %v2122_v28 = vld [vmem:[%s2620_s1 + $0x40] sm:$0xff]   ;;  %v2132_v36 = vld [vmem:[%s2620_s1 + $0x178] sm:$0xff]  }
  0x15   : > { %1901 = vmatprep.subr.bf16.mxu1 %v2103_v9  ;;  %v2119_v25 = vld [vmem:[%s2620_s1 + $0xc8] sm:$0xff]   ;;  %v2123_v29 = vld [vmem:[%s2620_s1 + $0xc0] sm:$0xff]   ;;  %v2133_v37 = vld [vmem:[%s2620_s1 + $0x1f8] sm:$0xff]  }
  0x16   : > { %v2120_v26 = vld [vmem:[%s2620_s1 + $0x8] sm:$0xff]   ;;  %v2124_v30 = vld [vmem:[%s2620_s1] sm:$0xff]   ;;  %v2134_v38 = vld [vmem:[%s2620_s1 + $0x138] sm:$0xff]  }
  0x17   : > { %1862 = vmatpush3.bf16.msra.mxu0 %v2104_v10  ;;  %v2121_v27 = vld [vmem:[%s2620_s1 + $0x88] sm:$0xff]   ;;  %v2125_v31 = vld [vmem:[%s2620_s1 + $0x80] sm:$0xff]   ;;  %v2135_v39 = vld [vmem:[%s2620_s1 + $0x1b8] sm:$0xff]  }
  0x18   : > { %1902 = vmatpush3.bf16.msra.mxu1 %v2105_v11  ;;  %1863 = vmatprep.subr.bf16.mxu0 %v2106_v12  ;;  %v2126_v32 = vld [vmem:[%s2389_s24] ss:$36 sps:$4 sm:$0xff]   ;;  %v2129_v34 = vld [vmem:[%s2389_s24 + $0x8] ss:$36 sps:$4 sm:$0xff]   ;;  %v2136_v40 = vld [vmem:[%s2620_s1 + $0x170] sm:$0xff]  }
  0x19   : > { %1903 = vmatprep.subr.bf16.mxu1 %v2107_v13  ;;  %v2128_v33 = vld [vmem:[%s2389_s24 + $0x4] ss:$36 sps:$4 sm:$0xff]   ;;  %v2131_v35 = vld [vmem:[%s2389_s24 + $0xc] ss:$36 sps:$4 sm:$0xff]   ;;  %v2142_v45 = vld [vmem:[%s2389_s24 + $0x54] ss:$36 sps:$4 sm:$0xff]  }
  0x1a   : > { %1155 = vmatprep.mubr.bf16.mxu0 %v2128_v33  ;;  %1220 = vmatprep.mubr.bf16.mxu1 %v2131_v35  ;;  %v2137_v41 = vld [vmem:[%s2620_s1 + $0x1f0] sm:$0xff]   ;;  %v2144_v46 = vld [vmem:[%s2389_s24 + $0x48] ss:$36 sps:$4 sm:$0xff]   ;;  %v2150_v52 = vld [vmem:[%s2620_s1 + $0x160] sm:$0xff]  }
  0x1b   : > { %1864 = vmatpush3.bf16.msra.mxu0 %v2108_v14  ;;  %v2138_v42 = vld [vmem:[%s2620_s1 + $0x130] sm:$0xff]   ;;  %v2146_v48 = vld [vmem:[%s2620_s1 + $0x168] sm:$0xff]   ;;  %v2151_v53 = vld [vmem:[%s2620_s1 + $0x1e0] sm:$0xff]  }
  0x1c   : > { %1904 = vmatpush3.bf16.msra.mxu1 %v2109_v15  ;;  %1865 = vmatprep.subr.bf16.mxu0 %v2110_v16  ;;  %v2139_v43 = vld [vmem:[%s2620_s1 + $0x1b0] sm:$0xff]   ;;  %v2147_v49 = vld [vmem:[%s2620_s1 + $0x1e8] sm:$0xff]   ;;  %v2152_v54 = vld [vmem:[%s2620_s1 + $0x120] sm:$0xff]  }
  0x1d   : > { %1905 = vmatprep.subr.bf16.mxu1 %v2111_v17  ;;  %v2140_v44 = vld [vmem:[%s2389_s24 + $0x4c] ss:$36 sps:$4 sm:$0xff]   ;;  %v2153_v55 = vld [vmem:[%s2620_s1 + $0x1a0] sm:$0xff]   ;;  %v2154_v56 = vld [vmem:[%s2389_s24 + $0x94] ss:$36 sps:$4 sm:$0xff]  }
  0x1e   : > { %v2145_v47 = vld [vmem:[%s2389_s24 + $0x50] ss:$36 sps:$4 sm:$0xff]   ;;  %v2148_v50 = vld [vmem:[%s2620_s1 + $0x128] sm:$0xff]   ;;  %v2156_v57 = vld [vmem:[%s2389_s24 + $0x9c] ss:$36 sps:$4 sm:$0xff]  }
  0x1f   : > { %1866 = vmatpush3.bf16.msra.mxu0 %v2112_v18  ;;  %v2149_v51 = vld [vmem:[%s2620_s1 + $0x1a8] sm:$0xff]   ;;  %v2158_v58 = vld [vmem:[%s2389_s24 + $0x90] ss:$36 sps:$4 sm:$0xff]   ;;  %v2159_v59 = vld [vmem:[%s2389_s24 + $0x98] ss:$36 sps:$4 sm:$0xff]  }
  0x20   : > { %1906 = vmatpush3.bf16.msra.mxu1 %v2113_v19  ;;  %1867 = vmatprep.subr.bf16.mxu0 %v2114_v20  ;;  %v2160_v60 = vld [vmem:[%s2620_s1 + $0x158] sm:$0xff]   ;;  %v2164_v0 = vld [vmem:[%s2620_s1 + $0x150] sm:$0xff]   ;;  %v2170_v5 = vld [vmem:[%s2389_s24 + $0xe4] ss:$36 sps:$4 sm:$0xff]  }
  0x21   : > { %1907 = vmatprep.subr.bf16.mxu1 %v2115_v21  ;;  %v2161_v61 = vld [vmem:[%s2620_s1 + $0x1d8] sm:$0xff]   ;;  %v2165_v1 = vld [vmem:[%s2620_s1 + $0x1d0] sm:$0xff]   ;;  %v2173_v7 = vld [vmem:[%s2389_s24 + $0xe0] ss:$36 sps:$4 sm:$0xff]  }
  0x22   : > { %v2162_v62 = vld [vmem:[%s2620_s1 + $0x118] sm:$0xff]   ;;  %v2166_v2 = vld [vmem:[%s2620_s1 + $0x110] sm:$0xff]   ;;  %v2174_v8 = vld [vmem:[%s2620_s1 + $0x148] sm:$0xff]  }
  0x23   : > { %1868 = vmatpush3.bf16.msra.mxu0 %v2116_v22  ;;  %v2163_v63 = vld [vmem:[%s2620_s1 + $0x198] sm:$0xff]   ;;  %v2167_v3 = vld [vmem:[%s2620_s1 + $0x190] sm:$0xff]   ;;  %v2175_v9 = vld [vmem:[%s2620_s1 + $0x1c8] sm:$0xff]  }
  0x24   : > { %1908 = vmatpush3.bf16.msra.mxu1 %v2117_v23  ;;  %1869 = vmatprep.subr.bf16.mxu0 %v2118_v24  ;;  %v2168_v4 = vld [vmem:[%s2389_s24 + $0xdc] ss:$36 sps:$4 sm:$0xff]   ;;  %v2176_v10 = vld [vmem:[%s2620_s1 + $0x108] sm:$0xff]   ;;  %v2182_v16 = vld [vmem:[%s2389_s24 + $0x10] ss:$36 sps:$4 sm:$0xff]  }
  0x25   : > { %1909 = vmatprep.subr.bf16.mxu1 %v2119_v25  ;;  %v2172_v6 = vld [vmem:[%s2389_s24 + $0xd8] ss:$36 sps:$4 sm:$0xff]   ;;  %v2177_v11 = vld [vmem:[%s2620_s1 + $0x188] sm:$0xff]   ;;  %v2178_v12 = vld [vmem:[%s2620_s1 + $0x140] sm:$0xff]  }
  0x26   : > { %v2179_v13 = vld [vmem:[%s2620_s1 + $0x1c0] sm:$0xff]   ;;  %v2184_v17 = vld [vmem:[%s2389_s24 + $0x14] ss:$36 sps:$4 sm:$0xff]   ;;  %v2206_v33 = vld [vmem:[%s2389_s24 + $0xec] ss:$36 sps:$4 sm:$0xff]  }
  0x27   : > { %1870 = vmatpush3.bf16.msra.mxu0 %v2120_v26  ;;  %v2180_v14 = vld [vmem:[%s2620_s1 + $0x100] sm:$0xff]   ;;  %v2185_v18 = vld [vmem:[%s2389_s24 + $0x18] ss:$36 sps:$4 sm:$0xff]   ;;  %v2189_v21 = vld [vmem:[%s2620_s1 + $0x230] sm:$0xff]  }
  0x28   : > { %1910 = vmatpush3.bf16.msra.mxu1 %v2121_v27  ;;  %1871 = vmatprep.subr.bf16.mxu0 %v2122_v28  ;;  %v2181_v15 = vld [vmem:[%s2620_s1 + $0x180] sm:$0xff]   ;;  %v2188_v20 = vld [vmem:[%s2620_s1 + $0x238] sm:$0xff]   ;;  %v2196_v26 = vld [vmem:[%s2620_s1 + $0x228] sm:$0xff]  }
  0x29   : > { %1911 = vmatprep.subr.bf16.mxu1 %v2123_v29  ;;  %v2187_v19 = vld [vmem:[%s2389_s24 + $0x1c] ss:$36 sps:$4 sm:$0xff]   ;;  %v2192_v23 = vld [vmem:[%s2389_s24 + $0x64] ss:$36 sps:$4 sm:$0xff]   ;;  %v2200_v28 = vld [vmem:[%s2389_s24 + $0xac] ss:$36 sps:$4 sm:$0xff]  }
  0x2a   : > { %v2190_v22 = vld [vmem:[%s2389_s24 + $0x5c] ss:$36 sps:$4 sm:$0xff]   ;;  %v2198_v27 = vld [vmem:[%s2389_s24 + $0xa4] ss:$36 sps:$4 sm:$0xff]   ;;  %v2205_v35 = vld [vmem:[%s2620_s1 + $0x210] sm:$0xff]  }
  0x2b   : > { %1872 = vmatpush3.bf16.msra.mxu0 %v2124_v30  ;;  %v2194_v24 = vld [vmem:[%s2389_s24 + $0x58] ss:$36 sps:$4 sm:$0xff]   ;;  %v2195_v25 = vld [vmem:[%s2389_s24 + $0x60] ss:$36 sps:$4 sm:$0xff]  }
  0x2c   : > { %1912 = vmatpush3.bf16.msra.mxu1 %v2125_v31  ;;  %1937 = vmatprep.subr.bf16.mxu0 %v2132_v36  ;;  %v2197_v29 = vld [vmem:[%s2620_s1 + $0x220] sm:$0xff]   ;;  %v2203_v31 = vld [vmem:[%s2389_s24 + $0xa8] ss:$36 sps:$4 sm:$0xff]  }
  0x2d   : > { %1977 = vmatprep.subr.bf16.mxu1 %v2133_v37  ;;  %v2202_v30 = vld [vmem:[%s2389_s24 + $0xa0] ss:$36 sps:$4 sm:$0xff]   ;;  %v2210_v36 = vld [vmem:[%s2389_s24 + $0xe8] ss:$36 sps:$4 sm:$0xff]  }
  0x2e   : > { %1156 = vmatmul.mubr.bf16.vlgmr.msra.gmra.mxu0 %v2126_v32  ;;  %v2204_v32 = vld [vmem:[%s2620_s1 + $0x218] sm:$0xff]   ;;  %v2212_v37 = vld [vmem:[%s2620_s1 + $0x208] sm:$0xff]  }
  0x2f   : > { %1221 = vmatmul.mubr.bf16.vlgmr.msra.gmra.mxu1 %v2129_v34  ;;  %1938 = vmatpush3.bf16.msra.mxu0 %v2134_v38  ;;  %v2208_v34 = vld [vmem:[%s2389_s24 + $0xf4] ss:$36 sps:$4 sm:$0xff]  }
  0x30   : > { %1978 = vmatpush3.bf16.msra.mxu1 %v2135_v39  ;;  %1939 = vmatprep.subr.bf16.mxu0 %v2136_v40  ;;  %v2211_v38 = vld [vmem:[%s2389_s24 + $0xf0] ss:$36 sps:$4 sm:$0xff]   ;;  %v2214_v39 = vld [vmem:[%s2389_s24 + $0x20] ss:$36 sps:$4 sm:$0xff]  }
  0x31   : > { %1979 = vmatprep.subr.bf16.mxu1 %v2137_v41  ;;  %1163 = vmatprep.mubr.bf16.mxu0 %v2140_v44  ;;  %v2215_v40 = vld [vmem:[%s2389_s24 + $0xb0] ss:$36 sps:$4 sm:$0xff]   ;;  %v2213_v41 = vld [vmem:[%s2620_s1 + $0x200] sm:$0xff]  }
  0x32   : > { %1228 = vmatprep.mubr.bf16.mxu1 %v2142_v45 }
  0x33   : > { %1940 = vmatpush3.bf16.msra.mxu0 %v2138_v42  ;;  %v2216_v42 = vld [vmem:[%s2389_s24 + $0x68] ss:$36 sps:$4 sm:$0xff]  }
  0x34   : > { %1980 = vmatpush3.bf16.msra.mxu1 %v2139_v43  ;;  %1941 = vmatprep.subr.bf16.mxu0 %v2146_v48  ;;  %v2217_v43 = vld [vmem:[%s2389_s24 + $0xf8] ss:$36 sps:$4 sm:$0xff]  }
  0x35   : > { %1981 = vmatprep.subr.bf16.mxu1 %v2147_v49 }
  0x36   : > { %1164 = vmatmul.mubr.bf16.gmra.mxu0 %v2144_v46 }
  0x37   : > { %1229 = vmatmul.mubr.bf16.gmra.mxu1 %v2145_v47  ;;  %1942 = vmatpush3.bf16.msra.mxu0 %v2148_v50 }
  0x38   : > { %1982 = vmatpush3.bf16.msra.mxu1 %v2149_v51  ;;  %1943 = vmatprep.subr.bf16.mxu0 %v2150_v52 }
  0x39   : > { %1983 = vmatprep.subr.bf16.mxu1 %v2151_v53  ;;  %1171 = vmatprep.mubr.bf16.mxu0 %v2154_v56 }
  0x3a   : > { %1236 = vmatprep.mubr.bf16.mxu1 %v2156_v57 }
  0x3b   : > { %1944 = vmatpush3.bf16.msra.mxu0 %v2152_v54 }
  0x3c   : > { %1984 = vmatpush3.bf16.msra.mxu1 %v2153_v55  ;;  %1945 = vmatprep.subr.bf16.mxu0 %v2160_v60 }
  0x3d   : > { %1985 = vmatprep.subr.bf16.mxu1 %v2161_v61 }
  0x3e   : > { %1172 = vmatmul.mubr.bf16.gmra.mxu0 %v2158_v58 }
  0x3f   : > { %1237 = vmatmul.mubr.bf16.gmra.mxu1 %v2159_v59  ;;  %1946 = vmatpush3.bf16.msra.mxu0 %v2162_v62 }
  0x40   : > { %1986 = vmatpush3.bf16.msra.mxu1 %v2163_v63  ;;  %1947 = vmatprep.subr.bf16.mxu0 %v2164_v0 }
  0x41   : > { %1987 = vmatprep.subr.bf16.mxu1 %v2165_v1  ;;  %1179 = vmatprep.mubr.bf16.mxu0 %v2168_v4 }
  0x42   : > { %1244 = vmatprep.mubr.bf16.mxu1 %v2170_v5 }
  0x43   : > { %1948 = vmatpush3.bf16.msra.mxu0 %v2166_v2 }
  0x44   : > { %1988 = vmatpush3.bf16.msra.mxu1 %v2167_v3  ;;  %1949 = vmatprep.subr.bf16.mxu0 %v2174_v8 }
  0x45   : > { %1989 = vmatprep.subr.bf16.mxu1 %v2175_v9 }
  0x46   : > { %1180 = vmatmul.mubr.bf16.gmra.mxu0 %v2172_v6 }
  0x47   : > { %1245 = vmatmul.mubr.bf16.gmra.mxu1 %v2173_v7  ;;  %1950 = vmatpush3.bf16.msra.mxu0 %v2176_v10 }
  0x48   : > { %1990 = vmatpush3.bf16.msra.mxu1 %v2177_v11  ;;  %1951 = vmatprep.subr.bf16.mxu0 %v2178_v12 }
  0x49   : > { %1991 = vmatprep.subr.bf16.mxu1 %v2179_v13  ;;  %1285 = vmatprep.mubr.bf16.mxu0 %v2184_v17 }
  0x4a   : > { %1350 = vmatprep.mubr.bf16.mxu1 %v2187_v19 }
  0x4b   : > { %1952 = vmatpush3.bf16.msra.mxu0 %v2180_v14 }
  0x4c   : > { %1992 = vmatpush3.bf16.msra.mxu1 %v2181_v15  ;;  %2029 = vmatprep.subr.bf16.mxu0 %v2188_v20 }
  0x4d   : > { %2053 = vmatprep.subr.bf16.mxu1 %v2188_v20 }
  0x4e   : > { %1286 = vmatmul.mubr.bf16.vlgmr.msra.gmra.mxu0 %v2182_v16 }
  0x4f   : > { %1351 = vmatmul.mubr.bf16.vlgmr.msra.gmra.mxu1 %v2185_v18  ;;  %2030 = vmatpush3.bf16.msra.mxu0 %v2188_v20 }
  0x50   : > { %2061 = vmatpush3.bf16.msra.mxu1 %v2188_v20  ;;  %2031 = vmatprep.subr.bf16.mxu0 %v2189_v21 }
  0x51   : > { %2054 = vmatprep.subr.bf16.mxu1 %v2189_v21  ;;  %1293 = vmatprep.mubr.bf16.mxu0 %v2190_v22 }
  0x52   : > { %1358 = vmatprep.mubr.bf16.mxu1 %v2192_v23 }
  0x53   : > { %2032 = vmatpush3.bf16.msra.mxu0 %v2189_v21 }
  0x54   : > { %2062 = vmatpush3.bf16.msra.mxu1 %v2189_v21  ;;  %2033 = vmatprep.subr.bf16.mxu0 %v2196_v26 }
  0x55   : > { %2055 = vmatprep.subr.bf16.mxu1 %v2196_v26 }
  0x56   : > { %1294 = vmatmul.mubr.bf16.gmra.mxu0 %v2194_v24 }
  0x57   : > { %1359 = vmatmul.mubr.bf16.gmra.mxu1 %v2195_v25  ;;  %1301 = vmatprep.mubr.bf16.mxu0 %v2198_v27 }
  0x58   : > { %2034 = vmatpush3.bf16.msra.mxu0 %v2196_v26  ;;  %1366 = vmatprep.mubr.bf16.mxu1 %v2200_v28 }
  0x59   : > { %2063 = vmatpush3.bf16.msra.mxu1 %v2196_v26  ;;  %2035 = vmatprep.subr.bf16.mxu0 %v2197_v29 }
  0x5a   : > { %2056 = vmatprep.subr.bf16.mxu1 %v2197_v29 }
  0x5c   : > { %2036 = vmatpush3.bf16.msra.mxu0 %v2197_v29 }
  0x5d   : > { %2064 = vmatpush3.bf16.msra.mxu1 %v2197_v29  ;;  %2037 = vmatprep.subr.bf16.mxu0 %v2204_v32 }
  0x5e   : > { %1302 = vmatmul.mubr.bf16.gmra.mxu0 %v2202_v30  ;;  %2057 = vmatprep.subr.bf16.mxu1 %v2204_v32 }
  0x5f   : > { %1367 = vmatmul.mubr.bf16.gmra.mxu1 %v2203_v31  ;;  %1309 = vmatprep.mubr.bf16.mxu0 %v2206_v33  ;;  %v1707_v33 = vld [vmem:[%s2621_s2] ss:$0 sm:$0xff] }
  0x60   : > { %2038 = vmatpush3.bf16.msra.mxu0 %v2204_v32  ;;  %1374 = vmatprep.mubr.bf16.mxu1 %v2208_v34 }
  0x61   : > { %2065 = vmatpush3.bf16.msra.mxu1 %v2204_v32  ;;  %2039 = vmatprep.subr.bf16.mxu0 %v2205_v35 }
  0x62   : > { %2058 = vmatprep.subr.bf16.mxu1 %v2205_v35 }
  0x64   : > { %2040 = vmatpush3.bf16.msra.mxu0 %v2205_v35 }
  0x65   : > { %2066 = vmatpush3.bf16.msra.mxu1 %v2205_v35  ;;  %2041 = vmatprep.subr.bf16.mxu0 %v2212_v37 }
  0x66   : > { %1310 = vmatmul.mubr.bf16.gmra.mxu0 %v2210_v36  ;;  %2059 = vmatprep.subr.bf16.mxu1 %v2212_v37 }
  0x67   : > { %1375 = vmatmul.mubr.bf16.gmra.mxu1 %v2211_v38  ;;  %2045 = vmatprep.mubr.bf16.mxu0 %v2214_v39 }
  0x68   : > { %2042 = vmatpush3.bf16.msra.mxu0 %v2212_v37  ;;  %2049 = vmatprep.mubr.bf16.mxu1 %v2215_v40 }
  0x69   : > { %2067 = vmatpush3.bf16.msra.mxu1 %v2212_v37  ;;  %2043 = vmatprep.subr.bf16.mxu0 %v2213_v41 }
  0x6a   : > { %2060 = vmatprep.subr.bf16.mxu1 %v2213_v41 }
  0x6c   : > { %2044 = vmatpush3.bf16.msra.mxu0 %v2213_v41 }
  0x6d   : > { %2068 = vmatpush3.bf16.msra.mxu1 %v2213_v41 }
  0x6f   : > { %2046 = vmatmul.mubr.bf16.vlgmr.msra.gmra.mxu0 %v2216_v42 }
  0x70   : > { %2050 = vmatmul.mubr.bf16.vlgmr.msra.gmra.mxu1 %v2217_v43 }
  0xee   : > { %v1873_v44 = vpop.f32.mrf.mxu0 }
  0xef   : > { %v2553_v45 = vpop.f32.mrf.mxu1 }
  0xf0   : > { %v1874_v46 = vpop.f32.mrf.mxu0 }
  0xf1   : > { %v1914_v47 = vpop.f32.mrf.mxu1  ;;  %v1875_v31 = vadd.f32 %v1874_v46, %v1873_v44 }
  0xf2   : > { %v1876_v48 = vpop.f32.mrf.mxu0 }
  0xf3   : > { %v1916_v49 = vpop.f32.mrf.mxu1  ;;  %v1158_v43 = vadd.f32 %v1875_v31, %v1707_v33 }
  0xf4   : > { %v1877_v50 = vpop.f32.mrf.mxu0 }
  0xf5   : > { %v1917_v51 = vpop.f32.mrf.mxu1  ;;  %v1878_v32 = vadd.f32 %v1877_v50, %v1876_v48 }
  0xf6   : > { %v1879_v52 = vpop.f32.mrf.mxu0  ;;  %v1918_v44 = vadd.f32 %v1917_v51, %v1916_v49 }
  0xf7   : > { %v1919_v53 = vpop.f32.mrf.mxu1 }
  0xf8   : > { %v1880_v54 = vpop.f32.mrf.mxu0 }
  0xf9   : > { %v1920_v55 = vpop.f32.mrf.mxu1  ;;  %v1881_v34 = vadd.f32 %v1880_v54, %v1879_v52 }
  0xfa   : > { %v1882_v56 = vpop.f32.mrf.mxu0  ;;  %v1921_v48 = vadd.f32 %v1920_v55, %v1919_v53 }
  0xfb   : > { %v1922_v57 = vpop.f32.mrf.mxu1  ;;  %v1166_v46 = vadd.f32 %v1881_v34, %v1707_v33 }
  0xfc   : > { %v1883_v58 = vpop.f32.mrf.mxu0 }
  0xfd   : > { %v1923_v59 = vpop.f32.mrf.mxu1  ;;  %v1884_v35 = vadd.f32 %v1883_v58, %v1882_v56  ;;  %v1231_v49 = vadd.f32 %v1921_v48, %v1166_v46 }
  0xfe   : > { %v1885_v60 = vpop.f32.mrf.mxu0 }
  0xff   : > { %v1925_v61 = vpop.f32.mrf.mxu1  ;;  %v1169_v50 = vadd.f32 %v1884_v35, %v1707_v33 }
 0x100   : > { %v1886_v62 = vpop.f32.mrf.mxu0 }
 0x101   : > { %v1926_v63 = vpop.f32.mrf.mxu1  ;;  %v1887_v38 = vadd.f32 %v1886_v62, %v1885_v60 }
 0x102   : > { %v1888_v0 = vpop.f32.mrf.mxu0  ;;  %v1927_v56 = vadd.f32 %v1926_v63, %v1925_v61 }
 0x103   : > { %v2555_v1 = vpop.f32.mrf.mxu1  ;;  %v1174_v54 = vadd.f32 %v1887_v38, %v1707_v33 }
 0x104   : > { %v1889_v2 = vpop.f32.mrf.mxu0 }
 0x105   : > { %v2557_v3 = vpop.f32.mrf.mxu1  ;;  %v1890_v58 = vadd.f32 %v1889_v2, %v1888_v0 }
 0x106   : > { %v1891_v4 = vpop.f32.mrf.mxu0  ;;  %v1930_v61 = vadd.f32 %v2557_v3, %v2555_v1 }
 0x107   : > { %v1931_v5 = vpop.f32.mrf.mxu1 }
 0x108   : > { %v1892_v6 = vpop.f32.mrf.mxu0 }
 0x109   : > { %v1932_v7 = vpop.f32.mrf.mxu1  ;;  %v1893_v39 = vadd.f32 %v1892_v6, %v1891_v4 }
 0x10a   : > { %v1894_v8 = vpop.f32.mrf.mxu0 }
 0x10b   : > { %v1934_v9 = vpop.f32.mrf.mxu1  ;;  %v1182_v60 = vadd.f32 %v1893_v39, %v1707_v33 }
 0x10c   : > { %v1895_v10 = vpop.f32.mrf.mxu0 }
 0x10d   : > { %v1935_v11 = vpop.f32.mrf.mxu1  ;;  %v1896_v40 = vadd.f32 %v1895_v10, %v1894_v8 }
 0x10e   : > { %v1953_v12 = vpop.f32.mrf.mxu0  ;;  %v1936_v4 = vadd.f32 %v1935_v11, %v1934_v9 }
 0x10f   : > { %v2559_v13 = vpop.f32.mrf.mxu1  ;;  %v1185_v62 = vadd.f32 %v1896_v40, %v1707_v33 }
 0x110   : > { %v1954_v14 = vpop.f32.mrf.mxu0 }
 0x111   : > { %v2561_v15 = vpop.f32.mrf.mxu1  ;;  %v1955_v6 = vadd.f32 %v1954_v14, %v1953_v12  ;;  %v1250_v2 = vadd.f32 %v1936_v4, %v1185_v62 }
 0x112   : > { %v2563_v16 = vpop.f32.mrf.mxu0 }
 0x113   : > { %v2565_v17 = vpop.f32.mrf.mxu1 }
 0x114   : > { %2625 = vst [vmem:[#allocation2_spill] sm:$0xff] %v2565_v17  ;;  %v2567_v18 = vpop.f32.mrf.mxu0  ;;  %v1924_v17 = vadd.f32 %v1923_v59, %v1922_v57  ;;  %v1239_v59 = vadd.f32 %v1927_v56, %v1174_v54 }
 0x115   : > { %v2569_v19 = vpop.f32.mrf.mxu1  ;;  %v1958_v12 = vadd.f32 %v2567_v18, %v2563_v16 }
 0x116   : > { %2626 = vst [vmem:[#allocation3_spill] sm:$0xff] %v2569_v19  ;;  %v1959_v20 = vpop.f32.mrf.mxu0  ;;  %v1161_v19 = vadd.f32 %v1878_v32, %v1707_v33  ;;  %v1234_v51 = vadd.f32 %v1924_v17, %v1169_v50  ;;  %v1177_v32 = vadd.f32 %v1890_v58, %v1707_v33 }
 0x117   : > { %v2571_v21 = vpop.f32.mrf.mxu1 }
 0x118   : > { %v1960_v22 = vpop.f32.mrf.mxu0 }
 0x119   : > { %v2000_v23 = vpop.f32.mrf.mxu1 }
 0x11a   : > { %v1962_v24 = vpop.f32.mrf.mxu0 }
 0x11b   : > { %v2573_v25 = vpop.f32.mrf.mxu1  ;;  %v2631_v16 = vld [vmem:[#allocation2_spill] sm:$0xff] }
 0x11c   : > { %v1963_v26 = vpop.f32.mrf.mxu0 }
 0x11d   : > { %v2575_v27 = vpop.f32.mrf.mxu1  ;;  %v1964_v63 = vadd.f32 %v1963_v26, %v1962_v24  ;;  %v2632_v18 = vld [vmem:[#allocation3_spill] sm:$0xff] }
 0x11e   : > { %2627 = vst [vmem:[#allocation4_spill] sm:$0xff] %v2575_v27  ;;  %v1965_v28 = vpop.f32.mrf.mxu0 }
 0x11f   : > { %v2577_v29 = vpop.f32.mrf.mxu1  ;;  %v1299_v24 = vadd.f32 %v1964_v63, %v1234_v51 }
 0x120   : > { %2628 = vst [vmem:[#allocation5_spill] sm:$0xff] %v2577_v29  ;;  %v1966_v30 = vpop.f32.mrf.mxu0  ;;  %v1915_v29 = vadd.f32 %v1914_v47, %v2553_v45  ;;  %v1961_v45 = vadd.f32 %v1960_v22, %v1959_v20  ;;  %v1226_v47 = vadd.f32 %v1918_v44, %v1161_v19  ;;  %v2001_v20 = vadd.f32 %v2000_v23, %v2571_v21 }
 0x121   : > { %v2582_v36 = vpop.f32.mrf.mxu1  ;;  %v1967_v17 = vadd.f32 %v1966_v30, %v1965_v28  ;;  %v1998_v28 = vadd.f32 %v2632_v18, %v2631_v16 }
 0x122   : > { %2629 = vst [vmem:[#allocation6_spill] sm:$0xff] %v2582_v36  ;;  %v1968_v37 = vpop.f32.mrf.mxu0  ;;  %v1933_v36 = vadd.f32 %v1932_v7, %v1931_v5  ;;  %v1223_v31 = vadd.f32 %v1915_v29, %v1158_v43  ;;  %v1995_v7 = vadd.f32 %v2561_v15, %v2559_v13  ;;  %v1296_v14 = vadd.f32 %v1961_v45, %v1231_v49 }
 0x123   : > { %v2008_v41 = vpop.f32.mrf.mxu1  ;;  %v1242_v15 = vadd.f32 %v1930_v61, %v1177_v32  ;;  %v1304_v30 = vadd.f32 %v1967_v17, %v1239_v59 }
 0x124   : > { %v1969_v42 = vpop.f32.mrf.mxu0  ;;  %v1247_v0 = vadd.f32 %v1933_v36, %v1182_v60  ;;  %v1288_v5 = vadd.f32 %v1955_v6, %v1223_v31  ;;  %v1291_v36 = vadd.f32 %v1958_v12, %v1226_v47 }
 0x125   : > { %v2009_v27 = vpop.f32.mrf.mxu1  ;;  %v1970_v22 = vadd.f32 %v1969_v42, %v1968_v37  ;;  %v2630_v26 = vld [vmem:[#allocation4_spill] sm:$0xff] }
 0x126   : > { %v1971_v52 = vpop.f32.mrf.mxu0  ;;  %v2004_v33 = vadd.f32 %v2630_v26, %v2573_v25  ;;  %v2010_v40 = vadd.f32 %v2009_v27, %v2008_v41  ;;  %v1361_v25 = vadd.f32 %v2001_v20, %v1296_v14  ;;  %v1353_v46 = vadd.f32 %v1995_v7, %v1288_v5 }
 0x127   : > { %v2011_v8 = vpop.f32.mrf.mxu1  ;;  %v2633_v38 = vld [vmem:[#allocation5_spill] sm:$0xff]  ;;  %v1307_v39 = vadd.f32 %v1970_v22, %v1242_v15  ;;  %v1356_v62 = vadd.f32 %v1998_v28, %v1291_v36 }
 0x128   : > { %v1972_v10 = vpop.f32.mrf.mxu0  ;;  %v1364_v50 = vadd.f32 %v2004_v33, %v1299_v24 }
 0x129   : > { %v1973_v53 = vadd.f32 %v1972_v10, %v1971_v52  ;;  %v2012_v55 = vpop.f32.mrf.mxu1  ;;  %v2634_v21 = vld [vmem:[#allocation6_spill] sm:$0xff] }
 0x12a   : > { %v1974_v57 = vpop.f32.mrf.mxu0  ;;  %v2013_v1 = vadd.f32 %v2012_v55, %v2011_v8  ;;  %v2007_v23 = vadd.f32 %v2634_v21, %v2633_v38  ;;  %v1372_v8 = vadd.f32 %v2010_v40, %v1307_v39 }
 0x12b   : > { %v2014_v9 = vpop.f32.mrf.mxu1  ;;  %v1312_v29 = vadd.f32 %v1973_v53, %v1247_v0 }
 0x12c   : > { %v1975_v11 = vpop.f32.mrf.mxu0  ;;  %v1369_v6 = vadd.f32 %v2007_v23, %v1304_v30 }
 0x12d   : > { %v1976_v19 = vadd.f32 %v1975_v11, %v1974_v57  ;;  %v2015_v3 = vpop.f32.mrf.mxu1  ;;  %v1377_v42 = vadd.f32 %v2013_v1, %v1312_v29 }
 0x12e   : > { %v2016_v13 = vadd.f32 %v2015_v3, %v2014_v9 }
 0x12f   : > { %v1315_v34 = vadd.f32 %v1976_v19, %v1250_v2  ;;  %v2047_v35 = vpop.f32.mrf.mxu0 }
 0x130   : > { %v2051_v37 = vpop.f32.mrf.mxu1  ;;  %v1426_v54 = vadd.f32 %v2047_v35, %v1361_v25 }
 0x131   : > { %v1417_v43 = vpop.f32.mrf.mxu0  ;;  %v1380_v44 = vadd.f32 %v2016_v13, %v1315_v34  ;;  %v1442_v4 = vadd.f32 %v2051_v37, %v1377_v42 }
 0x132   : > { %v1433_v48 = vpop.f32.mrf.mxu1  ;;  %v1418_v56 = vadd.f32 %v1417_v43, %v1353_v46  ;;  %v1464_v61 = vmul.f32 %v1426_v54, %v1426_v54 }
 0x133   : > { %v2048_v52 = vpop.f32.mrf.mxu0  ;;  %v1434_v47 = vadd.f32 %v1433_v48, %v1369_v6  ;;  %v1468_v20 = vmul.f32 %v1442_v4, %v1442_v4 }
 0x134   : > { %v1429_v58 = vadd.f32 %v2048_v52, %v1364_v50  ;;  %v2052_v60 = vpop.f32.mrf.mxu1  ;;  %v1462_v53 = vmul.f32 %v1418_v56, %v1418_v56 }
 0x135   : > { %v1445_v27 = vadd.f32 %v2052_v60, %v1380_v44  ;;  %v1420_v41 = vpop.f32.mrf.mxu0  ;;  %v1466_v9 = vmul.f32 %v1434_v47, %v1434_v47 }
 0x136   : > { %v1842_v10 = vpack.c.bf16 %v1429_v58, %v1426_v54  ;;  %v1421_v31 = vadd.f32 %v1420_v41, %v1356_v62  ;;  %v1436_v45 = vpop.f32.mrf.mxu1  ;;  %v1465_v2 = vmul.f32 %v1429_v58, %v1429_v58 }
 0x137   : > { %v1852_v49 = vpack.c.bf16 %v1445_v27, %v1442_v4  ;;  %v1437_v51 = vadd.f32 %v1436_v45, %v1372_v8  ;;  %v1469_v1 = vmul.f32 %v1445_v27, %v1445_v27 }
 0x138   : > { %1854 = vst [vmem:[%s301_s13 + $0x8] sm:$0xff] %v1842_v10   ;;  %v1448_v55 = vadd.f32 %v1421_v31, %v1418_v56  ;;  %v1463_v57 = vmul.f32 %v1421_v31, %v1421_v31  ;;  %v1837_v59 = vpack.c.bf16 %v1421_v31, %v1418_v56 }
 0x139   : > { %1856 = vst [vmem:[%s301_s13 + $0x18] sm:$0xff] %v1852_v49   ;;  %v1847_v32 = vpack.c.bf16 %v1437_v51, %v1434_v47  ;;  %v1467_v17 = vmul.f32 %v1437_v51, %v1437_v51 }
 0x13a   : > { %v1449_v63 = vadd.f32 %v1448_v55, %v1426_v54  ;;  %v1470_v0 = vadd.f32 %v1463_v57, %v1462_v53  ;;  %1838 = vst [vmem:[%s301_s13] sm:$0xff] %v1837_v59  }
 0x13b   : > { %1855 = vst [vmem:[%s301_s13 + $0x10] sm:$0xff] %v1847_v32  }
 0x13c   : > { %v1471_v5 = vadd.f32 %v1470_v0, %v1464_v61  ;;  %v1450_v7 = vadd.f32 %v1449_v63, %v1429_v58 }
 0x13e   : > { %v1451_v11 = vadd.f32 %v1450_v7, %v1434_v47  ;;  %v1472_v12 = vadd.f32 %v1471_v5, %v1465_v2 }
 0x140   : > { %v1452_v14 = vadd.f32 %v1451_v11, %v1437_v51  ;;  %v1473_v19 = vadd.f32 %v1472_v12, %v1466_v9 }
 0x142   : > { %v1453_v22 = vadd.f32 %v1452_v14, %v1442_v4  ;;  %v1474_v29 = vadd.f32 %v1473_v19, %v1467_v17 }
 0x144   : > { %v1454_v3 = vadd.f32 %v1453_v22, %v1445_v27  ;;  %v1475_v24 = vadd.f32 %v1474_v29, %v1468_v20 }
 0x146   : > { %v1455_v26 = vrot.slane %v1454_v3, 4  ;;  %v1476_v33 = vadd.f32 %v1475_v24, %v1469_v1 }
 0x148   : > { %v1456_v34 = vadd.f32 %v1455_v26, %v1454_v3  ;;  %v1477_v13 = vrot.slane %v1476_v33, 4 }
 0x14a   : > { %v1457_v15 = vrot.slane %v1456_v34, 2  ;;  %v1478_v35 = vadd.f32 %v1477_v13, %v1476_v33 }
 0x14c   : > { %v1458_v36 = vadd.f32 %v1457_v15, %v1456_v34  ;;  %v1479_v16 = vrot.slane %v1478_v35, 2 }
 0x14e   : > { %v1459_v18 = vrot.slane %v1458_v36, 1  ;;  %v1480_v28 = vadd.f32 %v1479_v16, %v1478_v35 }
 0x150   : > { %v1460_v30 = vadd.f32 %v1459_v18, %v1458_v36  ;;  %v1481_v38 = vrot.slane %v1480_v28, 1 }
 0x152   : > { %1461 = vst [vmem:[%s308_s15] sm:$0x1] %v1460_v30  ;;  %v1482_v21 = vadd.f32 %v1481_v38, %v1480_v28 }
 0x154   : > { %1483 = vst [vmem:[%s314_s22] sm:$0x1] %v1482_v21 }
 0x155 PF: > { %s16_s20 = sadd.s32 1, %s2240_s20   ;;  %s2635_s18 = smov %s2236_s19 }
 0x156   : > { %p13_p6 = scmp.ge.s32.totalorder %s16_s20, 4   ;;  %s2636_s19 = smov %s2638_s21 }
 0x158   :  { %15 = sbr.rel (!%p13_p6) target bundleno = 2 (0x2), region = 92 }

// kernel: vqvae_forward.23
= control target key start
LH: loop header
LB: loop body
LE: loop exit
PB: predicated region body
PF: predicated region fallthrough
CT: control target
= control target key end

     0   :  { %s542_s15 = smov 0   ;;  %s579_s0 = inlined_call_operand.vmem [shape: bf16[128,128], index: 0, kind: input, shape index: {}]   ;;  %s580_s1 = inlined_call_operand.vmem [shape: f32[1,128], index: 1, kind: input, shape index: {}]   ;;  %s581_s2 = inlined_call_operand.vmem [shape: f32[1,128], index: 2, kind: input, shape index: {}]   ;;  %s582_s3 = inlined_call_operand.vmem [shape: bf16[128,128], index: 3, kind: input, shape index: {}]   ;;  %s583_s4 = inlined_call_operand.vmem [shape: bf16[128,128], index: 4, kind: output, shape index: {}]  }
   0x1 LB: > { %s409_s16 = sadd.s32 4294967295, %s515_s15   ;;  %p413_p0 = scmp.ge.s32.totalorder %s515_s15, 1  ;;  %s515_s15 = sphi %s542_s15, %s14_s15  }
   0x2   : > { %p174_p1 = scmp.lt.s32.totalorder %s515_s15, 3 }
   0x4   : > { %p175_p2 = pnand %p413_p0, %p174_p1 }
   0x5   : > { %s414_s17 = sshll.u32 (!%p175_p2), %s409_s16, 3 }
   0x6   : > { %178 = sbr.rel (%p175_p2) target bundleno = 35 (0x23), region = 36  ;;  %p206_p3 = scmp.lt.s32.totalorder (!%p175_p2), %s414_s17, 15 }
   0xb   : > { %s585_s17 = smov (!%p206_p3, %s414_s17), 15  ;;  %v420_v0 = vld [vmem:[%s580_s1] ss:$0 sm:$0xff] }
   0xc   : > { %s550_s18 = sshll.u32 %s585_s17, 2  ;;  %v421_v11 = vld [vmem:[%s581_s2] ss:$0 sm:$0xff] }
   0xd   : > { %s209_s21 = scalar_lea.vmem %s579_s0, %s550_s18  ;;  %s560_s24 = scalar_lea.vmem %s582_s3, %s550_s18 }
   0xe   : > { %v441_v1 = vld [vmem:[%s209_s21] sm:$0xff]   ;;  %v492_v3 = vld [vmem:[%s209_s21 + $0x8] sm:$0xff]   ;;  %v493_v9 = vld [vmem:[%s209_s21 + $0x10] sm:$0xff]   ;;  %s221_s5 = scalar_lea.vmem %s583_s4, %s550_s18 }
   0xf   : > { %v457_v2 = vld [vmem:[%s560_s24] sm:$0xff]   ;;  %v442_v4 = vunpack.c.l.bf16 %v441_v1  ;;  %v443_v5 = vunpack.c.h.bf16 %v441_v1  ;;  %v495_v8 = vld [vmem:[%s560_s24 + $0x8] sm:$0xff]   ;;  %v496_v10 = vld [vmem:[%s560_s24 + $0x10] sm:$0xff]   ;;  %v446_v12 = vunpack.c.l.bf16 %v492_v3  ;;  %v447_v13 = vunpack.c.h.bf16 %v492_v3 }
  0x10   : > { %v458_v6 = vunpack.c.l.bf16 %v457_v2  ;;  %v459_v7 = vunpack.c.h.bf16 %v457_v2  ;;  %v462_v14 = vunpack.c.l.bf16 %v495_v8  ;;  %v463_v15 = vunpack.c.h.bf16 %v495_v8  ;;  %v494_v20 = vld [vmem:[%s209_s21 + $0x18] sm:$0xff]  }
  0x11   : > { %v246_v16 = vmul.f32 %v442_v4, %v420_v0  ;;  %v247_v17 = vmul.f32 %v443_v5, %v420_v0  ;;  %v450_v18 = vunpack.c.l.bf16 %v493_v9  ;;  %v451_v19 = vunpack.c.h.bf16 %v493_v9  ;;  %v497_v41 = vld [vmem:[%s560_s24 + $0x18] sm:$0xff]  }
  0x12   : > { %v248_v21 = vmul.f32 %v446_v12, %v420_v0  ;;  %v249_v22 = vmul.f32 %v447_v13, %v420_v0  ;;  %v466_v23 = vunpack.c.l.bf16 %v496_v10  ;;  %v467_v24 = vunpack.c.h.bf16 %v496_v10 }
  0x13   : > { %v261_v25 = vadd.f32 %v421_v11, %v246_v16  ;;  %v262_v26 = vadd.f32 %v421_v11, %v247_v17  ;;  %v250_v27 = vmul.f32 %v450_v18, %v420_v0  ;;  %v251_v28 = vmul.f32 %v451_v19, %v420_v0 }
  0x14   : > { %v263_v29 = vadd.f32 %v421_v11, %v248_v21  ;;  %v264_v30 = vadd.f32 %v421_v11, %v249_v22  ;;  %v454_v31 = vunpack.c.l.bf16 %v494_v20  ;;  %v455_v32 = vunpack.c.h.bf16 %v494_v20 }
  0x15   : > { %v285_v33 = vadd.f32 %v458_v6, %v261_v25  ;;  %v286_v34 = vadd.f32 %v459_v7, %v262_v26  ;;  %v265_v35 = vadd.f32 %v421_v11, %v250_v27  ;;  %v266_v36 = vadd.f32 %v421_v11, %v251_v28 }
  0x16   : > { %v287_v37 = vadd.f32 %v462_v14, %v263_v29  ;;  %v288_v38 = vadd.f32 %v463_v15, %v264_v30  ;;  %v252_v39 = vmul.f32 %v454_v31, %v420_v0  ;;  %v253_v40 = vmul.f32 %v455_v32, %v420_v0 }
  0x17   : > { %v293_v42 = vmax.f32 %v285_v33, 0.0  ;;  %v294_v43 = vmax.f32 %v286_v34, 0.0  ;;  %v289_v44 = vadd.f32 %v466_v23, %v265_v35  ;;  %v290_v45 = vadd.f32 %v467_v24, %v266_v36 }
  0x18   : > { %v295_v46 = vmax.f32 %v287_v37, 0.0  ;;  %v296_v47 = vmax.f32 %v288_v38, 0.0  ;;  %v267_v48 = vadd.f32 %v421_v11, %v252_v39  ;;  %v268_v49 = vadd.f32 %v421_v11, %v253_v40 }
  0x19   : > { %v475_v50 = vpack.c.bf16 %v294_v43, %v293_v42  ;;  %v297_v51 = vmax.f32 %v289_v44, 0.0  ;;  %v298_v52 = vmax.f32 %v290_v45, 0.0  ;;  %v470_v53 = vunpack.c.l.bf16 %v497_v41 }
  0x1a   : > { %v480_v54 = vpack.c.bf16 %v296_v47, %v295_v46  ;;  %v471_v55 = vunpack.c.h.bf16 %v497_v41 }
  0x1b   : > { %476 = vst [vmem:[%s221_s5] sm:$0xff] %v475_v50   ;;  %v485_v56 = vpack.c.bf16 %v298_v52, %v297_v51  ;;  %v291_v57 = vadd.f32 %v470_v53, %v267_v48 }
  0x1c   : > { %498 = vst [vmem:[%s221_s5 + $0x8] sm:$0xff] %v480_v54   ;;  %v292_v58 = vadd.f32 %v471_v55, %v268_v49 }
  0x1d   : > { %499 = vst [vmem:[%s221_s5 + $0x10] sm:$0xff] %v485_v56   ;;  %v299_v59 = vmax.f32 %v291_v57, 0.0 }
  0x1e   : > { %v300_v60 = vmax.f32 %v292_v58, 0.0 }
  0x20   : > { %v490_v61 = vpack.c.bf16 %v300_v60, %v299_v59 }
  0x22   : > { %500 = vst [vmem:[%s221_s5 + $0x18] sm:$0xff] %v490_v61  }
  0x23 PF: > { %s14_s15 = sadd.s32 1, %s515_s15  }
  0x24   : > { %p11_p4 = scmp.ge.s32.totalorder %s14_s15, 4  }
  0x26   :  { %13 = sbr.rel (!%p11_p4) target bundleno = 1 (0x1), region = 69 }

// kernel: tile.8
= control target key start
LH: loop header
LB: loop body
LE: loop exit
PB: predicated region body
PF: predicated region fallthrough
CT: control target
= control target key end

     0   :  { %s22_s0 = inlined_call_operand.vmem [shape: f32[128], index: 0, kind: input, shape index: {}]   ;;  %s23_s1 = inlined_call_operand.vmem [shape: f32[4,128], index: 1, kind: output, shape index: {}]  }
   0x1   :  { %v4_v0 = vld [vmem:[%s22_s0] ss:$0 sm:$0xff] }
   0x2   :  { %5 = vst [vmem:[%s23_s1] sm:$0xf] %v4_v0 }

// kernel: vqvae_forward.24
= control target key start
LH: loop header
LB: loop body
LE: loop exit
PB: predicated region body
PF: predicated region fallthrough
CT: control target
= control target key end

     0   :  { %s3207_s12 = smov 0   ;;  %s3209_s13 = smov 0   ;;  %s3984_s0 = inlined_call_operand.vmem [shape: bf16[128,1152], index: 0, kind: input, shape index: {}]   ;;  %s3985_s1 = inlined_call_operand.vmem [shape: bf16[1152,512], index: 1, kind: input, shape index: {}]   ;;  %s3986_s2 = inlined_call_operand.vmem [shape: f32[1,512], index: 2, kind: input, shape index: {}]   ;;  %s3987_s3 = inlined_call_operand.vmem [shape: bf16[128,512], index: 3, kind: output, shape index: {}]  }
   0x1   :  { %s3211_s14 = smov 0   ;;  %s3213_s15 = smov 0  }
   0x2   :  { %s3215_s16 = smov 0   ;;  %s3217_s17 = smov 0  }
   0x3   :  { %s3219_s18 = smov 0   ;;  %s3221_s19 = smov 0  }
   0x4   :  { %s3223_s20 = smov 0  }
   0x5 LB: > { %s2538_s21 = sadd.s32 4294967295, %s3184_s20   ;;  %s22_s22 = sadd.s32 1, %s3176_s18  ;;  %s3184_s20 = sphi %s3223_s20, %s13_s20   ;;  %s3180_s19 = sphi %s3221_s19, %s4010_s19   ;;  %s3176_s18 = sphi %s3219_s18, %s4009_s18   ;;  %s3172_s17 = sphi %s3217_s17, %s4008_s17   ;;  %s3168_s16 = sphi %s3215_s16, %s4007_s16   ;;  %s3164_s15 = sphi %s3213_s15, %s4006_s15   ;;  %s3160_s14 = sphi %s3211_s14, %s4005_s14   ;;  %s3156_s13 = sphi %s3209_s13, %s4004_s13   ;;  %s3152_s12 = sphi %s3207_s12, %s4003_s12  }
   0x6   : > { %p23_p0 = scmp.ge.s32.totalorder %s22_s22, 2  ;;  %s25_s23 = sadd.s32 1, %s3180_s19 }
   0x7   : > { %s58_s24 = sadd.s32 1, %s3164_s15  ;;  %p65_p1 = scmp.ne.s32.totalorder %s3164_s15, %s3160_s14 }
   0x8   : > { %s4012_s22 = smov (%p23_p0, %s22_s22), 0  ;;  %s4014_s23 = smov (!%p23_p0, %s25_s23), %s3180_s19 }
   0x9   : > { %s55_s25 = ssub.s32 %s3176_s18, %s4012_s22  ;;  %p66_p2 = scmp.eq.s32.totalorder %s3184_s20, 0 }
   0xa   : > { %p27_p3 = scmp.ge.s32.totalorder %s4014_s23, 2  ;;  %p56_p4 = scmp.eq.s32.totalorder %s55_s25, 0 }
   0xb   : > { %p67_p5 = por %p66_p2, %p65_p1  ;;  %s112_s26 = sadd.s32 1, %s3156_s13 }
   0xc   : > { %s4016_s23 = smov (%p27_p3, %s4014_s23), 0  ;;  %p122_p6 = scmp.ne.s32.totalorder %s3156_s13, %s3152_s12 }
   0xd   : > { %s3268_s27 = scalar_select %p56_p4, %s3164_s15, %s58_s24  }
   0xe   : > { %s107_s28 = ssub.s32 %s3180_s19, %s4016_s23  ;;  %p123_p7 = scmp.eq.s32.totalorder %s2538_s21, 3 }
   0xf   : > { %s109_s29 = sor.u32 %s107_s28, %s55_s25  ;;  %p2541_p10 = scmp.ge.s32.totalorder %s3184_s20, 4 }
  0x10   : > { %p110_p8 = scmp.eq.s32.totalorder %s109_s29, 0  ;;  %p3274_p9 = por %p123_p7, %p122_p6 }
  0x11   : > { %145 = sbr.rel (%p2541_p10) target bundleno = 98 (0x62), region = 16 }
  0x12   : > { %s3279_s4 = scalar_select %p110_p8, %s3156_s13, %s112_s26  }
  0x16   : > { %158 = sbr.rel (!%p67_p5) target bundleno = 98 (0x62), region = 24  ;;  %s160_s5 = sand.u32 (%p67_p5), 1, %s3164_s15  }
  0x17   : > { %s2744_s6 = sshll.u32 (%p67_p5), %s3176_s18, 3  ;;  %s2770_s7 = smul.u32 (%p67_p5), 1152, %s160_s5 }
  0x18   : > { %s3287_s10 = scalar_lea.vmem (%p67_p5), %s3985_s1, %s2744_s6 }
  0x19   : > { %v480_v0 = vld [vmem:[%s3287_s10] sm:$0xff] (%p67_p5)  ;;  %v482_v1 = vld [vmem:[%s3287_s10 + $0x10] sm:$0xff] (%p67_p5)  ;;  %s3295_s11 = scalar_lea.vmem (%p67_p5), [#allocation2], %s2770_s7 }
  0x1a   : > { %v484_v2 = vld [vmem:[%s3287_s10 + $0x20] sm:$0xff] (%p67_p5)  ;;  %v486_v3 = vld [vmem:[%s3287_s10 + $0x30] sm:$0xff] (%p67_p5)  ;;  %481 = vst [vmem:[%s3295_s11] sm:$0xff] (%p67_p5), %v480_v0  ;;  %483 = vst [vmem:[%s3295_s11 + $0x8] sm:$0xff] (%p67_p5), %v482_v1 }
  0x1b   : > { %v488_v4 = vld [vmem:[%s3287_s10 + $0x40] sm:$0xff]  ;;  %v490_v5 = vld [vmem:[%s3287_s10 + $0x50] sm:$0xff]  ;;  %485 = vst [vmem:[%s3295_s11 + $0x10] sm:$0xff] %v484_v2  ;;  %487 = vst [vmem:[%s3295_s11 + $0x18] sm:$0xff] %v486_v3 }
  0x1c   : > { %489 = vst [vmem:[%s3295_s11 + $0x20] sm:$0xff] %v488_v4  ;;  %491 = vst [vmem:[%s3295_s11 + $0x28] sm:$0xff] %v490_v5  ;;  %v492_v6 = vld [vmem:[%s3287_s10 + $0x60] sm:$0xff]  ;;  %v494_v7 = vld [vmem:[%s3287_s10 + $0x70] sm:$0xff] }
  0x1d   : > { %v496_v8 = vld [vmem:[%s3287_s10 + $0x80] sm:$0xff]  ;;  %493 = vst [vmem:[%s3295_s11 + $0x30] sm:$0xff] %v492_v6  ;;  %495 = vst [vmem:[%s3295_s11 + $0x38] sm:$0xff] %v494_v7  ;;  %v498_v9 = vld [vmem:[%s3287_s10 + $0x90] sm:$0xff] }
  0x1e   : > { %497 = vst [vmem:[%s3295_s11 + $0x40] sm:$0xff] %v496_v8  ;;  %v500_v10 = vld [vmem:[%s3287_s10 + $0xa0] sm:$0xff]  ;;  %v502_v11 = vld [vmem:[%s3287_s10 + $0xb0] sm:$0xff]  ;;  %499 = vst [vmem:[%s3295_s11 + $0x48] sm:$0xff] %v498_v9 }
  0x1f   : > { %501 = vst [vmem:[%s3295_s11 + $0x50] sm:$0xff] %v500_v10  ;;  %503 = vst [vmem:[%s3295_s11 + $0x58] sm:$0xff] %v502_v11  ;;  %v504_v12 = vld [vmem:[%s3287_s10 + $0xc0] sm:$0xff]  ;;  %v506_v13 = vld [vmem:[%s3287_s10 + $0xd0] sm:$0xff] }
  0x20   : > { %v508_v14 = vld [vmem:[%s3287_s10 + $0xe0] sm:$0xff]  ;;  %505 = vst [vmem:[%s3295_s11 + $0x60] sm:$0xff] %v504_v12  ;;  %507 = vst [vmem:[%s3295_s11 + $0x68] sm:$0xff] %v506_v13  ;;  %v510_v15 = vld [vmem:[%s3287_s10 + $0xf0] sm:$0xff] }
  0x21   : > { %509 = vst [vmem:[%s3295_s11 + $0x70] sm:$0xff] %v508_v14  ;;  %v512_v16 = vld [vmem:[%s3287_s10 + $0x100] sm:$0xff]  ;;  %v514_v17 = vld [vmem:[%s3287_s10 + $0x110] sm:$0xff]  ;;  %511 = vst [vmem:[%s3295_s11 + $0x78] sm:$0xff] %v510_v15 }
  0x22   : > { %513 = vst [vmem:[%s3295_s11 + $0x80] sm:$0xff] %v512_v16  ;;  %515 = vst [vmem:[%s3295_s11 + $0x88] sm:$0xff] %v514_v17  ;;  %v516_v18 = vld [vmem:[%s3287_s10 + $0x120] sm:$0xff]  ;;  %v518_v19 = vld [vmem:[%s3287_s10 + $0x130] sm:$0xff] }
  0x23   : > { %v520_v20 = vld [vmem:[%s3287_s10 + $0x140] sm:$0xff]  ;;  %517 = vst [vmem:[%s3295_s11 + $0x90] sm:$0xff] %v516_v18  ;;  %519 = vst [vmem:[%s3295_s11 + $0x98] sm:$0xff] %v518_v19  ;;  %v522_v21 = vld [vmem:[%s3287_s10 + $0x150] sm:$0xff] }
  0x24   : > { %521 = vst [vmem:[%s3295_s11 + $0xa0] sm:$0xff] %v520_v20  ;;  %v524_v22 = vld [vmem:[%s3287_s10 + $0x160] sm:$0xff]  ;;  %v526_v23 = vld [vmem:[%s3287_s10 + $0x170] sm:$0xff]  ;;  %523 = vst [vmem:[%s3295_s11 + $0xa8] sm:$0xff] %v522_v21 }
  0x25   : > { %525 = vst [vmem:[%s3295_s11 + $0xb0] sm:$0xff] %v524_v22  ;;  %527 = vst [vmem:[%s3295_s11 + $0xb8] sm:$0xff] %v526_v23  ;;  %v528_v24 = vld [vmem:[%s3287_s10 + $0x180] sm:$0xff]  ;;  %v530_v25 = vld [vmem:[%s3287_s10 + $0x190] sm:$0xff] }
  0x26   : > { %v532_v26 = vld [vmem:[%s3287_s10 + $0x1a0] sm:$0xff]  ;;  %529 = vst [vmem:[%s3295_s11 + $0xc0] sm:$0xff] %v528_v24  ;;  %531 = vst [vmem:[%s3295_s11 + $0xc8] sm:$0xff] %v530_v25  ;;  %v534_v27 = vld [vmem:[%s3287_s10 + $0x1b0] sm:$0xff] }
  0x27   : > { %533 = vst [vmem:[%s3295_s11 + $0xd0] sm:$0xff] %v532_v26  ;;  %v536_v28 = vld [vmem:[%s3287_s10 + $0x1c0] sm:$0xff]  ;;  %v538_v29 = vld [vmem:[%s3287_s10 + $0x1d0] sm:$0xff]  ;;  %535 = vst [vmem:[%s3295_s11 + $0xd8] sm:$0xff] %v534_v27 }
  0x28   : > { %537 = vst [vmem:[%s3295_s11 + $0xe0] sm:$0xff] %v536_v28  ;;  %539 = vst [vmem:[%s3295_s11 + $0xe8] sm:$0xff] %v538_v29  ;;  %v540_v30 = vld [vmem:[%s3287_s10 + $0x1e0] sm:$0xff]  ;;  %v542_v31 = vld [vmem:[%s3287_s10 + $0x1f0] sm:$0xff] }
  0x29   : > { %v544_v32 = vld [vmem:[%s3287_s10 + $0x200] sm:$0xff]  ;;  %541 = vst [vmem:[%s3295_s11 + $0xf0] sm:$0xff] %v540_v30  ;;  %543 = vst [vmem:[%s3295_s11 + $0xf8] sm:$0xff] %v542_v31  ;;  %v546_v33 = vld [vmem:[%s3287_s10 + $0x210] sm:$0xff] }
  0x2a   : > { %545 = vst [vmem:[%s3295_s11 + $0x100] sm:$0xff] %v544_v32  ;;  %v548_v34 = vld [vmem:[%s3287_s10 + $0x220] sm:$0xff]  ;;  %v550_v35 = vld [vmem:[%s3287_s10 + $0x230] sm:$0xff]  ;;  %547 = vst [vmem:[%s3295_s11 + $0x108] sm:$0xff] %v546_v33 }
  0x2b   : > { %549 = vst [vmem:[%s3295_s11 + $0x110] sm:$0xff] %v548_v34  ;;  %551 = vst [vmem:[%s3295_s11 + $0x118] sm:$0xff] %v550_v35  ;;  %v552_v36 = vld [vmem:[%s3287_s10 + $0x240] sm:$0xff]  ;;  %v554_v37 = vld [vmem:[%s3287_s10 + $0x250] sm:$0xff] }
  0x2c   : > { %v556_v38 = vld [vmem:[%s3287_s10 + $0x260] sm:$0xff]  ;;  %553 = vst [vmem:[%s3295_s11 + $0x120] sm:$0xff] %v552_v36  ;;  %555 = vst [vmem:[%s3295_s11 + $0x128] sm:$0xff] %v554_v37  ;;  %v558_v39 = vld [vmem:[%s3287_s10 + $0x270] sm:$0xff] }
  0x2d   : > { %557 = vst [vmem:[%s3295_s11 + $0x130] sm:$0xff] %v556_v38  ;;  %v560_v40 = vld [vmem:[%s3287_s10 + $0x280] sm:$0xff]  ;;  %v562_v41 = vld [vmem:[%s3287_s10 + $0x290] sm:$0xff]  ;;  %559 = vst [vmem:[%s3295_s11 + $0x138] sm:$0xff] %v558_v39 }
  0x2e   : > { %561 = vst [vmem:[%s3295_s11 + $0x140] sm:$0xff] %v560_v40  ;;  %563 = vst [vmem:[%s3295_s11 + $0x148] sm:$0xff] %v562_v41  ;;  %v564_v42 = vld [vmem:[%s3287_s10 + $0x2a0] sm:$0xff]  ;;  %v566_v43 = vld [vmem:[%s3287_s10 + $0x2b0] sm:$0xff] }
  0x2f   : > { %v568_v44 = vld [vmem:[%s3287_s10 + $0x2c0] sm:$0xff]  ;;  %565 = vst [vmem:[%s3295_s11 + $0x150] sm:$0xff] %v564_v42  ;;  %567 = vst [vmem:[%s3295_s11 + $0x158] sm:$0xff] %v566_v43  ;;  %v570_v45 = vld [vmem:[%s3287_s10 + $0x2d0] sm:$0xff] }
  0x30   : > { %569 = vst [vmem:[%s3295_s11 + $0x160] sm:$0xff] %v568_v44  ;;  %v572_v46 = vld [vmem:[%s3287_s10 + $0x2e0] sm:$0xff]  ;;  %v574_v47 = vld [vmem:[%s3287_s10 + $0x2f0] sm:$0xff]  ;;  %571 = vst [vmem:[%s3295_s11 + $0x168] sm:$0xff] %v570_v45 }
  0x31   : > { %573 = vst [vmem:[%s3295_s11 + $0x170] sm:$0xff] %v572_v46  ;;  %575 = vst [vmem:[%s3295_s11 + $0x178] sm:$0xff] %v574_v47  ;;  %v576_v48 = vld [vmem:[%s3287_s10 + $0x300] sm:$0xff]  ;;  %v578_v49 = vld [vmem:[%s3287_s10 + $0x310] sm:$0xff] }
  0x32   : > { %v580_v50 = vld [vmem:[%s3287_s10 + $0x320] sm:$0xff]  ;;  %577 = vst [vmem:[%s3295_s11 + $0x180] sm:$0xff] %v576_v48  ;;  %579 = vst [vmem:[%s3295_s11 + $0x188] sm:$0xff] %v578_v49  ;;  %v582_v51 = vld [vmem:[%s3287_s10 + $0x330] sm:$0xff] }
  0x33   : > { %581 = vst [vmem:[%s3295_s11 + $0x190] sm:$0xff] %v580_v50  ;;  %v584_v52 = vld [vmem:[%s3287_s10 + $0x340] sm:$0xff]  ;;  %v586_v53 = vld [vmem:[%s3287_s10 + $0x350] sm:$0xff]  ;;  %583 = vst [vmem:[%s3295_s11 + $0x198] sm:$0xff] %v582_v51 }
  0x34   : > { %585 = vst [vmem:[%s3295_s11 + $0x1a0] sm:$0xff] %v584_v52  ;;  %587 = vst [vmem:[%s3295_s11 + $0x1a8] sm:$0xff] %v586_v53  ;;  %v588_v54 = vld [vmem:[%s3287_s10 + $0x360] sm:$0xff]  ;;  %v590_v55 = vld [vmem:[%s3287_s10 + $0x370] sm:$0xff] }
  0x35   : > { %v592_v56 = vld [vmem:[%s3287_s10 + $0x380] sm:$0xff]  ;;  %589 = vst [vmem:[%s3295_s11 + $0x1b0] sm:$0xff] %v588_v54  ;;  %591 = vst [vmem:[%s3295_s11 + $0x1b8] sm:$0xff] %v590_v55  ;;  %v594_v57 = vld [vmem:[%s3287_s10 + $0x390] sm:$0xff] }
  0x36   : > { %593 = vst [vmem:[%s3295_s11 + $0x1c0] sm:$0xff] %v592_v56  ;;  %v596_v58 = vld [vmem:[%s3287_s10 + $0x3a0] sm:$0xff]  ;;  %v598_v59 = vld [vmem:[%s3287_s10 + $0x3b0] sm:$0xff]  ;;  %595 = vst [vmem:[%s3295_s11 + $0x1c8] sm:$0xff] %v594_v57 }
  0x37   : > { %597 = vst [vmem:[%s3295_s11 + $0x1d0] sm:$0xff] %v596_v58  ;;  %599 = vst [vmem:[%s3295_s11 + $0x1d8] sm:$0xff] %v598_v59  ;;  %v600_v60 = vld [vmem:[%s3287_s10 + $0x3c0] sm:$0xff]  ;;  %v602_v61 = vld [vmem:[%s3287_s10 + $0x3d0] sm:$0xff] }
  0x38   : > { %v604_v62 = vld [vmem:[%s3287_s10 + $0x3e0] sm:$0xff]  ;;  %601 = vst [vmem:[%s3295_s11 + $0x1e0] sm:$0xff] %v600_v60  ;;  %603 = vst [vmem:[%s3295_s11 + $0x1e8] sm:$0xff] %v602_v61  ;;  %v606_v63 = vld [vmem:[%s3287_s10 + $0x3f0] sm:$0xff] }
  0x39   : > { %605 = vst [vmem:[%s3295_s11 + $0x1f0] sm:$0xff] %v604_v62  ;;  %v608_v0 = vld [vmem:[%s3287_s10 + $0x400] sm:$0xff]  ;;  %v610_v1 = vld [vmem:[%s3287_s10 + $0x410] sm:$0xff]  ;;  %607 = vst [vmem:[%s3295_s11 + $0x1f8] sm:$0xff] %v606_v63 }
  0x3a   : > { %609 = vst [vmem:[%s3295_s11 + $0x200] sm:$0xff] %v608_v0  ;;  %611 = vst [vmem:[%s3295_s11 + $0x208] sm:$0xff] %v610_v1  ;;  %v612_v2 = vld [vmem:[%s3287_s10 + $0x420] sm:$0xff]  ;;  %v614_v3 = vld [vmem:[%s3287_s10 + $0x430] sm:$0xff] }
  0x3b   : > { %v616_v4 = vld [vmem:[%s3287_s10 + $0x440] sm:$0xff]  ;;  %613 = vst [vmem:[%s3295_s11 + $0x210] sm:$0xff] %v612_v2  ;;  %615 = vst [vmem:[%s3295_s11 + $0x218] sm:$0xff] %v614_v3  ;;  %v618_v5 = vld [vmem:[%s3287_s10 + $0x450] sm:$0xff] }
  0x3c   : > { %617 = vst [vmem:[%s3295_s11 + $0x220] sm:$0xff] %v616_v4  ;;  %v620_v6 = vld [vmem:[%s3287_s10 + $0x460] sm:$0xff]  ;;  %v622_v7 = vld [vmem:[%s3287_s10 + $0x470] sm:$0xff]  ;;  %619 = vst [vmem:[%s3295_s11 + $0x228] sm:$0xff] %v618_v5 }
  0x3d   : > { %621 = vst [vmem:[%s3295_s11 + $0x230] sm:$0xff] %v620_v6  ;;  %623 = vst [vmem:[%s3295_s11 + $0x238] sm:$0xff] %v622_v7  ;;  %v624_v8 = vld [vmem:[%s3287_s10 + $0x480] sm:$0xff]  ;;  %v626_v9 = vld [vmem:[%s3287_s10 + $0x490] sm:$0xff] }
  0x3e   : > { %v628_v10 = vld [vmem:[%s3287_s10 + $0x4a0] sm:$0xff]  ;;  %625 = vst [vmem:[%s3295_s11 + $0x240] sm:$0xff] %v624_v8  ;;  %627 = vst [vmem:[%s3295_s11 + $0x248] sm:$0xff] %v626_v9  ;;  %v630_v11 = vld [vmem:[%s3287_s10 + $0x4b0] sm:$0xff] }
  0x3f   : > { %629 = vst [vmem:[%s3295_s11 + $0x250] sm:$0xff] %v628_v10  ;;  %v632_v12 = vld [vmem:[%s3287_s10 + $0x4c0] sm:$0xff]  ;;  %v634_v13 = vld [vmem:[%s3287_s10 + $0x4d0] sm:$0xff]  ;;  %631 = vst [vmem:[%s3295_s11 + $0x258] sm:$0xff] %v630_v11 }
  0x40   : > { %633 = vst [vmem:[%s3295_s11 + $0x260] sm:$0xff] %v632_v12  ;;  %635 = vst [vmem:[%s3295_s11 + $0x268] sm:$0xff] %v634_v13  ;;  %v636_v14 = vld [vmem:[%s3287_s10 + $0x4e0] sm:$0xff]  ;;  %v638_v15 = vld [vmem:[%s3287_s10 + $0x4f0] sm:$0xff] }
  0x41   : > { %v640_v16 = vld [vmem:[%s3287_s10 + $0x500] sm:$0xff]  ;;  %637 = vst [vmem:[%s3295_s11 + $0x270] sm:$0xff] %v636_v14  ;;  %639 = vst [vmem:[%s3295_s11 + $0x278] sm:$0xff] %v638_v15  ;;  %v642_v17 = vld [vmem:[%s3287_s10 + $0x510] sm:$0xff] }
  0x42   : > { %641 = vst [vmem:[%s3295_s11 + $0x280] sm:$0xff] %v640_v16  ;;  %v644_v18 = vld [vmem:[%s3287_s10 + $0x520] sm:$0xff]  ;;  %v646_v19 = vld [vmem:[%s3287_s10 + $0x530] sm:$0xff]  ;;  %643 = vst [vmem:[%s3295_s11 + $0x288] sm:$0xff] %v642_v17 }
  0x43   : > { %645 = vst [vmem:[%s3295_s11 + $0x290] sm:$0xff] %v644_v18  ;;  %647 = vst [vmem:[%s3295_s11 + $0x298] sm:$0xff] %v646_v19  ;;  %v648_v20 = vld [vmem:[%s3287_s10 + $0x540] sm:$0xff]  ;;  %v650_v21 = vld [vmem:[%s3287_s10 + $0x550] sm:$0xff] }
  0x44   : > { %v652_v22 = vld [vmem:[%s3287_s10 + $0x560] sm:$0xff]  ;;  %649 = vst [vmem:[%s3295_s11 + $0x2a0] sm:$0xff] %v648_v20  ;;  %651 = vst [vmem:[%s3295_s11 + $0x2a8] sm:$0xff] %v650_v21  ;;  %v654_v23 = vld [vmem:[%s3287_s10 + $0x570] sm:$0xff] }
  0x45   : > { %653 = vst [vmem:[%s3295_s11 + $0x2b0] sm:$0xff] %v652_v22  ;;  %v656_v24 = vld [vmem:[%s3287_s10 + $0x580] sm:$0xff]  ;;  %v658_v25 = vld [vmem:[%s3287_s10 + $0x590] sm:$0xff]  ;;  %655 = vst [vmem:[%s3295_s11 + $0x2b8] sm:$0xff] %v654_v23 }
  0x46   : > { %657 = vst [vmem:[%s3295_s11 + $0x2c0] sm:$0xff] %v656_v24  ;;  %659 = vst [vmem:[%s3295_s11 + $0x2c8] sm:$0xff] %v658_v25  ;;  %v660_v26 = vld [vmem:[%s3287_s10 + $0x5a0] sm:$0xff]  ;;  %v662_v27 = vld [vmem:[%s3287_s10 + $0x5b0] sm:$0xff] }
  0x47   : > { %v664_v28 = vld [vmem:[%s3287_s10 + $0x5c0] sm:$0xff]  ;;  %661 = vst [vmem:[%s3295_s11 + $0x2d0] sm:$0xff] %v660_v26  ;;  %663 = vst [vmem:[%s3295_s11 + $0x2d8] sm:$0xff] %v662_v27  ;;  %v666_v29 = vld [vmem:[%s3287_s10 + $0x5d0] sm:$0xff] }
  0x48   : > { %665 = vst [vmem:[%s3295_s11 + $0x2e0] sm:$0xff] %v664_v28  ;;  %v668_v30 = vld [vmem:[%s3287_s10 + $0x5e0] sm:$0xff]  ;;  %v670_v31 = vld [vmem:[%s3287_s10 + $0x5f0] sm:$0xff]  ;;  %667 = vst [vmem:[%s3295_s11 + $0x2e8] sm:$0xff] %v666_v29 }
  0x49   : > { %669 = vst [vmem:[%s3295_s11 + $0x2f0] sm:$0xff] %v668_v30  ;;  %671 = vst [vmem:[%s3295_s11 + $0x2f8] sm:$0xff] %v670_v31  ;;  %v672_v32 = vld [vmem:[%s3287_s10 + $0x600] sm:$0xff]  ;;  %v674_v33 = vld [vmem:[%s3287_s10 + $0x610] sm:$0xff] }
  0x4a   : > { %v676_v34 = vld [vmem:[%s3287_s10 + $0x620] sm:$0xff]  ;;  %673 = vst [vmem:[%s3295_s11 + $0x300] sm:$0xff] %v672_v32  ;;  %675 = vst [vmem:[%s3295_s11 + $0x308] sm:$0xff] %v674_v33  ;;  %v678_v35 = vld [vmem:[%s3287_s10 + $0x630] sm:$0xff] }
  0x4b   : > { %677 = vst [vmem:[%s3295_s11 + $0x310] sm:$0xff] %v676_v34  ;;  %v680_v36 = vld [vmem:[%s3287_s10 + $0x640] sm:$0xff]  ;;  %v682_v37 = vld [vmem:[%s3287_s10 + $0x650] sm:$0xff]  ;;  %679 = vst [vmem:[%s3295_s11 + $0x318] sm:$0xff] %v678_v35 }
  0x4c   : > { %681 = vst [vmem:[%s3295_s11 + $0x320] sm:$0xff] %v680_v36  ;;  %683 = vst [vmem:[%s3295_s11 + $0x328] sm:$0xff] %v682_v37  ;;  %v684_v38 = vld [vmem:[%s3287_s10 + $0x660] sm:$0xff]  ;;  %v686_v39 = vld [vmem:[%s3287_s10 + $0x670] sm:$0xff] }
  0x4d   : > { %v688_v40 = vld [vmem:[%s3287_s10 + $0x680] sm:$0xff]  ;;  %685 = vst [vmem:[%s3295_s11 + $0x330] sm:$0xff] %v684_v38  ;;  %687 = vst [vmem:[%s3295_s11 + $0x338] sm:$0xff] %v686_v39  ;;  %v690_v41 = vld [vmem:[%s3287_s10 + $0x690] sm:$0xff] }
  0x4e   : > { %689 = vst [vmem:[%s3295_s11 + $0x340] sm:$0xff] %v688_v40  ;;  %v692_v42 = vld [vmem:[%s3287_s10 + $0x6a0] sm:$0xff]  ;;  %v694_v43 = vld [vmem:[%s3287_s10 + $0x6b0] sm:$0xff]  ;;  %691 = vst [vmem:[%s3295_s11 + $0x348] sm:$0xff] %v690_v41 }
  0x4f   : > { %693 = vst [vmem:[%s3295_s11 + $0x350] sm:$0xff] %v692_v42  ;;  %695 = vst [vmem:[%s3295_s11 + $0x358] sm:$0xff] %v694_v43  ;;  %v696_v44 = vld [vmem:[%s3287_s10 + $0x6c0] sm:$0xff]  ;;  %v698_v45 = vld [vmem:[%s3287_s10 + $0x6d0] sm:$0xff] }
  0x50   : > { %v700_v46 = vld [vmem:[%s3287_s10 + $0x6e0] sm:$0xff]  ;;  %697 = vst [vmem:[%s3295_s11 + $0x360] sm:$0xff] %v696_v44  ;;  %699 = vst [vmem:[%s3295_s11 + $0x368] sm:$0xff] %v698_v45  ;;  %v702_v47 = vld [vmem:[%s3287_s10 + $0x6f0] sm:$0xff] }
  0x51   : > { %701 = vst [vmem:[%s3295_s11 + $0x370] sm:$0xff] %v700_v46  ;;  %v704_v48 = vld [vmem:[%s3287_s10 + $0x700] sm:$0xff]  ;;  %v706_v49 = vld [vmem:[%s3287_s10 + $0x710] sm:$0xff]  ;;  %703 = vst [vmem:[%s3295_s11 + $0x378] sm:$0xff] %v702_v47 }
  0x52   : > { %705 = vst [vmem:[%s3295_s11 + $0x380] sm:$0xff] %v704_v48  ;;  %707 = vst [vmem:[%s3295_s11 + $0x388] sm:$0xff] %v706_v49  ;;  %v708_v50 = vld [vmem:[%s3287_s10 + $0x720] sm:$0xff]  ;;  %v710_v51 = vld [vmem:[%s3287_s10 + $0x730] sm:$0xff] }
  0x53   : > { %v712_v52 = vld [vmem:[%s3287_s10 + $0x740] sm:$0xff]  ;;  %709 = vst [vmem:[%s3295_s11 + $0x390] sm:$0xff] %v708_v50  ;;  %711 = vst [vmem:[%s3295_s11 + $0x398] sm:$0xff] %v710_v51  ;;  %v714_v53 = vld [vmem:[%s3287_s10 + $0x750] sm:$0xff] }
  0x54   : > { %713 = vst [vmem:[%s3295_s11 + $0x3a0] sm:$0xff] %v712_v52  ;;  %v716_v54 = vld [vmem:[%s3287_s10 + $0x760] sm:$0xff]  ;;  %v718_v55 = vld [vmem:[%s3287_s10 + $0x770] sm:$0xff]  ;;  %715 = vst [vmem:[%s3295_s11 + $0x3a8] sm:$0xff] %v714_v53 }
  0x55   : > { %717 = vst [vmem:[%s3295_s11 + $0x3b0] sm:$0xff] %v716_v54  ;;  %719 = vst [vmem:[%s3295_s11 + $0x3b8] sm:$0xff] %v718_v55  ;;  %v720_v56 = vld [vmem:[%s3287_s10 + $0x780] sm:$0xff]  ;;  %v722_v57 = vld [vmem:[%s3287_s10 + $0x790] sm:$0xff] }
  0x56   : > { %v724_v58 = vld [vmem:[%s3287_s10 + $0x7a0] sm:$0xff]  ;;  %721 = vst [vmem:[%s3295_s11 + $0x3c0] sm:$0xff] %v720_v56  ;;  %723 = vst [vmem:[%s3295_s11 + $0x3c8] sm:$0xff] %v722_v57  ;;  %v726_v59 = vld [vmem:[%s3287_s10 + $0x7b0] sm:$0xff] }
  0x57   : > { %725 = vst [vmem:[%s3295_s11 + $0x3d0] sm:$0xff] %v724_v58  ;;  %v728_v60 = vld [vmem:[%s3287_s10 + $0x7c0] sm:$0xff]  ;;  %v730_v61 = vld [vmem:[%s3287_s10 + $0x7d0] sm:$0xff]  ;;  %727 = vst [vmem:[%s3295_s11 + $0x3d8] sm:$0xff] %v726_v59 }
  0x58   : > { %729 = vst [vmem:[%s3295_s11 + $0x3e0] sm:$0xff] %v728_v60  ;;  %731 = vst [vmem:[%s3295_s11 + $0x3e8] sm:$0xff] %v730_v61  ;;  %v732_v62 = vld [vmem:[%s3287_s10 + $0x7e0] sm:$0xff]  ;;  %v734_v63 = vld [vmem:[%s3287_s10 + $0x7f0] sm:$0xff] }
  0x59   : > { %v736_v0 = vld [vmem:[%s3287_s10 + $0x800] sm:$0xff]  ;;  %733 = vst [vmem:[%s3295_s11 + $0x3f0] sm:$0xff] %v732_v62  ;;  %735 = vst [vmem:[%s3295_s11 + $0x3f8] sm:$0xff] %v734_v63  ;;  %v738_v1 = vld [vmem:[%s3287_s10 + $0x810] sm:$0xff] }
  0x5a   : > { %737 = vst [vmem:[%s3295_s11 + $0x400] sm:$0xff] %v736_v0  ;;  %v740_v2 = vld [vmem:[%s3287_s10 + $0x820] sm:$0xff]  ;;  %v742_v3 = vld [vmem:[%s3287_s10 + $0x830] sm:$0xff]  ;;  %739 = vst [vmem:[%s3295_s11 + $0x408] sm:$0xff] %v738_v1 }
  0x5b   : > { %741 = vst [vmem:[%s3295_s11 + $0x410] sm:$0xff] %v740_v2  ;;  %743 = vst [vmem:[%s3295_s11 + $0x418] sm:$0xff] %v742_v3  ;;  %v744_v4 = vld [vmem:[%s3287_s10 + $0x840] sm:$0xff]  ;;  %v746_v5 = vld [vmem:[%s3287_s10 + $0x850] sm:$0xff] }
  0x5c   : > { %v748_v6 = vld [vmem:[%s3287_s10 + $0x860] sm:$0xff]  ;;  %745 = vst [vmem:[%s3295_s11 + $0x420] sm:$0xff] %v744_v4  ;;  %747 = vst [vmem:[%s3295_s11 + $0x428] sm:$0xff] %v746_v5  ;;  %v750_v7 = vld [vmem:[%s3287_s10 + $0x870] sm:$0xff] }
  0x5d   : > { %749 = vst [vmem:[%s3295_s11 + $0x430] sm:$0xff] %v748_v6  ;;  %v752_v8 = vld [vmem:[%s3287_s10 + $0x880] sm:$0xff]  ;;  %v754_v9 = vld [vmem:[%s3287_s10 + $0x890] sm:$0xff]  ;;  %751 = vst [vmem:[%s3295_s11 + $0x438] sm:$0xff] %v750_v7 }
  0x5e   : > { %753 = vst [vmem:[%s3295_s11 + $0x440] sm:$0xff] %v752_v8  ;;  %755 = vst [vmem:[%s3295_s11 + $0x448] sm:$0xff] %v754_v9  ;;  %v756_v10 = vld [vmem:[%s3287_s10 + $0x8a0] sm:$0xff]  ;;  %v758_v11 = vld [vmem:[%s3287_s10 + $0x8b0] sm:$0xff] }
  0x5f   : > { %v760_v12 = vld [vmem:[%s3287_s10 + $0x8c0] sm:$0xff]  ;;  %757 = vst [vmem:[%s3295_s11 + $0x450] sm:$0xff] %v756_v10  ;;  %759 = vst [vmem:[%s3295_s11 + $0x458] sm:$0xff] %v758_v11  ;;  %v762_v13 = vld [vmem:[%s3287_s10 + $0x8d0] sm:$0xff] }
  0x60   : > { %761 = vst [vmem:[%s3295_s11 + $0x460] sm:$0xff] %v760_v12  ;;  %v764_v14 = vld [vmem:[%s3287_s10 + $0x8e0] sm:$0xff]  ;;  %v766_v15 = vld [vmem:[%s3287_s10 + $0x8f0] sm:$0xff]  ;;  %763 = vst [vmem:[%s3295_s11 + $0x468] sm:$0xff] %v762_v13 }
  0x61   : > { %765 = vst [vmem:[%s3295_s11 + $0x470] sm:$0xff] %v764_v14  ;;  %767 = vst [vmem:[%s3295_s11 + $0x478] sm:$0xff] %v766_v15 }
  0x62 PF: > { %p2544_p11 = scmp.ge.s32.totalorder %s3184_s20, 1  ;;  %p780_p12 = scmp.lt.s32.totalorder %s3184_s20, 5 }
  0x64   : > { %p781_p13 = pnand %p2544_p11, %p780_p12 }
  0x66   : > { %784 = sbr.rel (%p781_p13) target bundleno = 495 (0x1ef), region = 66 }
  0x6b   : > { %s787_s21 = sand.u32 1, %s3160_s14   ;;  %s2546_s14 = sshll.u32 %s3172_s17, 3 }
  0x6c   : > { %s2771_s24 = smul.u32 1152, %s787_s21  ;;  %p820_p0 = scmp.lt.s32.totalorder %s2546_s14, 15 }
  0x6d   : > { %s3829_s6 = sshll.u32 %s3168_s16, 1  ;;  %s816_s10 = sand.u32 1, %s3152_s12  }
  0x6e   : > { %s3582_s25 = scalar_lea.vmem [#allocation2], %s2771_s24  ;;  %s4018_s14 = smov (!%p820_p0, %s2546_s14), 15 }
  0x6f   : > { %v2846_v16 = vld [vmem:[%s3582_s25 + $0x74] ss:$8 sps:$4 sm:$0xff]   ;;  %v2850_v18 = vld [vmem:[%s3582_s25 + $0x70] ss:$8 sps:$4 sm:$0xff]   ;;  %v2852_v20 = vld [vmem:[%s3582_s25 + $0x64] ss:$8 sps:$4 sm:$0xff]  }
  0x70   : > { %v2848_v17 = vld [vmem:[%s3582_s25 + $0x174] ss:$8 sps:$4 sm:$0xff]   ;;  %1935 = vmatprep.subr.bf16.mxu0 %v2846_v16  ;;  %v2851_v19 = vld [vmem:[%s3582_s25 + $0x170] ss:$8 sps:$4 sm:$0xff]   ;;  %v2854_v21 = vld [vmem:[%s3582_s25 + $0x164] ss:$8 sps:$4 sm:$0xff]  }
  0x71   : > { %2008 = vmatprep.subr.bf16.mxu1 %v2848_v17  ;;  %1936 = vmatpush1.bf16.msra.mxu0 %v2850_v18  ;;  %v2856_v22 = vld [vmem:[%s3582_s25 + $0x60] ss:$8 sps:$4 sm:$0xff]   ;;  %v2858_v24 = vld [vmem:[%s3582_s25 + $0x54] ss:$8 sps:$4 sm:$0xff]   ;;  %v2862_v26 = vld [vmem:[%s3582_s25 + $0x50] ss:$8 sps:$4 sm:$0xff]  }
  0x72   : > { %2009 = vmatpush1.bf16.msra.mxu1 %v2851_v19  ;;  %1937 = vmatprep.subr.bf16.mxu0 %v2852_v20  ;;  %v2857_v23 = vld [vmem:[%s3582_s25 + $0x160] ss:$8 sps:$4 sm:$0xff]   ;;  %v2860_v25 = vld [vmem:[%s3582_s25 + $0x154] ss:$8 sps:$4 sm:$0xff]   ;;  %v2863_v27 = vld [vmem:[%s3582_s25 + $0x150] ss:$8 sps:$4 sm:$0xff]  }
  0x73   : > { %2010 = vmatprep.subr.bf16.mxu1 %v2854_v21  ;;  %v2864_v28 = vld [vmem:[%s3582_s25 + $0x44] ss:$8 sps:$4 sm:$0xff]   ;;  %v2868_v30 = vld [vmem:[%s3582_s25 + $0x40] ss:$8 sps:$4 sm:$0xff]   ;;  %v2870_v32 = vld [vmem:[%s3582_s25 + $0x34] ss:$8 sps:$4 sm:$0xff]  }
  0x74   : > { %v2866_v29 = vld [vmem:[%s3582_s25 + $0x144] ss:$8 sps:$4 sm:$0xff]   ;;  %v2869_v31 = vld [vmem:[%s3582_s25 + $0x140] ss:$8 sps:$4 sm:$0xff]   ;;  %v2872_v33 = vld [vmem:[%s3582_s25 + $0x134] ss:$8 sps:$4 sm:$0xff]  }
  0x75   : > { %1938 = vmatpush1.bf16.msra.mxu0 %v2856_v22  ;;  %v2874_v34 = vld [vmem:[%s3582_s25 + $0x30] ss:$8 sps:$4 sm:$0xff]   ;;  %v2876_v36 = vld [vmem:[%s3582_s25 + $0x24] ss:$8 sps:$4 sm:$0xff]   ;;  %v2880_v38 = vld [vmem:[%s3582_s25 + $0x20] ss:$8 sps:$4 sm:$0xff]  }
  0x76   : > { %2011 = vmatpush1.bf16.msra.mxu1 %v2857_v23  ;;  %1939 = vmatprep.subr.bf16.mxu0 %v2858_v24  ;;  %v2875_v35 = vld [vmem:[%s3582_s25 + $0x130] ss:$8 sps:$4 sm:$0xff]   ;;  %v2878_v37 = vld [vmem:[%s3582_s25 + $0x124] ss:$8 sps:$4 sm:$0xff]   ;;  %v2881_v39 = vld [vmem:[%s3582_s25 + $0x120] ss:$8 sps:$4 sm:$0xff]  }
  0x77   : > { %2012 = vmatprep.subr.bf16.mxu1 %v2860_v25  ;;  %v2882_v40 = vld [vmem:[%s3582_s25 + $0x14] ss:$8 sps:$4 sm:$0xff]   ;;  %v2886_v42 = vld [vmem:[%s3582_s25 + $0x10] ss:$8 sps:$4 sm:$0xff]   ;;  %v2888_v44 = vld [vmem:[%s3582_s25 + $0x4] ss:$8 sps:$4 sm:$0xff]  }
  0x78   : > { %v2884_v41 = vld [vmem:[%s3582_s25 + $0x114] ss:$8 sps:$4 sm:$0xff]   ;;  %v2887_v43 = vld [vmem:[%s3582_s25 + $0x110] ss:$8 sps:$4 sm:$0xff]   ;;  %v2890_v45 = vld [vmem:[%s3582_s25 + $0x104] ss:$8 sps:$4 sm:$0xff]  }
  0x79   : > { %1940 = vmatpush1.bf16.msra.mxu0 %v2862_v26  ;;  %v2892_v46 = vld [vmem:[%s3582_s25] ss:$8 sps:$4 sm:$0xff]   ;;  %v2894_v48 = vld [vmem:[%s3582_s25 + $0xf4] ss:$8 sps:$4 sm:$0xff]   ;;  %v2898_v50 = vld [vmem:[%s3582_s25 + $0xf0] ss:$8 sps:$4 sm:$0xff]  }
  0x7a   : > { %2013 = vmatpush1.bf16.msra.mxu1 %v2863_v27  ;;  %1941 = vmatprep.subr.bf16.mxu0 %v2864_v28  ;;  %v2893_v47 = vld [vmem:[%s3582_s25 + $0x100] ss:$8 sps:$4 sm:$0xff]   ;;  %v2896_v49 = vld [vmem:[%s3582_s25 + $0x1f4] ss:$8 sps:$4 sm:$0xff]   ;;  %v2899_v51 = vld [vmem:[%s3582_s25 + $0x1f0] ss:$8 sps:$4 sm:$0xff]  }
  0x7b   : > { %2014 = vmatprep.subr.bf16.mxu1 %v2866_v29  ;;  %v2900_v52 = vld [vmem:[%s3582_s25 + $0xe4] ss:$8 sps:$4 sm:$0xff]   ;;  %v2904_v54 = vld [vmem:[%s3582_s25 + $0xe0] ss:$8 sps:$4 sm:$0xff]   ;;  %v2906_v56 = vld [vmem:[%s3582_s25 + $0xd4] ss:$8 sps:$4 sm:$0xff]  }
  0x7c   : > { %v2902_v53 = vld [vmem:[%s3582_s25 + $0x1e4] ss:$8 sps:$4 sm:$0xff]   ;;  %v2905_v55 = vld [vmem:[%s3582_s25 + $0x1e0] ss:$8 sps:$4 sm:$0xff]   ;;  %s2772_s26 = smul.u32 36, %s4018_s14  ;;  %p828_p1 = scmp.lt.s32.totalorder %s3829_s6, 3 }
  0x7d   : > { %1942 = vmatpush1.bf16.msra.mxu0 %v2868_v30  ;;  %v2908_v57 = vld [vmem:[%s3582_s25 + $0x1d4] ss:$8 sps:$4 sm:$0xff]   ;;  %v2910_v58 = vld [vmem:[%s3582_s25 + $0xd0] ss:$8 sps:$4 sm:$0xff]   ;;  %v2912_v60 = vld [vmem:[%s3582_s25 + $0xc4] ss:$8 sps:$4 sm:$0xff]  }
  0x7e   : > { %2015 = vmatpush1.bf16.msra.mxu1 %v2869_v31  ;;  %1943 = vmatprep.subr.bf16.mxu0 %v2870_v32  ;;  %v2911_v59 = vld [vmem:[%s3582_s25 + $0x1d0] ss:$8 sps:$4 sm:$0xff]   ;;  %s3633_s5 = scalar_lea.vmem %s3984_s0, %s2772_s26  ;;  %v2914_v61 = vld [vmem:[%s3582_s25 + $0x1c4] ss:$8 sps:$4 sm:$0xff]   ;;  %v2916_v62 = vld [vmem:[%s3582_s25 + $0xc0] ss:$8 sps:$4 sm:$0xff]  }
  0x7f   : > { %2016 = vmatprep.subr.bf16.mxu1 %v2872_v33  ;;  %v2917_v63 = vld [vmem:[%s3582_s25 + $0x1c0] ss:$8 sps:$4 sm:$0xff]   ;;  %v2918_v0 = vld [vmem:[%s3582_s25 + $0xb4] ss:$8 sps:$4 sm:$0xff]   ;;  %v2947_v3 = vld [vmem:[%s3633_s5 + $0xc] ss:$36 sps:$4 sm:$0xff]  }
  0x80   : > { %v2944_v1 = vld [vmem:[%s3633_s5 + $0x4] ss:$36 sps:$4 sm:$0xff]   ;;  %v2920_v2 = vld [vmem:[%s3582_s25 + $0x1b4] ss:$8 sps:$4 sm:$0xff]   ;;  %v2922_v4 = vld [vmem:[%s3582_s25 + $0xb0] ss:$8 sps:$4 sm:$0xff]   ;;  %2040 = vmatprep.mubr.bf16.mxu1 %v2947_v3 }
  0x81   : > { %1944 = vmatpush1.bf16.msra.mxu0 %v2874_v34  ;;  %1967 = vmatprep.mubr.bf16.mxu0 %v2944_v1  ;;  %v2923_v5 = vld [vmem:[%s3582_s25 + $0x1b0] ss:$8 sps:$4 sm:$0xff]   ;;  %v2924_v6 = vld [vmem:[%s3582_s25 + $0xa4] ss:$8 sps:$4 sm:$0xff]   ;;  %v2928_v8 = vld [vmem:[%s3582_s25 + $0xa0] ss:$8 sps:$4 sm:$0xff]  }
  0x82   : > { %2017 = vmatpush1.bf16.msra.mxu1 %v2875_v35  ;;  %1945 = vmatprep.subr.bf16.mxu0 %v2876_v36  ;;  %v2926_v7 = vld [vmem:[%s3582_s25 + $0x1a4] ss:$8 sps:$4 sm:$0xff]   ;;  %v2929_v9 = vld [vmem:[%s3582_s25 + $0x1a0] ss:$8 sps:$4 sm:$0xff]   ;;  %v2930_v10 = vld [vmem:[%s3582_s25 + $0x94] ss:$8 sps:$4 sm:$0xff]  }
  0x83   : > { %2018 = vmatprep.subr.bf16.mxu1 %v2878_v37  ;;  %v2932_v11 = vld [vmem:[%s3582_s25 + $0x194] ss:$8 sps:$4 sm:$0xff]   ;;  %v2934_v12 = vld [vmem:[%s3582_s25 + $0x90] ss:$8 sps:$4 sm:$0xff]   ;;  %v2936_v14 = vld [vmem:[%s3582_s25 + $0x84] ss:$8 sps:$4 sm:$0xff]  }
  0x84   : > { %v2935_v13 = vld [vmem:[%s3582_s25 + $0x190] ss:$8 sps:$4 sm:$0xff]   ;;  %v2938_v15 = vld [vmem:[%s3582_s25 + $0x184] ss:$8 sps:$4 sm:$0xff]   ;;  %v2940_v16 = vld [vmem:[%s3582_s25 + $0x80] ss:$8 sps:$4 sm:$0xff]  }
  0x85   : > { %1946 = vmatpush1.bf16.msra.mxu0 %v2880_v38  ;;  %v2941_v17 = vld [vmem:[%s3582_s25 + $0x180] ss:$8 sps:$4 sm:$0xff]   ;;  %v2950_v18 = vld [vmem:[%s3582_s25 + $0x274] ss:$8 sps:$4 sm:$0xff]   ;;  %v2948_v22 = vld [vmem:[%s3582_s25 + $0x270] ss:$8 sps:$4 sm:$0xff]  }
  0x86   : > { %2019 = vmatpush1.bf16.msra.mxu1 %v2881_v39  ;;  %1947 = vmatprep.subr.bf16.mxu0 %v2882_v40  ;;  %v2953_v19 = vld [vmem:[%s3582_s25 + $0x374] ss:$8 sps:$4 sm:$0xff]   ;;  %v2942_v20 = vld [vmem:[%s3633_s5] ss:$36 sps:$4 sm:$0xff]   ;;  %v2945_v21 = vld [vmem:[%s3633_s5 + $0x8] ss:$36 sps:$4 sm:$0xff]  }
  0x87   : > { %2020 = vmatprep.subr.bf16.mxu1 %v2884_v41  ;;  %v2951_v23 = vld [vmem:[%s3582_s25 + $0x370] ss:$8 sps:$4 sm:$0xff]   ;;  %v2956_v24 = vld [vmem:[%s3582_s25 + $0x264] ss:$8 sps:$4 sm:$0xff]   ;;  %v2954_v26 = vld [vmem:[%s3582_s25 + $0x260] ss:$8 sps:$4 sm:$0xff]  }
  0x88   : > { %v2959_v25 = vld [vmem:[%s3582_s25 + $0x364] ss:$8 sps:$4 sm:$0xff]   ;;  %v2957_v28 = vld [vmem:[%s3582_s25 + $0x360] ss:$8 sps:$4 sm:$0xff]   ;;  %v2962_v29 = vld [vmem:[%s3582_s25 + $0x254] ss:$8 sps:$4 sm:$0xff]  }
  0x89   : > { %1948 = vmatpush1.bf16.msra.mxu0 %v2886_v42  ;;  %v2996_v27 = vld [vmem:[%s3633_s5 + $0x4c] ss:$36 sps:$4 sm:$0xff]   ;;  %v2965_v30 = vld [vmem:[%s3582_s25 + $0x354] ss:$8 sps:$4 sm:$0xff]   ;;  %v2966_v38 = vld [vmem:[%s3582_s25 + $0x240] ss:$8 sps:$4 sm:$0xff]  }
  0x8a   : > { %2021 = vmatpush1.bf16.msra.mxu1 %v2887_v43  ;;  %1949 = vmatprep.subr.bf16.mxu0 %v2888_v44  ;;  %v2960_v31 = vld [vmem:[%s3582_s25 + $0x250] ss:$8 sps:$4 sm:$0xff]   ;;  %v3004_v33 = vld [vmem:[%s3633_s5 + $0x48] ss:$36 sps:$4 sm:$0xff]   ;;  %v2974_v41 = vld [vmem:[%s3582_s25 + $0x234] ss:$8 sps:$4 sm:$0xff]  }
  0x8b   : > { %2022 = vmatprep.subr.bf16.mxu1 %v2890_v45  ;;  %v2963_v32 = vld [vmem:[%s3582_s25 + $0x350] ss:$8 sps:$4 sm:$0xff]   ;;  %v2968_v36 = vld [vmem:[%s3582_s25 + $0x244] ss:$8 sps:$4 sm:$0xff]   ;;  %v2969_v40 = vld [vmem:[%s3582_s25 + $0x340] ss:$8 sps:$4 sm:$0xff]  }
  0x8c   : > { %v3005_v34 = vld [vmem:[%s3633_s5 + $0x54] ss:$36 sps:$4 sm:$0xff]   ;;  %v2971_v37 = vld [vmem:[%s3582_s25 + $0x344] ss:$8 sps:$4 sm:$0xff]   ;;  %s829_s16 = scalar_select %p828_p1, %s3829_s6, 3 }
  0x8d   : > { %1950 = vmatpush1.bf16.msra.mxu0 %v2892_v46  ;;  %v3007_v35 = vld [vmem:[%s3633_s5 + $0x50] ss:$36 sps:$4 sm:$0xff]   ;;  %v3023_v46 = vld [vmem:[%s3633_s5 + $0x9c] ss:$36 sps:$4 sm:$0xff]   ;;  %s3916_s11 = sshll.u32 %s816_s10, 6  ;;  %s2753_s21 = sshll.u32 (%p3274_p9), %s3172_s17, 5 }
  0x8e   : > { %2023 = vmatpush1.bf16.msra.mxu1 %v2893_v47  ;;  %1951 = vmatprep.subr.bf16.mxu0 %v2894_v48  ;;  %v3014_v39 = vld [vmem:[%s3633_s5 + $0x94] ss:$36 sps:$4 sm:$0xff]   ;;  %v2980_v48 = vld [vmem:[%s3582_s25 + $0x224] ss:$8 sps:$4 sm:$0xff]   ;;  %s830_s9 = scalar_lea.vmem %s3986_s2, %s829_s16  ;;  %s3928_s12 = scalar_lea.vmem [#allocation3], %s3916_s11 }
  0x8f   : > { %2024 = vmatprep.subr.bf16.mxu1 %v2896_v49  ;;  %v2977_v42 = vld [vmem:[%s3582_s25 + $0x334] ss:$8 sps:$4 sm:$0xff]   ;;  %v2972_v43 = vld [vmem:[%s3582_s25 + $0x230] ss:$8 sps:$4 sm:$0xff]   ;;  %v2983_v49 = vld [vmem:[%s3582_s25 + $0x324] ss:$8 sps:$4 sm:$0xff]   ;;  %s2382_s24 = sadd.s32 (%p3274_p9), %s2753_s21, %s3829_s6 }
  0x90   : > { %v2975_v44 = vld [vmem:[%s3582_s25 + $0x330] ss:$8 sps:$4 sm:$0xff]   ;;  %v3003_v1 = vld [vmem:[%s3582_s25 + $0x3f4] ss:$8 sps:$4 sm:$0xff]   ;;  %s2741_s30 = sshll.u32 (%p3274_p9), %s2382_s24, 2 }
  0x91   : > { %1952 = vmatpush2.bf16.msra.mxu0 %v2898_v50  ;;  %v3022_v45 = vld [vmem:[%s3633_s5 + $0x90] ss:$36 sps:$4 sm:$0xff]   ;;  %v3025_v47 = vld [vmem:[%s3633_s5 + $0x98] ss:$36 sps:$4 sm:$0xff]   ;;  %v2978_v50 = vld [vmem:[%s3582_s25 + $0x220] ss:$8 sps:$4 sm:$0xff]   ;;  %s2384_s26 = scalar_lea.vmem (%p3274_p9), %s3987_s3, %s2741_s30 }
  0x92   : > { %2025 = vmatpush2.bf16.msra.mxu1 %v2899_v51  ;;  %1953 = vmatprep.subr.bf16.mxu0 %v2900_v52  ;;  %v3032_v51 = vld [vmem:[%s3633_s5 + $0xdc] ss:$36 sps:$4 sm:$0xff]   ;;  %v3001_v3 = vld [vmem:[%s3582_s25 + $0x3f0] ss:$8 sps:$4 sm:$0xff]  }
  0x93   : > { %2026 = vmatprep.subr.bf16.mxu1 %v2902_v53  ;;  %v2981_v52 = vld [vmem:[%s3582_s25 + $0x320] ss:$8 sps:$4 sm:$0xff]   ;;  %v2986_v53 = vld [vmem:[%s3582_s25 + $0x214] ss:$8 sps:$4 sm:$0xff]  }
  0x95   : > { %1954 = vmatpush2.bf16.msra.mxu0 %v2904_v54  ;;  %v2989_v54 = vld [vmem:[%s3582_s25 + $0x314] ss:$8 sps:$4 sm:$0xff]  }
  0x96   : > { %2027 = vmatpush2.bf16.msra.mxu1 %v2905_v55  ;;  %1955 = vmatprep.subr.bf16.mxu0 %v2906_v56  ;;  %v2984_v55 = vld [vmem:[%s3582_s25 + $0x210] ss:$8 sps:$4 sm:$0xff]  }
  0x97   : > { %2028 = vmatprep.subr.bf16.mxu1 %v2908_v57  ;;  %v2987_v56 = vld [vmem:[%s3582_s25 + $0x310] ss:$8 sps:$4 sm:$0xff]  }
  0x98   : > { %v3040_v57 = vld [vmem:[%s3633_s5 + $0xd8] ss:$36 sps:$4 sm:$0xff]  }
  0x99   : > { %1956 = vmatpush2.bf16.msra.mxu0 %v2910_v58  ;;  %v3041_v58 = vld [vmem:[%s3633_s5 + $0xe4] ss:$36 sps:$4 sm:$0xff]  }
  0x9a   : > { %2029 = vmatpush2.bf16.msra.mxu1 %v2911_v59  ;;  %1957 = vmatprep.subr.bf16.mxu0 %v2912_v60  ;;  %v3043_v59 = vld [vmem:[%s3633_s5 + $0xe0] ss:$36 sps:$4 sm:$0xff]  }
  0x9b   : > { %2030 = vmatprep.subr.bf16.mxu1 %v2914_v61  ;;  %v2992_v60 = vld [vmem:[%s3582_s25 + $0x204] ss:$8 sps:$4 sm:$0xff]  }
  0x9c   : > { %v2995_v61 = vld [vmem:[%s3582_s25 + $0x304] ss:$8 sps:$4 sm:$0xff]  }
  0x9d   : > { %1958 = vmatpush2.bf16.msra.mxu0 %v2916_v62  ;;  %v2990_v62 = vld [vmem:[%s3582_s25 + $0x200] ss:$8 sps:$4 sm:$0xff]  }
  0x9e   : > { %2031 = vmatpush2.bf16.msra.mxu1 %v2917_v63  ;;  %1959 = vmatprep.subr.bf16.mxu0 %v2918_v0  ;;  %v2993_v63 = vld [vmem:[%s3582_s25 + $0x300] ss:$8 sps:$4 sm:$0xff]   ;;  %v3000_v0 = vld [vmem:[%s3582_s25 + $0x2f4] ss:$8 sps:$4 sm:$0xff]  }
  0x9f   : > { %2032 = vmatprep.subr.bf16.mxu1 %v2920_v2  ;;  %v2998_v2 = vld [vmem:[%s3582_s25 + $0x2f0] ss:$8 sps:$4 sm:$0xff]  }
  0xa1   : > { %1960 = vmatpush2.bf16.msra.mxu0 %v2922_v4  ;;  %v3010_v4 = vld [vmem:[%s3582_s25 + $0x2e4] ss:$8 sps:$4 sm:$0xff]  }
  0xa2   : > { %2033 = vmatpush2.bf16.msra.mxu1 %v2923_v5  ;;  %1961 = vmatprep.subr.bf16.mxu0 %v2924_v6  ;;  %v3013_v5 = vld [vmem:[%s3582_s25 + $0x3e4] ss:$8 sps:$4 sm:$0xff]   ;;  %v3064_v6 = vld [vmem:[%s3633_s5 + $0x14] ss:$36 sps:$4 sm:$0xff]  }
  0xa3   : > { %2034 = vmatprep.subr.bf16.mxu1 %v2926_v7  ;;  %v3067_v7 = vld [vmem:[%s3633_s5 + $0x1c] ss:$36 sps:$4 sm:$0xff]  }
  0xa5   : > { %1962 = vmatpush2.bf16.msra.mxu0 %v2928_v8  ;;  %v3008_v8 = vld [vmem:[%s3582_s25 + $0x2e0] ss:$8 sps:$4 sm:$0xff]  }
  0xa6   : > { %2035 = vmatpush2.bf16.msra.mxu1 %v2929_v9  ;;  %1963 = vmatprep.subr.bf16.mxu0 %v2930_v10  ;;  %v3011_v9 = vld [vmem:[%s3582_s25 + $0x3e0] ss:$8 sps:$4 sm:$0xff]   ;;  %v3018_v10 = vld [vmem:[%s3582_s25 + $0x2d4] ss:$8 sps:$4 sm:$0xff]  }
  0xa7   : > { %2036 = vmatprep.subr.bf16.mxu1 %v2932_v11  ;;  %v3021_v11 = vld [vmem:[%s3582_s25 + $0x3d4] ss:$8 sps:$4 sm:$0xff]  }
  0xa9   : > { %1964 = vmatpush2.bf16.msra.mxu0 %v2934_v12  ;;  %v3016_v12 = vld [vmem:[%s3582_s25 + $0x2d0] ss:$8 sps:$4 sm:$0xff]  }
  0xaa   : > { %2037 = vmatpush2.bf16.msra.mxu1 %v2935_v13  ;;  %1965 = vmatprep.subr.bf16.mxu0 %v2936_v14  ;;  %v3019_v13 = vld [vmem:[%s3582_s25 + $0x3d0] ss:$8 sps:$4 sm:$0xff]   ;;  %v3028_v14 = vld [vmem:[%s3582_s25 + $0x2c4] ss:$8 sps:$4 sm:$0xff]  }
  0xab   : > { %2038 = vmatprep.subr.bf16.mxu1 %v2938_v15  ;;  %v3031_v15 = vld [vmem:[%s3582_s25 + $0x3c4] ss:$8 sps:$4 sm:$0xff]  }
  0xad   : > { %1966 = vmatpush2.bf16.msra.mxu0 %v2940_v16  ;;  %v3026_v16 = vld [vmem:[%s3582_s25 + $0x2c0] ss:$8 sps:$4 sm:$0xff]  }
  0xae   : > { %2039 = vmatpush2.bf16.msra.mxu1 %v2941_v17  ;;  %2081 = vmatprep.subr.bf16.mxu0 %v2950_v18  ;;  %v3029_v17 = vld [vmem:[%s3582_s25 + $0x3c0] ss:$8 sps:$4 sm:$0xff]   ;;  %v3036_v18 = vld [vmem:[%s3582_s25 + $0x2b4] ss:$8 sps:$4 sm:$0xff]  }
  0xaf   : > { %2154 = vmatprep.subr.bf16.mxu1 %v2953_v19  ;;  %v3039_v19 = vld [vmem:[%s3582_s25 + $0x3b4] ss:$8 sps:$4 sm:$0xff]  }
  0xb0   : > { %1968 = vmatmul.mubr.bf16.vlgmr.msra.gmra.mxu0 %v2942_v20  ;;  %v3034_v20 = vld [vmem:[%s3582_s25 + $0x2b0] ss:$8 sps:$4 sm:$0xff]  }
  0xb1   : > { %2041 = vmatmul.mubr.bf16.vlgmr.msra.gmra.mxu1 %v2945_v21  ;;  %2082 = vmatpush1.bf16.msra.mxu0 %v2948_v22  ;;  %v3037_v21 = vld [vmem:[%s3582_s25 + $0x3b0] ss:$8 sps:$4 sm:$0xff]   ;;  %v3046_v22 = vld [vmem:[%s3582_s25 + $0x2a4] ss:$8 sps:$4 sm:$0xff]  }
  0xb2   : > { %2155 = vmatpush1.bf16.msra.mxu1 %v2951_v23  ;;  %2083 = vmatprep.subr.bf16.mxu0 %v2956_v24  ;;  %v3049_v23 = vld [vmem:[%s3582_s25 + $0x3a4] ss:$8 sps:$4 sm:$0xff]   ;;  %v3044_v24 = vld [vmem:[%s3582_s25 + $0x2a0] ss:$8 sps:$4 sm:$0xff]  }
  0xb3   : > { %2156 = vmatprep.subr.bf16.mxu1 %v2959_v25  ;;  %1977 = vmatprep.mubr.bf16.mxu0 %v2996_v27  ;;  %v3047_v25 = vld [vmem:[%s3582_s25 + $0x3a0] ss:$8 sps:$4 sm:$0xff]   ;;  %v3055_v27 = vld [vmem:[%s3582_s25 + $0x394] ss:$8 sps:$4 sm:$0xff]  }
  0xb4   : > { %2050 = vmatprep.mubr.bf16.mxu1 %v3005_v34  ;;  %v3070_v34 = vld [vmem:[%s3582_s25 + $0x474] ss:$8 sps:$4 sm:$0xff]  }
  0xb5   : > { %2084 = vmatpush1.bf16.msra.mxu0 %v2954_v26  ;;  %v3052_v26 = vld [vmem:[%s3582_s25 + $0x294] ss:$8 sps:$4 sm:$0xff]  }
  0xb6   : > { %2157 = vmatpush1.bf16.msra.mxu1 %v2957_v28  ;;  %2085 = vmatprep.subr.bf16.mxu0 %v2962_v29  ;;  %v3050_v28 = vld [vmem:[%s3582_s25 + $0x290] ss:$8 sps:$4 sm:$0xff]  }
  0xb7   : > { %2158 = vmatprep.subr.bf16.mxu1 %v2965_v30  ;;  %v3053_v29 = vld [vmem:[%s3582_s25 + $0x390] ss:$8 sps:$4 sm:$0xff]   ;;  %v3058_v30 = vld [vmem:[%s3582_s25 + $0x284] ss:$8 sps:$4 sm:$0xff]  }
  0xb8   : > { %1978 = vmatmul.mubr.bf16.gmra.mxu0 %v3004_v33  ;;  %v3059_v33 = vld [vmem:[%s3582_s25 + $0x380] ss:$8 sps:$4 sm:$0xff]  }
  0xb9   : > { %2051 = vmatmul.mubr.bf16.gmra.mxu1 %v3007_v35  ;;  %2086 = vmatpush1.bf16.msra.mxu0 %v2960_v31  ;;  %v3061_v31 = vld [vmem:[%s3582_s25 + $0x384] ss:$8 sps:$4 sm:$0xff]   ;;  %v3062_v35 = vld [vmem:[%s3633_s5 + $0x10] ss:$36 sps:$4 sm:$0xff]  }
  0xba   : > { %2159 = vmatpush1.bf16.msra.mxu1 %v2963_v32  ;;  %2087 = vmatprep.subr.bf16.mxu0 %v2968_v36  ;;  %v3056_v32 = vld [vmem:[%s3582_s25 + $0x280] ss:$8 sps:$4 sm:$0xff]   ;;  %v3065_v36 = vld [vmem:[%s3633_s5 + $0x18] ss:$36 sps:$4 sm:$0xff]  }
  0xbb   : > { %2160 = vmatprep.subr.bf16.mxu1 %v2971_v37  ;;  %1987 = vmatprep.mubr.bf16.mxu0 %v3014_v39  ;;  %v3068_v37 = vld [vmem:[%s3582_s25 + $0x470] ss:$8 sps:$4 sm:$0xff]   ;;  %v3074_v39 = vld [vmem:[%s3633_s5 + $0x5c] ss:$36 sps:$4 sm:$0xff]  }
  0xbc   : > { %2060 = vmatprep.mubr.bf16.mxu1 %v3023_v46  ;;  %v3085_v46 = vld [vmem:[%s3582_s25 + $0x444] ss:$8 sps:$4 sm:$0xff]  }
  0xbd   : > { %2088 = vmatpush1.bf16.msra.mxu0 %v2966_v38  ;;  %v3073_v38 = vld [vmem:[%s3582_s25 + $0x464] ss:$8 sps:$4 sm:$0xff]  }
  0xbe   : > { %2161 = vmatpush1.bf16.msra.mxu1 %v2969_v40  ;;  %2089 = vmatprep.subr.bf16.mxu0 %v2974_v41  ;;  %v3076_v40 = vld [vmem:[%s3633_s5 + $0x64] ss:$36 sps:$4 sm:$0xff]  }
  0xbf   : > { %2162 = vmatprep.subr.bf16.mxu1 %v2977_v42  ;;  %v3071_v41 = vld [vmem:[%s3582_s25 + $0x460] ss:$8 sps:$4 sm:$0xff]   ;;  %v3082_v42 = vld [vmem:[%s3582_s25 + $0x454] ss:$8 sps:$4 sm:$0xff]  }
  0xc0   : > { %1988 = vmatmul.mubr.bf16.gmra.mxu0 %v3022_v45  ;;  %v3080_v45 = vld [vmem:[%s3582_s25 + $0x450] ss:$8 sps:$4 sm:$0xff]  }
  0xc1   : > { %2061 = vmatmul.mubr.bf16.gmra.mxu1 %v3025_v47  ;;  %2090 = vmatpush1.bf16.msra.mxu0 %v2972_v43  ;;  %v3078_v43 = vld [vmem:[%s3633_s5 + $0x58] ss:$36 sps:$4 sm:$0xff]   ;;  %v3086_v47 = vld [vmem:[%s3633_s5 + $0xa4] ss:$36 sps:$4 sm:$0xff]  }
  0xc2   : > { %2163 = vmatpush1.bf16.msra.mxu1 %v2975_v44  ;;  %2091 = vmatprep.subr.bf16.mxu0 %v2980_v48  ;;  %v3079_v44 = vld [vmem:[%s3633_s5 + $0x60] ss:$36 sps:$4 sm:$0xff]   ;;  %v3088_v48 = vld [vmem:[%s3633_s5 + $0xac] ss:$36 sps:$4 sm:$0xff]  }
  0xc3   : > { %2164 = vmatprep.subr.bf16.mxu1 %v2983_v49  ;;  %1997 = vmatprep.mubr.bf16.mxu0 %v3032_v51  ;;  %v3083_v49 = vld [vmem:[%s3582_s25 + $0x440] ss:$8 sps:$4 sm:$0xff]  }
  0xc4   : > { %2070 = vmatprep.mubr.bf16.mxu1 %v3041_v58  ;;  %v3090_v51 = vld [vmem:[%s3633_s5 + $0xa0] ss:$36 sps:$4 sm:$0xff]   ;;  %v3106_v58 = vld [vmem:[%s3582_s25 + $0x414] ss:$8 sps:$4 sm:$0xff]  }
  0xc5   : > { %2092 = vmatpush1.bf16.msra.mxu0 %v2978_v50  ;;  %v3094_v50 = vld [vmem:[%s3582_s25 + $0x434] ss:$8 sps:$4 sm:$0xff]  }
  0xc6   : > { %2165 = vmatpush1.bf16.msra.mxu1 %v2981_v52  ;;  %2093 = vmatprep.subr.bf16.mxu0 %v2986_v53  ;;  %v3091_v52 = vld [vmem:[%s3633_s5 + $0xa8] ss:$36 sps:$4 sm:$0xff]   ;;  %v3092_v53 = vld [vmem:[%s3582_s25 + $0x430] ss:$8 sps:$4 sm:$0xff]  }
  0xc7   : > { %2166 = vmatprep.subr.bf16.mxu1 %v2989_v54  ;;  %v3097_v54 = vld [vmem:[%s3582_s25 + $0x424] ss:$8 sps:$4 sm:$0xff]  }
  0xc8   : > { %1998 = vmatmul.mubr.bf16.gmra.mxu0 %v3040_v57  ;;  %v3095_v57 = vld [vmem:[%s3582_s25 + $0x420] ss:$8 sps:$4 sm:$0xff]  }
  0xc9   : > { %2071 = vmatmul.mubr.bf16.gmra.mxu1 %v3043_v59  ;;  %2094 = vmatpush1.bf16.msra.mxu0 %v2984_v55  ;;  %v3098_v55 = vld [vmem:[%s3633_s5 + $0xec] ss:$36 sps:$4 sm:$0xff]  }
  0xca   : > { %2167 = vmatpush1.bf16.msra.mxu1 %v2987_v56  ;;  %2095 = vmatprep.subr.bf16.mxu0 %v2992_v60  ;;  %v3100_v56 = vld [vmem:[%s3633_s5 + $0xf4] ss:$36 sps:$4 sm:$0xff]   ;;  %v3102_v59 = vld [vmem:[%s3633_s5 + $0xe8] ss:$36 sps:$4 sm:$0xff]  }
  0xcb   : > { %2168 = vmatprep.subr.bf16.mxu1 %v2995_v61  ;;  %2113 = vmatprep.mubr.bf16.mxu0 %v3064_v6  ;;  %v3103_v60 = vld [vmem:[%s3633_s5 + $0xf0] ss:$36 sps:$4 sm:$0xff]  }
  0xcc   : > { %2186 = vmatprep.mubr.bf16.mxu1 %v3067_v7  ;;  %v3104_v61 = vld [vmem:[%s3582_s25 + $0x410] ss:$8 sps:$4 sm:$0xff]  }
  0xcd   : > { %2096 = vmatpush1.bf16.msra.mxu0 %v2990_v62  ;;  %v3109_v62 = vld [vmem:[%s3582_s25 + $0x404] ss:$8 sps:$4 sm:$0xff]  }
  0xce   : > { %2169 = vmatpush1.bf16.msra.mxu1 %v2993_v63  ;;  %2097 = vmatprep.subr.bf16.mxu0 %v3000_v0  ;;  %v3107_v63 = vld [vmem:[%s3582_s25 + $0x400] ss:$8 sps:$4 sm:$0xff]   ;;  %v3186_v0 = vmov 0  }
  0xcf   : > { %2170 = vmatprep.subr.bf16.mxu1 %v3003_v1  ;;  %v3110_v1 = vld [vmem:[%s3633_s5 + $0x20] ss:$36 sps:$4 sm:$0xff]  }
  0xd1   : > { %2098 = vmatpush2.bf16.msra.mxu0 %v2998_v2  ;;  %v3111_v2 = vld [vmem:[%s3633_s5 + $0xb0] ss:$36 sps:$4 sm:$0xff]  }
  0xd2   : > { %2171 = vmatpush2.bf16.msra.mxu1 %v3001_v3  ;;  %2099 = vmatprep.subr.bf16.mxu0 %v3010_v4  ;;  %v3112_v3 = vld [vmem:[%s3633_s5 + $0x68] ss:$36 sps:$4 sm:$0xff]   ;;  %v3113_v4 = vld [vmem:[%s3633_s5 + $0xf8] ss:$36 sps:$4 sm:$0xff]  }
  0xd3   : > { %2172 = vmatprep.subr.bf16.mxu1 %v3013_v5 }
  0xd5   : > { %2100 = vmatpush2.bf16.msra.mxu0 %v3008_v8 }
  0xd6   : > { %2173 = vmatpush2.bf16.msra.mxu1 %v3011_v9  ;;  %2101 = vmatprep.subr.bf16.mxu0 %v3018_v10 }
  0xd7   : > { %2174 = vmatprep.subr.bf16.mxu1 %v3021_v11 }
  0xd9   : > { %2102 = vmatpush2.bf16.msra.mxu0 %v3016_v12 }
  0xda   : > { %2175 = vmatpush2.bf16.msra.mxu1 %v3019_v13  ;;  %2103 = vmatprep.subr.bf16.mxu0 %v3028_v14 }
  0xdb   : > { %2176 = vmatprep.subr.bf16.mxu1 %v3031_v15 }
  0xdd   : > { %2104 = vmatpush2.bf16.msra.mxu0 %v3026_v16 }
  0xde   : > { %2177 = vmatpush2.bf16.msra.mxu1 %v3029_v17  ;;  %2105 = vmatprep.subr.bf16.mxu0 %v3036_v18 }
  0xdf   : > { %2178 = vmatprep.subr.bf16.mxu1 %v3039_v19 }
  0xe1   : > { %2106 = vmatpush2.bf16.msra.mxu0 %v3034_v20 }
  0xe2   : > { %2179 = vmatpush2.bf16.msra.mxu1 %v3037_v21  ;;  %2107 = vmatprep.subr.bf16.mxu0 %v3046_v22 }
  0xe3   : > { %2180 = vmatprep.subr.bf16.mxu1 %v3049_v23 }
  0xe5   : > { %2108 = vmatpush2.bf16.msra.mxu0 %v3044_v24 }
  0xe6   : > { %2181 = vmatpush2.bf16.msra.mxu1 %v3047_v25  ;;  %2109 = vmatprep.subr.bf16.mxu0 %v3052_v26 }
  0xe7   : > { %2182 = vmatprep.subr.bf16.mxu1 %v3055_v27 }
  0xe9   : > { %2110 = vmatpush2.bf16.msra.mxu0 %v3050_v28 }
  0xea   : > { %2183 = vmatpush2.bf16.msra.mxu1 %v3053_v29  ;;  %2111 = vmatprep.subr.bf16.mxu0 %v3058_v30 }
  0xeb   : > { %2184 = vmatprep.subr.bf16.mxu1 %v3061_v31 }
  0xed   : > { %2112 = vmatpush2.bf16.msra.mxu0 %v3056_v32 }
  0xee   : > { %2185 = vmatpush2.bf16.msra.mxu1 %v3059_v33  ;;  %2227 = vmatprep.subr.bf16.mxu0 %v3070_v34 }
  0xef   : > { %2754 = vmatprep.subr.bf16.mxu1 %v3070_v34 }
  0xf0   : > { %2114 = vmatmul.mubr.bf16.vlgmr.msra.gmra.mxu0 %v3062_v35 }
  0xf1   : > { %2187 = vmatmul.mubr.bf16.vlgmr.msra.gmra.mxu1 %v3065_v36  ;;  %2228 = vmatpush1.bf16.msra.mxu0 %v3068_v37 }
  0xf2   : > { %2762 = vmatpush1.bf16.msra.mxu1 %v3068_v37  ;;  %2229 = vmatprep.subr.bf16.mxu0 %v3073_v38 }
  0xf3   : > { %2755 = vmatprep.subr.bf16.mxu1 %v3073_v38  ;;  %2123 = vmatprep.mubr.bf16.mxu0 %v3074_v39 }
  0xf4   : > { %2196 = vmatprep.mubr.bf16.mxu1 %v3076_v40 }
  0xf5   : > { %2230 = vmatpush1.bf16.msra.mxu0 %v3071_v41 }
  0xf6   : > { %2763 = vmatpush1.bf16.msra.mxu1 %v3071_v41  ;;  %2231 = vmatprep.subr.bf16.mxu0 %v3082_v42 }
  0xf7   : > { %2756 = vmatprep.subr.bf16.mxu1 %v3082_v42 }
  0xf8   : > { %2124 = vmatmul.mubr.bf16.gmra.mxu0 %v3078_v43  ;;  %v1021_v43 = vlaneseq }
  0xf9   : > { %2197 = vmatmul.mubr.bf16.gmra.mxu1 %v3079_v44  ;;  %2232 = vmatpush1.bf16.msra.mxu0 %v3080_v45 }
  0xfa   : > { %2764 = vmatpush1.bf16.msra.mxu1 %v3080_v45  ;;  %2233 = vmatprep.subr.bf16.mxu0 %v3085_v46 }
  0xfb   : > { %2757 = vmatprep.subr.bf16.mxu1 %v3085_v46  ;;  %2133 = vmatprep.mubr.bf16.mxu0 %v3086_v47 }
  0xfc   : > { %2206 = vmatprep.mubr.bf16.mxu1 %v3088_v48  ;;  %v1022_v48 = vshrl.u32 %v1021_v43, 7 }
  0xfd   : > { %2234 = vmatpush1.bf16.msra.mxu0 %v3083_v49 }
  0xfe   : > { %2765 = vmatpush1.bf16.msra.mxu1 %v3083_v49  ;;  %2235 = vmatprep.subr.bf16.mxu0 %v3094_v50 }
  0xff   : > { %2758 = vmatprep.subr.bf16.mxu1 %v3094_v50 }
 0x100   : > { %2134 = vmatmul.mubr.bf16.gmra.mxu0 %v3090_v51 }
 0x101   : > { %2207 = vmatmul.mubr.bf16.gmra.mxu1 %v3091_v52  ;;  %2236 = vmatpush1.bf16.msra.mxu0 %v3092_v53 }
 0x102   : > { %2766 = vmatpush1.bf16.msra.mxu1 %v3092_v53  ;;  %2237 = vmatprep.subr.bf16.mxu0 %v3097_v54  ;;  %v1023_v53 = vsub.s32 0, %v1022_v48 }
 0x103   : > { %2759 = vmatprep.subr.bf16.mxu1 %v3097_v54  ;;  %2143 = vmatprep.mubr.bf16.mxu0 %v3098_v55  ;;  %v1019_v54 = vld [vmem:[%s830_s9] sm:$0x3]  ;;  %v1027_v55 = vsub.s32 1, %v1022_v48 }
 0x104   : > { %2216 = vmatprep.mubr.bf16.mxu1 %v3100_v56 }
 0x105   : > { %2238 = vmatpush1.bf16.msra.mxu0 %v3095_v57 }
 0x106   : > { %2767 = vmatpush1.bf16.msra.mxu1 %v3095_v57  ;;  %2239 = vmatprep.subr.bf16.mxu0 %v3106_v58 }
 0x107   : > { %2760 = vmatprep.subr.bf16.mxu1 %v3106_v58 }
 0x108   : > { %2144 = vmatmul.mubr.bf16.gmra.mxu0 %v3102_v59 }
 0x109   : > { %2217 = vmatmul.mubr.bf16.gmra.mxu1 %v3103_v60  ;;  %2240 = vmatpush1.bf16.msra.mxu0 %v3104_v61  ;;  %v1024_v60 = vrot.slane %v1019_v54, %v1023_v53 }
 0x10a   : > { %2768 = vmatpush1.bf16.msra.mxu1 %v3104_v61  ;;  %2241 = vmatprep.subr.bf16.mxu0 %v3109_v62  ;;  %v1028_v61 = vrot.slane %v1019_v54, %v1027_v55 }
 0x10b   : > { %2761 = vmatprep.subr.bf16.mxu1 %v3109_v62  ;;  %2259 = vmatprep.mubr.bf16.mxu0 %v3186_v0 }
 0x10c   : > { %2279 = vmatprep.mubr.bf16.mxu1 %v3186_v0 }
 0x10d   : > { %2242 = vmatpush1.bf16.msra.mxu0 %v3107_v63 }
 0x10e   : > { %2769 = vmatpush1.bf16.msra.mxu1 %v3107_v63 }
 0x110   : > { %2260 = vmatmul.mubr.bf16.vlgmr.msra.gmra.mxu0 %v3110_v1 }
 0x111   : > { %2280 = vmatmul.mubr.bf16.vlgmr.msra.gmra.mxu1 %v3111_v2  ;;  %2269 = vmatprep.mubr.bf16.mxu0 %v3186_v0 }
 0x112   : > { %2289 = vmatprep.mubr.bf16.mxu1 %v3186_v0 }
 0x118   : > { %2270 = vmatmul.mubr.bf16.gmra.mxu0 %v3112_v3 }
 0x119   : > { %2290 = vmatmul.mubr.bf16.gmra.mxu1 %v3113_v4 }
 0x170   : > { %v3770_v5 = vpop.f32.mrf.mxu0 }
 0x171   : > { %v3772_v6 = vpop.f32.mrf.mxu1  ;;  %v1970_v2 = vadd.f32 %v3770_v5, %v1024_v60 }
 0x172   : > { %v3774_v7 = vpop.f32.mrf.mxu0 }
 0x173   : > { %v3776_v8 = vpop.f32.mrf.mxu1  ;;  %v1972_v4 = vadd.f32 %v3774_v7, %v1028_v61  ;;  %v2043_v5 = vadd.f32 %v3772_v6, %v1970_v2 }
 0x174   : > { %v3778_v9 = vpop.f32.mrf.mxu0 }
 0x175   : > { %v3780_v10 = vpop.f32.mrf.mxu1  ;;  %v1974_v43 = vadd.f32 %v3778_v9, %v1024_v60 }
 0x176   : > { %v3782_v11 = vpop.f32.mrf.mxu0 }
 0x177   : > { %v3784_v12 = vpop.f32.mrf.mxu1 }
 0x178   : > { %v3786_v13 = vpop.f32.mrf.mxu0 }
 0x179   : > { %v3788_v14 = vpop.f32.mrf.mxu1  ;;  %v1980_v53 = vadd.f32 %v3786_v13, %v1024_v60 }
 0x17a   : > { %v3790_v15 = vpop.f32.mrf.mxu0 }
 0x17b   : > { %v3792_v16 = vpop.f32.mrf.mxu1  ;;  %v1982_v54 = vadd.f32 %v3790_v15, %v1028_v61 }
 0x17c   : > { %v3794_v17 = vpop.f32.mrf.mxu0 }
 0x17d   : > { %v3796_v18 = vpop.f32.mrf.mxu1 }
 0x17e   : > { %v3798_v19 = vpop.f32.mrf.mxu0 }
 0x17f   : > { %v3800_v20 = vpop.f32.mrf.mxu1  ;;  %v1986_v7 = vadd.f32 %v3798_v19, %v1028_v61 }
 0x180   : > { %v1989_v21 = vpop.f32.mrf.mxu0 }
 0x181   : > { %v3802_v22 = vpop.f32.mrf.mxu1  ;;  %v1990_v3 = vadd.f32 %v1989_v21, %v1024_v60  ;;  %v1984_v21 = vadd.f32 %v3794_v17, %v1024_v60 }
 0x182   : > { %v1991_v23 = vpop.f32.mrf.mxu0 }
 0x183   : > { %v3804_v24 = vpop.f32.mrf.mxu1  ;;  %v2063_v9 = vadd.f32 %v3802_v22, %v1990_v3  ;;  %v2053_v22 = vadd.f32 %v3788_v14, %v1980_v53 }
 0x184   : > { %v3806_v25 = vpop.f32.mrf.mxu0 }
 0x185   : > { %v3808_v26 = vpop.f32.mrf.mxu1 }
 0x186   : > { %v1995_v27 = vpop.f32.mrf.mxu0 }
 0x187   : > { %v3810_v28 = vpop.f32.mrf.mxu1  ;;  %v1996_v13 = vadd.f32 %v1995_v27, %v1028_v61  ;;  %v2057_v27 = vadd.f32 %v3796_v18, %v1984_v21 }
 0x188   : > { %v3812_v29 = vpop.f32.mrf.mxu0 }
 0x189   : > { %v3814_v30 = vpop.f32.mrf.mxu1  ;;  %v2000_v6 = vadd.f32 %v3812_v29, %v1024_v60 }
 0x18a   : > { %v3816_v31 = vpop.f32.mrf.mxu0 }
 0x18b   : > { %v3818_v32 = vpop.f32.mrf.mxu1 }
 0x18c   : > { %v3820_v33 = vpop.f32.mrf.mxu0 }
 0x18d   : > { %v3822_v34 = vpop.f32.mrf.mxu1  ;;  %v2004_v14 = vadd.f32 %v3820_v33, %v1024_v60 }
 0x18e   : > { %v3824_v35 = vpop.f32.mrf.mxu0 }
 0x18f   : > { %v3826_v36 = vpop.f32.mrf.mxu1 }
 0x1b0   : > { %v2115_v37 = vpop.f32.mrf.mxu0 }
 0x1b1   : > { %v3831_v38 = vpop.f32.mrf.mxu1  ;;  %v2116_v2 = vadd.f32 %v2115_v37, %v2043_v5 }
 0x1b2   : > { %v3833_v39 = vpop.f32.mrf.mxu0 }
 0x1b3   : > { %v3835_v40 = vpop.f32.mrf.mxu1  ;;  %v2189_v18 = vadd.f32 %v3831_v38, %v2116_v2  ;;  %v2077_v38 = vadd.f32 %v3822_v34, %v2004_v14 }
 0x1b4   : > { %v3838_v41 = vpop.f32.mrf.mxu0 }
 0x1b5   : > { %v3840_v42 = vpop.f32.mrf.mxu1 }
 0x1b6   : > { %v3842_v44 = vpop.f32.mrf.mxu0 }
 0x1b7   : > { %v3844_v45 = vpop.f32.mrf.mxu1 }
 0x1b8   : > { %v3847_v46 = vpop.f32.mrf.mxu0 }
 0x1b9   : > { %v3849_v47 = vpop.f32.mrf.mxu1 }
 0x1ba   : > { %v3851_v49 = vpop.f32.mrf.mxu0 }
 0x1bb   : > { %v3853_v50 = vpop.f32.mrf.mxu1 }
 0x1bc   : > { %3989 = vst [vmem:[#allocation4_spill] sm:$0xff] %v3853_v50  ;;  %v3858_v51 = vpop.f32.mrf.mxu0 }
 0x1bd   : > { %3990 = vst [vmem:[#allocation5_spill] sm:$0xff] %v3858_v51  ;;  %v3860_v52 = vpop.f32.mrf.mxu1 }
 0x1be   : > { %3991 = vst [vmem:[#allocation6_spill] sm:$0xff] %v3860_v52  ;;  %v3862_v56 = vpop.f32.mrf.mxu0 }
 0x1bf   : > { %3992 = vst [vmem:[#allocation7_spill] sm:$0xff] %v3862_v56  ;;  %v3864_v57 = vpop.f32.mrf.mxu1  ;;  %v1976_v56 = vadd.f32 %v3782_v11, %v1028_v61  ;;  %v1994_v11 = vadd.f32 %v3806_v25, %v1024_v60 }
 0x1c0   : > { %3993 = vst [vmem:[#allocation8_spill] sm:$0xff] %v3864_v57  ;;  %v2135_v58 = vpop.f32.mrf.mxu0  ;;  %v1992_v57 = vadd.f32 %v1991_v23, %v1028_v61  ;;  %v2047_v23 = vadd.f32 %v3780_v10, %v1974_v43  ;;  %v2002_v10 = vadd.f32 %v3816_v31, %v1028_v61 }
 0x1c1   : > { %v2208_v59 = vpop.f32.mrf.mxu1  ;;  %v2136_v17 = vadd.f32 %v2135_v58, %v2063_v9  ;;  %v2049_v19 = vadd.f32 %v3784_v12, %v1976_v56  ;;  %v2067_v37 = vadd.f32 %v3808_v26, %v1994_v11  ;;  %v2069_v12 = vadd.f32 %v3810_v28, %v1996_v13 }
 0x1c2   : > { %v2137_v62 = vpop.f32.mrf.mxu0  ;;  %v2126_v28 = vadd.f32 %v3847_v46, %v2053_v22 }
 0x1c3   : > { %v2210_v63 = vpop.f32.mrf.mxu1  ;;  %v2122_v26 = vadd.f32 %v3842_v44, %v2049_v19  ;;  %v3996_v9 = vld [vmem:[#allocation4_spill] sm:$0xff] }
 0x1c4   : > { %v2139_v0 = vpop.f32.mrf.mxu0  ;;  %v3998_v2 = vld [vmem:[#allocation5_spill] sm:$0xff] }
 0x1c5   : > { %v3866_v1 = vpop.f32.mrf.mxu1 }
 0x1c6   : > { %v2141_v48 = vpop.f32.mrf.mxu0  ;;  %v4000_v22 = vld [vmem:[#allocation7_spill] sm:$0xff] }
 0x1c7   : > { %v3871_v52 = vpop.f32.mrf.mxu1 }
 0x1c8   : > { %3994 = vst [vmem:[#allocation9_spill] sm:$0xff] %v3871_v52  ;;  %v2145_v55 = vpop.f32.mrf.mxu0  ;;  %v2045_v52 = vadd.f32 %v3776_v8, %v1972_v4  ;;  %v2055_v8 = vadd.f32 %v3792_v16, %v1982_v54  ;;  %v2059_v4 = vadd.f32 %v3800_v20, %v1986_v7  ;;  %v2006_v16 = vadd.f32 %v3824_v35, %v1028_v61 }
 0x1c9   : > { %v3876_v51 = vpop.f32.mrf.mxu1  ;;  %v2120_v20 = vadd.f32 %v3838_v41, %v2047_v23 }
 0x1ca   : > { %3995 = vst [vmem:[#allocation10_spill] sm:$0xff] %v3876_v51  ;;  %v2147_v50 = vpop.f32.mrf.mxu0  ;;  %v2065_v51 = vadd.f32 %v3804_v24, %v1992_v57  ;;  %v2118_v24 = vadd.f32 %v3833_v39, %v2045_v52  ;;  %v2073_v57 = vadd.f32 %v3814_v30, %v2000_v6  ;;  %v2209_v39 = vadd.f32 %v2208_v59, %v2136_v17 }
 0x1cb   : > { %v3885_v15 = vpop.f32.mrf.mxu1  ;;  %v2140_v52 = vadd.f32 %v2139_v0, %v2067_v37  ;;  %v2079_v41 = vadd.f32 %v3826_v36, %v2006_v16  ;;  %v2128_v59 = vadd.f32 %v3851_v49, %v2055_v8  ;;  %v2193_v46 = vadd.f32 %v3840_v42, %v2120_v20 }
 0x1cc   : > { %v2149_v3 = vpop.f32.mrf.mxu0  ;;  %v2138_v29 = vadd.f32 %v2137_v62, %v2065_v51  ;;  %v2075_v51 = vadd.f32 %v3818_v32, %v2002_v10  ;;  %v2191_v35 = vadd.f32 %v3835_v40, %v2118_v24  ;;  %v2142_v32 = vadd.f32 %v2141_v48, %v2069_v12 }
 0x1cd   : > { %v3893_v25 = vpop.f32.mrf.mxu1  ;;  %v2146_v0 = vadd.f32 %v2145_v55, %v2073_v57  ;;  %v2195_v40 = vadd.f32 %v3844_v45, %v2122_v26  ;;  %v2213_v34 = vadd.f32 %v3866_v1, %v2140_v52  ;;  %v2201_v42 = vadd.f32 %v3996_v9, %v2128_v59  ;;  %v4002_v59 = vld [vmem:[#allocation8_spill] sm:$0xff] }
 0x1ce   : > { %v2151_v31 = vpop.f32.mrf.mxu0  ;;  %v2211_v60 = vadd.f32 %v2210_v63, %v2138_v29  ;;  %v2199_v63 = vadd.f32 %v3849_v47, %v2126_v28  ;;  %v2148_v54 = vadd.f32 %v2147_v50, %v2075_v51  ;;  %v2130_v47 = vadd.f32 %v3998_v2, %v2057_v27 }
 0x1cf   : > { %v3902_v56 = vpop.f32.mrf.mxu1  ;;  %v3997_v55 = vld [vmem:[#allocation9_spill] sm:$0xff]  ;;  %v2132_v8 = vadd.f32 %v4000_v22, %v2059_v4  ;;  %v2150_v10 = vadd.f32 %v2149_v3, %v2077_v38  ;;  %v2152_v16 = vadd.f32 %v2151_v31, %v2079_v41 }
 0x1d0   : > { %v2261_v33 = vpop.f32.mrf.mxu0  ;;  %v2215_v23 = vadd.f32 %v3997_v55, %v2142_v32  ;;  %v2221_v14 = vadd.f32 %v3885_v15, %v2148_v54  ;;  %v4001_v15 = vld [vmem:[#allocation6_spill] sm:$0xff] }
 0x1d1   : > { %v2281_v58 = vpop.f32.mrf.mxu1  ;;  %v2262_v61 = vadd.f32 %v2261_v33, %v2189_v18  ;;  %v3999_v17 = vld [vmem:[#allocation10_spill] sm:$0xff]  ;;  %v2203_v31 = vadd.f32 %v4001_v15, %v2130_v47  ;;  %v2223_v52 = vadd.f32 %v3893_v25, %v2150_v10  ;;  %v2205_v32 = vadd.f32 %v4002_v59, %v2132_v8 }
 0x1d2   : > { %v2282_v30 = vadd.f32 %v2281_v58, %v2209_v39  ;;  %v2263_v62 = vpop.f32.mrf.mxu0  ;;  %v2219_v1 = vadd.f32 %v3999_v17, %v2146_v0 }
 0x1d3   : > { %v2283_v44 = vpop.f32.mrf.mxu1  ;;  %v2264_v43 = vadd.f32 %v2263_v62, %v2191_v35  ;;  %v2300_v49 = vmax.f32 %v2262_v61, 0.0  ;;  %v2225_v62 = vadd.f32 %v3902_v56, %v2152_v16 }
 0x1d4   : > { %v2284_v53 = vadd.f32 %v2283_v44, %v2211_v60  ;;  %v2265_v36 = vpop.f32.mrf.mxu0  ;;  %v2308_v48 = vmax.f32 %v2282_v30, 0.0 }
 0x1d5   : > { %v2285_v5 = vpop.f32.mrf.mxu1  ;;  %v2301_v21 = vmax.f32 %v2264_v43, 0.0  ;;  %v2266_v11 = vadd.f32 %v2265_v36, %v2193_v46 }
 0x1d6   : > { %v2309_v7 = vmax.f32 %v2284_v53, 0.0  ;;  %v2286_v13 = vadd.f32 %v2285_v5, %v2213_v34  ;;  %v2267_v6 = vpop.f32.mrf.mxu0 }
 0x1d7   : > { %v2287_v45 = vpop.f32.mrf.mxu1  ;;  %v2745_v50 = vpack.c.bf16 %v2301_v21, %v2300_v49  ;;  %v2268_v24 = vadd.f32 %v2267_v6, %v2195_v40  ;;  %v2302_v18 = vmax.f32 %v2266_v11, 0.0 }
 0x1d8   : > { %v2749_v19 = vpack.c.bf16 %v2309_v7, %v2308_v48  ;;  %v2288_v29 = vadd.f32 %v2287_v45, %v2215_v23  ;;  %v2271_v37 = vpop.f32.mrf.mxu0  ;;  %v2310_v20 = vmax.f32 %v2286_v13, 0.0 }
 0x1d9   : > { %v2291_v12 = vpop.f32.mrf.mxu1  ;;  %2364 = vst [vmem:[%s3928_s12] sm:$0xff] %v2745_v50  ;;  %v2272_v27 = vadd.f32 %v2271_v37, %v2199_v63  ;;  %v2303_v39 = vmax.f32 %v2268_v24, 0.0 }
 0x1da   : > { %2368 = vst [vmem:[%s3928_s12 + $0x20] sm:$0xff] %v2749_v19  ;;  %v2292_v57 = vadd.f32 %v2291_v12, %v2219_v1  ;;  %v2311_v4 = vmax.f32 %v2288_v29, 0.0  ;;  %v2273_v3 = vpop.f32.mrf.mxu0 }
 0x1db   : > { %v2293_v51 = vpop.f32.mrf.mxu1  ;;  %v2274_v26 = vadd.f32 %v2273_v3, %v2201_v42  ;;  %v2746_v33 = vpack.c.bf16 %v2303_v39, %v2302_v18  ;;  %v2304_v61 = vmax.f32 %v2272_v27, 0.0 }
 0x1dc   : > { %v2294_v28 = vadd.f32 %v2293_v51, %v2221_v14  ;;  %v2750_v58 = vpack.c.bf16 %v2311_v4, %v2310_v20  ;;  %v2275_v35 = vpop.f32.mrf.mxu0  ;;  %v2312_v30 = vmax.f32 %v2292_v57, 0.0 }
 0x1dd   : > { %v2295_v60 = vpop.f32.mrf.mxu1  ;;  %v2305_v38 = vmax.f32 %v2274_v26, 0.0  ;;  %2365 = vst [vmem:[%s3928_s12 + $0x8] sm:$0xff] %v2746_v33  ;;  %v2276_v44 = vadd.f32 %v2275_v35, %v2203_v31 }
 0x1de   : > { %v2313_v41 = vmax.f32 %v2294_v28, 0.0  ;;  %2369 = vst [vmem:[%s3928_s12 + $0x28] sm:$0xff] %v2750_v58  ;;  %v2296_v46 = vadd.f32 %v2295_v60, %v2223_v52  ;;  %v2277_v25 = vpop.f32.mrf.mxu0 }
 0x1df   : > { %v2297_v0 = vpop.f32.mrf.mxu1  ;;  %v2747_v43 = vpack.c.bf16 %v2305_v38, %v2304_v61  ;;  %v2278_v40 = vadd.f32 %v2277_v25, %v2205_v32  ;;  %v2306_v34 = vmax.f32 %v2276_v44, 0.0 }
 0x1e0   : > { %v2751_v53 = vpack.c.bf16 %v2313_v41, %v2312_v30  ;;  %v2298_v63 = vadd.f32 %v2297_v0, %v2225_v62  ;;  %v2314_v54 = vmax.f32 %v2296_v46, 0.0  ;;  %v2427_v48 = vld [vmem:[%s3928_s12] sm:$0xff] (%p3274_p9) }
 0x1e1   : > { %2366 = vst [vmem:[%s3928_s12 + $0x10] sm:$0xff] %v2747_v43  ;;  %v2307_v36 = vmax.f32 %v2278_v40, 0.0  ;;  %v2435_v42 = vld [vmem:[%s3928_s12 + $0x20] sm:$0xff] (%p3274_p9)  ;;  %2428 = vst [vmem:[%s2384_s26] sm:$0xff] (%p3274_p9), %v2427_v48 }
 0x1e2   : > { %2370 = vst [vmem:[%s3928_s12 + $0x30] sm:$0xff] %v2751_v53  ;;  %v2315_v5 = vmax.f32 %v2298_v63, 0.0  ;;  %2378 = sbr.rel (!%p3274_p9) target bundleno = 495 (0x1ef), region = 74  ;;  %2436 = vst [vmem:[%s2384_s26 + $0x40] sm:$0xff] (%p3274_p9), %v2435_v42 }
 0x1e3   : > { %v2748_v49 = vpack.c.bf16 %v2307_v36, %v2306_v34 }
 0x1e4   : > { %v2752_v56 = vpack.c.bf16 %v2315_v5, %v2314_v54  ;;  %v2429_v21 = vld [vmem:[%s3928_s12 + $0x8] sm:$0xff] (%p3274_p9) }
 0x1e5   : > { %2367 = vst [vmem:[%s3928_s12 + $0x18] sm:$0xff] %v2748_v49  ;;  %v2437_v55 = vld [vmem:[%s3928_s12 + $0x28] sm:$0xff] (%p3274_p9)  ;;  %2430 = vst [vmem:[%s2384_s26 + $0x10] sm:$0xff] (%p3274_p9), %v2429_v21 }
 0x1e6   : > { %2371 = vst [vmem:[%s3928_s12 + $0x38] sm:$0xff] %v2752_v56  ;;  %2438 = vst [vmem:[%s2384_s26 + $0x50] sm:$0xff] (%p3274_p9), %v2437_v55 }
 0x1e8   : > { %v2431_v7 = vld [vmem:[%s3928_s12 + $0x10] sm:$0xff] }
 0x1e9   : > { %v2439_v23 = vld [vmem:[%s3928_s12 + $0x30] sm:$0xff]  ;;  %2432 = vst [vmem:[%s2384_s26 + $0x20] sm:$0xff] %v2431_v7 }
 0x1ea   : > { %2440 = vst [vmem:[%s2384_s26 + $0x60] sm:$0xff] %v2439_v23 }
 0x1ec   : > { %v2433_v9 = vld [vmem:[%s3928_s12 + $0x18] sm:$0xff] }
 0x1ed   : > { %v2441_v11 = vld [vmem:[%s3928_s12 + $0x38] sm:$0xff]  ;;  %2434 = vst [vmem:[%s2384_s26 + $0x30] sm:$0xff] %v2433_v9 }
 0x1ee   : > { %2442 = vst [vmem:[%s2384_s26 + $0x70] sm:$0xff] %v2441_v11 }
 0x1ef PF: > { %s13_s20 = sadd.s32 1, %s3184_s20   ;;  %s4003_s12 = smov %s3156_s13 }
 0x1f0   : > { %p10_p2 = scmp.ge.s32.totalorder %s13_s20, 6   ;;  %s4004_s13 = smov %s3279_s4 }
 0x1f1   : > { %s4005_s14 = smov %s3164_s15  ;;  %s4006_s15 = smov %s3268_s27 }
 0x1f2   : > { %s4007_s16 = smov %s3176_s18  ;;  %s4008_s17 = smov %s3180_s19 }
 0x1f3   : > { %s4009_s18 = smov %s4012_s22  ;;  %s4010_s19 = smov %s4016_s23 }
 0x1f4   :  { %12 = sbr.rel (!%p10_p2) target bundleno = 5 (0x5), region = 149 }

// kernel: squeeze.35
= control target key start
LH: loop header
LB: loop body
LE: loop exit
PB: predicated region body
PF: predicated region fallthrough
CT: control target
= control target key end

     0   :  { %s197_s0 = inlined_call_operand.vmem [shape: s32[128], index: 0, kind: input, shape index: {}]   ;;  %s198_s1 = inlined_call_operand.hbm [shape: s32[2,8,8], index: 1, kind: output, shape index: {}]  }
   0x1   :  { %v6_v0 = vld [vmem:[%s197_s0] sm:$0x1] }
   0x2   :  { %7 = vst [vmem:[#allocation2] sm:$0x1] %v6_v0 }
   0x3   :  { %2 = vsyncpa [#allocation1], 0  ;;  %s149_s0 = smov 120   ;;  %s150_s8 = smov 104   ;;  %vm9_vm0 = vcmask 64512  }
   0x4   :  { %s151_s9 = smov 112   ;;  %s152_s10 = smov 96  }
   0x5   :  { %s153_s11 = smov 88   ;;  %s154_s12 = smov 80  }
   0x6   :  { %s155_s13 = smov 72   ;;  %s156_s14 = smov 64  }
   0x7   :  { %s157_s15 = smov 56   ;;  %s158_s16 = smov 48  }
   0x8   :  { %s159_s17 = smov 40   ;;  %s160_s18 = smov 32  }
   0x9   :  { %v11_v1 = vld [vmem:[#allocation2] sm:$0x1]   ;;  %s161_s19 = smov 24   ;;  %s162_s20 = smov 16  }
   0xa   :  { %v23_v2 = vld [vmem:[#allocation2] sm:$0x1]   ;;  %12 = vrot.lane.b32.xlu0 %v11_v1, %s149_s0  ;;  %s163_s21 = smov 8   ;;  %s164_s22 = smov [#allocation0]  }
   0xb   :  { %24 = vrot.lane.b32.xlu1 %v23_v2, %s150_s8  ;;  %v17_v3 = vld [vmem:[#allocation2] sm:$0x1]   ;;  %s105_s23 = sshll.u32 %s164_s22, 4  ;;  %s106_s23 = int_to_ptr.vmem [resolvable:$true] %s105_s23 }
   0xc   :  { %v29_v4 = vld [vmem:[#allocation2] sm:$0x1]   ;;  %s127_s24 = scalar_lea.vmem %s106_s23, 256  ;;  %p132_p1 = scmp.lt.s32.totalorder %s106_s23, %s106_s23 }
   0xd   :  { %v35_v5 = vld [vmem:[#allocation2] sm:$0x1]   ;;  %p128_p0 = scmp.ne.s32.totalorder %s106_s23, %s127_s24  ;;  %p133_p2 = scmp.lt.s32.totalorder %s127_s24, %s127_s24 }
   0xe   :  { %18 = vrot.lane.b32.xlu0 %v17_v3, %s151_s9  ;;  %v41_v6 = vld [vmem:[#allocation2] sm:$0x1]  }
   0xf   :  { %30 = vrot.lane.b32.xlu1 %v29_v4, %s152_s10  ;;  %v47_v7 = vld [vmem:[#allocation2] sm:$0x1]   ;;  %p134_p3 = por %p133_p2, %p132_p1 }
  0x10   :  { %v53_v8 = vld [vmem:[#allocation2] sm:$0x1]  }
  0x11   :  { %v59_v9 = vld [vmem:[#allocation2] sm:$0x1]   ;;  %p135_p4 = pnand %p134_p3, %p128_p0 }
  0x12   :  { %36 = vrot.lane.b32.xlu0 %v35_v5, %s153_s11  ;;  %v65_v10 = vld [vmem:[#allocation2] sm:$0x1]  }
  0x13   :  { %42 = vrot.lane.b32.xlu1 %v41_v6, %s154_s12  ;;  %v8_v11 = vld [vmem:[#allocation2] sm:$0x1]  }
  0x14   :  { %10 = vst.msk [vmem:[#allocation0] sm:$0x1] %vm9_vm0, %v8_v11   ;;  %v71_v12 = vld [vmem:[#allocation2] sm:$0x1]  }
  0x15   :  { %v77_v13 = vld [vmem:[#allocation2] sm:$0x1]  }
  0x16   :  { %48 = vrot.lane.b32.xlu0 %v47_v7, %s155_s13  ;;  %v83_v14 = vld [vmem:[#allocation2] sm:$0x1]  }
  0x17   :  { %54 = vrot.lane.b32.xlu1 %v53_v8, %s156_s14  ;;  %v89_v15 = vld [vmem:[#allocation2] sm:$0x1]  }
  0x18   :  { %v95_v16 = vld [vmem:[#allocation2] sm:$0x1]  }
  0x1a   :  { %60 = vrot.lane.b32.xlu0 %v59_v9, %s157_s15 }
  0x1b   :  { %66 = vrot.lane.b32.xlu1 %v65_v10, %s158_s16 }
  0x1e   :  { %72 = vrot.lane.b32.xlu0 %v71_v12, %s159_s17 }
  0x1f   :  { %78 = vrot.lane.b32.xlu1 %v77_v13, %s160_s18 }
  0x22   :  { %84 = vrot.lane.b32.xlu0 %v83_v14, %s161_s19 }
  0x23   :  { %90 = vrot.lane.b32.xlu1 %v89_v15, %s162_s20 }
  0x26   :  { %96 = vrot.lane.b32.xlu0 %v95_v16, %s163_s21 }
  0x7c   :  { %v13_v17 = vpop.permute.xlu0 %12  }
  0x7d   :  { %v25_v18 = vpop.permute.xlu1 %24   ;;  %16 = vst.msk [vmem:[#allocation0 + $0x1] sm:$0x1] %vm9_vm0, %v13_v17  }
  0x7e   :  { %28 = vst.msk [vmem:[#allocation0 + $0x3] sm:$0x1] %vm9_vm0, %v25_v18  }
  0x80   :  { %v19_v19 = vpop.permute.xlu0 %18  }
  0x81   :  { %v31_v20 = vpop.permute.xlu1 %30   ;;  %22 = vst.msk [vmem:[#allocation0 + $0x2] sm:$0x1] %vm9_vm0, %v19_v19  }
  0x82   :  { %34 = vst.msk [vmem:[#allocation0 + $0x4] sm:$0x1] %vm9_vm0, %v31_v20  }
  0x84   :  { %v37_v21 = vpop.permute.xlu0 %36  }
  0x85   :  { %v43_v22 = vpop.permute.xlu1 %42   ;;  %40 = vst.msk [vmem:[#allocation0 + $0x5] sm:$0x1] %vm9_vm0, %v37_v21  }
  0x86   :  { %46 = vst.msk [vmem:[#allocation0 + $0x6] sm:$0x1] %vm9_vm0, %v43_v22  }
  0x88   :  { %v49_v23 = vpop.permute.xlu0 %48  }
  0x89   :  { %v55_v24 = vpop.permute.xlu1 %54   ;;  %52 = vst.msk [vmem:[#allocation0 + $0x7] sm:$0x1] %vm9_vm0, %v49_v23  }
  0x8a   :  { %58 = vst.msk [vmem:[#allocation0 + $0x8] sm:$0x1] %vm9_vm0, %v55_v24  }
  0x8c   :  { %v61_v25 = vpop.permute.xlu0 %60  }
  0x8d   :  { %v67_v26 = vpop.permute.xlu1 %66   ;;  %64 = vst.msk [vmem:[#allocation0 + $0x9] sm:$0x1] %vm9_vm0, %v61_v25  }
  0x8e   :  { %70 = vst.msk [vmem:[#allocation0 + $0xa] sm:$0x1] %vm9_vm0, %v67_v26  }
  0x90   :  { %v73_v27 = vpop.permute.xlu0 %72  }
  0x91   :  { %v79_v28 = vpop.permute.xlu1 %78   ;;  %76 = vst.msk [vmem:[#allocation0 + $0xb] sm:$0x1] %vm9_vm0, %v73_v27  }
  0x92   :  { %82 = vst.msk [vmem:[#allocation0 + $0xc] sm:$0x1] %vm9_vm0, %v79_v28  }
  0x94   :  { %v85_v29 = vpop.permute.xlu0 %84  }
  0x95   :  { %v91_v30 = vpop.permute.xlu1 %90   ;;  %88 = vst.msk [vmem:[#allocation0 + $0xd] sm:$0x1] %vm9_vm0, %v85_v29  }
  0x96   :  { %94 = vst.msk [vmem:[#allocation0 + $0xe] sm:$0x1] %vm9_vm0, %v91_v30  }
  0x98   :  { %v97_v31 = vpop.permute.xlu0 %96  }
  0x99   :  { %100 = vst.msk [vmem:[#allocation0 + $0xf] sm:$0x1] %vm9_vm0, %v97_v31  }
  0x9a   :  { %138 = shalt.err (!%p135_p4)
}
  0x9b   :  { %108 = dma.vmem_to_hbm [thread:$0]  %s106_s23, 256, %s198_s1, [#allocation1]  }
  0x9c   :  { %147 = dma.done.wait [#allocation1], 256  }
  0x9d   :  { %148 = vsyncadd [#allocation1], 4294967040 }
  0x9e   :  { %110 = vsyncpa [#allocation1], 1 }

// kernel: vqvae_forward.25
= control target key start
LH: loop header
LB: loop body
LE: loop exit
PB: predicated region body
PF: predicated region fallthrough
CT: control target
= control target key end

     0   :  { %s1290_s12 = smov 0   ;;  %s1292_s13 = smov 0   ;;  %s1440_s0 = inlined_call_operand.vmem [shape: bf16[512,128], index: 0, kind: input, shape index: {}]   ;;  %s1441_s1 = inlined_call_operand.vmem [shape: bf16[128,128], index: 1, kind: input, shape index: {}]   ;;  %s1442_s2 = inlined_call_operand.vmem [shape: f32[1,128], index: 2, kind: input, shape index: {}]   ;;  %s1443_s3 = inlined_call_operand.vmem [shape: f32[512,128], index: 3, kind: output, shape index: {}]  }
   0x1   :  { %s1294_s14 = smov 0  }
   0x2 LB: > { %s25_s15 = sadd.s32 1, %s1264_s13  ;;  %p918_p0 = scmp.ge.s32.totalorder %s1268_s14, 1  ;;  %s1268_s14 = sphi %s1294_s14, %s13_s14   ;;  %s1264_s13 = sphi %s1292_s13, %s1445_s13   ;;  %s1260_s12 = sphi %s1290_s12, %s1444_s12  }
   0x3   : > { %p27_p1 = scmp.ge.s32.totalorder %s25_s15, 2  ;;  %p169_p2 = scmp.lt.s32.totalorder %s1268_s14, 3 }
   0x5   : > { %s1447_s15 = smov (%p27_p1, %s25_s15), 0  ;;  %p170_p3 = pnand %p918_p0, %p169_p2 }
   0x6   : > { %s919_s18 = sshll.u32 (!%p170_p3), %s1260_s12, 5 }
   0x7   : > { %173 = sbr.rel (%p170_p3) target bundleno = 320 (0x140), region = 32  ;;  %p204_p4 = scmp.lt.s32.totalorder (!%p170_p3), %s919_s18, 63 }
   0xc   : > { %v1094_v0 = vld [vmem:[%s1441_s1 + $0x38] sm:$0xff]   ;;  %v1095_v1 = vld [vmem:[%s1441_s1 + $0x30] sm:$0xff]   ;;  %s1449_s18 = smov (!%p204_p4, %s919_s18), 63  ;;  %v1096_v2 = vld [vmem:[%s1441_s1 + $0x28] sm:$0xff]  }
   0xd   : > { %1006 = vmatprep.subr.bf16.mxu0 %v1094_v0  ;;  %1054 = vmatprep.subr.bf16.mxu1 %v1094_v0  ;;  %s920_s23 = sshll.u32 %s1449_s18, 2  ;;  %v1097_v3 = vld [vmem:[%s1441_s1 + $0x20] sm:$0xff]   ;;  %v1098_v6 = vld [vmem:[%s1441_s1 + $0x18] sm:$0xff]   ;;  %v1099_v7 = vld [vmem:[%s1441_s1 + $0x10] sm:$0xff]   ;;  %s922_s12 = sshll.u32 %s1449_s18, 3 }
   0xe   : > { %1007 = vmatpush3.bf16.msra.mxu0 %v1094_v0  ;;  %1062 = vmatpush3.bf16.msra.mxu1 %v1094_v0  ;;  %s1323_s26 = scalar_lea.vmem %s1440_s0, %s920_s23  ;;  %v1100_v8 = vld [vmem:[%s1441_s1 + $0x8] sm:$0xff]   ;;  %v1101_v9 = vld [vmem:[%s1441_s1] sm:$0xff]   ;;  %s1384_s18 = scalar_lea.vmem %s1443_s3, %s922_s12 }
   0xf   : > { %1008 = vmatprep.subr.bf16.mxu0 %v1095_v1  ;;  %1055 = vmatprep.subr.bf16.mxu1 %v1095_v1  ;;  %v1102_v4 = vld [vmem:[%s1323_s26] sm:$0xff]   ;;  %v1104_v10 = vld [vmem:[%s1323_s26 + $0x8] sm:$0xff]   ;;  %v1106_v12 = vld [vmem:[%s1323_s26 + $0x10] sm:$0xff]  }
  0x10   : > { %v1103_v5 = vld [vmem:[%s1323_s26 + $0x40] sm:$0xff]   ;;  %1022 = vmatprep.mubr.bf16.mxu0 %v1102_v4  ;;  %v1105_v11 = vld [vmem:[%s1323_s26 + $0x48] sm:$0xff]   ;;  %v1107_v13 = vld [vmem:[%s1323_s26 + $0x50] sm:$0xff]  }
  0x11   : > { %1038 = vmatprep.mubr.bf16.mxu1 %v1103_v5  ;;  %v1108_v14 = vld [vmem:[%s1323_s26 + $0x18] sm:$0xff]   ;;  %v1110_v16 = vld [vmem:[%s1323_s26 + $0x20] sm:$0xff]   ;;  %v1112_v18 = vld [vmem:[%s1323_s26 + $0x28] sm:$0xff]  }
  0x12   : > { %1009 = vmatpush3.bf16.msra.mxu0 %v1095_v1  ;;  %1063 = vmatpush3.bf16.msra.mxu1 %v1095_v1  ;;  %v1109_v15 = vld [vmem:[%s1323_s26 + $0x58] sm:$0xff]   ;;  %v1111_v17 = vld [vmem:[%s1323_s26 + $0x60] sm:$0xff]   ;;  %v1113_v19 = vld [vmem:[%s1323_s26 + $0x68] sm:$0xff]  }
  0x13   : > { %1010 = vmatprep.subr.bf16.mxu0 %v1096_v2  ;;  %1056 = vmatprep.subr.bf16.mxu1 %v1096_v2  ;;  %v1114_v20 = vld [vmem:[%s1323_s26 + $0x30] sm:$0xff]   ;;  %v1116_v22 = vld [vmem:[%s1323_s26 + $0x38] sm:$0xff]   ;;  %v1359_v24 = vld [vmem:[%s1442_s2] ss:$0 sm:$0xff] }
  0x14   : > { %v1115_v21 = vld [vmem:[%s1323_s26 + $0x70] sm:$0xff]   ;;  %v1117_v23 = vld [vmem:[%s1323_s26 + $0x78] sm:$0xff]  }
  0x16   : > { %1011 = vmatpush3.bf16.msra.mxu0 %v1096_v2  ;;  %1064 = vmatpush3.bf16.msra.mxu1 %v1096_v2 }
  0x17   : > { %1012 = vmatprep.subr.bf16.mxu0 %v1097_v3  ;;  %1057 = vmatprep.subr.bf16.mxu1 %v1097_v3 }
  0x1a   : > { %1013 = vmatpush3.bf16.msra.mxu0 %v1097_v3  ;;  %1065 = vmatpush3.bf16.msra.mxu1 %v1097_v3 }
  0x1b   : > { %1014 = vmatprep.subr.bf16.mxu0 %v1098_v6  ;;  %1058 = vmatprep.subr.bf16.mxu1 %v1098_v6 }
  0x1e   : > { %1015 = vmatpush3.bf16.msra.mxu0 %v1098_v6  ;;  %1066 = vmatpush3.bf16.msra.mxu1 %v1098_v6 }
  0x1f   : > { %1016 = vmatprep.subr.bf16.mxu0 %v1099_v7  ;;  %1059 = vmatprep.subr.bf16.mxu1 %v1099_v7 }
  0x22   : > { %1017 = vmatpush3.bf16.msra.mxu0 %v1099_v7  ;;  %1067 = vmatpush3.bf16.msra.mxu1 %v1099_v7 }
  0x23   : > { %1018 = vmatprep.subr.bf16.mxu0 %v1100_v8  ;;  %1060 = vmatprep.subr.bf16.mxu1 %v1100_v8 }
  0x26   : > { %1019 = vmatpush3.bf16.msra.mxu0 %v1100_v8  ;;  %1068 = vmatpush3.bf16.msra.mxu1 %v1100_v8 }
  0x27   : > { %1020 = vmatprep.subr.bf16.mxu0 %v1101_v9  ;;  %1061 = vmatprep.subr.bf16.mxu1 %v1101_v9 }
  0x2a   : > { %1021 = vmatpush3.bf16.msra.mxu0 %v1101_v9  ;;  %1069 = vmatpush3.bf16.msra.mxu1 %v1101_v9 }
  0x2d   : > { %1023 = vmatmul.mubr.bf16.vlgmr.msra.gmra.mxu0 %v1104_v10  ;;  %1039 = vmatmul.mubr.bf16.vlgmr.msra.gmra.mxu1 %v1105_v11 }
  0x2e   : > { %1026 = vmatprep.mubr.bf16.mxu0 %v1106_v12  ;;  %1042 = vmatprep.mubr.bf16.mxu1 %v1107_v13 }
  0x35   : > { %1027 = vmatmul.mubr.bf16.gmra.mxu0 %v1108_v14  ;;  %1043 = vmatmul.mubr.bf16.gmra.mxu1 %v1109_v15 }
  0x36   : > { %1030 = vmatprep.mubr.bf16.mxu0 %v1110_v16  ;;  %1046 = vmatprep.mubr.bf16.mxu1 %v1111_v17 }
  0x3d   : > { %1031 = vmatmul.mubr.bf16.gmra.mxu0 %v1112_v18  ;;  %1047 = vmatmul.mubr.bf16.gmra.mxu1 %v1113_v19 }
  0x3e   : > { %1034 = vmatprep.mubr.bf16.mxu0 %v1114_v20  ;;  %1050 = vmatprep.mubr.bf16.mxu1 %v1115_v21 }
  0x45   : > { %1035 = vmatmul.mubr.bf16.gmra.mxu0 %v1116_v22  ;;  %1051 = vmatmul.mubr.bf16.gmra.mxu1 %v1117_v23 }
  0xed   : > { %v1024_v25 = vpop.f32.mrf.mxu0  ;;  %v1040_v26 = vpop.f32.mrf.mxu1 }
  0xee   : > { %v468_v27 = vadd.f32 %v1024_v25, %v1359_v24  ;;  %v532_v28 = vadd.f32 %v1040_v26, %v1359_v24 }
  0xef   : > { %v459_v29 = vpop.f32.mrf.mxu0  ;;  %v523_v30 = vpop.f32.mrf.mxu1 }
  0xf0   : > { %v950_v31 = vmul.f32 -1.442695, %v468_v27  ;;  %v966_v32 = vmul.f32 -1.442695, %v532_v28  ;;  %v460_v33 = vadd.f32 %v1359_v24, %v459_v29  ;;  %v524_v34 = vadd.f32 %v1359_v24, %v523_v30 }
  0xf1   : > { %v1025_v35 = vpop.f32.mrf.mxu0  ;;  %v1041_v36 = vpop.f32.mrf.mxu1 }
  0xf2   : > { %1118 = vpow2.f32 %v950_v31  ;;  %v948_v37 = vmul.f32 -1.442695, %v460_v33  ;;  %v964_v38 = vmul.f32 -1.442695, %v524_v34  ;;  %v471_v39 = vadd.f32 %v1025_v35, %v1359_v24 }
  0xf3   : > { %1120 = vpow2.f32 %v966_v32  ;;  %v535_v40 = vadd.f32 %v1041_v36, %v1359_v24  ;;  %v462_v41 = vpop.f32.mrf.mxu0  ;;  %v526_v42 = vpop.f32.mrf.mxu1 }
  0xf4   : > { %1122 = vpow2.f32 %v948_v37  ;;  %v951_v43 = vmul.f32 -1.442695, %v471_v39  ;;  %v463_v44 = vadd.f32 %v1359_v24, %v462_v41  ;;  %v527_v45 = vadd.f32 %v1359_v24, %v526_v42 }
  0xf5   : > { %1124 = vpow2.f32 %v964_v38  ;;  %v967_v46 = vmul.f32 -1.442695, %v535_v40  ;;  %v1028_v47 = vpop.f32.mrf.mxu0  ;;  %v1044_v48 = vpop.f32.mrf.mxu1 }
  0xf6   : > { %1126 = vpow2.f32 %v951_v43  ;;  %v949_v49 = vmul.f32 -1.442695, %v463_v44  ;;  %v965_v50 = vmul.f32 -1.442695, %v527_v45  ;;  %v484_v51 = vadd.f32 %v1028_v47, %v1359_v24 }
  0xf7   : > { %1128 = vpow2.f32 %v967_v46  ;;  %v548_v52 = vadd.f32 %v1044_v48, %v1359_v24  ;;  %v475_v53 = vpop.f32.mrf.mxu0  ;;  %v539_v54 = vpop.f32.mrf.mxu1 }
  0xf8   : > { %1130 = vpow2.f32 %v949_v49  ;;  %v954_v55 = vmul.f32 -1.442695, %v484_v51  ;;  %v476_v56 = vadd.f32 %v1359_v24, %v475_v53  ;;  %v540_v57 = vadd.f32 %v1359_v24, %v539_v54 }
  0xf9   : > { %1132 = vpow2.f32 %v965_v50  ;;  %v970_v58 = vmul.f32 -1.442695, %v548_v52  ;;  %v1029_v59 = vpop.f32.mrf.mxu0  ;;  %v1045_v60 = vpop.f32.mrf.mxu1 }
  0xfa   : > { %1134 = vpow2.f32 %v954_v55  ;;  %v952_v61 = vmul.f32 -1.442695, %v476_v56  ;;  %v968_v62 = vmul.f32 -1.442695, %v540_v57  ;;  %v487_v63 = vadd.f32 %v1029_v59, %v1359_v24 }
  0xfb   : > { %1136 = vpow2.f32 %v970_v58  ;;  %v551_v0 = vadd.f32 %v1045_v60, %v1359_v24  ;;  %v478_v1 = vpop.f32.mrf.mxu0  ;;  %v542_v2 = vpop.f32.mrf.mxu1 }
  0xfc   : > { %1138 = vpow2.f32 %v952_v61  ;;  %v955_v3 = vmul.f32 -1.442695, %v487_v63  ;;  %v479_v4 = vadd.f32 %v1359_v24, %v478_v1  ;;  %v543_v5 = vadd.f32 %v1359_v24, %v542_v2 }
  0xfd   : > { %1140 = vpow2.f32 %v968_v62  ;;  %v971_v6 = vmul.f32 -1.442695, %v551_v0  ;;  %v1032_v7 = vpop.f32.mrf.mxu0  ;;  %v1048_v8 = vpop.f32.mrf.mxu1 }
  0xfe   : > { %1142 = vpow2.f32 %v955_v3  ;;  %v953_v9 = vmul.f32 -1.442695, %v479_v4  ;;  %v969_v10 = vmul.f32 -1.442695, %v543_v5  ;;  %v500_v42 = vadd.f32 %v1032_v7, %v1359_v24 }
  0xff   : > { %v1119_v11 = vpop.eup %1118  ;;  %1144 = vpow2.f32 %v971_v6  ;;  %v491_v12 = vpop.f32.mrf.mxu0  ;;  %v564_v46 = vadd.f32 %v1048_v8, %v1359_v24 }
 0x100   : > { %v555_v13 = vpop.f32.mrf.mxu1  ;;  %v1121_v14 = vpop.eup %1120  ;;  %v684_v15 = vadd.f32 1.0, %v1119_v11  ;;  %1146 = vpow2.f32 %v953_v9  ;;  %v492_v49 = vadd.f32 %v1359_v24, %v491_v12  ;;  %v958_v56 = vmul.f32 -1.442695, %v500_v42 }
 0x101   : > { %v1123_v16 = vpop.eup %1122  ;;  %v700_v17 = vadd.f32 1.0, %v1121_v14  ;;  %1148 = vpow2.f32 %v969_v10  ;;  %v1033_v18 = vpop.f32.mrf.mxu0  ;;  %v556_v52 = vadd.f32 %v1359_v24, %v555_v13  ;;  %v974_v61 = vmul.f32 -1.442695, %v564_v46 }
 0x102   : > { %v1125_v19 = vpop.eup %1124  ;;  %1150 = vrcp.f32 %v684_v15  ;;  %v682_v20 = vadd.f32 1.0, %v1123_v16  ;;  %v1049_v21 = vpop.f32.mrf.mxu1  ;;  %v503_v57 = vadd.f32 %v1033_v18, %v1359_v24  ;;  %v956_v0 = vmul.f32 -1.442695, %v492_v49 }
 0x103   : > { %v1127_v22 = vpop.eup %1126  ;;  %1152 = vrcp.f32 %v700_v17  ;;  %v698_v23 = vadd.f32 1.0, %v1125_v19  ;;  %v494_v29 = vpop.f32.mrf.mxu0  ;;  %v567_v62 = vadd.f32 %v1049_v21, %v1359_v24  ;;  %v972_v3 = vmul.f32 -1.442695, %v556_v52 }
 0x104   : > { %v1129_v25 = vpop.eup %1128  ;;  %1154 = vrcp.f32 %v682_v20  ;;  %v685_v26 = vadd.f32 1.0, %v1127_v22  ;;  %v558_v32 = vpop.f32.mrf.mxu1  ;;  %v495_v1 = vadd.f32 %v1359_v24, %v494_v29  ;;  %v959_v7 = vmul.f32 -1.442695, %v503_v57 }
 0x105   : > { %v1131_v27 = vpop.eup %1130  ;;  %1156 = vrcp.f32 %v698_v23  ;;  %v701_v28 = vadd.f32 1.0, %v1129_v25  ;;  %v1036_v39 = vpop.f32.mrf.mxu0  ;;  %v559_v4 = vadd.f32 %v1359_v24, %v558_v32  ;;  %v975_v11 = vmul.f32 -1.442695, %v567_v62 }
 0x106   : > { %v1133_v30 = vpop.eup %1132  ;;  %1158 = vrcp.f32 %v685_v26  ;;  %v683_v31 = vadd.f32 1.0, %v1131_v27  ;;  %v1052_v43 = vpop.f32.mrf.mxu1  ;;  %v516_v8 = vadd.f32 %v1036_v39, %v1359_v24  ;;  %v957_v14 = vmul.f32 -1.442695, %v495_v1 }
 0x107   : > { %v1135_v33 = vpop.eup %1134  ;;  %1160 = vrcp.f32 %v701_v28  ;;  %v699_v34 = vadd.f32 1.0, %v1133_v30  ;;  %v507_v53 = vpop.f32.mrf.mxu0  ;;  %v580_v12 = vadd.f32 %v1052_v43, %v1359_v24  ;;  %v973_v17 = vmul.f32 -1.442695, %v559_v4 }
 0x108   : > { %v1137_v35 = vpop.eup %1136  ;;  %1162 = vrcp.f32 %v683_v31  ;;  %v688_v36 = vadd.f32 1.0, %v1135_v33  ;;  %v571_v58 = vpop.f32.mrf.mxu1  ;;  %v508_v15 = vadd.f32 %v1359_v24, %v507_v53  ;;  %v962_v21 = vmul.f32 -1.442695, %v516_v8 }
 0x109   : > { %v1139_v37 = vpop.eup %1138  ;;  %1164 = vrcp.f32 %v699_v34  ;;  %v704_v38 = vadd.f32 1.0, %v1137_v35  ;;  %v1037_v5 = vpop.f32.mrf.mxu0  ;;  %v572_v18 = vadd.f32 %v1359_v24, %v571_v58  ;;  %v978_v26 = vmul.f32 -1.442695, %v580_v12 }
 0x10a   : > { %v1141_v40 = vpop.eup %1140  ;;  %1166 = vrcp.f32 %v688_v36  ;;  %v686_v41 = vadd.f32 1.0, %v1139_v37  ;;  %v1053_v9 = vpop.f32.mrf.mxu1  ;;  %v519_v22 = vadd.f32 %v1037_v5, %v1359_v24  ;;  %v960_v29 = vmul.f32 -1.442695, %v508_v15 }
 0x10b   : > { %v1143_v44 = vpop.eup %1142  ;;  %1168 = vrcp.f32 %v704_v38  ;;  %v702_v45 = vadd.f32 1.0, %v1141_v40  ;;  %v510_v19 = vpop.f32.mrf.mxu0  ;;  %v583_v27 = vadd.f32 %v1053_v9, %v1359_v24  ;;  %v976_v32 = vmul.f32 -1.442695, %v572_v18 }
 0x10c   : > { %v1145_v47 = vpop.eup %1144  ;;  %1170 = vrcp.f32 %v686_v41  ;;  %v689_v48 = vadd.f32 1.0, %v1143_v44  ;;  %v574_v23 = vpop.f32.mrf.mxu1  ;;  %v511_v30 = vadd.f32 %v1359_v24, %v510_v19  ;;  %v963_v35 = vmul.f32 -1.442695, %v519_v22 }
 0x10d   : > { %v1147_v50 = vpop.eup %1146  ;;  %1172 = vrcp.f32 %v702_v45  ;;  %v705_v51 = vadd.f32 1.0, %v1145_v47  ;;  %v575_v33 = vadd.f32 %v1359_v24, %v574_v23  ;;  %v979_v37 = vmul.f32 -1.442695, %v583_v27 }
 0x10e   : > { %v1149_v54 = vpop.eup %1148  ;;  %1174 = vrcp.f32 %v689_v48  ;;  %v687_v55 = vadd.f32 1.0, %v1147_v50  ;;  %v961_v39 = vmul.f32 -1.442695, %v511_v30 }
 0x10f   : > { %v1151_v59 = vpop.eup %1150  ;;  %1176 = vrcp.f32 %v705_v51  ;;  %v703_v60 = vadd.f32 1.0, %v1149_v54  ;;  %v977_v41 = vmul.f32 -1.442695, %v575_v33 }
 0x110   : > { %v1153_v63 = vpop.eup %1152  ;;  %780 = vst [vmem:[%s1384_s18 + $0x10] sm:$0xff] %v1151_v59  ;;  %1178 = vrcp.f32 %v687_v55 }
 0x111   : > { %v1155_v2 = vpop.eup %1154  ;;  %796 = vst [vmem:[%s1384_s18 + $0x90] sm:$0xff] %v1153_v63  ;;  %1180 = vrcp.f32 %v703_v60 }
 0x112   : > { %v1157_v6 = vpop.eup %1156  ;;  %778 = vst [vmem:[%s1384_s18] sm:$0xff] %v1155_v2  ;;  %1182 = vpow2.f32 %v958_v56 }
 0x113   : > { %v1159_v10 = vpop.eup %1158  ;;  %794 = vst [vmem:[%s1384_s18 + $0x80] sm:$0xff] %v1157_v6  ;;  %1184 = vpow2.f32 %v974_v61 }
 0x114   : > { %v1161_v13 = vpop.eup %1160  ;;  %781 = vst [vmem:[%s1384_s18 + $0x18] sm:$0xff] %v1159_v10  ;;  %1186 = vpow2.f32 %v956_v0 }
 0x115   : > { %v1163_v16 = vpop.eup %1162  ;;  %797 = vst [vmem:[%s1384_s18 + $0x98] sm:$0xff] %v1161_v13  ;;  %1188 = vpow2.f32 %v972_v3 }
 0x116   : > { %v1165_v20 = vpop.eup %1164  ;;  %779 = vst [vmem:[%s1384_s18 + $0x8] sm:$0xff] %v1163_v16  ;;  %1190 = vpow2.f32 %v959_v7 }
 0x117   : > { %v1167_v25 = vpop.eup %1166  ;;  %795 = vst [vmem:[%s1384_s18 + $0x88] sm:$0xff] %v1165_v20  ;;  %1192 = vpow2.f32 %v975_v11 }
 0x118   : > { %v1169_v28 = vpop.eup %1168  ;;  %784 = vst [vmem:[%s1384_s18 + $0x30] sm:$0xff] %v1167_v25  ;;  %1194 = vpow2.f32 %v957_v14 }
 0x119   : > { %v1171_v31 = vpop.eup %1170  ;;  %800 = vst [vmem:[%s1384_s18 + $0xb0] sm:$0xff] %v1169_v28  ;;  %1196 = vpow2.f32 %v973_v17 }
 0x11a   : > { %v1173_v34 = vpop.eup %1172  ;;  %782 = vst [vmem:[%s1384_s18 + $0x20] sm:$0xff] %v1171_v31  ;;  %1198 = vpow2.f32 %v962_v21 }
 0x11b   : > { %v1175_v36 = vpop.eup %1174  ;;  %798 = vst [vmem:[%s1384_s18 + $0xa0] sm:$0xff] %v1173_v34  ;;  %1200 = vpow2.f32 %v978_v26 }
 0x11c   : > { %v1177_v38 = vpop.eup %1176  ;;  %785 = vst [vmem:[%s1384_s18 + $0x38] sm:$0xff] %v1175_v36  ;;  %1202 = vpow2.f32 %v960_v29 }
 0x11d   : > { %v1179_v40 = vpop.eup %1178  ;;  %801 = vst [vmem:[%s1384_s18 + $0xb8] sm:$0xff] %v1177_v38  ;;  %1204 = vpow2.f32 %v976_v32 }
 0x11e   : > { %v1181_v42 = vpop.eup %1180  ;;  %783 = vst [vmem:[%s1384_s18 + $0x28] sm:$0xff] %v1179_v40  ;;  %1206 = vpow2.f32 %v963_v35 }
 0x11f   : > { %v1183_v24 = vpop.eup %1182  ;;  %799 = vst [vmem:[%s1384_s18 + $0xa8] sm:$0xff] %v1181_v42  ;;  %1208 = vpow2.f32 %v979_v37 }
 0x120   : > { %v1185_v43 = vpop.eup %1184  ;;  %v692_v44 = vadd.f32 1.0, %v1183_v24  ;;  %1210 = vpow2.f32 %v961_v39 }
 0x121   : > { %v1187_v45 = vpop.eup %1186  ;;  %v708_v46 = vadd.f32 1.0, %v1185_v43  ;;  %1212 = vpow2.f32 %v977_v41 }
 0x122   : > { %v1189_v47 = vpop.eup %1188  ;;  %1214 = vrcp.f32 %v692_v44  ;;  %v690_v48 = vadd.f32 1.0, %v1187_v45 }
 0x123   : > { %v1191_v49 = vpop.eup %1190  ;;  %1216 = vrcp.f32 %v708_v46  ;;  %v706_v50 = vadd.f32 1.0, %v1189_v47 }
 0x124   : > { %v1193_v51 = vpop.eup %1192  ;;  %1218 = vrcp.f32 %v690_v48  ;;  %v693_v52 = vadd.f32 1.0, %v1191_v49 }
 0x125   : > { %v1195_v53 = vpop.eup %1194  ;;  %1220 = vrcp.f32 %v706_v50  ;;  %v709_v54 = vadd.f32 1.0, %v1193_v51 }
 0x126   : > { %v1197_v55 = vpop.eup %1196  ;;  %1222 = vrcp.f32 %v693_v52  ;;  %v691_v56 = vadd.f32 1.0, %v1195_v53 }
 0x127   : > { %v1199_v57 = vpop.eup %1198  ;;  %1224 = vrcp.f32 %v709_v54  ;;  %v707_v58 = vadd.f32 1.0, %v1197_v55 }
 0x128   : > { %v1201_v59 = vpop.eup %1200  ;;  %1226 = vrcp.f32 %v691_v56  ;;  %v696_v60 = vadd.f32 1.0, %v1199_v57 }
 0x129   : > { %v1203_v61 = vpop.eup %1202  ;;  %1228 = vrcp.f32 %v707_v58  ;;  %v712_v62 = vadd.f32 1.0, %v1201_v59 }
 0x12a   : > { %v1205_v63 = vpop.eup %1204  ;;  %1230 = vrcp.f32 %v696_v60  ;;  %v694_v0 = vadd.f32 1.0, %v1203_v61 }
 0x12b   : > { %v1207_v1 = vpop.eup %1206  ;;  %1232 = vrcp.f32 %v712_v62  ;;  %v710_v2 = vadd.f32 1.0, %v1205_v63 }
 0x12c   : > { %v1209_v3 = vpop.eup %1208  ;;  %1234 = vrcp.f32 %v694_v0  ;;  %v697_v4 = vadd.f32 1.0, %v1207_v1 }
 0x12d   : > { %v1211_v5 = vpop.eup %1210  ;;  %1236 = vrcp.f32 %v710_v2  ;;  %v713_v6 = vadd.f32 1.0, %v1209_v3 }
 0x12e   : > { %v1213_v7 = vpop.eup %1212  ;;  %1238 = vrcp.f32 %v697_v4  ;;  %v695_v8 = vadd.f32 1.0, %v1211_v5 }
 0x12f   : > { %v1215_v9 = vpop.eup %1214  ;;  %1240 = vrcp.f32 %v713_v6  ;;  %v711_v10 = vadd.f32 1.0, %v1213_v7 }
 0x130   : > { %v1217_v11 = vpop.eup %1216  ;;  %788 = vst [vmem:[%s1384_s18 + $0x50] sm:$0xff] %v1215_v9  ;;  %1242 = vrcp.f32 %v695_v8 }
 0x131   : > { %v1219_v12 = vpop.eup %1218  ;;  %804 = vst [vmem:[%s1384_s18 + $0xd0] sm:$0xff] %v1217_v11  ;;  %1244 = vrcp.f32 %v711_v10 }
 0x132   : > { %v1221_v13 = vpop.eup %1220  ;;  %786 = vst [vmem:[%s1384_s18 + $0x40] sm:$0xff] %v1219_v12 }
 0x133   : > { %v1223_v14 = vpop.eup %1222  ;;  %802 = vst [vmem:[%s1384_s18 + $0xc0] sm:$0xff] %v1221_v13 }
 0x134   : > { %v1225_v15 = vpop.eup %1224  ;;  %789 = vst [vmem:[%s1384_s18 + $0x58] sm:$0xff] %v1223_v14 }
 0x135   : > { %v1227_v16 = vpop.eup %1226  ;;  %805 = vst [vmem:[%s1384_s18 + $0xd8] sm:$0xff] %v1225_v15 }
 0x136   : > { %v1229_v17 = vpop.eup %1228  ;;  %787 = vst [vmem:[%s1384_s18 + $0x48] sm:$0xff] %v1227_v16 }
 0x137   : > { %v1231_v18 = vpop.eup %1230  ;;  %803 = vst [vmem:[%s1384_s18 + $0xc8] sm:$0xff] %v1229_v17 }
 0x138   : > { %v1233_v19 = vpop.eup %1232  ;;  %792 = vst [vmem:[%s1384_s18 + $0x70] sm:$0xff] %v1231_v18 }
 0x139   : > { %v1235_v20 = vpop.eup %1234  ;;  %808 = vst [vmem:[%s1384_s18 + $0xf0] sm:$0xff] %v1233_v19 }
 0x13a   : > { %v1237_v21 = vpop.eup %1236  ;;  %790 = vst [vmem:[%s1384_s18 + $0x60] sm:$0xff] %v1235_v20 }
 0x13b   : > { %v1239_v22 = vpop.eup %1238  ;;  %806 = vst [vmem:[%s1384_s18 + $0xe0] sm:$0xff] %v1237_v21 }
 0x13c   : > { %v1241_v23 = vpop.eup %1240  ;;  %793 = vst [vmem:[%s1384_s18 + $0x78] sm:$0xff] %v1239_v22 }
 0x13d   : > { %v1243_v25 = vpop.eup %1242  ;;  %809 = vst [vmem:[%s1384_s18 + $0xf8] sm:$0xff] %v1241_v23 }
 0x13e   : > { %v1245_v26 = vpop.eup %1244  ;;  %791 = vst [vmem:[%s1384_s18 + $0x68] sm:$0xff] %v1243_v25 }
 0x13f   : > { %807 = vst [vmem:[%s1384_s18 + $0xe8] sm:$0xff] %v1245_v26 }
 0x140 PF: > { %s13_s14 = sadd.s32 1, %s1268_s14   ;;  %s1444_s12 = smov %s1264_s13 }
 0x141   : > { %p10_p5 = scmp.ge.s32.totalorder %s13_s14, 4   ;;  %s1445_s13 = smov %s1447_s15 }
 0x143   :  { %12 = sbr.rel (!%p10_p5) target bundleno = 2 (0x2), region = 68 }

</bundles_post_ra>
